<compile_context>
chip_gen: v7x
topology: tpu7x:2x2x1
jax: 0.10.0
libtpu: 0.0.40
codegen_flags: <defaults>
</compile_context>

<pallas_src>
import jax
import jax.numpy as jnp
from jax.experimental import pallas as pl
from jax.experimental.pallas import tpu as pltpu


# ----------------------------- fused Pallas kernel -----------------------------

def make_rctc_kernel(n_blocks, n_lstm, Bb, H, W, Cin, C, Hs, NC):
    T = W              # sequence length == feature-map width
    M = Bb * H * W     # rows for all conv matmuls

    def kernel(*refs):
        it = iter(refs)
        x_ref = next(it)                                        # [Bb,H,W,Cin] (NHWC)
        wip, ship = next(it), next(it)                          # input_proj (BN-folded)
        blk = [tuple(next(it) for _ in range(4)) for _ in range(n_blocks)]
        lstm = [tuple(next(it) for _ in range(3)) for _ in range(n_lstm)]
        wo, bo = next(it), next(it)                             # fused output head
        o_ref = next(it)                                        # [Bb,T,NC]
        xpad_ref = next(it)                                     # [Bb,H+2,W+2,C] scratch
        hseq_refs = [next(it) for _ in range(n_lstm)]           # [Bb,T,2Hs] per layer

        # ---- input_proj: 1x1 conv (scale folded into weight) + shift + ReLU ----
        x = x_ref[...].reshape(M, Cin)
        h0 = jnp.maximum(
            jnp.dot(x, wip[...], preferred_element_type=jnp.float32) + ship[...], 0.0)

        # zero the padded scratch once; only its interior is rewritten below,
        # so the zero border is preserved across all convs.
        xpad_ref[...] = jnp.zeros(xpad_ref.shape, xpad_ref.dtype)

        def conv3x3(flat, w_ref, shift):
            # 9 accumulating dots (no im2col materialization); w_ref: (9, C, C)
            xpad_ref[:, 1:H + 1, 1:W + 1, :] = flat.reshape(Bb, H, W, C)
            acc = None
            for k in range(9):
                dy, dx = divmod(k, 3)
                tap = xpad_ref[:, dy:dy + H, dx:dx + W, :].reshape(M, C)
                d = jnp.dot(tap, w_ref[k], preferred_element_type=jnp.float32)
                acc = d if acc is None else acc + d
            return acc + shift

        # ---- residual blocks: (conv3x3+BN+ReLU) then (conv3x3+BN+res+ReLU) ----
        xc = h0
        for (w1, sh1, w2, sh2) in blk:
            r = xc
            t1 = jnp.maximum(conv3x3(xc, w1, sh1[...]), 0.0)
            xc = jnp.maximum(conv3x3(t1, w2, sh2[...]) + r, 0.0)

        # ---- add residual_input then AdaptiveAvgPool2d((1,None)) -> [Bb,T,C] ----
        feat = jnp.mean((xc + h0).reshape(Bb, H, W, C), axis=1)
        feat2d = feat.reshape(Bb * T, C)

        # ---- 2-layer BiLSTM: fused directions, (i,f,o,g) gate order, unrolled ----
        seq2d = feat2d
        for li, (wih, bih, whh_bd) in enumerate(lstm):
            # one matmul for the input-gate pre-activations of BOTH directions
            xg = (jnp.dot(seq2d, wih[...], preferred_element_type=jnp.float32)
                  + bih[...]).reshape(Bb, T, 8 * Hs)
            h_cat = jnp.zeros((Bb, 2 * Hs), jnp.float32)        # [h_f | h_b], 128 lanes
            c_f = jnp.zeros((Bb, Hs), jnp.float32)
            c_b = jnp.zeros((Bb, Hs), jnp.float32)
            hfs, hbs = [], []
            for s in range(T):                                  # fully unrolled
                tb = T - 1 - s
                # one block-diagonal recurrent matmul for both directions
                rec = jnp.dot(h_cat, whh_bd[...], preferred_element_type=jnp.float32)
                g_f = xg[:, s, 0:4 * Hs] + rec[:, 0:4 * Hs]
                g_b = xg[:, tb, 4 * Hs:8 * Hs] + rec[:, 4 * Hs:8 * Hs]
                # gate order is (i, f, o, g): sigmoid on 3*Hs, tanh on Hs only
                sf = jax.nn.sigmoid(g_f[:, 0:3 * Hs])
                sb = jax.nn.sigmoid(g_b[:, 0:3 * Hs])
                gf = jnp.tanh(g_f[:, 3 * Hs:4 * Hs])
                gb = jnp.tanh(g_b[:, 3 * Hs:4 * Hs])
                c_f = sf[:, Hs:2 * Hs] * c_f + sf[:, 0:Hs] * gf
                h_f = sf[:, 2 * Hs:3 * Hs] * jnp.tanh(c_f)
                c_b = sb[:, Hs:2 * Hs] * c_b + sb[:, 0:Hs] * gb
                h_b = sb[:, 2 * Hs:3 * Hs] * jnp.tanh(c_b)
                h_cat = jnp.concatenate([h_f, h_b], axis=-1)
                hfs.append(h_f)
                hbs.append(h_b)
            # assemble layer output with full 128-lane row stores (no masking)
            for t in range(T):
                hseq_refs[li][:, t, :] = jnp.concatenate(
                    [hfs[t], hbs[T - 1 - t]], axis=-1)
            seq2d = hseq_refs[li][...].reshape(Bb * T, 2 * Hs)

        # ---- fused output heads: [seq | feat] @ [wo1; wo2] + (bo1 + bo2) ----
        cat = jnp.concatenate([seq2d, feat2d], axis=-1)         # [Bb*T, 2Hs + C]
        logits = jnp.dot(cat, wo[...], preferred_element_type=jnp.float32) + bo[...]
        o_ref[...] = logits.reshape(Bb, T, NC)

    return kernel


# ----------------------------- wrapper -----------------------------

def _perm_ifog(a):
    # reorder gate columns (i, f, g, o) -> (i, f, o, g)
    i, f, g, o = jnp.split(a, 4, axis=-1)
    return jnp.concatenate([i, f, o, g], axis=-1)


@jax.jit
def rctc_forward_pallas(x_nchw, params):
    B, Cin, H, W = x_nchw.shape
    C = params['input_proj']['w'].shape[1]
    Hs = params['lstm'][0]['fwd']['whh'].shape[0]
    NC = params['out']['w1'].shape[1]
    n_blocks = len(params['blocks'])
    n_lstm = len(params['lstm'])
    T = W

    GRID_STEPS = 1            # whole batch per step; set to 2 on v7x for megacore
    Bb = B // GRID_STEPS

    x = jnp.transpose(x_nchw, (0, 2, 3, 1))        # NCHW -> NHWC, once

    inputs = [x]
    in_specs = [pl.BlockSpec((Bb, H, W, Cin), lambda g: (g, 0, 0, 0))]

    def add_w(arr):
        nd = arr.ndim
        inputs.append(arr)
        # constant index map -> weight DMA'd once, resident across grid steps
        in_specs.append(pl.BlockSpec(arr.shape, lambda g, nd=nd: (0,) * nd))

    # input_proj: fold BN scale into the 1x1 conv weight
    ip = params['input_proj']
    add_w(ip['w'] * ip['scale'])
    add_w(ip['shift'])

    # residual blocks: fold BN scale into conv weights; keep (9, C, C) layout
    for bp in params['blocks']:
        add_w((bp['w1'] * bp['scale1'].reshape(1, 1, 1, C)).reshape(9, C, C))
        add_w(bp['shift1'])
        add_w((bp['w2'] * bp['scale2'].reshape(1, 1, 1, C)).reshape(9, C, C))
        add_w(bp['shift2'])

    # BiLSTM: permute gates to (i,f,o,g), fuse directions, block-diagonal W_hh
    for lp in params['lstm']:
        wih_f = _perm_ifog(lp['fwd']['wih'])
        wih_b = _perm_ifog(lp['bwd']['wih'])
        b_f = _perm_ifog(lp['fwd']['b'])
        b_b = _perm_ifog(lp['bwd']['b'])
        whh_f = _perm_ifog(lp['fwd']['whh'])
        whh_b = _perm_ifog(lp['bwd']['whh'])
        add_w(jnp.concatenate([wih_f, wih_b], axis=1))          # (din, 8Hs)
        add_w(jnp.concatenate([b_f, b_b], axis=1))              # (1, 8Hs)
        z = jnp.zeros((Hs, 4 * Hs), jnp.float32)
        add_w(jnp.concatenate(
            [jnp.concatenate([whh_f, z], axis=1),
             jnp.concatenate([z, whh_b], axis=1)], axis=0))     # (2Hs, 8Hs)

    # fused output head
    op = params['out']
    add_w(jnp.concatenate([op['w1'], op['w2']], axis=0))        # (2Hs + C, NC)
    add_w(op['b1'] + op['b2'])                                  # (1, NC)

    kernel = make_rctc_kernel(n_blocks, n_lstm, Bb, H, W, Cin, C, Hs, NC)

    scratch = [pltpu.VMEM((Bb, H + 2, W + 2, C), jnp.float32)]              # padded act
    scratch += [pltpu.VMEM((Bb, T, 2 * Hs), jnp.float32) for _ in range(n_lstm)]

    return pl.pallas_call(
        kernel,
        out_shape=jax.ShapeDtypeStruct((B, T, NC), jnp.float32),
        grid=(GRID_STEPS,),
        in_specs=in_specs,
        out_specs=pl.BlockSpec((Bb, T, NC), lambda g: (g, 0, 0)),
        scratch_shapes=scratch,
        compiler_params=pltpu.CompilerParams(
            dimension_semantics=("parallel",),                  # megacore on v7x
        ),
    )(*inputs)


# ----------------------------- pure-JAX reference -----------------------------

def _lstm_dir_ref(x, p):
    bsz = x.shape[0]
    hs = p['whh'].shape[0]

    def step(carry, xt):
        h, c = carry
        gates = xt @ p['wih'] + h @ p['whh'] + p['b']
        i, f, g, o = jnp.split(gates, 4, axis=-1)
        c = jax.nn.sigmoid(f) * c + jax.nn.sigmoid(i) * jnp.tanh(g)
        h = jax.nn.sigmoid(o) * jnp.tanh(c)
        return (h, c), h

    init = (jnp.zeros((bsz, hs)), jnp.zeros((bsz, hs)))
    _, hs_seq = jax.lax.scan(step, init, jnp.transpose(x, (1, 0, 2)))
    return jnp.transpose(hs_seq, (1, 0, 2))


def _conv3x3_ref(x, w):
    return jax.lax.conv_general_dilated(
        x, w, window_strides=(1, 1), padding='SAME',
        dimension_numbers=('NHWC', 'HWIO', 'NHWC'))


def rctc_forward_ref(x_nchw, params):
    x = jnp.transpose(x_nchw, (0, 2, 3, 1))
    ip = params['input_proj']
    h0 = jnp.maximum(jnp.einsum('bhwc,cd->bhwd', x, ip['w']) * ip['scale']
                     + ip['shift'], 0.0)
    xc = h0
    for bp in params['blocks']:
        r = xc
        t = jnp.maximum(_conv3x3_ref(xc, bp['w1']) * bp['scale1'] + bp['shift1'], 0.0)
        xc = jnp.maximum(_conv3x3_ref(t, bp['w2']) * bp['scale2'] + bp['shift2'] + r, 0.0)
    seq_feat = jnp.mean(xc + h0, axis=1)
    seq = seq_feat
    for lp in params['lstm']:
        fwd = _lstm_dir_ref(seq, lp['fwd'])
        bwd = _lstm_dir_ref(seq[:, ::-1], lp['bwd'])[:, ::-1]
        seq = jnp.concatenate([fwd, bwd], axis=-1)
    p = params['out']
    return seq @ p['w1'] + p['b1'] + seq_feat @ p['w2'] + p['b2']


# ----------------------------- parameter init -----------------------------

def build_params(c_in, hid, seq_h, num_classes, n_blocks, n_lstm_layers, eps=1e-5):
    keys = iter(jax.random.split(jax.random.PRNGKey(0), 256))

    def nrm(shape, scale=0.1):
        return scale * jax.random.normal(next(keys), shape, dtype=jnp.float32)

    def bn_fold(c, conv_bias):
        gamma = 1.0 + nrm((c,), 0.05)
        beta = nrm((c,), 0.05)
        mean = nrm((c,), 0.05)
        var = 1.0 + 0.1 * jnp.abs(nrm((c,), 1.0))
        scale = gamma / jnp.sqrt(var + eps)
        shift = beta - scale * mean + scale * conv_bias
        return scale.reshape(1, c), shift.reshape(1, c)

    # input_proj: Conv2d(c_in, hid, 1) + BN + ReLU
    w_ip = nrm((c_in, hid))
    b_ip = nrm((hid,))
    s_ip, sh_ip = bn_fold(hid, b_ip)
    params = {'input_proj': {'w': w_ip, 'scale': s_ip, 'shift': sh_ip}}

    # residual blocks: Conv3x3 + BN + ReLU, Conv3x3 + BN + residual + ReLU
    blocks = []
    for _ in range(n_blocks):
        w1 = nrm((3, 3, hid, hid))
        b1 = nrm((hid,))
        s1, sh1 = bn_fold(hid, b1)
        w2 = nrm((3, 3, hid, hid))
        b2 = nrm((hid,))
        s2, sh2 = bn_fold(hid, b2)
        blocks.append({'w1': w1, 'scale1': s1, 'shift1': sh1,
                       'w2': w2, 'scale2': s2, 'shift2': sh2})
    params['blocks'] = blocks

    # BiLSTM (PyTorch layout weight_ih [4H, Din] stored transposed; b = b_ih + b_hh)
    lstm = []
    din = hid
    for _ in range(n_lstm_layers):
        layer = {}
        for d in ('fwd', 'bwd'):
            layer[d] = {
                'wih': nrm((din, 4 * seq_h)),
                'whh': nrm((seq_h, 4 * seq_h)),
                'b': (nrm((4 * seq_h,)) + nrm((4 * seq_h,))).reshape(1, 4 * seq_h),
            }
        lstm.append(layer)
        din = 2 * seq_h
    params['lstm'] = lstm

    # output heads
    params['out'] = {
        'w1': nrm((2 * seq_h, num_classes)), 'b1': nrm((num_classes,)).reshape(1, -1),
        'w2': nrm((hid, num_classes)), 'b2': nrm((num_classes,)).reshape(1, -1),
    }
    return params


# ----------------------------- main -----------------------------

if __name__ == "__main__":
    # small shapes; sequence length T == W; lane-dense 2*SEQ_H and NUM_CLASSES
    B, C_IN, HGT, WID = 2, 16, 4, 8
    HID, SEQ_H, NUM_CLASSES = 32, 64, 128
    N_BLOCKS, N_LSTM_LAYERS = 2, 2

    params = build_params(C_IN, HID, SEQ_H, NUM_CLASSES, N_BLOCKS, N_LSTM_LAYERS)
    x = 0.5 * jax.random.normal(jax.random.PRNGKey(0), (B, C_IN, HGT, WID),
                                dtype=jnp.float32)

    logits = jax.block_until_ready(rctc_forward_pallas(x, params))
    assert logits.shape == (B, WID, NUM_CLASSES), logits.shape

    ref = jax.block_until_ready(rctc_forward_ref(x, params))
    assert jnp.all(jnp.isfinite(logits))
    assert jnp.allclose(logits, ref, atol=2e-2, rtol=2e-2), float(
        jnp.max(jnp.abs(logits - ref)))

    print("KERNEL_OK")
</pallas_src>

<mosaic_0001>
module attributes {stable_mosaic.version = 11 : i64} {
  func.func @kernel(%arg0: i32, %arg1: memref<2x4x8x16xf32, #tpu.memory_space<vmem>>, %arg2: memref<16x32xf32, #tpu.memory_space<vmem>>, %arg3: memref<1x32xf32, #tpu.memory_space<vmem>>, %arg4: memref<9x32x32xf32, #tpu.memory_space<vmem>>, %arg5: memref<1x32xf32, #tpu.memory_space<vmem>>, %arg6: memref<9x32x32xf32, #tpu.memory_space<vmem>>, %arg7: memref<1x32xf32, #tpu.memory_space<vmem>>, %arg8: memref<9x32x32xf32, #tpu.memory_space<vmem>>, %arg9: memref<1x32xf32, #tpu.memory_space<vmem>>, %arg10: memref<9x32x32xf32, #tpu.memory_space<vmem>>, %arg11: memref<1x32xf32, #tpu.memory_space<vmem>>, %arg12: memref<32x512xf32, #tpu.memory_space<vmem>>, %arg13: memref<1x512xf32, #tpu.memory_space<vmem>>, %arg14: memref<128x512xf32, #tpu.memory_space<vmem>>, %arg15: memref<128x512xf32, #tpu.memory_space<vmem>>, %arg16: memref<1x512xf32, #tpu.memory_space<vmem>>, %arg17: memref<128x512xf32, #tpu.memory_space<vmem>>, %arg18: memref<160x128xf32, #tpu.memory_space<vmem>>, %arg19: memref<1x128xf32, #tpu.memory_space<vmem>>, %arg20: memref<2x8x128xf32, #tpu.memory_space<vmem>>, %arg21: memref<2x6x10x32xf32, #tpu.memory_space<vmem>>, %arg22: memref<2x8x128xf32, #tpu.memory_space<vmem>>, %arg23: memref<2x8x128xf32, #tpu.memory_space<vmem>>) attributes {dimension_semantics = [#tpu.dimension_semantics<parallel>], iteration_bounds = array<i64: 1>, scalar_prefetch = 0 : i64, scratch_operands = 3 : i64, tpu.core_type = #tpu.core_type<tc>, window_params = [{transform_indices = @transform_0, window_bounds = array<i64: 2, 4, 8, 16>}, {pipeline_mode = #tpu.pipeline_mode<synchronous>, transform_indices = @transform_1, window_bounds = array<i64: 16, 32>}, {pipeline_mode = #tpu.pipeline_mode<synchronous>, transform_indices = @transform_2, window_bounds = array<i64: 1, 32>}, {pipeline_mode = #tpu.pipeline_mode<synchronous>, transform_indices = @transform_3, window_bounds = array<i64: 9, 32, 32>}, {pipeline_mode = #tpu.pipeline_mode<synchronous>, transform_indices = @transform_4, window_bounds = array<i64: 1, 32>}, {pipeline_mode = #tpu.pipeline_mode<synchronous>, transform_indices = @transform_5, window_bounds = array<i64: 9, 32, 32>}, {pipeline_mode = #tpu.pipeline_mode<synchronous>, transform_indices = @transform_6, window_bounds = array<i64: 1, 32>}, {pipeline_mode = #tpu.pipeline_mode<synchronous>, transform_indices = @transform_7, window_bounds = array<i64: 9, 32, 32>}, {pipeline_mode = #tpu.pipeline_mode<synchronous>, transform_indices = @transform_8, window_bounds = array<i64: 1, 32>}, {pipeline_mode = #tpu.pipeline_mode<synchronous>, transform_indices = @transform_9, window_bounds = array<i64: 9, 32, 32>}, {pipeline_mode = #tpu.pipeline_mode<synchronous>, transform_indices = @transform_10, window_bounds = array<i64: 1, 32>}, {pipeline_mode = #tpu.pipeline_mode<synchronous>, transform_indices = @transform_11, window_bounds = array<i64: 32, 512>}, {pipeline_mode = #tpu.pipeline_mode<synchronous>, transform_indices = @transform_12, window_bounds = array<i64: 1, 512>}, {pipeline_mode = #tpu.pipeline_mode<synchronous>, transform_indices = @transform_13, window_bounds = array<i64: 128, 512>}, {pipeline_mode = #tpu.pipeline_mode<synchronous>, transform_indices = @transform_14, window_bounds = array<i64: 128, 512>}, {pipeline_mode = #tpu.pipeline_mode<synchronous>, transform_indices = @transform_15, window_bounds = array<i64: 1, 512>}, {pipeline_mode = #tpu.pipeline_mode<synchronous>, transform_indices = @transform_16, window_bounds = array<i64: 128, 512>}, {pipeline_mode = #tpu.pipeline_mode<synchronous>, transform_indices = @transform_17, window_bounds = array<i64: 160, 128>}, {pipeline_mode = #tpu.pipeline_mode<synchronous>, transform_indices = @transform_18, window_bounds = array<i64: 1, 128>}, {transform_indices = @transform_19, window_bounds = array<i64: 2, 8, 128>}]} {
    %c0 = arith.constant 0 : index
    %c0_0 = arith.constant 0 : index
    %c0_1 = arith.constant 0 : index
    %c0_2 = arith.constant 0 : index
    %0 = vector.load %arg1[%c0, %c0_0, %c0_1, %c0_2] : memref<2x4x8x16xf32, #tpu.memory_space<vmem>>, vector<2x4x8x16xf32>
    %1 = vector.shape_cast %0 : vector<2x4x8x16xf32> to vector<64x16xf32>
    %c0_3 = arith.constant 0 : index
    %c0_4 = arith.constant 0 : index
    %2 = vector.load %arg2[%c0_3, %c0_4] : memref<16x32xf32, #tpu.memory_space<vmem>>, vector<16x32xf32>
    %cst = arith.constant dense<0.000000e+00> : vector<64x32xf32>
    %3 = tpu.matmul %1, %2, %cst {dimension_numbers = #tpu.dot_dimension_numbers<[1], [0], [0], [1], [0, 0, 1, 1], [], []>} : vector<64x16xf32>, vector<16x32xf32>, vector<64x32xf32> -> vector<64x32xf32>
    %c0_5 = arith.constant 0 : index
    %c0_6 = arith.constant 0 : index
    %4 = vector.load %arg3[%c0_5, %c0_6] : memref<1x32xf32, #tpu.memory_space<vmem>>, vector<1x32xf32>
    %5 = vector.broadcast %4 : vector<1x32xf32> to vector<64x32xf32>
    %6 = arith.addf %3, %5 : vector<64x32xf32>
    %cst_7 = arith.constant 0.000000e+00 : f32
    %7 = vector.broadcast %cst_7 : f32 to vector<64x32xf32>
    %8 = arith.maximumf %6, %7 : vector<64x32xf32>
    %cst_8 = arith.constant 0.000000e+00 : f32
    %9 = vector.broadcast %cst_8 : f32 to vector<2x6x10x32xf32>
    %c0_9 = arith.constant 0 : index
    %c0_10 = arith.constant 0 : index
    %c0_11 = arith.constant 0 : index
    %c0_12 = arith.constant 0 : index
    %10 = vector.load %arg21[%c0_9, %c0_10, %c0_11, %c0_12] : memref<2x6x10x32xf32, #tpu.memory_space<vmem>>, vector<2x6x10x32xf32>
    tpu.vector_store %arg21[%c0_9, %c0_10, %c0_11, %c0_12], %9 {strides = array<i32>} : memref<2x6x10x32xf32, #tpu.memory_space<vmem>>, vector<2x6x10x32xf32>,
    %c0_13 = arith.constant 0 : index
    %c0_14 = arith.constant 0 : index
    %11 = vector.load %arg5[%c0_13, %c0_14] : memref<1x32xf32, #tpu.memory_space<vmem>>, vector<1x32xf32>
    %12 = vector.shape_cast %8 : vector<64x32xf32> to vector<2x4x8x32xf32>
    %c0_15 = arith.constant 0 : index
    %c1 = arith.constant 1 : index
    %c1_16 = arith.constant 1 : index
    %c0_17 = arith.constant 0 : index
    %13 = vector.load %arg21[%c0_15, %c1, %c1_16, %c0_17] : memref<2x6x10x32xf32, #tpu.memory_space<vmem>>, vector<2x4x8x32xf32>
    tpu.vector_store %arg21[%c0_15, %c1, %c1_16, %c0_17], %12 {strides = array<i32>} : memref<2x6x10x32xf32, #tpu.memory_space<vmem>>, vector<2x4x8x32xf32>,
    %c0_18 = arith.constant 0 : index
    %c0_19 = arith.constant 0 : index
    %c0_20 = arith.constant 0 : index
    %c0_21 = arith.constant 0 : index
    %14 = vector.load %arg21[%c0_18, %c0_19, %c0_20, %c0_21] : memref<2x6x10x32xf32, #tpu.memory_space<vmem>>, vector<2x4x8x32xf32>
    %15 = vector.shape_cast %14 : vector<2x4x8x32xf32> to vector<64x32xf32>
    %c0_22 = arith.constant 0 : index
    %c0_23 = arith.constant 0 : index
    %c0_24 = arith.constant 0 : index
    %16 = vector.load %arg4[%c0_22, %c0_23, %c0_24] : memref<9x32x32xf32, #tpu.memory_space<vmem>>, vector<1x32x32xf32>
    %17 = vector.shape_cast %16 : vector<1x32x32xf32> to vector<32x32xf32>
    %cst_25 = arith.constant dense<0.000000e+00> : vector<64x32xf32>
    %18 = tpu.matmul %15, %17, %cst_25 {dimension_numbers = #tpu.dot_dimension_numbers<[1], [0], [0], [1], [0, 0, 1, 1], [], []>} : vector<64x32xf32>, vector<32x32xf32>, vector<64x32xf32> -> vector<64x32xf32>
    %c0_26 = arith.constant 0 : index
    %c0_27 = arith.constant 0 : index
    %c1_28 = arith.constant 1 : index
    %c0_29 = arith.constant 0 : index
    %19 = vector.load %arg21[%c0_26, %c0_27, %c1_28, %c0_29] : memref<2x6x10x32xf32, #tpu.memory_space<vmem>>, vector<2x4x8x32xf32>
    %20 = vector.shape_cast %19 : vector<2x4x8x32xf32> to vector<64x32xf32>
    %c1_30 = arith.constant 1 : index
    %c0_31 = arith.constant 0 : index
    %c0_32 = arith.constant 0 : index
    %21 = vector.load %arg4[%c1_30, %c0_31, %c0_32] : memref<9x32x32xf32, #tpu.memory_space<vmem>>, vector<1x32x32xf32>
    %22 = vector.shape_cast %21 : vector<1x32x32xf32> to vector<32x32xf32>
    %cst_33 = arith.constant dense<0.000000e+00> : vector<64x32xf32>
    %23 = tpu.matmul %20, %22, %cst_33 {dimension_numbers = #tpu.dot_dimension_numbers<[1], [0], [0], [1], [0, 0, 1, 1], [], []>} : vector<64x32xf32>, vector<32x32xf32>, vector<64x32xf32> -> vector<64x32xf32>
    %24 = arith.addf %18, %23 : vector<64x32xf32>
    %c0_34 = arith.constant 0 : index
    %c0_35 = arith.constant 0 : index
    %c2 = arith.constant 2 : index
    %c0_36 = arith.constant 0 : index
    %25 = vector.load %arg21[%c0_34, %c0_35, %c2, %c0_36] : memref<2x6x10x32xf32, #tpu.memory_space<vmem>>, vector<2x4x8x32xf32>
    %26 = vector.shape_cast %25 : vector<2x4x8x32xf32> to vector<64x32xf32>
    %c2_37 = arith.constant 2 : index
    %c0_38 = arith.constant 0 : index
    %c0_39 = arith.constant 0 : index
    %27 = vector.load %arg4[%c2_37, %c0_38, %c0_39] : memref<9x32x32xf32, #tpu.memory_space<vmem>>, vector<1x32x32xf32>
    %28 = vector.shape_cast %27 : vector<1x32x32xf32> to vector<32x32xf32>
    %cst_40 = arith.constant dense<0.000000e+00> : vector<64x32xf32>
    %29 = tpu.matmul %26, %28, %cst_40 {dimension_numbers = #tpu.dot_dimension_numbers<[1], [0], [0], [1], [0, 0, 1, 1], [], []>} : vector<64x32xf32>, vector<32x32xf32>, vector<64x32xf32> -> vector<64x32xf32>
    %30 = arith.addf %24, %29 : vector<64x32xf32>
    %c0_41 = arith.constant 0 : index
    %c1_42 = arith.constant 1 : index
    %c0_43 = arith.constant 0 : index
    %c0_44 = arith.constant 0 : index
    %31 = vector.load %arg21[%c0_41, %c1_42, %c0_43, %c0_44] : memref<2x6x10x32xf32, #tpu.memory_space<vmem>>, vector<2x4x8x32xf32>
    %32 = vector.shape_cast %31 : vector<2x4x8x32xf32> to vector<64x32xf32>
    %c3 = arith.constant 3 : index
    %c0_45 = arith.constant 0 : index
    %c0_46 = arith.constant 0 : index
    %33 = vector.load %arg4[%c3, %c0_45, %c0_46] : memref<9x32x32xf32, #tpu.memory_space<vmem>>, vector<1x32x32xf32>
    %34 = vector.shape_cast %33 : vector<1x32x32xf32> to vector<32x32xf32>
    %cst_47 = arith.constant dense<0.000000e+00> : vector<64x32xf32>
    %35 = tpu.matmul %32, %34, %cst_47 {dimension_numbers = #tpu.dot_dimension_numbers<[1], [0], [0], [1], [0, 0, 1, 1], [], []>} : vector<64x32xf32>, vector<32x32xf32>, vector<64x32xf32> -> vector<64x32xf32>
    %36 = arith.addf %30, %35 : vector<64x32xf32>
    %c0_48 = arith.constant 0 : index
    %c1_49 = arith.constant 1 : index
    %c1_50 = arith.constant 1 : index
    %c0_51 = arith.constant 0 : index
    %37 = vector.load %arg21[%c0_48, %c1_49, %c1_50, %c0_51] : memref<2x6x10x32xf32, #tpu.memory_space<vmem>>, vector<2x4x8x32xf32>
    %38 = vector.shape_cast %37 : vector<2x4x8x32xf32> to vector<64x32xf32>
    %c4 = arith.constant 4 : index
    %c0_52 = arith.constant 0 : index
    %c0_53 = arith.constant 0 : index
    %39 = vector.load %arg4[%c4, %c0_52, %c0_53] : memref<9x32x32xf32, #tpu.memory_space<vmem>>, vector<1x32x32xf32>
    %40 = vector.shape_cast %39 : vector<1x32x32xf32> to vector<32x32xf32>
    %cst_54 = arith.constant dense<0.000000e+00> : vector<64x32xf32>
    %41 = tpu.matmul %38, %40, %cst_54 {dimension_numbers = #tpu.dot_dimension_numbers<[1], [0], [0], [1], [0, 0, 1, 1], [], []>} : vector<64x32xf32>, vector<32x32xf32>, vector<64x32xf32> -> vector<64x32xf32>
    %42 = arith.addf %36, %41 : vector<64x32xf32>
    %c0_55 = arith.constant 0 : index
    %c1_56 = arith.constant 1 : index
    %c2_57 = arith.constant 2 : index
    %c0_58 = arith.constant 0 : index
    %43 = vector.load %arg21[%c0_55, %c1_56, %c2_57, %c0_58] : memref<2x6x10x32xf32, #tpu.memory_space<vmem>>, vector<2x4x8x32xf32>
    %44 = vector.shape_cast %43 : vector<2x4x8x32xf32> to vector<64x32xf32>
    %c5 = arith.constant 5 : index
    %c0_59 = arith.constant 0 : index
    %c0_60 = arith.constant 0 : index
    %45 = vector.load %arg4[%c5, %c0_59, %c0_60] : memref<9x32x32xf32, #tpu.memory_space<vmem>>, vector<1x32x32xf32>
    %46 = vector.shape_cast %45 : vector<1x32x32xf32> to vector<32x32xf32>
    %cst_61 = arith.constant dense<0.000000e+00> : vector<64x32xf32>
    %47 = tpu.matmul %44, %46, %cst_61 {dimension_numbers = #tpu.dot_dimension_numbers<[1], [0], [0], [1], [0, 0, 1, 1], [], []>} : vector<64x32xf32>, vector<32x32xf32>, vector<64x32xf32> -> vector<64x32xf32>
    %48 = arith.addf %42, %47 : vector<64x32xf32>
    %c0_62 = arith.constant 0 : index
    %c2_63 = arith.constant 2 : index
    %c0_64 = arith.constant 0 : index
    %c0_65 = arith.constant 0 : index
    %49 = vector.load %arg21[%c0_62, %c2_63, %c0_64, %c0_65] : memref<2x6x10x32xf32, #tpu.memory_space<vmem>>, vector<2x4x8x32xf32>
    %50 = vector.shape_cast %49 : vector<2x4x8x32xf32> to vector<64x32xf32>
    %c6 = arith.constant 6 : index
    %c0_66 = arith.constant 0 : index
    %c0_67 = arith.constant 0 : index
    %51 = vector.load %arg4[%c6, %c0_66, %c0_67] : memref<9x32x32xf32, #tpu.memory_space<vmem>>, vector<1x32x32xf32>
    %52 = vector.shape_cast %51 : vector<1x32x32xf32> to vector<32x32xf32>
    %cst_68 = arith.constant dense<0.000000e+00> : vector<64x32xf32>
    %53 = tpu.matmul %50, %52, %cst_68 {dimension_numbers = #tpu.dot_dimension_numbers<[1], [0], [0], [1], [0, 0, 1, 1], [], []>} : vector<64x32xf32>, vector<32x32xf32>, vector<64x32xf32> -> vector<64x32xf32>
    %54 = arith.addf %48, %53 : vector<64x32xf32>
    %c0_69 = arith.constant 0 : index
    %c2_70 = arith.constant 2 : index
    %c1_71 = arith.constant 1 : index
    %c0_72 = arith.constant 0 : index
    %55 = vector.load %arg21[%c0_69, %c2_70, %c1_71, %c0_72] : memref<2x6x10x32xf32, #tpu.memory_space<vmem>>, vector<2x4x8x32xf32>
    %56 = vector.shape_cast %55 : vector<2x4x8x32xf32> to vector<64x32xf32>
    %c7 = arith.constant 7 : index
    %c0_73 = arith.constant 0 : index
    %c0_74 = arith.constant 0 : index
    %57 = vector.load %arg4[%c7, %c0_73, %c0_74] : memref<9x32x32xf32, #tpu.memory_space<vmem>>, vector<1x32x32xf32>
    %58 = vector.shape_cast %57 : vector<1x32x32xf32> to vector<32x32xf32>
    %cst_75 = arith.constant dense<0.000000e+00> : vector<64x32xf32>
    %59 = tpu.matmul %56, %58, %cst_75 {dimension_numbers = #tpu.dot_dimension_numbers<[1], [0], [0], [1], [0, 0, 1, 1], [], []>} : vector<64x32xf32>, vector<32x32xf32>, vector<64x32xf32> -> vector<64x32xf32>
    %60 = arith.addf %54, %59 : vector<64x32xf32>
    %c0_76 = arith.constant 0 : index
    %c2_77 = arith.constant 2 : index
    %c2_78 = arith.constant 2 : index
    %c0_79 = arith.constant 0 : index
    %61 = vector.load %arg21[%c0_76, %c2_77, %c2_78, %c0_79] : memref<2x6x10x32xf32, #tpu.memory_space<vmem>>, vector<2x4x8x32xf32>
    %62 = vector.shape_cast %61 : vector<2x4x8x32xf32> to vector<64x32xf32>
    %c8 = arith.constant 8 : index
    %c0_80 = arith.constant 0 : index
    %c0_81 = arith.constant 0 : index
    %63 = vector.load %arg4[%c8, %c0_80, %c0_81] : memref<9x32x32xf32, #tpu.memory_space<vmem>>, vector<1x32x32xf32>
    %64 = vector.shape_cast %63 : vector<1x32x32xf32> to vector<32x32xf32>
    %cst_82 = arith.constant dense<0.000000e+00> : vector<64x32xf32>
    %65 = tpu.matmul %62, %64, %cst_82 {dimension_numbers = #tpu.dot_dimension_numbers<[1], [0], [0], [1], [0, 0, 1, 1], [], []>} : vector<64x32xf32>, vector<32x32xf32>, vector<64x32xf32> -> vector<64x32xf32>
    %66 = arith.addf %60, %65 : vector<64x32xf32>
    %67 = vector.broadcast %11 : vector<1x32xf32> to vector<64x32xf32>
    %68 = arith.addf %66, %67 : vector<64x32xf32>
    %cst_83 = arith.constant 0.000000e+00 : f32
    %69 = vector.broadcast %cst_83 : f32 to vector<64x32xf32>
    %70 = arith.maximumf %68, %69 : vector<64x32xf32>
    %c0_84 = arith.constant 0 : index
    %c0_85 = arith.constant 0 : index
    %71 = vector.load %arg7[%c0_84, %c0_85] : memref<1x32xf32, #tpu.memory_space<vmem>>, vector<1x32xf32>
    %72 = vector.shape_cast %70 : vector<64x32xf32> to vector<2x4x8x32xf32>
    %c0_86 = arith.constant 0 : index
    %c1_87 = arith.constant 1 : index
    %c1_88 = arith.constant 1 : index
    %c0_89 = arith.constant 0 : index
    %73 = vector.load %arg21[%c0_86, %c1_87, %c1_88, %c0_89] : memref<2x6x10x32xf32, #tpu.memory_space<vmem>>, vector<2x4x8x32xf32>
    tpu.vector_store %arg21[%c0_86, %c1_87, %c1_88, %c0_89], %72 {strides = array<i32>} : memref<2x6x10x32xf32, #tpu.memory_space<vmem>>, vector<2x4x8x32xf32>,
    %c0_90 = arith.constant 0 : index
    %c0_91 = arith.constant 0 : index
    %c0_92 = arith.constant 0 : index
    %c0_93 = arith.constant 0 : index
    %74 = vector.load %arg21[%c0_90, %c0_91, %c0_92, %c0_93] : memref<2x6x10x32xf32, #tpu.memory_space<vmem>>, vector<2x4x8x32xf32>
    %75 = vector.shape_cast %74 : vector<2x4x8x32xf32> to vector<64x32xf32>
    %c0_94 = arith.constant 0 : index
    %c0_95 = arith.constant 0 : index
    %c0_96 = arith.constant 0 : index
    %76 = vector.load %arg6[%c0_94, %c0_95, %c0_96] : memref<9x32x32xf32, #tpu.memory_space<vmem>>, vector<1x32x32xf32>
    %77 = vector.shape_cast %76 : vector<1x32x32xf32> to vector<32x32xf32>
    %cst_97 = arith.constant dense<0.000000e+00> : vector<64x32xf32>
    %78 = tpu.matmul %75, %77, %cst_97 {dimension_numbers = #tpu.dot_dimension_numbers<[1], [0], [0], [1], [0, 0, 1, 1], [], []>} : vector<64x32xf32>, vector<32x32xf32>, vector<64x32xf32> -> vector<64x32xf32>
    %c0_98 = arith.constant 0 : index
    %c0_99 = arith.constant 0 : index
    %c1_100 = arith.constant 1 : index
    %c0_101 = arith.constant 0 : index
    %79 = vector.load %arg21[%c0_98, %c0_99, %c1_100, %c0_101] : memref<2x6x10x32xf32, #tpu.memory_space<vmem>>, vector<2x4x8x32xf32>
    %80 = vector.shape_cast %79 : vector<2x4x8x32xf32> to vector<64x32xf32>
    %c1_102 = arith.constant 1 : index
    %c0_103 = arith.constant 0 : index
    %c0_104 = arith.constant 0 : index
    %81 = vector.load %arg6[%c1_102, %c0_103, %c0_104] : memref<9x32x32xf32, #tpu.memory_space<vmem>>, vector<1x32x32xf32>
    %82 = vector.shape_cast %81 : vector<1x32x32xf32> to vector<32x32xf32>
    %cst_105 = arith.constant dense<0.000000e+00> : vector<64x32xf32>
    %83 = tpu.matmul %80, %82, %cst_105 {dimension_numbers = #tpu.dot_dimension_numbers<[1], [0], [0], [1], [0, 0, 1, 1], [], []>} : vector<64x32xf32>, vector<32x32xf32>, vector<64x32xf32> -> vector<64x32xf32>
    %84 = arith.addf %78, %83 : vector<64x32xf32>
    %c0_106 = arith.constant 0 : index
    %c0_107 = arith.constant 0 : index
    %c2_108 = arith.constant 2 : index
    %c0_109 = arith.constant 0 : index
    %85 = vector.load %arg21[%c0_106, %c0_107, %c2_108, %c0_109] : memref<2x6x10x32xf32, #tpu.memory_space<vmem>>, vector<2x4x8x32xf32>
    %86 = vector.shape_cast %85 : vector<2x4x8x32xf32> to vector<64x32xf32>
    %c2_110 = arith.constant 2 : index
    %c0_111 = arith.constant 0 : index
    %c0_112 = arith.constant 0 : index
    %87 = vector.load %arg6[%c2_110, %c0_111, %c0_112] : memref<9x32x32xf32, #tpu.memory_space<vmem>>, vector<1x32x32xf32>
    %88 = vector.shape_cast %87 : vector<1x32x32xf32> to vector<32x32xf32>
    %cst_113 = arith.constant dense<0.000000e+00> : vector<64x32xf32>
    %89 = tpu.matmul %86, %88, %cst_113 {dimension_numbers = #tpu.dot_dimension_numbers<[1], [0], [0], [1], [0, 0, 1, 1], [], []>} : vector<64x32xf32>, vector<32x32xf32>, vector<64x32xf32> -> vector<64x32xf32>
    %90 = arith.addf %84, %89 : vector<64x32xf32>
    %c0_114 = arith.constant 0 : index
    %c1_115 = arith.constant 1 : index
    %c0_116 = arith.constant 0 : index
    %c0_117 = arith.constant 0 : index
    %91 = vector.load %arg21[%c0_114, %c1_115, %c0_116, %c0_117] : memref<2x6x10x32xf32, #tpu.memory_space<vmem>>, vector<2x4x8x32xf32>
    %92 = vector.shape_cast %91 : vector<2x4x8x32xf32> to vector<64x32xf32>
    %c3_118 = arith.constant 3 : index
    %c0_119 = arith.constant 0 : index
    %c0_120 = arith.constant 0 : index
    %93 = vector.load %arg6[%c3_118, %c0_119, %c0_120] : memref<9x32x32xf32, #tpu.memory_space<vmem>>, vector<1x32x32xf32>
    %94 = vector.shape_cast %93 : vector<1x32x32xf32> to vector<32x32xf32>
    %cst_121 = arith.constant dense<0.000000e+00> : vector<64x32xf32>
    %95 = tpu.matmul %92, %94, %cst_121 {dimension_numbers = #tpu.dot_dimension_numbers<[1], [0], [0], [1], [0, 0, 1, 1], [], []>} : vector<64x32xf32>, vector<32x32xf32>, vector<64x32xf32> -> vector<64x32xf32>
    %96 = arith.addf %90, %95 : vector<64x32xf32>
    %c0_122 = arith.constant 0 : index
    %c1_123 = arith.constant 1 : index
    %c1_124 = arith.constant 1 : index
    %c0_125 = arith.constant 0 : index
    %97 = vector.load %arg21[%c0_122, %c1_123, %c1_124, %c0_125] : memref<2x6x10x32xf32, #tpu.memory_space<vmem>>, vector<2x4x8x32xf32>
    %98 = vector.shape_cast %97 : vector<2x4x8x32xf32> to vector<64x32xf32>
    %c4_126 = arith.constant 4 : index
    %c0_127 = arith.constant 0 : index
    %c0_128 = arith.constant 0 : index
    %99 = vector.load %arg6[%c4_126, %c0_127, %c0_128] : memref<9x32x32xf32, #tpu.memory_space<vmem>>, vector<1x32x32xf32>
    %100 = vector.shape_cast %99 : vector<1x32x32xf32> to vector<32x32xf32>
    %cst_129 = arith.constant dense<0.000000e+00> : vector<64x32xf32>
    %101 = tpu.matmul %98, %100, %cst_129 {dimension_numbers = #tpu.dot_dimension_numbers<[1], [0], [0], [1], [0, 0, 1, 1], [], []>} : vector<64x32xf32>, vector<32x32xf32>, vector<64x32xf32> -> vector<64x32xf32>
    %102 = arith.addf %96, %101 : vector<64x32xf32>
    %c0_130 = arith.constant 0 : index
    %c1_131 = arith.constant 1 : index
    %c2_132 = arith.constant 2 : index
    %c0_133 = arith.constant 0 : index
    %103 = vector.load %arg21[%c0_130, %c1_131, %c2_132, %c0_133] : memref<2x6x10x32xf32, #tpu.memory_space<vmem>>, vector<2x4x8x32xf32>
    %104 = vector.shape_cast %103 : vector<2x4x8x32xf32> to vector<64x32xf32>
    %c5_134 = arith.constant 5 : index
    %c0_135 = arith.constant 0 : index
    %c0_136 = arith.constant 0 : index
    %105 = vector.load %arg6[%c5_134, %c0_135, %c0_136] : memref<9x32x32xf32, #tpu.memory_space<vmem>>, vector<1x32x32xf32>
    %106 = vector.shape_cast %105 : vector<1x32x32xf32> to vector<32x32xf32>
    %cst_137 = arith.constant dense<0.000000e+00> : vector<64x32xf32>
    %107 = tpu.matmul %104, %106, %cst_137 {dimension_numbers = #tpu.dot_dimension_numbers<[1], [0], [0], [1], [0, 0, 1, 1], [], []>} : vector<64x32xf32>, vector<32x32xf32>, vector<64x32xf32> -> vector<64x32xf32>
    %108 = arith.addf %102, %107 : vector<64x32xf32>
    %c0_138 = arith.constant 0 : index
    %c2_139 = arith.constant 2 : index
    %c0_140 = arith.constant 0 : index
    %c0_141 = arith.constant 0 : index
    %109 = vector.load %arg21[%c0_138, %c2_139, %c0_140, %c0_141] : memref<2x6x10x32xf32, #tpu.memory_space<vmem>>, vector<2x4x8x32xf32>
    %110 = vector.shape_cast %109 : vector<2x4x8x32xf32> to vector<64x32xf32>
    %c6_142 = arith.constant 6 : index
    %c0_143 = arith.constant 0 : index
    %c0_144 = arith.constant 0 : index
    %111 = vector.load %arg6[%c6_142, %c0_143, %c0_144] : memref<9x32x32xf32, #tpu.memory_space<vmem>>, vector<1x32x32xf32>
    %112 = vector.shape_cast %111 : vector<1x32x32xf32> to vector<32x32xf32>
    %cst_145 = arith.constant dense<0.000000e+00> : vector<64x32xf32>
    %113 = tpu.matmul %110, %112, %cst_145 {dimension_numbers = #tpu.dot_dimension_numbers<[1], [0], [0], [1], [0, 0, 1, 1], [], []>} : vector<64x32xf32>, vector<32x32xf32>, vector<64x32xf32> -> vector<64x32xf32>
    %114 = arith.addf %108, %113 : vector<64x32xf32>
    %c0_146 = arith.constant 0 : index
    %c2_147 = arith.constant 2 : index
    %c1_148 = arith.constant 1 : index
    %c0_149 = arith.constant 0 : index
    %115 = vector.load %arg21[%c0_146, %c2_147, %c1_148, %c0_149] : memref<2x6x10x32xf32, #tpu.memory_space<vmem>>, vector<2x4x8x32xf32>
    %116 = vector.shape_cast %115 : vector<2x4x8x32xf32> to vector<64x32xf32>
    %c7_150 = arith.constant 7 : index
    %c0_151 = arith.constant 0 : index
    %c0_152 = arith.constant 0 : index
    %117 = vector.load %arg6[%c7_150, %c0_151, %c0_152] : memref<9x32x32xf32, #tpu.memory_space<vmem>>, vector<1x32x32xf32>
    %118 = vector.shape_cast %117 : vector<1x32x32xf32> to vector<32x32xf32>
    %cst_153 = arith.constant dense<0.000000e+00> : vector<64x32xf32>
    %119 = tpu.matmul %116, %118, %cst_153 {dimension_numbers = #tpu.dot_dimension_numbers<[1], [0], [0], [1], [0, 0, 1, 1], [], []>} : vector<64x32xf32>, vector<32x32xf32>, vector<64x32xf32> -> vector<64x32xf32>
    %120 = arith.addf %114, %119 : vector<64x32xf32>
    %c0_154 = arith.constant 0 : index
    %c2_155 = arith.constant 2 : index
    %c2_156 = arith.constant 2 : index
    %c0_157 = arith.constant 0 : index
    %121 = vector.load %arg21[%c0_154, %c2_155, %c2_156, %c0_157] : memref<2x6x10x32xf32, #tpu.memory_space<vmem>>, vector<2x4x8x32xf32>
    %122 = vector.shape_cast %121 : vector<2x4x8x32xf32> to vector<64x32xf32>
    %c8_158 = arith.constant 8 : index
    %c0_159 = arith.constant 0 : index
    %c0_160 = arith.constant 0 : index
    %123 = vector.load %arg6[%c8_158, %c0_159, %c0_160] : memref<9x32x32xf32, #tpu.memory_space<vmem>>, vector<1x32x32xf32>
    %124 = vector.shape_cast %123 : vector<1x32x32xf32> to vector<32x32xf32>
    %cst_161 = arith.constant dense<0.000000e+00> : vector<64x32xf32>
    %125 = tpu.matmul %122, %124, %cst_161 {dimension_numbers = #tpu.dot_dimension_numbers<[1], [0], [0], [1], [0, 0, 1, 1], [], []>} : vector<64x32xf32>, vector<32x32xf32>, vector<64x32xf32> -> vector<64x32xf32>
    %126 = arith.addf %120, %125 : vector<64x32xf32>
    %127 = vector.broadcast %71 : vector<1x32xf32> to vector<64x32xf32>
    %128 = arith.addf %126, %127 : vector<64x32xf32>
    %129 = arith.addf %128, %8 : vector<64x32xf32>
    %cst_162 = arith.constant 0.000000e+00 : f32
    %130 = vector.broadcast %cst_162 : f32 to vector<64x32xf32>
    %131 = arith.maximumf %129, %130 : vector<64x32xf32>
    %c0_163 = arith.constant 0 : index
    %c0_164 = arith.constant 0 : index
    %132 = vector.load %arg9[%c0_163, %c0_164] : memref<1x32xf32, #tpu.memory_space<vmem>>, vector<1x32xf32>
    %133 = vector.shape_cast %131 : vector<64x32xf32> to vector<2x4x8x32xf32>
    %c0_165 = arith.constant 0 : index
    %c1_166 = arith.constant 1 : index
    %c1_167 = arith.constant 1 : index
    %c0_168 = arith.constant 0 : index
    %134 = vector.load %arg21[%c0_165, %c1_166, %c1_167, %c0_168] : memref<2x6x10x32xf32, #tpu.memory_space<vmem>>, vector<2x4x8x32xf32>
    tpu.vector_store %arg21[%c0_165, %c1_166, %c1_167, %c0_168], %133 {strides = array<i32>} : memref<2x6x10x32xf32, #tpu.memory_space<vmem>>, vector<2x4x8x32xf32>,
    %c0_169 = arith.constant 0 : index
    %c0_170 = arith.constant 0 : index
    %c0_171 = arith.constant 0 : index
    %c0_172 = arith.constant 0 : index
    %135 = vector.load %arg21[%c0_169, %c0_170, %c0_171, %c0_172] : memref<2x6x10x32xf32, #tpu.memory_space<vmem>>, vector<2x4x8x32xf32>
    %136 = vector.shape_cast %135 : vector<2x4x8x32xf32> to vector<64x32xf32>
    %c0_173 = arith.constant 0 : index
    %c0_174 = arith.constant 0 : index
    %c0_175 = arith.constant 0 : index
    %137 = vector.load %arg8[%c0_173, %c0_174, %c0_175] : memref<9x32x32xf32, #tpu.memory_space<vmem>>, vector<1x32x32xf32>
    %138 = vector.shape_cast %137 : vector<1x32x32xf32> to vector<32x32xf32>
    %cst_176 = arith.constant dense<0.000000e+00> : vector<64x32xf32>
    %139 = tpu.matmul %136, %138, %cst_176 {dimension_numbers = #tpu.dot_dimension_numbers<[1], [0], [0], [1], [0, 0, 1, 1], [], []>} : vector<64x32xf32>, vector<32x32xf32>, vector<64x32xf32> -> vector<64x32xf32>
    %c0_177 = arith.constant 0 : index
    %c0_178 = arith.constant 0 : index
    %c1_179 = arith.constant 1 : index
    %c0_180 = arith.constant 0 : index
    %140 = vector.load %arg21[%c0_177, %c0_178, %c1_179, %c0_180] : memref<2x6x10x32xf32, #tpu.memory_space<vmem>>, vector<2x4x8x32xf32>
    %141 = vector.shape_cast %140 : vector<2x4x8x32xf32> to vector<64x32xf32>
    %c1_181 = arith.constant 1 : index
    %c0_182 = arith.constant 0 : index
    %c0_183 = arith.constant 0 : index
    %142 = vector.load %arg8[%c1_181, %c0_182, %c0_183] : memref<9x32x32xf32, #tpu.memory_space<vmem>>, vector<1x32x32xf32>
    %143 = vector.shape_cast %142 : vector<1x32x32xf32> to vector<32x32xf32>
    %cst_184 = arith.constant dense<0.000000e+00> : vector<64x32xf32>
    %144 = tpu.matmul %141, %143, %cst_184 {dimension_numbers = #tpu.dot_dimension_numbers<[1], [0], [0], [1], [0, 0, 1, 1], [], []>} : vector<64x32xf32>, vector<32x32xf32>, vector<64x32xf32> -> vector<64x32xf32>
    %145 = arith.addf %139, %144 : vector<64x32xf32>
    %c0_185 = arith.constant 0 : index
    %c0_186 = arith.constant 0 : index
    %c2_187 = arith.constant 2 : index
    %c0_188 = arith.constant 0 : index
    %146 = vector.load %arg21[%c0_185, %c0_186, %c2_187, %c0_188] : memref<2x6x10x32xf32, #tpu.memory_space<vmem>>, vector<2x4x8x32xf32>
    %147 = vector.shape_cast %146 : vector<2x4x8x32xf32> to vector<64x32xf32>
    %c2_189 = arith.constant 2 : index
    %c0_190 = arith.constant 0 : index
    %c0_191 = arith.constant 0 : index
    %148 = vector.load %arg8[%c2_189, %c0_190, %c0_191] : memref<9x32x32xf32, #tpu.memory_space<vmem>>, vector<1x32x32xf32>
    %149 = vector.shape_cast %148 : vector<1x32x32xf32> to vector<32x32xf32>
    %cst_192 = arith.constant dense<0.000000e+00> : vector<64x32xf32>
    %150 = tpu.matmul %147, %149, %cst_192 {dimension_numbers = #tpu.dot_dimension_numbers<[1], [0], [0], [1], [0, 0, 1, 1], [], []>} : vector<64x32xf32>, vector<32x32xf32>, vector<64x32xf32> -> vector<64x32xf32>
    %151 = arith.addf %145, %150 : vector<64x32xf32>
    %c0_193 = arith.constant 0 : index
    %c1_194 = arith.constant 1 : index
    %c0_195 = arith.constant 0 : index
    %c0_196 = arith.constant 0 : index
    %152 = vector.load %arg21[%c0_193, %c1_194, %c0_195, %c0_196] : memref<2x6x10x32xf32, #tpu.memory_space<vmem>>, vector<2x4x8x32xf32>
    %153 = vector.shape_cast %152 : vector<2x4x8x32xf32> to vector<64x32xf32>
    %c3_197 = arith.constant 3 : index
    %c0_198 = arith.constant 0 : index
    %c0_199 = arith.constant 0 : index
    %154 = vector.load %arg8[%c3_197, %c0_198, %c0_199] : memref<9x32x32xf32, #tpu.memory_space<vmem>>, vector<1x32x32xf32>
    %155 = vector.shape_cast %154 : vector<1x32x32xf32> to vector<32x32xf32>
    %cst_200 = arith.constant dense<0.000000e+00> : vector<64x32xf32>
    %156 = tpu.matmul %153, %155, %cst_200 {dimension_numbers = #tpu.dot_dimension_numbers<[1], [0], [0], [1], [0, 0, 1, 1], [], []>} : vector<64x32xf32>, vector<32x32xf32>, vector<64x32xf32> -> vector<64x32xf32>
    %157 = arith.addf %151, %156 : vector<64x32xf32>
    %c0_201 = arith.constant 0 : index
    %c1_202 = arith.constant 1 : index
    %c1_203 = arith.constant 1 : index
    %c0_204 = arith.constant 0 : index
    %158 = vector.load %arg21[%c0_201, %c1_202, %c1_203, %c0_204] : memref<2x6x10x32xf32, #tpu.memory_space<vmem>>, vector<2x4x8x32xf32>
    %159 = vector.shape_cast %158 : vector<2x4x8x32xf32> to vector<64x32xf32>
    %c4_205 = arith.constant 4 : index
    %c0_206 = arith.constant 0 : index
    %c0_207 = arith.constant 0 : index
    %160 = vector.load %arg8[%c4_205, %c0_206, %c0_207] : memref<9x32x32xf32, #tpu.memory_space<vmem>>, vector<1x32x32xf32>
    %161 = vector.shape_cast %160 : vector<1x32x32xf32> to vector<32x32xf32>
    %cst_208 = arith.constant dense<0.000000e+00> : vector<64x32xf32>
    %162 = tpu.matmul %159, %161, %cst_208 {dimension_numbers = #tpu.dot_dimension_numbers<[1], [0], [0], [1], [0, 0, 1, 1], [], []>} : vector<64x32xf32>, vector<32x32xf32>, vector<64x32xf32> -> vector<64x32xf32>
    %163 = arith.addf %157, %162 : vector<64x32xf32>
    %c0_209 = arith.constant 0 : index
    %c1_210 = arith.constant 1 : index
    %c2_211 = arith.constant 2 : index
    %c0_212 = arith.constant 0 : index
    %164 = vector.load %arg21[%c0_209, %c1_210, %c2_211, %c0_212] : memref<2x6x10x32xf32, #tpu.memory_space<vmem>>, vector<2x4x8x32xf32>
    %165 = vector.shape_cast %164 : vector<2x4x8x32xf32> to vector<64x32xf32>
    %c5_213 = arith.constant 5 : index
    %c0_214 = arith.constant 0 : index
    %c0_215 = arith.constant 0 : index
    %166 = vector.load %arg8[%c5_213, %c0_214, %c0_215] : memref<9x32x32xf32, #tpu.memory_space<vmem>>, vector<1x32x32xf32>
    %167 = vector.shape_cast %166 : vector<1x32x32xf32> to vector<32x32xf32>
    %cst_216 = arith.constant dense<0.000000e+00> : vector<64x32xf32>
    %168 = tpu.matmul %165, %167, %cst_216 {dimension_numbers = #tpu.dot_dimension_numbers<[1], [0], [0], [1], [0, 0, 1, 1], [], []>} : vector<64x32xf32>, vector<32x32xf32>, vector<64x32xf32> -> vector<64x32xf32>
    %169 = arith.addf %163, %168 : vector<64x32xf32>
    %c0_217 = arith.constant 0 : index
    %c2_218 = arith.constant 2 : index
    %c0_219 = arith.constant 0 : index
    %c0_220 = arith.constant 0 : index
    %170 = vector.load %arg21[%c0_217, %c2_218, %c0_219, %c0_220] : memref<2x6x10x32xf32, #tpu.memory_space<vmem>>, vector<2x4x8x32xf32>
    %171 = vector.shape_cast %170 : vector<2x4x8x32xf32> to vector<64x32xf32>
    %c6_221 = arith.constant 6 : index
    %c0_222 = arith.constant 0 : index
    %c0_223 = arith.constant 0 : index
    %172 = vector.load %arg8[%c6_221, %c0_222, %c0_223] : memref<9x32x32xf32, #tpu.memory_space<vmem>>, vector<1x32x32xf32>
    %173 = vector.shape_cast %172 : vector<1x32x32xf32> to vector<32x32xf32>
    %cst_224 = arith.constant dense<0.000000e+00> : vector<64x32xf32>
    %174 = tpu.matmul %171, %173, %cst_224 {dimension_numbers = #tpu.dot_dimension_numbers<[1], [0], [0], [1], [0, 0, 1, 1], [], []>} : vector<64x32xf32>, vector<32x32xf32>, vector<64x32xf32> -> vector<64x32xf32>
    %175 = arith.addf %169, %174 : vector<64x32xf32>
    %c0_225 = arith.constant 0 : index
    %c2_226 = arith.constant 2 : index
    %c1_227 = arith.constant 1 : index
    %c0_228 = arith.constant 0 : index
    %176 = vector.load %arg21[%c0_225, %c2_226, %c1_227, %c0_228] : memref<2x6x10x32xf32, #tpu.memory_space<vmem>>, vector<2x4x8x32xf32>
    %177 = vector.shape_cast %176 : vector<2x4x8x32xf32> to vector<64x32xf32>
    %c7_229 = arith.constant 7 : index
    %c0_230 = arith.constant 0 : index
    %c0_231 = arith.constant 0 : index
    %178 = vector.load %arg8[%c7_229, %c0_230, %c0_231] : memref<9x32x32xf32, #tpu.memory_space<vmem>>, vector<1x32x32xf32>
    %179 = vector.shape_cast %178 : vector<1x32x32xf32> to vector<32x32xf32>
    %cst_232 = arith.constant dense<0.000000e+00> : vector<64x32xf32>
    %180 = tpu.matmul %177, %179, %cst_232 {dimension_numbers = #tpu.dot_dimension_numbers<[1], [0], [0], [1], [0, 0, 1, 1], [], []>} : vector<64x32xf32>, vector<32x32xf32>, vector<64x32xf32> -> vector<64x32xf32>
    %181 = arith.addf %175, %180 : vector<64x32xf32>
    %c0_233 = arith.constant 0 : index
    %c2_234 = arith.constant 2 : index
    %c2_235 = arith.constant 2 : index
    %c0_236 = arith.constant 0 : index
    %182 = vector.load %arg21[%c0_233, %c2_234, %c2_235, %c0_236] : memref<2x6x10x32xf32, #tpu.memory_space<vmem>>, vector<2x4x8x32xf32>
    %183 = vector.shape_cast %182 : vector<2x4x8x32xf32> to vector<64x32xf32>
    %c8_237 = arith.constant 8 : index
    %c0_238 = arith.constant 0 : index
    %c0_239 = arith.constant 0 : index
    %184 = vector.load %arg8[%c8_237, %c0_238, %c0_239] : memref<9x32x32xf32, #tpu.memory_space<vmem>>, vector<1x32x32xf32>
    %185 = vector.shape_cast %184 : vector<1x32x32xf32> to vector<32x32xf32>
    %cst_240 = arith.constant dense<0.000000e+00> : vector<64x32xf32>
    %186 = tpu.matmul %183, %185, %cst_240 {dimension_numbers = #tpu.dot_dimension_numbers<[1], [0], [0], [1], [0, 0, 1, 1], [], []>} : vector<64x32xf32>, vector<32x32xf32>, vector<64x32xf32> -> vector<64x32xf32>
    %187 = arith.addf %181, %186 : vector<64x32xf32>
    %188 = vector.broadcast %132 : vector<1x32xf32> to vector<64x32xf32>
    %189 = arith.addf %187, %188 : vector<64x32xf32>
    %cst_241 = arith.constant 0.000000e+00 : f32
    %190 = vector.broadcast %cst_241 : f32 to vector<64x32xf32>
    %191 = arith.maximumf %189, %190 : vector<64x32xf32>
    %c0_242 = arith.constant 0 : index
    %c0_243 = arith.constant 0 : index
    %192 = vector.load %arg11[%c0_242, %c0_243] : memref<1x32xf32, #tpu.memory_space<vmem>>, vector<1x32xf32>
    %193 = vector.shape_cast %191 : vector<64x32xf32> to vector<2x4x8x32xf32>
    %c0_244 = arith.constant 0 : index
    %c1_245 = arith.constant 1 : index
    %c1_246 = arith.constant 1 : index
    %c0_247 = arith.constant 0 : index
    %194 = vector.load %arg21[%c0_244, %c1_245, %c1_246, %c0_247] : memref<2x6x10x32xf32, #tpu.memory_space<vmem>>, vector<2x4x8x32xf32>
    tpu.vector_store %arg21[%c0_244, %c1_245, %c1_246, %c0_247], %193 {strides = array<i32>} : memref<2x6x10x32xf32, #tpu.memory_space<vmem>>, vector<2x4x8x32xf32>,
    %c0_248 = arith.constant 0 : index
    %c0_249 = arith.constant 0 : index
    %c0_250 = arith.constant 0 : index
    %c0_251 = arith.constant 0 : index
    %195 = vector.load %arg21[%c0_248, %c0_249, %c0_250, %c0_251] : memref<2x6x10x32xf32, #tpu.memory_space<vmem>>, vector<2x4x8x32xf32>
    %196 = vector.shape_cast %195 : vector<2x4x8x32xf32> to vector<64x32xf32>
    %c0_252 = arith.constant 0 : index
    %c0_253 = arith.constant 0 : index
    %c0_254 = arith.constant 0 : index
    %197 = vector.load %arg10[%c0_252, %c0_253, %c0_254] : memref<9x32x32xf32, #tpu.memory_space<vmem>>, vector<1x32x32xf32>
    %198 = vector.shape_cast %197 : vector<1x32x32xf32> to vector<32x32xf32>
    %cst_255 = arith.constant dense<0.000000e+00> : vector<64x32xf32>
    %199 = tpu.matmul %196, %198, %cst_255 {dimension_numbers = #tpu.dot_dimension_numbers<[1], [0], [0], [1], [0, 0, 1, 1], [], []>} : vector<64x32xf32>, vector<32x32xf32>, vector<64x32xf32> -> vector<64x32xf32>
    %c0_256 = arith.constant 0 : index
    %c0_257 = arith.constant 0 : index
    %c1_258 = arith.constant 1 : index
    %c0_259 = arith.constant 0 : index
    %200 = vector.load %arg21[%c0_256, %c0_257, %c1_258, %c0_259] : memref<2x6x10x32xf32, #tpu.memory_space<vmem>>, vector<2x4x8x32xf32>
    %201 = vector.shape_cast %200 : vector<2x4x8x32xf32> to vector<64x32xf32>
    %c1_260 = arith.constant 1 : index
    %c0_261 = arith.constant 0 : index
    %c0_262 = arith.constant 0 : index
    %202 = vector.load %arg10[%c1_260, %c0_261, %c0_262] : memref<9x32x32xf32, #tpu.memory_space<vmem>>, vector<1x32x32xf32>
    %203 = vector.shape_cast %202 : vector<1x32x32xf32> to vector<32x32xf32>
    %cst_263 = arith.constant dense<0.000000e+00> : vector<64x32xf32>
    %204 = tpu.matmul %201, %203, %cst_263 {dimension_numbers = #tpu.dot_dimension_numbers<[1], [0], [0], [1], [0, 0, 1, 1], [], []>} : vector<64x32xf32>, vector<32x32xf32>, vector<64x32xf32> -> vector<64x32xf32>
    %205 = arith.addf %199, %204 : vector<64x32xf32>
    %c0_264 = arith.constant 0 : index
    %c0_265 = arith.constant 0 : index
    %c2_266 = arith.constant 2 : index
    %c0_267 = arith.constant 0 : index
    %206 = vector.load %arg21[%c0_264, %c0_265, %c2_266, %c0_267] : memref<2x6x10x32xf32, #tpu.memory_space<vmem>>, vector<2x4x8x32xf32>
    %207 = vector.shape_cast %206 : vector<2x4x8x32xf32> to vector<64x32xf32>
    %c2_268 = arith.constant 2 : index
    %c0_269 = arith.constant 0 : index
    %c0_270 = arith.constant 0 : index
    %208 = vector.load %arg10[%c2_268, %c0_269, %c0_270] : memref<9x32x32xf32, #tpu.memory_space<vmem>>, vector<1x32x32xf32>
    %209 = vector.shape_cast %208 : vector<1x32x32xf32> to vector<32x32xf32>
    %cst_271 = arith.constant dense<0.000000e+00> : vector<64x32xf32>
    %210 = tpu.matmul %207, %209, %cst_271 {dimension_numbers = #tpu.dot_dimension_numbers<[1], [0], [0], [1], [0, 0, 1, 1], [], []>} : vector<64x32xf32>, vector<32x32xf32>, vector<64x32xf32> -> vector<64x32xf32>
    %211 = arith.addf %205, %210 : vector<64x32xf32>
    %c0_272 = arith.constant 0 : index
    %c1_273 = arith.constant 1 : index
    %c0_274 = arith.constant 0 : index
    %c0_275 = arith.constant 0 : index
    %212 = vector.load %arg21[%c0_272, %c1_273, %c0_274, %c0_275] : memref<2x6x10x32xf32, #tpu.memory_space<vmem>>, vector<2x4x8x32xf32>
    %213 = vector.shape_cast %212 : vector<2x4x8x32xf32> to vector<64x32xf32>
    %c3_276 = arith.constant 3 : index
    %c0_277 = arith.constant 0 : index
    %c0_278 = arith.constant 0 : index
    %214 = vector.load %arg10[%c3_276, %c0_277, %c0_278] : memref<9x32x32xf32, #tpu.memory_space<vmem>>, vector<1x32x32xf32>
    %215 = vector.shape_cast %214 : vector<1x32x32xf32> to vector<32x32xf32>
    %cst_279 = arith.constant dense<0.000000e+00> : vector<64x32xf32>
    %216 = tpu.matmul %213, %215, %cst_279 {dimension_numbers = #tpu.dot_dimension_numbers<[1], [0], [0], [1], [0, 0, 1, 1], [], []>} : vector<64x32xf32>, vector<32x32xf32>, vector<64x32xf32> -> vector<64x32xf32>
    %217 = arith.addf %211, %216 : vector<64x32xf32>
    %c0_280 = arith.constant 0 : index
    %c1_281 = arith.constant 1 : index
    %c1_282 = arith.constant 1 : index
    %c0_283 = arith.constant 0 : index
    %218 = vector.load %arg21[%c0_280, %c1_281, %c1_282, %c0_283] : memref<2x6x10x32xf32, #tpu.memory_space<vmem>>, vector<2x4x8x32xf32>
    %219 = vector.shape_cast %218 : vector<2x4x8x32xf32> to vector<64x32xf32>
    %c4_284 = arith.constant 4 : index
    %c0_285 = arith.constant 0 : index
    %c0_286 = arith.constant 0 : index
    %220 = vector.load %arg10[%c4_284, %c0_285, %c0_286] : memref<9x32x32xf32, #tpu.memory_space<vmem>>, vector<1x32x32xf32>
    %221 = vector.shape_cast %220 : vector<1x32x32xf32> to vector<32x32xf32>
    %cst_287 = arith.constant dense<0.000000e+00> : vector<64x32xf32>
    %222 = tpu.matmul %219, %221, %cst_287 {dimension_numbers = #tpu.dot_dimension_numbers<[1], [0], [0], [1], [0, 0, 1, 1], [], []>} : vector<64x32xf32>, vector<32x32xf32>, vector<64x32xf32> -> vector<64x32xf32>
    %223 = arith.addf %217, %222 : vector<64x32xf32>
    %c0_288 = arith.constant 0 : index
    %c1_289 = arith.constant 1 : index
    %c2_290 = arith.constant 2 : index
    %c0_291 = arith.constant 0 : index
    %224 = vector.load %arg21[%c0_288, %c1_289, %c2_290, %c0_291] : memref<2x6x10x32xf32, #tpu.memory_space<vmem>>, vector<2x4x8x32xf32>
    %225 = vector.shape_cast %224 : vector<2x4x8x32xf32> to vector<64x32xf32>
    %c5_292 = arith.constant 5 : index
    %c0_293 = arith.constant 0 : index
    %c0_294 = arith.constant 0 : index
    %226 = vector.load %arg10[%c5_292, %c0_293, %c0_294] : memref<9x32x32xf32, #tpu.memory_space<vmem>>, vector<1x32x32xf32>
    %227 = vector.shape_cast %226 : vector<1x32x32xf32> to vector<32x32xf32>
    %cst_295 = arith.constant dense<0.000000e+00> : vector<64x32xf32>
    %228 = tpu.matmul %225, %227, %cst_295 {dimension_numbers = #tpu.dot_dimension_numbers<[1], [0], [0], [1], [0, 0, 1, 1], [], []>} : vector<64x32xf32>, vector<32x32xf32>, vector<64x32xf32> -> vector<64x32xf32>
    %229 = arith.addf %223, %228 : vector<64x32xf32>
    %c0_296 = arith.constant 0 : index
    %c2_297 = arith.constant 2 : index
    %c0_298 = arith.constant 0 : index
    %c0_299 = arith.constant 0 : index
    %230 = vector.load %arg21[%c0_296, %c2_297, %c0_298, %c0_299] : memref<2x6x10x32xf32, #tpu.memory_space<vmem>>, vector<2x4x8x32xf32>
    %231 = vector.shape_cast %230 : vector<2x4x8x32xf32> to vector<64x32xf32>
    %c6_300 = arith.constant 6 : index
    %c0_301 = arith.constant 0 : index
    %c0_302 = arith.constant 0 : index
    %232 = vector.load %arg10[%c6_300, %c0_301, %c0_302] : memref<9x32x32xf32, #tpu.memory_space<vmem>>, vector<1x32x32xf32>
    %233 = vector.shape_cast %232 : vector<1x32x32xf32> to vector<32x32xf32>
    %cst_303 = arith.constant dense<0.000000e+00> : vector<64x32xf32>
    %234 = tpu.matmul %231, %233, %cst_303 {dimension_numbers = #tpu.dot_dimension_numbers<[1], [0], [0], [1], [0, 0, 1, 1], [], []>} : vector<64x32xf32>, vector<32x32xf32>, vector<64x32xf32> -> vector<64x32xf32>
    %235 = arith.addf %229, %234 : vector<64x32xf32>
    %c0_304 = arith.constant 0 : index
    %c2_305 = arith.constant 2 : index
    %c1_306 = arith.constant 1 : index
    %c0_307 = arith.constant 0 : index
    %236 = vector.load %arg21[%c0_304, %c2_305, %c1_306, %c0_307] : memref<2x6x10x32xf32, #tpu.memory_space<vmem>>, vector<2x4x8x32xf32>
    %237 = vector.shape_cast %236 : vector<2x4x8x32xf32> to vector<64x32xf32>
    %c7_308 = arith.constant 7 : index
    %c0_309 = arith.constant 0 : index
    %c0_310 = arith.constant 0 : index
    %238 = vector.load %arg10[%c7_308, %c0_309, %c0_310] : memref<9x32x32xf32, #tpu.memory_space<vmem>>, vector<1x32x32xf32>
    %239 = vector.shape_cast %238 : vector<1x32x32xf32> to vector<32x32xf32>
    %cst_311 = arith.constant dense<0.000000e+00> : vector<64x32xf32>
    %240 = tpu.matmul %237, %239, %cst_311 {dimension_numbers = #tpu.dot_dimension_numbers<[1], [0], [0], [1], [0, 0, 1, 1], [], []>} : vector<64x32xf32>, vector<32x32xf32>, vector<64x32xf32> -> vector<64x32xf32>
    %241 = arith.addf %235, %240 : vector<64x32xf32>
    %c0_312 = arith.constant 0 : index
    %c2_313 = arith.constant 2 : index
    %c2_314 = arith.constant 2 : index
    %c0_315 = arith.constant 0 : index
    %242 = vector.load %arg21[%c0_312, %c2_313, %c2_314, %c0_315] : memref<2x6x10x32xf32, #tpu.memory_space<vmem>>, vector<2x4x8x32xf32>
    %243 = vector.shape_cast %242 : vector<2x4x8x32xf32> to vector<64x32xf32>
    %c8_316 = arith.constant 8 : index
    %c0_317 = arith.constant 0 : index
    %c0_318 = arith.constant 0 : index
    %244 = vector.load %arg10[%c8_316, %c0_317, %c0_318] : memref<9x32x32xf32, #tpu.memory_space<vmem>>, vector<1x32x32xf32>
    %245 = vector.shape_cast %244 : vector<1x32x32xf32> to vector<32x32xf32>
    %cst_319 = arith.constant dense<0.000000e+00> : vector<64x32xf32>
    %246 = tpu.matmul %243, %245, %cst_319 {dimension_numbers = #tpu.dot_dimension_numbers<[1], [0], [0], [1], [0, 0, 1, 1], [], []>} : vector<64x32xf32>, vector<32x32xf32>, vector<64x32xf32> -> vector<64x32xf32>
    %247 = arith.addf %241, %246 : vector<64x32xf32>
    %248 = vector.broadcast %192 : vector<1x32xf32> to vector<64x32xf32>
    %249 = arith.addf %247, %248 : vector<64x32xf32>
    %250 = arith.addf %249, %131 : vector<64x32xf32>
    %cst_320 = arith.constant 0.000000e+00 : f32
    %251 = vector.broadcast %cst_320 : f32 to vector<64x32xf32>
    %252 = arith.maximumf %250, %251 : vector<64x32xf32>
    %253 = arith.addf %252, %8 : vector<64x32xf32>
    %254 = vector.shape_cast %253 : vector<64x32xf32> to vector<2x4x8x32xf32>
    %cst_321 = arith.constant dense<0.000000e+00> : vector<2x8x32xf32>
    %255 = vector.multi_reduction <add>, %254, %cst_321 [1] : vector<2x4x8x32xf32> to vector<2x8x32xf32>
    %cst_322 = arith.constant 4.000000e+00 : f32
    %256 = vector.broadcast %cst_322 : f32 to vector<2x8x32xf32>
    %257 = arith.divf %255, %256 : vector<2x8x32xf32>
    %258 = vector.shape_cast %257 : vector<2x8x32xf32> to vector<16x32xf32>
    %c0_323 = arith.constant 0 : index
    %c0_324 = arith.constant 0 : index
    %259 = vector.load %arg12[%c0_323, %c0_324] : memref<32x512xf32, #tpu.memory_space<vmem>>, vector<32x512xf32>
    %cst_325 = arith.constant dense<0.000000e+00> : vector<16x512xf32>
    %260 = tpu.matmul %258, %259, %cst_325 {dimension_numbers = #tpu.dot_dimension_numbers<[1], [0], [0], [1], [0, 0, 1, 1], [], []>} : vector<16x32xf32>, vector<32x512xf32>, vector<16x512xf32> -> vector<16x512xf32>
    %c0_326 = arith.constant 0 : index
    %c0_327 = arith.constant 0 : index
    %261 = vector.load %arg13[%c0_326, %c0_327] : memref<1x512xf32, #tpu.memory_space<vmem>>, vector<1x512xf32>
    %262 = vector.broadcast %261 : vector<1x512xf32> to vector<16x512xf32>
    %263 = arith.addf %260, %262 : vector<16x512xf32>
    %264 = vector.shape_cast %263 : vector<16x512xf32> to vector<2x8x512xf32>
    %cst_328 = arith.constant 0.000000e+00 : f32
    %265 = vector.broadcast %cst_328 : f32 to vector<2x128xf32>
    %cst_329 = arith.constant 0.000000e+00 : f32
    %266 = vector.broadcast %cst_329 : f32 to vector<2x64xf32>
    %cst_330 = arith.constant 0.000000e+00 : f32
    %267 = vector.broadcast %cst_330 : f32 to vector<2x64xf32>
    %c0_331 = arith.constant 0 : index
    %c0_332 = arith.constant 0 : index
    %268 = vector.load %arg14[%c0_331, %c0_332] : memref<128x512xf32, #tpu.memory_space<vmem>>, vector<128x512xf32>
    %cst_333 = arith.constant dense<0.000000e+00> : vector<2x512xf32>
    %269 = tpu.matmul %265, %268, %cst_333 {dimension_numbers = #tpu.dot_dimension_numbers<[1], [0], [0], [1], [0, 0, 1, 1], [], []>} : vector<2x128xf32>, vector<128x512xf32>, vector<2x512xf32> -> vector<2x512xf32>
    %270 = vector.extract_strided_slice %264 {offsets = [0, 0, 0], sizes = [2, 1, 256], strides = [1, 1, 1]} : vector<2x8x512xf32> to vector<2x1x256xf32>
    %271 = vector.shape_cast %270 : vector<2x1x256xf32> to vector<2x256xf32>
    %272 = vector.extract_strided_slice %269 {offsets = [0, 0], sizes = [2, 256], strides = [1, 1]} : vector<2x512xf32> to vector<2x256xf32>
    %273 = arith.addf %271, %272 : vector<2x256xf32>
    %274 = vector.extract_strided_slice %264 {offsets = [0, 7, 256], sizes = [2, 1, 256], strides = [1, 1, 1]} : vector<2x8x512xf32> to vector<2x1x256xf32>
    %275 = vector.shape_cast %274 : vector<2x1x256xf32> to vector<2x256xf32>
    %276 = vector.extract_strided_slice %269 {offsets = [0, 256], sizes = [2, 256], strides = [1, 1]} : vector<2x512xf32> to vector<2x256xf32>
    %277 = arith.addf %275, %276 : vector<2x256xf32>
    %278 = vector.extract_strided_slice %273 {offsets = [0, 0], sizes = [2, 192], strides = [1, 1]} : vector<2x256xf32> to vector<2x192xf32>
    %279 = arith.negf %278 : vector<2x192xf32>
    %280 = math.exp %279 : vector<2x192xf32>
    %cst_334 = arith.constant 1.000000e+00 : f32
    %281 = vector.broadcast %cst_334 : f32 to vector<2x192xf32>
    %282 = arith.addf %281, %280 : vector<2x192xf32>
    %283 = arith.divf %281, %282 : vector<2x192xf32>
    %284 = vector.extract_strided_slice %277 {offsets = [0, 0], sizes = [2, 192], strides = [1, 1]} : vector<2x256xf32> to vector<2x192xf32>
    %285 = arith.negf %284 : vector<2x192xf32>
    %286 = math.exp %285 : vector<2x192xf32>
    %cst_335 = arith.constant 1.000000e+00 : f32
    %287 = vector.broadcast %cst_335 : f32 to vector<2x192xf32>
    %288 = arith.addf %287, %286 : vector<2x192xf32>
    %289 = arith.divf %287, %288 : vector<2x192xf32>
    %290 = vector.extract_strided_slice %273 {offsets = [0, 192], sizes = [2, 64], strides = [1, 1]} : vector<2x256xf32> to vector<2x64xf32>
    %291 = math.tanh %290 : vector<2x64xf32>
    %292 = vector.extract_strided_slice %277 {offsets = [0, 192], sizes = [2, 64], strides = [1, 1]} : vector<2x256xf32> to vector<2x64xf32>
    %293 = math.tanh %292 : vector<2x64xf32>
    %294 = vector.extract_strided_slice %283 {offsets = [0, 64], sizes = [2, 64], strides = [1, 1]} : vector<2x192xf32> to vector<2x64xf32>
    %295 = arith.mulf %294, %266 : vector<2x64xf32>
    %296 = vector.extract_strided_slice %283 {offsets = [0, 0], sizes = [2, 64], strides = [1, 1]} : vector<2x192xf32> to vector<2x64xf32>
    %297 = arith.mulf %296, %291 : vector<2x64xf32>
    %298 = arith.addf %295, %297 : vector<2x64xf32>
    %299 = vector.extract_strided_slice %283 {offsets = [0, 128], sizes = [2, 64], strides = [1, 1]} : vector<2x192xf32> to vector<2x64xf32>
    %300 = math.tanh %298 : vector<2x64xf32>
    %301 = arith.mulf %299, %300 : vector<2x64xf32>
    %302 = vector.extract_strided_slice %289 {offsets = [0, 64], sizes = [2, 64], strides = [1, 1]} : vector<2x192xf32> to vector<2x64xf32>
    %303 = arith.mulf %302, %267 : vector<2x64xf32>
    %304 = vector.extract_strided_slice %289 {offsets = [0, 0], sizes = [2, 64], strides = [1, 1]} : vector<2x192xf32> to vector<2x64xf32>
    %305 = arith.mulf %304, %293 : vector<2x64xf32>
    %306 = arith.addf %303, %305 : vector<2x64xf32>
    %307 = vector.extract_strided_slice %289 {offsets = [0, 128], sizes = [2, 64], strides = [1, 1]} : vector<2x192xf32> to vector<2x64xf32>
    %308 = math.tanh %306 : vector<2x64xf32>
    %309 = arith.mulf %307, %308 : vector<2x64xf32>
    %310 = tpu.concatenate %301, %309 in 1 : vector<2x64xf32>, vector<2x64xf32> -> vector<2x128xf32>
    %c0_336 = arith.constant 0 : index
    %c0_337 = arith.constant 0 : index
    %311 = vector.load %arg14[%c0_336, %c0_337] : memref<128x512xf32, #tpu.memory_space<vmem>>, vector<128x512xf32>
    %cst_338 = arith.constant dense<0.000000e+00> : vector<2x512xf32>
    %312 = tpu.matmul %310, %311, %cst_338 {dimension_numbers = #tpu.dot_dimension_numbers<[1], [0], [0], [1], [0, 0, 1, 1], [], []>} : vector<2x128xf32>, vector<128x512xf32>, vector<2x512xf32> -> vector<2x512xf32>
    %313 = vector.extract_strided_slice %264 {offsets = [0, 1, 0], sizes = [2, 1, 256], strides = [1, 1, 1]} : vector<2x8x512xf32> to vector<2x1x256xf32>
    %314 = vector.shape_cast %313 : vector<2x1x256xf32> to vector<2x256xf32>
    %315 = vector.extract_strided_slice %312 {offsets = [0, 0], sizes = [2, 256], strides = [1, 1]} : vector<2x512xf32> to vector<2x256xf32>
    %316 = arith.addf %314, %315 : vector<2x256xf32>
    %317 = vector.extract_strided_slice %264 {offsets = [0, 6, 256], sizes = [2, 1, 256], strides = [1, 1, 1]} : vector<2x8x512xf32> to vector<2x1x256xf32>
    %318 = vector.shape_cast %317 : vector<2x1x256xf32> to vector<2x256xf32>
    %319 = vector.extract_strided_slice %312 {offsets = [0, 256], sizes = [2, 256], strides = [1, 1]} : vector<2x512xf32> to vector<2x256xf32>
    %320 = arith.addf %318, %319 : vector<2x256xf32>
    %321 = vector.extract_strided_slice %316 {offsets = [0, 0], sizes = [2, 192], strides = [1, 1]} : vector<2x256xf32> to vector<2x192xf32>
    %322 = arith.negf %321 : vector<2x192xf32>
    %323 = math.exp %322 : vector<2x192xf32>
    %cst_339 = arith.constant 1.000000e+00 : f32
    %324 = vector.broadcast %cst_339 : f32 to vector<2x192xf32>
    %325 = arith.addf %324, %323 : vector<2x192xf32>
    %326 = arith.divf %324, %325 : vector<2x192xf32>
    %327 = vector.extract_strided_slice %320 {offsets = [0, 0], sizes = [2, 192], strides = [1, 1]} : vector<2x256xf32> to vector<2x192xf32>
    %328 = arith.negf %327 : vector<2x192xf32>
    %329 = math.exp %328 : vector<2x192xf32>
    %cst_340 = arith.constant 1.000000e+00 : f32
    %330 = vector.broadcast %cst_340 : f32 to vector<2x192xf32>
    %331 = arith.addf %330, %329 : vector<2x192xf32>
    %332 = arith.divf %330, %331 : vector<2x192xf32>
    %333 = vector.extract_strided_slice %316 {offsets = [0, 192], sizes = [2, 64], strides = [1, 1]} : vector<2x256xf32> to vector<2x64xf32>
    %334 = math.tanh %333 : vector<2x64xf32>
    %335 = vector.extract_strided_slice %320 {offsets = [0, 192], sizes = [2, 64], strides = [1, 1]} : vector<2x256xf32> to vector<2x64xf32>
    %336 = math.tanh %335 : vector<2x64xf32>
    %337 = vector.extract_strided_slice %326 {offsets = [0, 64], sizes = [2, 64], strides = [1, 1]} : vector<2x192xf32> to vector<2x64xf32>
    %338 = arith.mulf %337, %298 : vector<2x64xf32>
    %339 = vector.extract_strided_slice %326 {offsets = [0, 0], sizes = [2, 64], strides = [1, 1]} : vector<2x192xf32> to vector<2x64xf32>
    %340 = arith.mulf %339, %334 : vector<2x64xf32>
    %341 = arith.addf %338, %340 : vector<2x64xf32>
    %342 = vector.extract_strided_slice %326 {offsets = [0, 128], sizes = [2, 64], strides = [1, 1]} : vector<2x192xf32> to vector<2x64xf32>
    %343 = math.tanh %341 : vector<2x64xf32>
    %344 = arith.mulf %342, %343 : vector<2x64xf32>
    %345 = vector.extract_strided_slice %332 {offsets = [0, 64], sizes = [2, 64], strides = [1, 1]} : vector<2x192xf32> to vector<2x64xf32>
    %346 = arith.mulf %345, %306 : vector<2x64xf32>
    %347 = vector.extract_strided_slice %332 {offsets = [0, 0], sizes = [2, 64], strides = [1, 1]} : vector<2x192xf32> to vector<2x64xf32>
    %348 = arith.mulf %347, %336 : vector<2x64xf32>
    %349 = arith.addf %346, %348 : vector<2x64xf32>
    %350 = vector.extract_strided_slice %332 {offsets = [0, 128], sizes = [2, 64], strides = [1, 1]} : vector<2x192xf32> to vector<2x64xf32>
    %351 = math.tanh %349 : vector<2x64xf32>
    %352 = arith.mulf %350, %351 : vector<2x64xf32>
    %353 = tpu.concatenate %344, %352 in 1 : vector<2x64xf32>, vector<2x64xf32> -> vector<2x128xf32>
    %c0_341 = arith.constant 0 : index
    %c0_342 = arith.constant 0 : index
    %354 = vector.load %arg14[%c0_341, %c0_342] : memref<128x512xf32, #tpu.memory_space<vmem>>, vector<128x512xf32>
    %cst_343 = arith.constant dense<0.000000e+00> : vector<2x512xf32>
    %355 = tpu.matmul %353, %354, %cst_343 {dimension_numbers = #tpu.dot_dimension_numbers<[1], [0], [0], [1], [0, 0, 1, 1], [], []>} : vector<2x128xf32>, vector<128x512xf32>, vector<2x512xf32> -> vector<2x512xf32>
    %356 = vector.extract_strided_slice %264 {offsets = [0, 2, 0], sizes = [2, 1, 256], strides = [1, 1, 1]} : vector<2x8x512xf32> to vector<2x1x256xf32>
    %357 = vector.shape_cast %356 : vector<2x1x256xf32> to vector<2x256xf32>
    %358 = vector.extract_strided_slice %355 {offsets = [0, 0], sizes = [2, 256], strides = [1, 1]} : vector<2x512xf32> to vector<2x256xf32>
    %359 = arith.addf %357, %358 : vector<2x256xf32>
    %360 = vector.extract_strided_slice %264 {offsets = [0, 5, 256], sizes = [2, 1, 256], strides = [1, 1, 1]} : vector<2x8x512xf32> to vector<2x1x256xf32>
    %361 = vector.shape_cast %360 : vector<2x1x256xf32> to vector<2x256xf32>
    %362 = vector.extract_strided_slice %355 {offsets = [0, 256], sizes = [2, 256], strides = [1, 1]} : vector<2x512xf32> to vector<2x256xf32>
    %363 = arith.addf %361, %362 : vector<2x256xf32>
    %364 = vector.extract_strided_slice %359 {offsets = [0, 0], sizes = [2, 192], strides = [1, 1]} : vector<2x256xf32> to vector<2x192xf32>
    %365 = arith.negf %364 : vector<2x192xf32>
    %366 = math.exp %365 : vector<2x192xf32>
    %cst_344 = arith.constant 1.000000e+00 : f32
    %367 = vector.broadcast %cst_344 : f32 to vector<2x192xf32>
    %368 = arith.addf %367, %366 : vector<2x192xf32>
    %369 = arith.divf %367, %368 : vector<2x192xf32>
    %370 = vector.extract_strided_slice %363 {offsets = [0, 0], sizes = [2, 192], strides = [1, 1]} : vector<2x256xf32> to vector<2x192xf32>
    %371 = arith.negf %370 : vector<2x192xf32>
    %372 = math.exp %371 : vector<2x192xf32>
    %cst_345 = arith.constant 1.000000e+00 : f32
    %373 = vector.broadcast %cst_345 : f32 to vector<2x192xf32>
    %374 = arith.addf %373, %372 : vector<2x192xf32>
    %375 = arith.divf %373, %374 : vector<2x192xf32>
    %376 = vector.extract_strided_slice %359 {offsets = [0, 192], sizes = [2, 64], strides = [1, 1]} : vector<2x256xf32> to vector<2x64xf32>
    %377 = math.tanh %376 : vector<2x64xf32>
    %378 = vector.extract_strided_slice %363 {offsets = [0, 192], sizes = [2, 64], strides = [1, 1]} : vector<2x256xf32> to vector<2x64xf32>
    %379 = math.tanh %378 : vector<2x64xf32>
    %380 = vector.extract_strided_slice %369 {offsets = [0, 64], sizes = [2, 64], strides = [1, 1]} : vector<2x192xf32> to vector<2x64xf32>
    %381 = arith.mulf %380, %341 : vector<2x64xf32>
    %382 = vector.extract_strided_slice %369 {offsets = [0, 0], sizes = [2, 64], strides = [1, 1]} : vector<2x192xf32> to vector<2x64xf32>
    %383 = arith.mulf %382, %377 : vector<2x64xf32>
    %384 = arith.addf %381, %383 : vector<2x64xf32>
    %385 = vector.extract_strided_slice %369 {offsets = [0, 128], sizes = [2, 64], strides = [1, 1]} : vector<2x192xf32> to vector<2x64xf32>
    %386 = math.tanh %384 : vector<2x64xf32>
    %387 = arith.mulf %385, %386 : vector<2x64xf32>
    %388 = vector.extract_strided_slice %375 {offsets = [0, 64], sizes = [2, 64], strides = [1, 1]} : vector<2x192xf32> to vector<2x64xf32>
    %389 = arith.mulf %388, %349 : vector<2x64xf32>
    %390 = vector.extract_strided_slice %375 {offsets = [0, 0], sizes = [2, 64], strides = [1, 1]} : vector<2x192xf32> to vector<2x64xf32>
    %391 = arith.mulf %390, %379 : vector<2x64xf32>
    %392 = arith.addf %389, %391 : vector<2x64xf32>
    %393 = vector.extract_strided_slice %375 {offsets = [0, 128], sizes = [2, 64], strides = [1, 1]} : vector<2x192xf32> to vector<2x64xf32>
    %394 = math.tanh %392 : vector<2x64xf32>
    %395 = arith.mulf %393, %394 : vector<2x64xf32>
    %396 = tpu.concatenate %387, %395 in 1 : vector<2x64xf32>, vector<2x64xf32> -> vector<2x128xf32>
    %c0_346 = arith.constant 0 : index
    %c0_347 = arith.constant 0 : index
    %397 = vector.load %arg14[%c0_346, %c0_347] : memref<128x512xf32, #tpu.memory_space<vmem>>, vector<128x512xf32>
    %cst_348 = arith.constant dense<0.000000e+00> : vector<2x512xf32>
    %398 = tpu.matmul %396, %397, %cst_348 {dimension_numbers = #tpu.dot_dimension_numbers<[1], [0], [0], [1], [0, 0, 1, 1], [], []>} : vector<2x128xf32>, vector<128x512xf32>, vector<2x512xf32> -> vector<2x512xf32>
    %399 = vector.extract_strided_slice %264 {offsets = [0, 3, 0], sizes = [2, 1, 256], strides = [1, 1, 1]} : vector<2x8x512xf32> to vector<2x1x256xf32>
    %400 = vector.shape_cast %399 : vector<2x1x256xf32> to vector<2x256xf32>
    %401 = vector.extract_strided_slice %398 {offsets = [0, 0], sizes = [2, 256], strides = [1, 1]} : vector<2x512xf32> to vector<2x256xf32>
    %402 = arith.addf %400, %401 : vector<2x256xf32>
    %403 = vector.extract_strided_slice %264 {offsets = [0, 4, 256], sizes = [2, 1, 256], strides = [1, 1, 1]} : vector<2x8x512xf32> to vector<2x1x256xf32>
    %404 = vector.shape_cast %403 : vector<2x1x256xf32> to vector<2x256xf32>
    %405 = vector.extract_strided_slice %398 {offsets = [0, 256], sizes = [2, 256], strides = [1, 1]} : vector<2x512xf32> to vector<2x256xf32>
    %406 = arith.addf %404, %405 : vector<2x256xf32>
    %407 = vector.extract_strided_slice %402 {offsets = [0, 0], sizes = [2, 192], strides = [1, 1]} : vector<2x256xf32> to vector<2x192xf32>
    %408 = arith.negf %407 : vector<2x192xf32>
    %409 = math.exp %408 : vector<2x192xf32>
    %cst_349 = arith.constant 1.000000e+00 : f32
    %410 = vector.broadcast %cst_349 : f32 to vector<2x192xf32>
    %411 = arith.addf %410, %409 : vector<2x192xf32>
    %412 = arith.divf %410, %411 : vector<2x192xf32>
    %413 = vector.extract_strided_slice %406 {offsets = [0, 0], sizes = [2, 192], strides = [1, 1]} : vector<2x256xf32> to vector<2x192xf32>
    %414 = arith.negf %413 : vector<2x192xf32>
    %415 = math.exp %414 : vector<2x192xf32>
    %cst_350 = arith.constant 1.000000e+00 : f32
    %416 = vector.broadcast %cst_350 : f32 to vector<2x192xf32>
    %417 = arith.addf %416, %415 : vector<2x192xf32>
    %418 = arith.divf %416, %417 : vector<2x192xf32>
    %419 = vector.extract_strided_slice %402 {offsets = [0, 192], sizes = [2, 64], strides = [1, 1]} : vector<2x256xf32> to vector<2x64xf32>
    %420 = math.tanh %419 : vector<2x64xf32>
    %421 = vector.extract_strided_slice %406 {offsets = [0, 192], sizes = [2, 64], strides = [1, 1]} : vector<2x256xf32> to vector<2x64xf32>
    %422 = math.tanh %421 : vector<2x64xf32>
    %423 = vector.extract_strided_slice %412 {offsets = [0, 64], sizes = [2, 64], strides = [1, 1]} : vector<2x192xf32> to vector<2x64xf32>
    %424 = arith.mulf %423, %384 : vector<2x64xf32>
    %425 = vector.extract_strided_slice %412 {offsets = [0, 0], sizes = [2, 64], strides = [1, 1]} : vector<2x192xf32> to vector<2x64xf32>
    %426 = arith.mulf %425, %420 : vector<2x64xf32>
    %427 = arith.addf %424, %426 : vector<2x64xf32>
    %428 = vector.extract_strided_slice %412 {offsets = [0, 128], sizes = [2, 64], strides = [1, 1]} : vector<2x192xf32> to vector<2x64xf32>
    %429 = math.tanh %427 : vector<2x64xf32>
    %430 = arith.mulf %428, %429 : vector<2x64xf32>
    %431 = vector.extract_strided_slice %418 {offsets = [0, 64], sizes = [2, 64], strides = [1, 1]} : vector<2x192xf32> to vector<2x64xf32>
    %432 = arith.mulf %431, %392 : vector<2x64xf32>
    %433 = vector.extract_strided_slice %418 {offsets = [0, 0], sizes = [2, 64], strides = [1, 1]} : vector<2x192xf32> to vector<2x64xf32>
    %434 = arith.mulf %433, %422 : vector<2x64xf32>
    %435 = arith.addf %432, %434 : vector<2x64xf32>
    %436 = vector.extract_strided_slice %418 {offsets = [0, 128], sizes = [2, 64], strides = [1, 1]} : vector<2x192xf32> to vector<2x64xf32>
    %437 = math.tanh %435 : vector<2x64xf32>
    %438 = arith.mulf %436, %437 : vector<2x64xf32>
    %439 = tpu.concatenate %430, %438 in 1 : vector<2x64xf32>, vector<2x64xf32> -> vector<2x128xf32>
    %c0_351 = arith.constant 0 : index
    %c0_352 = arith.constant 0 : index
    %440 = vector.load %arg14[%c0_351, %c0_352] : memref<128x512xf32, #tpu.memory_space<vmem>>, vector<128x512xf32>
    %cst_353 = arith.constant dense<0.000000e+00> : vector<2x512xf32>
    %441 = tpu.matmul %439, %440, %cst_353 {dimension_numbers = #tpu.dot_dimension_numbers<[1], [0], [0], [1], [0, 0, 1, 1], [], []>} : vector<2x128xf32>, vector<128x512xf32>, vector<2x512xf32> -> vector<2x512xf32>
    %442 = vector.extract_strided_slice %264 {offsets = [0, 4, 0], sizes = [2, 1, 256], strides = [1, 1, 1]} : vector<2x8x512xf32> to vector<2x1x256xf32>
    %443 = vector.shape_cast %442 : vector<2x1x256xf32> to vector<2x256xf32>
    %444 = vector.extract_strided_slice %441 {offsets = [0, 0], sizes = [2, 256], strides = [1, 1]} : vector<2x512xf32> to vector<2x256xf32>
    %445 = arith.addf %443, %444 : vector<2x256xf32>
    %446 = vector.extract_strided_slice %264 {offsets = [0, 3, 256], sizes = [2, 1, 256], strides = [1, 1, 1]} : vector<2x8x512xf32> to vector<2x1x256xf32>
    %447 = vector.shape_cast %446 : vector<2x1x256xf32> to vector<2x256xf32>
    %448 = vector.extract_strided_slice %441 {offsets = [0, 256], sizes = [2, 256], strides = [1, 1]} : vector<2x512xf32> to vector<2x256xf32>
    %449 = arith.addf %447, %448 : vector<2x256xf32>
    %450 = vector.extract_strided_slice %445 {offsets = [0, 0], sizes = [2, 192], strides = [1, 1]} : vector<2x256xf32> to vector<2x192xf32>
    %451 = arith.negf %450 : vector<2x192xf32>
    %452 = math.exp %451 : vector<2x192xf32>
    %cst_354 = arith.constant 1.000000e+00 : f32
    %453 = vector.broadcast %cst_354 : f32 to vector<2x192xf32>
    %454 = arith.addf %453, %452 : vector<2x192xf32>
    %455 = arith.divf %453, %454 : vector<2x192xf32>
    %456 = vector.extract_strided_slice %449 {offsets = [0, 0], sizes = [2, 192], strides = [1, 1]} : vector<2x256xf32> to vector<2x192xf32>
    %457 = arith.negf %456 : vector<2x192xf32>
    %458 = math.exp %457 : vector<2x192xf32>
    %cst_355 = arith.constant 1.000000e+00 : f32
    %459 = vector.broadcast %cst_355 : f32 to vector<2x192xf32>
    %460 = arith.addf %459, %458 : vector<2x192xf32>
    %461 = arith.divf %459, %460 : vector<2x192xf32>
    %462 = vector.extract_strided_slice %445 {offsets = [0, 192], sizes = [2, 64], strides = [1, 1]} : vector<2x256xf32> to vector<2x64xf32>
    %463 = math.tanh %462 : vector<2x64xf32>
    %464 = vector.extract_strided_slice %449 {offsets = [0, 192], sizes = [2, 64], strides = [1, 1]} : vector<2x256xf32> to vector<2x64xf32>
    %465 = math.tanh %464 : vector<2x64xf32>
    %466 = vector.extract_strided_slice %455 {offsets = [0, 64], sizes = [2, 64], strides = [1, 1]} : vector<2x192xf32> to vector<2x64xf32>
    %467 = arith.mulf %466, %427 : vector<2x64xf32>
    %468 = vector.extract_strided_slice %455 {offsets = [0, 0], sizes = [2, 64], strides = [1, 1]} : vector<2x192xf32> to vector<2x64xf32>
    %469 = arith.mulf %468, %463 : vector<2x64xf32>
    %470 = arith.addf %467, %469 : vector<2x64xf32>
    %471 = vector.extract_strided_slice %455 {offsets = [0, 128], sizes = [2, 64], strides = [1, 1]} : vector<2x192xf32> to vector<2x64xf32>
    %472 = math.tanh %470 : vector<2x64xf32>
    %473 = arith.mulf %471, %472 : vector<2x64xf32>
    %474 = vector.extract_strided_slice %461 {offsets = [0, 64], sizes = [2, 64], strides = [1, 1]} : vector<2x192xf32> to vector<2x64xf32>
    %475 = arith.mulf %474, %435 : vector<2x64xf32>
    %476 = vector.extract_strided_slice %461 {offsets = [0, 0], sizes = [2, 64], strides = [1, 1]} : vector<2x192xf32> to vector<2x64xf32>
    %477 = arith.mulf %476, %465 : vector<2x64xf32>
    %478 = arith.addf %475, %477 : vector<2x64xf32>
    %479 = vector.extract_strided_slice %461 {offsets = [0, 128], sizes = [2, 64], strides = [1, 1]} : vector<2x192xf32> to vector<2x64xf32>
    %480 = math.tanh %478 : vector<2x64xf32>
    %481 = arith.mulf %479, %480 : vector<2x64xf32>
    %482 = tpu.concatenate %473, %481 in 1 : vector<2x64xf32>, vector<2x64xf32> -> vector<2x128xf32>
    %c0_356 = arith.constant 0 : index
    %c0_357 = arith.constant 0 : index
    %483 = vector.load %arg14[%c0_356, %c0_357] : memref<128x512xf32, #tpu.memory_space<vmem>>, vector<128x512xf32>
    %cst_358 = arith.constant dense<0.000000e+00> : vector<2x512xf32>
    %484 = tpu.matmul %482, %483, %cst_358 {dimension_numbers = #tpu.dot_dimension_numbers<[1], [0], [0], [1], [0, 0, 1, 1], [], []>} : vector<2x128xf32>, vector<128x512xf32>, vector<2x512xf32> -> vector<2x512xf32>
    %485 = vector.extract_strided_slice %264 {offsets = [0, 5, 0], sizes = [2, 1, 256], strides = [1, 1, 1]} : vector<2x8x512xf32> to vector<2x1x256xf32>
    %486 = vector.shape_cast %485 : vector<2x1x256xf32> to vector<2x256xf32>
    %487 = vector.extract_strided_slice %484 {offsets = [0, 0], sizes = [2, 256], strides = [1, 1]} : vector<2x512xf32> to vector<2x256xf32>
    %488 = arith.addf %486, %487 : vector<2x256xf32>
    %489 = vector.extract_strided_slice %264 {offsets = [0, 2, 256], sizes = [2, 1, 256], strides = [1, 1, 1]} : vector<2x8x512xf32> to vector<2x1x256xf32>
    %490 = vector.shape_cast %489 : vector<2x1x256xf32> to vector<2x256xf32>
    %491 = vector.extract_strided_slice %484 {offsets = [0, 256], sizes = [2, 256], strides = [1, 1]} : vector<2x512xf32> to vector<2x256xf32>
    %492 = arith.addf %490, %491 : vector<2x256xf32>
    %493 = vector.extract_strided_slice %488 {offsets = [0, 0], sizes = [2, 192], strides = [1, 1]} : vector<2x256xf32> to vector<2x192xf32>
    %494 = arith.negf %493 : vector<2x192xf32>
    %495 = math.exp %494 : vector<2x192xf32>
    %cst_359 = arith.constant 1.000000e+00 : f32
    %496 = vector.broadcast %cst_359 : f32 to vector<2x192xf32>
    %497 = arith.addf %496, %495 : vector<2x192xf32>
    %498 = arith.divf %496, %497 : vector<2x192xf32>
    %499 = vector.extract_strided_slice %492 {offsets = [0, 0], sizes = [2, 192], strides = [1, 1]} : vector<2x256xf32> to vector<2x192xf32>
    %500 = arith.negf %499 : vector<2x192xf32>
    %501 = math.exp %500 : vector<2x192xf32>
    %cst_360 = arith.constant 1.000000e+00 : f32
    %502 = vector.broadcast %cst_360 : f32 to vector<2x192xf32>
    %503 = arith.addf %502, %501 : vector<2x192xf32>
    %504 = arith.divf %502, %503 : vector<2x192xf32>
    %505 = vector.extract_strided_slice %488 {offsets = [0, 192], sizes = [2, 64], strides = [1, 1]} : vector<2x256xf32> to vector<2x64xf32>
    %506 = math.tanh %505 : vector<2x64xf32>
    %507 = vector.extract_strided_slice %492 {offsets = [0, 192], sizes = [2, 64], strides = [1, 1]} : vector<2x256xf32> to vector<2x64xf32>
    %508 = math.tanh %507 : vector<2x64xf32>
    %509 = vector.extract_strided_slice %498 {offsets = [0, 64], sizes = [2, 64], strides = [1, 1]} : vector<2x192xf32> to vector<2x64xf32>
    %510 = arith.mulf %509, %470 : vector<2x64xf32>
    %511 = vector.extract_strided_slice %498 {offsets = [0, 0], sizes = [2, 64], strides = [1, 1]} : vector<2x192xf32> to vector<2x64xf32>
    %512 = arith.mulf %511, %506 : vector<2x64xf32>
    %513 = arith.addf %510, %512 : vector<2x64xf32>
    %514 = vector.extract_strided_slice %498 {offsets = [0, 128], sizes = [2, 64], strides = [1, 1]} : vector<2x192xf32> to vector<2x64xf32>
    %515 = math.tanh %513 : vector<2x64xf32>
    %516 = arith.mulf %514, %515 : vector<2x64xf32>
    %517 = vector.extract_strided_slice %504 {offsets = [0, 64], sizes = [2, 64], strides = [1, 1]} : vector<2x192xf32> to vector<2x64xf32>
    %518 = arith.mulf %517, %478 : vector<2x64xf32>
    %519 = vector.extract_strided_slice %504 {offsets = [0, 0], sizes = [2, 64], strides = [1, 1]} : vector<2x192xf32> to vector<2x64xf32>
    %520 = arith.mulf %519, %508 : vector<2x64xf32>
    %521 = arith.addf %518, %520 : vector<2x64xf32>
    %522 = vector.extract_strided_slice %504 {offsets = [0, 128], sizes = [2, 64], strides = [1, 1]} : vector<2x192xf32> to vector<2x64xf32>
    %523 = math.tanh %521 : vector<2x64xf32>
    %524 = arith.mulf %522, %523 : vector<2x64xf32>
    %525 = tpu.concatenate %516, %524 in 1 : vector<2x64xf32>, vector<2x64xf32> -> vector<2x128xf32>
    %c0_361 = arith.constant 0 : index
    %c0_362 = arith.constant 0 : index
    %526 = vector.load %arg14[%c0_361, %c0_362] : memref<128x512xf32, #tpu.memory_space<vmem>>, vector<128x512xf32>
    %cst_363 = arith.constant dense<0.000000e+00> : vector<2x512xf32>
    %527 = tpu.matmul %525, %526, %cst_363 {dimension_numbers = #tpu.dot_dimension_numbers<[1], [0], [0], [1], [0, 0, 1, 1], [], []>} : vector<2x128xf32>, vector<128x512xf32>, vector<2x512xf32> -> vector<2x512xf32>
    %528 = vector.extract_strided_slice %264 {offsets = [0, 6, 0], sizes = [2, 1, 256], strides = [1, 1, 1]} : vector<2x8x512xf32> to vector<2x1x256xf32>
    %529 = vector.shape_cast %528 : vector<2x1x256xf32> to vector<2x256xf32>
    %530 = vector.extract_strided_slice %527 {offsets = [0, 0], sizes = [2, 256], strides = [1, 1]} : vector<2x512xf32> to vector<2x256xf32>
    %531 = arith.addf %529, %530 : vector<2x256xf32>
    %532 = vector.extract_strided_slice %264 {offsets = [0, 1, 256], sizes = [2, 1, 256], strides = [1, 1, 1]} : vector<2x8x512xf32> to vector<2x1x256xf32>
    %533 = vector.shape_cast %532 : vector<2x1x256xf32> to vector<2x256xf32>
    %534 = vector.extract_strided_slice %527 {offsets = [0, 256], sizes = [2, 256], strides = [1, 1]} : vector<2x512xf32> to vector<2x256xf32>
    %535 = arith.addf %533, %534 : vector<2x256xf32>
    %536 = vector.extract_strided_slice %531 {offsets = [0, 0], sizes = [2, 192], strides = [1, 1]} : vector<2x256xf32> to vector<2x192xf32>
    %537 = arith.negf %536 : vector<2x192xf32>
    %538 = math.exp %537 : vector<2x192xf32>
    %cst_364 = arith.constant 1.000000e+00 : f32
    %539 = vector.broadcast %cst_364 : f32 to vector<2x192xf32>
    %540 = arith.addf %539, %538 : vector<2x192xf32>
    %541 = arith.divf %539, %540 : vector<2x192xf32>
    %542 = vector.extract_strided_slice %535 {offsets = [0, 0], sizes = [2, 192], strides = [1, 1]} : vector<2x256xf32> to vector<2x192xf32>
    %543 = arith.negf %542 : vector<2x192xf32>
    %544 = math.exp %543 : vector<2x192xf32>
    %cst_365 = arith.constant 1.000000e+00 : f32
    %545 = vector.broadcast %cst_365 : f32 to vector<2x192xf32>
    %546 = arith.addf %545, %544 : vector<2x192xf32>
    %547 = arith.divf %545, %546 : vector<2x192xf32>
    %548 = vector.extract_strided_slice %531 {offsets = [0, 192], sizes = [2, 64], strides = [1, 1]} : vector<2x256xf32> to vector<2x64xf32>
    %549 = math.tanh %548 : vector<2x64xf32>
    %550 = vector.extract_strided_slice %535 {offsets = [0, 192], sizes = [2, 64], strides = [1, 1]} : vector<2x256xf32> to vector<2x64xf32>
    %551 = math.tanh %550 : vector<2x64xf32>
    %552 = vector.extract_strided_slice %541 {offsets = [0, 64], sizes = [2, 64], strides = [1, 1]} : vector<2x192xf32> to vector<2x64xf32>
    %553 = arith.mulf %552, %513 : vector<2x64xf32>
    %554 = vector.extract_strided_slice %541 {offsets = [0, 0], sizes = [2, 64], strides = [1, 1]} : vector<2x192xf32> to vector<2x64xf32>
    %555 = arith.mulf %554, %549 : vector<2x64xf32>
    %556 = arith.addf %553, %555 : vector<2x64xf32>
    %557 = vector.extract_strided_slice %541 {offsets = [0, 128], sizes = [2, 64], strides = [1, 1]} : vector<2x192xf32> to vector<2x64xf32>
    %558 = math.tanh %556 : vector<2x64xf32>
    %559 = arith.mulf %557, %558 : vector<2x64xf32>
    %560 = vector.extract_strided_slice %547 {offsets = [0, 64], sizes = [2, 64], strides = [1, 1]} : vector<2x192xf32> to vector<2x64xf32>
    %561 = arith.mulf %560, %521 : vector<2x64xf32>
    %562 = vector.extract_strided_slice %547 {offsets = [0, 0], sizes = [2, 64], strides = [1, 1]} : vector<2x192xf32> to vector<2x64xf32>
    %563 = arith.mulf %562, %551 : vector<2x64xf32>
    %564 = arith.addf %561, %563 : vector<2x64xf32>
    %565 = vector.extract_strided_slice %547 {offsets = [0, 128], sizes = [2, 64], strides = [1, 1]} : vector<2x192xf32> to vector<2x64xf32>
    %566 = math.tanh %564 : vector<2x64xf32>
    %567 = arith.mulf %565, %566 : vector<2x64xf32>
    %568 = tpu.concatenate %559, %567 in 1 : vector<2x64xf32>, vector<2x64xf32> -> vector<2x128xf32>
    %c0_366 = arith.constant 0 : index
    %c0_367 = arith.constant 0 : index
    %569 = vector.load %arg14[%c0_366, %c0_367] : memref<128x512xf32, #tpu.memory_space<vmem>>, vector<128x512xf32>
    %cst_368 = arith.constant dense<0.000000e+00> : vector<2x512xf32>
    %570 = tpu.matmul %568, %569, %cst_368 {dimension_numbers = #tpu.dot_dimension_numbers<[1], [0], [0], [1], [0, 0, 1, 1], [], []>} : vector<2x128xf32>, vector<128x512xf32>, vector<2x512xf32> -> vector<2x512xf32>
    %571 = vector.extract_strided_slice %264 {offsets = [0, 7, 0], sizes = [2, 1, 256], strides = [1, 1, 1]} : vector<2x8x512xf32> to vector<2x1x256xf32>
    %572 = vector.shape_cast %571 : vector<2x1x256xf32> to vector<2x256xf32>
    %573 = vector.extract_strided_slice %570 {offsets = [0, 0], sizes = [2, 256], strides = [1, 1]} : vector<2x512xf32> to vector<2x256xf32>
    %574 = arith.addf %572, %573 : vector<2x256xf32>
    %575 = vector.extract_strided_slice %264 {offsets = [0, 0, 256], sizes = [2, 1, 256], strides = [1, 1, 1]} : vector<2x8x512xf32> to vector<2x1x256xf32>
    %576 = vector.shape_cast %575 : vector<2x1x256xf32> to vector<2x256xf32>
    %577 = vector.extract_strided_slice %570 {offsets = [0, 256], sizes = [2, 256], strides = [1, 1]} : vector<2x512xf32> to vector<2x256xf32>
    %578 = arith.addf %576, %577 : vector<2x256xf32>
    %579 = vector.extract_strided_slice %574 {offsets = [0, 0], sizes = [2, 192], strides = [1, 1]} : vector<2x256xf32> to vector<2x192xf32>
    %580 = arith.negf %579 : vector<2x192xf32>
    %581 = math.exp %580 : vector<2x192xf32>
    %cst_369 = arith.constant 1.000000e+00 : f32
    %582 = vector.broadcast %cst_369 : f32 to vector<2x192xf32>
    %583 = arith.addf %582, %581 : vector<2x192xf32>
    %584 = arith.divf %582, %583 : vector<2x192xf32>
    %585 = vector.extract_strided_slice %578 {offsets = [0, 0], sizes = [2, 192], strides = [1, 1]} : vector<2x256xf32> to vector<2x192xf32>
    %586 = arith.negf %585 : vector<2x192xf32>
    %587 = math.exp %586 : vector<2x192xf32>
    %cst_370 = arith.constant 1.000000e+00 : f32
    %588 = vector.broadcast %cst_370 : f32 to vector<2x192xf32>
    %589 = arith.addf %588, %587 : vector<2x192xf32>
    %590 = arith.divf %588, %589 : vector<2x192xf32>
    %591 = vector.extract_strided_slice %574 {offsets = [0, 192], sizes = [2, 64], strides = [1, 1]} : vector<2x256xf32> to vector<2x64xf32>
    %592 = math.tanh %591 : vector<2x64xf32>
    %593 = vector.extract_strided_slice %578 {offsets = [0, 192], sizes = [2, 64], strides = [1, 1]} : vector<2x256xf32> to vector<2x64xf32>
    %594 = math.tanh %593 : vector<2x64xf32>
    %595 = vector.extract_strided_slice %584 {offsets = [0, 64], sizes = [2, 64], strides = [1, 1]} : vector<2x192xf32> to vector<2x64xf32>
    %596 = arith.mulf %595, %556 : vector<2x64xf32>
    %597 = vector.extract_strided_slice %584 {offsets = [0, 0], sizes = [2, 64], strides = [1, 1]} : vector<2x192xf32> to vector<2x64xf32>
    %598 = arith.mulf %597, %592 : vector<2x64xf32>
    %599 = arith.addf %596, %598 : vector<2x64xf32>
    %600 = vector.extract_strided_slice %584 {offsets = [0, 128], sizes = [2, 64], strides = [1, 1]} : vector<2x192xf32> to vector<2x64xf32>
    %601 = math.tanh %599 : vector<2x64xf32>
    %602 = arith.mulf %600, %601 : vector<2x64xf32>
    %603 = vector.extract_strided_slice %590 {offsets = [0, 64], sizes = [2, 64], strides = [1, 1]} : vector<2x192xf32> to vector<2x64xf32>
    %604 = arith.mulf %603, %564 : vector<2x64xf32>
    %605 = vector.extract_strided_slice %590 {offsets = [0, 0], sizes = [2, 64], strides = [1, 1]} : vector<2x192xf32> to vector<2x64xf32>
    %606 = arith.mulf %605, %594 : vector<2x64xf32>
    %607 = arith.addf %604, %606 : vector<2x64xf32>
    %608 = vector.extract_strided_slice %590 {offsets = [0, 128], sizes = [2, 64], strides = [1, 1]} : vector<2x192xf32> to vector<2x64xf32>
    %609 = math.tanh %607 : vector<2x64xf32>
    %610 = arith.mulf %608, %609 : vector<2x64xf32>
    %611 = tpu.concatenate %301, %610 in 1 : vector<2x64xf32>, vector<2x64xf32> -> vector<2x128xf32>
    %c0_371 = arith.constant 0 : index
    %c0_372 = arith.constant 0 : index
    %c0_373 = arith.constant 0 : index
    %612 = vector.load %arg22[%c0_371, %c0_372, %c0_373] : memref<2x8x128xf32, #tpu.memory_space<vmem>>, vector<2x1x128xf32>
    %613 = vector.shape_cast %612 : vector<2x1x128xf32> to vector<2x128xf32>
    %614 = vector.shape_cast %611 : vector<2x128xf32> to vector<2x1x128xf32>
    tpu.vector_store %arg22[%c0_371, %c0_372, %c0_373], %614 {strides = array<i32>} : memref<2x8x128xf32, #tpu.memory_space<vmem>>, vector<2x1x128xf32>,
    %615 = tpu.concatenate %344, %567 in 1 : vector<2x64xf32>, vector<2x64xf32> -> vector<2x128xf32>
    %c0_374 = arith.constant 0 : index
    %c1_375 = arith.constant 1 : index
    %c0_376 = arith.constant 0 : index
    %616 = vector.load %arg22[%c0_374, %c1_375, %c0_376] : memref<2x8x128xf32, #tpu.memory_space<vmem>>, vector<2x1x128xf32>
    %617 = vector.shape_cast %616 : vector<2x1x128xf32> to vector<2x128xf32>
    %618 = vector.shape_cast %615 : vector<2x128xf32> to vector<2x1x128xf32>
    tpu.vector_store %arg22[%c0_374, %c1_375, %c0_376], %618 {strides = array<i32>} : memref<2x8x128xf32, #tpu.memory_space<vmem>>, vector<2x1x128xf32>,
    %619 = tpu.concatenate %387, %524 in 1 : vector<2x64xf32>, vector<2x64xf32> -> vector<2x128xf32>
    %c0_377 = arith.constant 0 : index
    %c2_378 = arith.constant 2 : index
    %c0_379 = arith.constant 0 : index
    %620 = vector.load %arg22[%c0_377, %c2_378, %c0_379] : memref<2x8x128xf32, #tpu.memory_space<vmem>>, vector<2x1x128xf32>
    %621 = vector.shape_cast %620 : vector<2x1x128xf32> to vector<2x128xf32>
    %622 = vector.shape_cast %619 : vector<2x128xf32> to vector<2x1x128xf32>
    tpu.vector_store %arg22[%c0_377, %c2_378, %c0_379], %622 {strides = array<i32>} : memref<2x8x128xf32, #tpu.memory_space<vmem>>, vector<2x1x128xf32>,
    %623 = tpu.concatenate %430, %481 in 1 : vector<2x64xf32>, vector<2x64xf32> -> vector<2x128xf32>
    %c0_380 = arith.constant 0 : index
    %c3_381 = arith.constant 3 : index
    %c0_382 = arith.constant 0 : index
    %624 = vector.load %arg22[%c0_380, %c3_381, %c0_382] : memref<2x8x128xf32, #tpu.memory_space<vmem>>, vector<2x1x128xf32>
    %625 = vector.shape_cast %624 : vector<2x1x128xf32> to vector<2x128xf32>
    %626 = vector.shape_cast %623 : vector<2x128xf32> to vector<2x1x128xf32>
    tpu.vector_store %arg22[%c0_380, %c3_381, %c0_382], %626 {strides = array<i32>} : memref<2x8x128xf32, #tpu.memory_space<vmem>>, vector<2x1x128xf32>,
    %627 = tpu.concatenate %473, %438 in 1 : vector<2x64xf32>, vector<2x64xf32> -> vector<2x128xf32>
    %c0_383 = arith.constant 0 : index
    %c4_384 = arith.constant 4 : index
    %c0_385 = arith.constant 0 : index
    %628 = vector.load %arg22[%c0_383, %c4_384, %c0_385] : memref<2x8x128xf32, #tpu.memory_space<vmem>>, vector<2x1x128xf32>
    %629 = vector.shape_cast %628 : vector<2x1x128xf32> to vector<2x128xf32>
    %630 = vector.shape_cast %627 : vector<2x128xf32> to vector<2x1x128xf32>
    tpu.vector_store %arg22[%c0_383, %c4_384, %c0_385], %630 {strides = array<i32>} : memref<2x8x128xf32, #tpu.memory_space<vmem>>, vector<2x1x128xf32>,
    %631 = tpu.concatenate %516, %395 in 1 : vector<2x64xf32>, vector<2x64xf32> -> vector<2x128xf32>
    %c0_386 = arith.constant 0 : index
    %c5_387 = arith.constant 5 : index
    %c0_388 = arith.constant 0 : index
    %632 = vector.load %arg22[%c0_386, %c5_387, %c0_388] : memref<2x8x128xf32, #tpu.memory_space<vmem>>, vector<2x1x128xf32>
    %633 = vector.shape_cast %632 : vector<2x1x128xf32> to vector<2x128xf32>
    %634 = vector.shape_cast %631 : vector<2x128xf32> to vector<2x1x128xf32>
    tpu.vector_store %arg22[%c0_386, %c5_387, %c0_388], %634 {strides = array<i32>} : memref<2x8x128xf32, #tpu.memory_space<vmem>>, vector<2x1x128xf32>,
    %635 = tpu.concatenate %559, %352 in 1 : vector<2x64xf32>, vector<2x64xf32> -> vector<2x128xf32>
    %c0_389 = arith.constant 0 : index
    %c6_390 = arith.constant 6 : index
    %c0_391 = arith.constant 0 : index
    %636 = vector.load %arg22[%c0_389, %c6_390, %c0_391] : memref<2x8x128xf32, #tpu.memory_space<vmem>>, vector<2x1x128xf32>
    %637 = vector.shape_cast %636 : vector<2x1x128xf32> to vector<2x128xf32>
    %638 = vector.shape_cast %635 : vector<2x128xf32> to vector<2x1x128xf32>
    tpu.vector_store %arg22[%c0_389, %c6_390, %c0_391], %638 {strides = array<i32>} : memref<2x8x128xf32, #tpu.memory_space<vmem>>, vector<2x1x128xf32>,
    %639 = tpu.concatenate %602, %309 in 1 : vector<2x64xf32>, vector<2x64xf32> -> vector<2x128xf32>
    %c0_392 = arith.constant 0 : index
    %c7_393 = arith.constant 7 : index
    %c0_394 = arith.constant 0 : index
    %640 = vector.load %arg22[%c0_392, %c7_393, %c0_394] : memref<2x8x128xf32, #tpu.memory_space<vmem>>, vector<2x1x128xf32>
    %641 = vector.shape_cast %640 : vector<2x1x128xf32> to vector<2x128xf32>
    %642 = vector.shape_cast %639 : vector<2x128xf32> to vector<2x1x128xf32>
    tpu.vector_store %arg22[%c0_392, %c7_393, %c0_394], %642 {strides = array<i32>} : memref<2x8x128xf32, #tpu.memory_space<vmem>>, vector<2x1x128xf32>,
    %c0_395 = arith.constant 0 : index
    %c0_396 = arith.constant 0 : index
    %c0_397 = arith.constant 0 : index
    %643 = vector.load %arg22[%c0_395, %c0_396, %c0_397] : memref<2x8x128xf32, #tpu.memory_space<vmem>>, vector<2x8x128xf32>
    %644 = vector.shape_cast %643 : vector<2x8x128xf32> to vector<16x128xf32>
    %c0_398 = arith.constant 0 : index
    %c0_399 = arith.constant 0 : index
    %645 = vector.load %arg15[%c0_398, %c0_399] : memref<128x512xf32, #tpu.memory_space<vmem>>, vector<128x512xf32>
    %cst_400 = arith.constant dense<0.000000e+00> : vector<16x512xf32>
    %646 = tpu.matmul %644, %645, %cst_400 {dimension_numbers = #tpu.dot_dimension_numbers<[1], [0], [0], [1], [0, 0, 1, 1], [], []>} : vector<16x128xf32>, vector<128x512xf32>, vector<16x512xf32> -> vector<16x512xf32>
    %c0_401 = arith.constant 0 : index
    %c0_402 = arith.constant 0 : index
    %647 = vector.load %arg16[%c0_401, %c0_402] : memref<1x512xf32, #tpu.memory_space<vmem>>, vector<1x512xf32>
    %648 = vector.broadcast %647 : vector<1x512xf32> to vector<16x512xf32>
    %649 = arith.addf %646, %648 : vector<16x512xf32>
    %650 = vector.shape_cast %649 : vector<16x512xf32> to vector<2x8x512xf32>
    %cst_403 = arith.constant 0.000000e+00 : f32
    %651 = vector.broadcast %cst_403 : f32 to vector<2x128xf32>
    %cst_404 = arith.constant 0.000000e+00 : f32
    %652 = vector.broadcast %cst_404 : f32 to vector<2x64xf32>
    %cst_405 = arith.constant 0.000000e+00 : f32
    %653 = vector.broadcast %cst_405 : f32 to vector<2x64xf32>
    %c0_406 = arith.constant 0 : index
    %c0_407 = arith.constant 0 : index
    %654 = vector.load %arg17[%c0_406, %c0_407] : memref<128x512xf32, #tpu.memory_space<vmem>>, vector<128x512xf32>
    %cst_408 = arith.constant dense<0.000000e+00> : vector<2x512xf32>
    %655 = tpu.matmul %651, %654, %cst_408 {dimension_numbers = #tpu.dot_dimension_numbers<[1], [0], [0], [1], [0, 0, 1, 1], [], []>} : vector<2x128xf32>, vector<128x512xf32>, vector<2x512xf32> -> vector<2x512xf32>
    %656 = vector.extract_strided_slice %650 {offsets = [0, 0, 0], sizes = [2, 1, 256], strides = [1, 1, 1]} : vector<2x8x512xf32> to vector<2x1x256xf32>
    %657 = vector.shape_cast %656 : vector<2x1x256xf32> to vector<2x256xf32>
    %658 = vector.extract_strided_slice %655 {offsets = [0, 0], sizes = [2, 256], strides = [1, 1]} : vector<2x512xf32> to vector<2x256xf32>
    %659 = arith.addf %657, %658 : vector<2x256xf32>
    %660 = vector.extract_strided_slice %650 {offsets = [0, 7, 256], sizes = [2, 1, 256], strides = [1, 1, 1]} : vector<2x8x512xf32> to vector<2x1x256xf32>
    %661 = vector.shape_cast %660 : vector<2x1x256xf32> to vector<2x256xf32>
    %662 = vector.extract_strided_slice %655 {offsets = [0, 256], sizes = [2, 256], strides = [1, 1]} : vector<2x512xf32> to vector<2x256xf32>
    %663 = arith.addf %661, %662 : vector<2x256xf32>
    %664 = vector.extract_strided_slice %659 {offsets = [0, 0], sizes = [2, 192], strides = [1, 1]} : vector<2x256xf32> to vector<2x192xf32>
    %665 = arith.negf %664 : vector<2x192xf32>
    %666 = math.exp %665 : vector<2x192xf32>
    %cst_409 = arith.constant 1.000000e+00 : f32
    %667 = vector.broadcast %cst_409 : f32 to vector<2x192xf32>
    %668 = arith.addf %667, %666 : vector<2x192xf32>
    %669 = arith.divf %667, %668 : vector<2x192xf32>
    %670 = vector.extract_strided_slice %663 {offsets = [0, 0], sizes = [2, 192], strides = [1, 1]} : vector<2x256xf32> to vector<2x192xf32>
    %671 = arith.negf %670 : vector<2x192xf32>
    %672 = math.exp %671 : vector<2x192xf32>
    %cst_410 = arith.constant 1.000000e+00 : f32
    %673 = vector.broadcast %cst_410 : f32 to vector<2x192xf32>
    %674 = arith.addf %673, %672 : vector<2x192xf32>
    %675 = arith.divf %673, %674 : vector<2x192xf32>
    %676 = vector.extract_strided_slice %659 {offsets = [0, 192], sizes = [2, 64], strides = [1, 1]} : vector<2x256xf32> to vector<2x64xf32>
    %677 = math.tanh %676 : vector<2x64xf32>
    %678 = vector.extract_strided_slice %663 {offsets = [0, 192], sizes = [2, 64], strides = [1, 1]} : vector<2x256xf32> to vector<2x64xf32>
    %679 = math.tanh %678 : vector<2x64xf32>
    %680 = vector.extract_strided_slice %669 {offsets = [0, 64], sizes = [2, 64], strides = [1, 1]} : vector<2x192xf32> to vector<2x64xf32>
    %681 = arith.mulf %680, %652 : vector<2x64xf32>
    %682 = vector.extract_strided_slice %669 {offsets = [0, 0], sizes = [2, 64], strides = [1, 1]} : vector<2x192xf32> to vector<2x64xf32>
    %683 = arith.mulf %682, %677 : vector<2x64xf32>
    %684 = arith.addf %681, %683 : vector<2x64xf32>
    %685 = vector.extract_strided_slice %669 {offsets = [0, 128], sizes = [2, 64], strides = [1, 1]} : vector<2x192xf32> to vector<2x64xf32>
    %686 = math.tanh %684 : vector<2x64xf32>
    %687 = arith.mulf %685, %686 : vector<2x64xf32>
    %688 = vector.extract_strided_slice %675 {offsets = [0, 64], sizes = [2, 64], strides = [1, 1]} : vector<2x192xf32> to vector<2x64xf32>
    %689 = arith.mulf %688, %653 : vector<2x64xf32>
    %690 = vector.extract_strided_slice %675 {offsets = [0, 0], sizes = [2, 64], strides = [1, 1]} : vector<2x192xf32> to vector<2x64xf32>
    %691 = arith.mulf %690, %679 : vector<2x64xf32>
    %692 = arith.addf %689, %691 : vector<2x64xf32>
    %693 = vector.extract_strided_slice %675 {offsets = [0, 128], sizes = [2, 64], strides = [1, 1]} : vector<2x192xf32> to vector<2x64xf32>
    %694 = math.tanh %692 : vector<2x64xf32>
    %695 = arith.mulf %693, %694 : vector<2x64xf32>
    %696 = tpu.concatenate %687, %695 in 1 : vector<2x64xf32>, vector<2x64xf32> -> vector<2x128xf32>
    %c0_411 = arith.constant 0 : index
    %c0_412 = arith.constant 0 : index
    %697 = vector.load %arg17[%c0_411, %c0_412] : memref<128x512xf32, #tpu.memory_space<vmem>>, vector<128x512xf32>
    %cst_413 = arith.constant dense<0.000000e+00> : vector<2x512xf32>
    %698 = tpu.matmul %696, %697, %cst_413 {dimension_numbers = #tpu.dot_dimension_numbers<[1], [0], [0], [1], [0, 0, 1, 1], [], []>} : vector<2x128xf32>, vector<128x512xf32>, vector<2x512xf32> -> vector<2x512xf32>
    %699 = vector.extract_strided_slice %650 {offsets = [0, 1, 0], sizes = [2, 1, 256], strides = [1, 1, 1]} : vector<2x8x512xf32> to vector<2x1x256xf32>
    %700 = vector.shape_cast %699 : vector<2x1x256xf32> to vector<2x256xf32>
    %701 = vector.extract_strided_slice %698 {offsets = [0, 0], sizes = [2, 256], strides = [1, 1]} : vector<2x512xf32> to vector<2x256xf32>
    %702 = arith.addf %700, %701 : vector<2x256xf32>
    %703 = vector.extract_strided_slice %650 {offsets = [0, 6, 256], sizes = [2, 1, 256], strides = [1, 1, 1]} : vector<2x8x512xf32> to vector<2x1x256xf32>
    %704 = vector.shape_cast %703 : vector<2x1x256xf32> to vector<2x256xf32>
    %705 = vector.extract_strided_slice %698 {offsets = [0, 256], sizes = [2, 256], strides = [1, 1]} : vector<2x512xf32> to vector<2x256xf32>
    %706 = arith.addf %704, %705 : vector<2x256xf32>
    %707 = vector.extract_strided_slice %702 {offsets = [0, 0], sizes = [2, 192], strides = [1, 1]} : vector<2x256xf32> to vector<2x192xf32>
    %708 = arith.negf %707 : vector<2x192xf32>
    %709 = math.exp %708 : vector<2x192xf32>
    %cst_414 = arith.constant 1.000000e+00 : f32
    %710 = vector.broadcast %cst_414 : f32 to vector<2x192xf32>
    %711 = arith.addf %710, %709 : vector<2x192xf32>
    %712 = arith.divf %710, %711 : vector<2x192xf32>
    %713 = vector.extract_strided_slice %706 {offsets = [0, 0], sizes = [2, 192], strides = [1, 1]} : vector<2x256xf32> to vector<2x192xf32>
    %714 = arith.negf %713 : vector<2x192xf32>
    %715 = math.exp %714 : vector<2x192xf32>
    %cst_415 = arith.constant 1.000000e+00 : f32
    %716 = vector.broadcast %cst_415 : f32 to vector<2x192xf32>
    %717 = arith.addf %716, %715 : vector<2x192xf32>
    %718 = arith.divf %716, %717 : vector<2x192xf32>
    %719 = vector.extract_strided_slice %702 {offsets = [0, 192], sizes = [2, 64], strides = [1, 1]} : vector<2x256xf32> to vector<2x64xf32>
    %720 = math.tanh %719 : vector<2x64xf32>
    %721 = vector.extract_strided_slice %706 {offsets = [0, 192], sizes = [2, 64], strides = [1, 1]} : vector<2x256xf32> to vector<2x64xf32>
    %722 = math.tanh %721 : vector<2x64xf32>
    %723 = vector.extract_strided_slice %712 {offsets = [0, 64], sizes = [2, 64], strides = [1, 1]} : vector<2x192xf32> to vector<2x64xf32>
    %724 = arith.mulf %723, %684 : vector<2x64xf32>
    %725 = vector.extract_strided_slice %712 {offsets = [0, 0], sizes = [2, 64], strides = [1, 1]} : vector<2x192xf32> to vector<2x64xf32>
    %726 = arith.mulf %725, %720 : vector<2x64xf32>
    %727 = arith.addf %724, %726 : vector<2x64xf32>
    %728 = vector.extract_strided_slice %712 {offsets = [0, 128], sizes = [2, 64], strides = [1, 1]} : vector<2x192xf32> to vector<2x64xf32>
    %729 = math.tanh %727 : vector<2x64xf32>
    %730 = arith.mulf %728, %729 : vector<2x64xf32>
    %731 = vector.extract_strided_slice %718 {offsets = [0, 64], sizes = [2, 64], strides = [1, 1]} : vector<2x192xf32> to vector<2x64xf32>
    %732 = arith.mulf %731, %692 : vector<2x64xf32>
    %733 = vector.extract_strided_slice %718 {offsets = [0, 0], sizes = [2, 64], strides = [1, 1]} : vector<2x192xf32> to vector<2x64xf32>
    %734 = arith.mulf %733, %722 : vector<2x64xf32>
    %735 = arith.addf %732, %734 : vector<2x64xf32>
    %736 = vector.extract_strided_slice %718 {offsets = [0, 128], sizes = [2, 64], strides = [1, 1]} : vector<2x192xf32> to vector<2x64xf32>
    %737 = math.tanh %735 : vector<2x64xf32>
    %738 = arith.mulf %736, %737 : vector<2x64xf32>
    %739 = tpu.concatenate %730, %738 in 1 : vector<2x64xf32>, vector<2x64xf32> -> vector<2x128xf32>
    %c0_416 = arith.constant 0 : index
    %c0_417 = arith.constant 0 : index
    %740 = vector.load %arg17[%c0_416, %c0_417] : memref<128x512xf32, #tpu.memory_space<vmem>>, vector<128x512xf32>
    %cst_418 = arith.constant dense<0.000000e+00> : vector<2x512xf32>
    %741 = tpu.matmul %739, %740, %cst_418 {dimension_numbers = #tpu.dot_dimension_numbers<[1], [0], [0], [1], [0, 0, 1, 1], [], []>} : vector<2x128xf32>, vector<128x512xf32>, vector<2x512xf32> -> vector<2x512xf32>
    %742 = vector.extract_strided_slice %650 {offsets = [0, 2, 0], sizes = [2, 1, 256], strides = [1, 1, 1]} : vector<2x8x512xf32> to vector<2x1x256xf32>
    %743 = vector.shape_cast %742 : vector<2x1x256xf32> to vector<2x256xf32>
    %744 = vector.extract_strided_slice %741 {offsets = [0, 0], sizes = [2, 256], strides = [1, 1]} : vector<2x512xf32> to vector<2x256xf32>
    %745 = arith.addf %743, %744 : vector<2x256xf32>
    %746 = vector.extract_strided_slice %650 {offsets = [0, 5, 256], sizes = [2, 1, 256], strides = [1, 1, 1]} : vector<2x8x512xf32> to vector<2x1x256xf32>
    %747 = vector.shape_cast %746 : vector<2x1x256xf32> to vector<2x256xf32>
    %748 = vector.extract_strided_slice %741 {offsets = [0, 256], sizes = [2, 256], strides = [1, 1]} : vector<2x512xf32> to vector<2x256xf32>
    %749 = arith.addf %747, %748 : vector<2x256xf32>
    %750 = vector.extract_strided_slice %745 {offsets = [0, 0], sizes = [2, 192], strides = [1, 1]} : vector<2x256xf32> to vector<2x192xf32>
    %751 = arith.negf %750 : vector<2x192xf32>
    %752 = math.exp %751 : vector<2x192xf32>
    %cst_419 = arith.constant 1.000000e+00 : f32
    %753 = vector.broadcast %cst_419 : f32 to vector<2x192xf32>
    %754 = arith.addf %753, %752 : vector<2x192xf32>
    %755 = arith.divf %753, %754 : vector<2x192xf32>
    %756 = vector.extract_strided_slice %749 {offsets = [0, 0], sizes = [2, 192], strides = [1, 1]} : vector<2x256xf32> to vector<2x192xf32>
    %757 = arith.negf %756 : vector<2x192xf32>
    %758 = math.exp %757 : vector<2x192xf32>
    %cst_420 = arith.constant 1.000000e+00 : f32
    %759 = vector.broadcast %cst_420 : f32 to vector<2x192xf32>
    %760 = arith.addf %759, %758 : vector<2x192xf32>
    %761 = arith.divf %759, %760 : vector<2x192xf32>
    %762 = vector.extract_strided_slice %745 {offsets = [0, 192], sizes = [2, 64], strides = [1, 1]} : vector<2x256xf32> to vector<2x64xf32>
    %763 = math.tanh %762 : vector<2x64xf32>
    %764 = vector.extract_strided_slice %749 {offsets = [0, 192], sizes = [2, 64], strides = [1, 1]} : vector<2x256xf32> to vector<2x64xf32>
    %765 = math.tanh %764 : vector<2x64xf32>
    %766 = vector.extract_strided_slice %755 {offsets = [0, 64], sizes = [2, 64], strides = [1, 1]} : vector<2x192xf32> to vector<2x64xf32>
    %767 = arith.mulf %766, %727 : vector<2x64xf32>
    %768 = vector.extract_strided_slice %755 {offsets = [0, 0], sizes = [2, 64], strides = [1, 1]} : vector<2x192xf32> to vector<2x64xf32>
    %769 = arith.mulf %768, %763 : vector<2x64xf32>
    %770 = arith.addf %767, %769 : vector<2x64xf32>
    %771 = vector.extract_strided_slice %755 {offsets = [0, 128], sizes = [2, 64], strides = [1, 1]} : vector<2x192xf32> to vector<2x64xf32>
    %772 = math.tanh %770 : vector<2x64xf32>
    %773 = arith.mulf %771, %772 : vector<2x64xf32>
    %774 = vector.extract_strided_slice %761 {offsets = [0, 64], sizes = [2, 64], strides = [1, 1]} : vector<2x192xf32> to vector<2x64xf32>
    %775 = arith.mulf %774, %735 : vector<2x64xf32>
    %776 = vector.extract_strided_slice %761 {offsets = [0, 0], sizes = [2, 64], strides = [1, 1]} : vector<2x192xf32> to vector<2x64xf32>
    %777 = arith.mulf %776, %765 : vector<2x64xf32>
    %778 = arith.addf %775, %777 : vector<2x64xf32>
    %779 = vector.extract_strided_slice %761 {offsets = [0, 128], sizes = [2, 64], strides = [1, 1]} : vector<2x192xf32> to vector<2x64xf32>
    %780 = math.tanh %778 : vector<2x64xf32>
    %781 = arith.mulf %779, %780 : vector<2x64xf32>
    %782 = tpu.concatenate %773, %781 in 1 : vector<2x64xf32>, vector<2x64xf32> -> vector<2x128xf32>
    %c0_421 = arith.constant 0 : index
    %c0_422 = arith.constant 0 : index
    %783 = vector.load %arg17[%c0_421, %c0_422] : memref<128x512xf32, #tpu.memory_space<vmem>>, vector<128x512xf32>
    %cst_423 = arith.constant dense<0.000000e+00> : vector<2x512xf32>
    %784 = tpu.matmul %782, %783, %cst_423 {dimension_numbers = #tpu.dot_dimension_numbers<[1], [0], [0], [1], [0, 0, 1, 1], [], []>} : vector<2x128xf32>, vector<128x512xf32>, vector<2x512xf32> -> vector<2x512xf32>
    %785 = vector.extract_strided_slice %650 {offsets = [0, 3, 0], sizes = [2, 1, 256], strides = [1, 1, 1]} : vector<2x8x512xf32> to vector<2x1x256xf32>
    %786 = vector.shape_cast %785 : vector<2x1x256xf32> to vector<2x256xf32>
    %787 = vector.extract_strided_slice %784 {offsets = [0, 0], sizes = [2, 256], strides = [1, 1]} : vector<2x512xf32> to vector<2x256xf32>
    %788 = arith.addf %786, %787 : vector<2x256xf32>
    %789 = vector.extract_strided_slice %650 {offsets = [0, 4, 256], sizes = [2, 1, 256], strides = [1, 1, 1]} : vector<2x8x512xf32> to vector<2x1x256xf32>
    %790 = vector.shape_cast %789 : vector<2x1x256xf32> to vector<2x256xf32>
    %791 = vector.extract_strided_slice %784 {offsets = [0, 256], sizes = [2, 256], strides = [1, 1]} : vector<2x512xf32> to vector<2x256xf32>
    %792 = arith.addf %790, %791 : vector<2x256xf32>
    %793 = vector.extract_strided_slice %788 {offsets = [0, 0], sizes = [2, 192], strides = [1, 1]} : vector<2x256xf32> to vector<2x192xf32>
    %794 = arith.negf %793 : vector<2x192xf32>
    %795 = math.exp %794 : vector<2x192xf32>
    %cst_424 = arith.constant 1.000000e+00 : f32
    %796 = vector.broadcast %cst_424 : f32 to vector<2x192xf32>
    %797 = arith.addf %796, %795 : vector<2x192xf32>
    %798 = arith.divf %796, %797 : vector<2x192xf32>
    %799 = vector.extract_strided_slice %792 {offsets = [0, 0], sizes = [2, 192], strides = [1, 1]} : vector<2x256xf32> to vector<2x192xf32>
    %800 = arith.negf %799 : vector<2x192xf32>
    %801 = math.exp %800 : vector<2x192xf32>
    %cst_425 = arith.constant 1.000000e+00 : f32
    %802 = vector.broadcast %cst_425 : f32 to vector<2x192xf32>
    %803 = arith.addf %802, %801 : vector<2x192xf32>
    %804 = arith.divf %802, %803 : vector<2x192xf32>
    %805 = vector.extract_strided_slice %788 {offsets = [0, 192], sizes = [2, 64], strides = [1, 1]} : vector<2x256xf32> to vector<2x64xf32>
    %806 = math.tanh %805 : vector<2x64xf32>
    %807 = vector.extract_strided_slice %792 {offsets = [0, 192], sizes = [2, 64], strides = [1, 1]} : vector<2x256xf32> to vector<2x64xf32>
    %808 = math.tanh %807 : vector<2x64xf32>
    %809 = vector.extract_strided_slice %798 {offsets = [0, 64], sizes = [2, 64], strides = [1, 1]} : vector<2x192xf32> to vector<2x64xf32>
    %810 = arith.mulf %809, %770 : vector<2x64xf32>
    %811 = vector.extract_strided_slice %798 {offsets = [0, 0], sizes = [2, 64], strides = [1, 1]} : vector<2x192xf32> to vector<2x64xf32>
    %812 = arith.mulf %811, %806 : vector<2x64xf32>
    %813 = arith.addf %810, %812 : vector<2x64xf32>
    %814 = vector.extract_strided_slice %798 {offsets = [0, 128], sizes = [2, 64], strides = [1, 1]} : vector<2x192xf32> to vector<2x64xf32>
    %815 = math.tanh %813 : vector<2x64xf32>
    %816 = arith.mulf %814, %815 : vector<2x64xf32>
    %817 = vector.extract_strided_slice %804 {offsets = [0, 64], sizes = [2, 64], strides = [1, 1]} : vector<2x192xf32> to vector<2x64xf32>
    %818 = arith.mulf %817, %778 : vector<2x64xf32>
    %819 = vector.extract_strided_slice %804 {offsets = [0, 0], sizes = [2, 64], strides = [1, 1]} : vector<2x192xf32> to vector<2x64xf32>
    %820 = arith.mulf %819, %808 : vector<2x64xf32>
    %821 = arith.addf %818, %820 : vector<2x64xf32>
    %822 = vector.extract_strided_slice %804 {offsets = [0, 128], sizes = [2, 64], strides = [1, 1]} : vector<2x192xf32> to vector<2x64xf32>
    %823 = math.tanh %821 : vector<2x64xf32>
    %824 = arith.mulf %822, %823 : vector<2x64xf32>
    %825 = tpu.concatenate %816, %824 in 1 : vector<2x64xf32>, vector<2x64xf32> -> vector<2x128xf32>
    %c0_426 = arith.constant 0 : index
    %c0_427 = arith.constant 0 : index
    %826 = vector.load %arg17[%c0_426, %c0_427] : memref<128x512xf32, #tpu.memory_space<vmem>>, vector<128x512xf32>
    %cst_428 = arith.constant dense<0.000000e+00> : vector<2x512xf32>
    %827 = tpu.matmul %825, %826, %cst_428 {dimension_numbers = #tpu.dot_dimension_numbers<[1], [0], [0], [1], [0, 0, 1, 1], [], []>} : vector<2x128xf32>, vector<128x512xf32>, vector<2x512xf32> -> vector<2x512xf32>
    %828 = vector.extract_strided_slice %650 {offsets = [0, 4, 0], sizes = [2, 1, 256], strides = [1, 1, 1]} : vector<2x8x512xf32> to vector<2x1x256xf32>
    %829 = vector.shape_cast %828 : vector<2x1x256xf32> to vector<2x256xf32>
    %830 = vector.extract_strided_slice %827 {offsets = [0, 0], sizes = [2, 256], strides = [1, 1]} : vector<2x512xf32> to vector<2x256xf32>
    %831 = arith.addf %829, %830 : vector<2x256xf32>
    %832 = vector.extract_strided_slice %650 {offsets = [0, 3, 256], sizes = [2, 1, 256], strides = [1, 1, 1]} : vector<2x8x512xf32> to vector<2x1x256xf32>
    %833 = vector.shape_cast %832 : vector<2x1x256xf32> to vector<2x256xf32>
    %834 = vector.extract_strided_slice %827 {offsets = [0, 256], sizes = [2, 256], strides = [1, 1]} : vector<2x512xf32> to vector<2x256xf32>
    %835 = arith.addf %833, %834 : vector<2x256xf32>
    %836 = vector.extract_strided_slice %831 {offsets = [0, 0], sizes = [2, 192], strides = [1, 1]} : vector<2x256xf32> to vector<2x192xf32>
    %837 = arith.negf %836 : vector<2x192xf32>
    %838 = math.exp %837 : vector<2x192xf32>
    %cst_429 = arith.constant 1.000000e+00 : f32
    %839 = vector.broadcast %cst_429 : f32 to vector<2x192xf32>
    %840 = arith.addf %839, %838 : vector<2x192xf32>
    %841 = arith.divf %839, %840 : vector<2x192xf32>
    %842 = vector.extract_strided_slice %835 {offsets = [0, 0], sizes = [2, 192], strides = [1, 1]} : vector<2x256xf32> to vector<2x192xf32>
    %843 = arith.negf %842 : vector<2x192xf32>
    %844 = math.exp %843 : vector<2x192xf32>
    %cst_430 = arith.constant 1.000000e+00 : f32
    %845 = vector.broadcast %cst_430 : f32 to vector<2x192xf32>
    %846 = arith.addf %845, %844 : vector<2x192xf32>
    %847 = arith.divf %845, %846 : vector<2x192xf32>
    %848 = vector.extract_strided_slice %831 {offsets = [0, 192], sizes = [2, 64], strides = [1, 1]} : vector<2x256xf32> to vector<2x64xf32>
    %849 = math.tanh %848 : vector<2x64xf32>
    %850 = vector.extract_strided_slice %835 {offsets = [0, 192], sizes = [2, 64], strides = [1, 1]} : vector<2x256xf32> to vector<2x64xf32>
    %851 = math.tanh %850 : vector<2x64xf32>
    %852 = vector.extract_strided_slice %841 {offsets = [0, 64], sizes = [2, 64], strides = [1, 1]} : vector<2x192xf32> to vector<2x64xf32>
    %853 = arith.mulf %852, %813 : vector<2x64xf32>
    %854 = vector.extract_strided_slice %841 {offsets = [0, 0], sizes = [2, 64], strides = [1, 1]} : vector<2x192xf32> to vector<2x64xf32>
    %855 = arith.mulf %854, %849 : vector<2x64xf32>
    %856 = arith.addf %853, %855 : vector<2x64xf32>
    %857 = vector.extract_strided_slice %841 {offsets = [0, 128], sizes = [2, 64], strides = [1, 1]} : vector<2x192xf32> to vector<2x64xf32>
    %858 = math.tanh %856 : vector<2x64xf32>
    %859 = arith.mulf %857, %858 : vector<2x64xf32>
    %860 = vector.extract_strided_slice %847 {offsets = [0, 64], sizes = [2, 64], strides = [1, 1]} : vector<2x192xf32> to vector<2x64xf32>
    %861 = arith.mulf %860, %821 : vector<2x64xf32>
    %862 = vector.extract_strided_slice %847 {offsets = [0, 0], sizes = [2, 64], strides = [1, 1]} : vector<2x192xf32> to vector<2x64xf32>
    %863 = arith.mulf %862, %851 : vector<2x64xf32>
    %864 = arith.addf %861, %863 : vector<2x64xf32>
    %865 = vector.extract_strided_slice %847 {offsets = [0, 128], sizes = [2, 64], strides = [1, 1]} : vector<2x192xf32> to vector<2x64xf32>
    %866 = math.tanh %864 : vector<2x64xf32>
    %867 = arith.mulf %865, %866 : vector<2x64xf32>
    %868 = tpu.concatenate %859, %867 in 1 : vector<2x64xf32>, vector<2x64xf32> -> vector<2x128xf32>
    %c0_431 = arith.constant 0 : index
    %c0_432 = arith.constant 0 : index
    %869 = vector.load %arg17[%c0_431, %c0_432] : memref<128x512xf32, #tpu.memory_space<vmem>>, vector<128x512xf32>
    %cst_433 = arith.constant dense<0.000000e+00> : vector<2x512xf32>
    %870 = tpu.matmul %868, %869, %cst_433 {dimension_numbers = #tpu.dot_dimension_numbers<[1], [0], [0], [1], [0, 0, 1, 1], [], []>} : vector<2x128xf32>, vector<128x512xf32>, vector<2x512xf32> -> vector<2x512xf32>
    %871 = vector.extract_strided_slice %650 {offsets = [0, 5, 0], sizes = [2, 1, 256], strides = [1, 1, 1]} : vector<2x8x512xf32> to vector<2x1x256xf32>
    %872 = vector.shape_cast %871 : vector<2x1x256xf32> to vector<2x256xf32>
    %873 = vector.extract_strided_slice %870 {offsets = [0, 0], sizes = [2, 256], strides = [1, 1]} : vector<2x512xf32> to vector<2x256xf32>
    %874 = arith.addf %872, %873 : vector<2x256xf32>
    %875 = vector.extract_strided_slice %650 {offsets = [0, 2, 256], sizes = [2, 1, 256], strides = [1, 1, 1]} : vector<2x8x512xf32> to vector<2x1x256xf32>
    %876 = vector.shape_cast %875 : vector<2x1x256xf32> to vector<2x256xf32>
    %877 = vector.extract_strided_slice %870 {offsets = [0, 256], sizes = [2, 256], strides = [1, 1]} : vector<2x512xf32> to vector<2x256xf32>
    %878 = arith.addf %876, %877 : vector<2x256xf32>
    %879 = vector.extract_strided_slice %874 {offsets = [0, 0], sizes = [2, 192], strides = [1, 1]} : vector<2x256xf32> to vector<2x192xf32>
    %880 = arith.negf %879 : vector<2x192xf32>
    %881 = math.exp %880 : vector<2x192xf32>
    %cst_434 = arith.constant 1.000000e+00 : f32
    %882 = vector.broadcast %cst_434 : f32 to vector<2x192xf32>
    %883 = arith.addf %882, %881 : vector<2x192xf32>
    %884 = arith.divf %882, %883 : vector<2x192xf32>
    %885 = vector.extract_strided_slice %878 {offsets = [0, 0], sizes = [2, 192], strides = [1, 1]} : vector<2x256xf32> to vector<2x192xf32>
    %886 = arith.negf %885 : vector<2x192xf32>
    %887 = math.exp %886 : vector<2x192xf32>
    %cst_435 = arith.constant 1.000000e+00 : f32
    %888 = vector.broadcast %cst_435 : f32 to vector<2x192xf32>
    %889 = arith.addf %888, %887 : vector<2x192xf32>
    %890 = arith.divf %888, %889 : vector<2x192xf32>
    %891 = vector.extract_strided_slice %874 {offsets = [0, 192], sizes = [2, 64], strides = [1, 1]} : vector<2x256xf32> to vector<2x64xf32>
    %892 = math.tanh %891 : vector<2x64xf32>
    %893 = vector.extract_strided_slice %878 {offsets = [0, 192], sizes = [2, 64], strides = [1, 1]} : vector<2x256xf32> to vector<2x64xf32>
    %894 = math.tanh %893 : vector<2x64xf32>
    %895 = vector.extract_strided_slice %884 {offsets = [0, 64], sizes = [2, 64], strides = [1, 1]} : vector<2x192xf32> to vector<2x64xf32>
    %896 = arith.mulf %895, %856 : vector<2x64xf32>
    %897 = vector.extract_strided_slice %884 {offsets = [0, 0], sizes = [2, 64], strides = [1, 1]} : vector<2x192xf32> to vector<2x64xf32>
    %898 = arith.mulf %897, %892 : vector<2x64xf32>
    %899 = arith.addf %896, %898 : vector<2x64xf32>
    %900 = vector.extract_strided_slice %884 {offsets = [0, 128], sizes = [2, 64], strides = [1, 1]} : vector<2x192xf32> to vector<2x64xf32>
    %901 = math.tanh %899 : vector<2x64xf32>
    %902 = arith.mulf %900, %901 : vector<2x64xf32>
    %903 = vector.extract_strided_slice %890 {offsets = [0, 64], sizes = [2, 64], strides = [1, 1]} : vector<2x192xf32> to vector<2x64xf32>
    %904 = arith.mulf %903, %864 : vector<2x64xf32>
    %905 = vector.extract_strided_slice %890 {offsets = [0, 0], sizes = [2, 64], strides = [1, 1]} : vector<2x192xf32> to vector<2x64xf32>
    %906 = arith.mulf %905, %894 : vector<2x64xf32>
    %907 = arith.addf %904, %906 : vector<2x64xf32>
    %908 = vector.extract_strided_slice %890 {offsets = [0, 128], sizes = [2, 64], strides = [1, 1]} : vector<2x192xf32> to vector<2x64xf32>
    %909 = math.tanh %907 : vector<2x64xf32>
    %910 = arith.mulf %908, %909 : vector<2x64xf32>
    %911 = tpu.concatenate %902, %910 in 1 : vector<2x64xf32>, vector<2x64xf32> -> vector<2x128xf32>
    %c0_436 = arith.constant 0 : index
    %c0_437 = arith.constant 0 : index
    %912 = vector.load %arg17[%c0_436, %c0_437] : memref<128x512xf32, #tpu.memory_space<vmem>>, vector<128x512xf32>
    %cst_438 = arith.constant dense<0.000000e+00> : vector<2x512xf32>
    %913 = tpu.matmul %911, %912, %cst_438 {dimension_numbers = #tpu.dot_dimension_numbers<[1], [0], [0], [1], [0, 0, 1, 1], [], []>} : vector<2x128xf32>, vector<128x512xf32>, vector<2x512xf32> -> vector<2x512xf32>
    %914 = vector.extract_strided_slice %650 {offsets = [0, 6, 0], sizes = [2, 1, 256], strides = [1, 1, 1]} : vector<2x8x512xf32> to vector<2x1x256xf32>
    %915 = vector.shape_cast %914 : vector<2x1x256xf32> to vector<2x256xf32>
    %916 = vector.extract_strided_slice %913 {offsets = [0, 0], sizes = [2, 256], strides = [1, 1]} : vector<2x512xf32> to vector<2x256xf32>
    %917 = arith.addf %915, %916 : vector<2x256xf32>
    %918 = vector.extract_strided_slice %650 {offsets = [0, 1, 256], sizes = [2, 1, 256], strides = [1, 1, 1]} : vector<2x8x512xf32> to vector<2x1x256xf32>
    %919 = vector.shape_cast %918 : vector<2x1x256xf32> to vector<2x256xf32>
    %920 = vector.extract_strided_slice %913 {offsets = [0, 256], sizes = [2, 256], strides = [1, 1]} : vector<2x512xf32> to vector<2x256xf32>
    %921 = arith.addf %919, %920 : vector<2x256xf32>
    %922 = vector.extract_strided_slice %917 {offsets = [0, 0], sizes = [2, 192], strides = [1, 1]} : vector<2x256xf32> to vector<2x192xf32>
    %923 = arith.negf %922 : vector<2x192xf32>
    %924 = math.exp %923 : vector<2x192xf32>
    %cst_439 = arith.constant 1.000000e+00 : f32
    %925 = vector.broadcast %cst_439 : f32 to vector<2x192xf32>
    %926 = arith.addf %925, %924 : vector<2x192xf32>
    %927 = arith.divf %925, %926 : vector<2x192xf32>
    %928 = vector.extract_strided_slice %921 {offsets = [0, 0], sizes = [2, 192], strides = [1, 1]} : vector<2x256xf32> to vector<2x192xf32>
    %929 = arith.negf %928 : vector<2x192xf32>
    %930 = math.exp %929 : vector<2x192xf32>
    %cst_440 = arith.constant 1.000000e+00 : f32
    %931 = vector.broadcast %cst_440 : f32 to vector<2x192xf32>
    %932 = arith.addf %931, %930 : vector<2x192xf32>
    %933 = arith.divf %931, %932 : vector<2x192xf32>
    %934 = vector.extract_strided_slice %917 {offsets = [0, 192], sizes = [2, 64], strides = [1, 1]} : vector<2x256xf32> to vector<2x64xf32>
    %935 = math.tanh %934 : vector<2x64xf32>
    %936 = vector.extract_strided_slice %921 {offsets = [0, 192], sizes = [2, 64], strides = [1, 1]} : vector<2x256xf32> to vector<2x64xf32>
    %937 = math.tanh %936 : vector<2x64xf32>
    %938 = vector.extract_strided_slice %927 {offsets = [0, 64], sizes = [2, 64], strides = [1, 1]} : vector<2x192xf32> to vector<2x64xf32>
    %939 = arith.mulf %938, %899 : vector<2x64xf32>
    %940 = vector.extract_strided_slice %927 {offsets = [0, 0], sizes = [2, 64], strides = [1, 1]} : vector<2x192xf32> to vector<2x64xf32>
    %941 = arith.mulf %940, %935 : vector<2x64xf32>
    %942 = arith.addf %939, %941 : vector<2x64xf32>
    %943 = vector.extract_strided_slice %927 {offsets = [0, 128], sizes = [2, 64], strides = [1, 1]} : vector<2x192xf32> to vector<2x64xf32>
    %944 = math.tanh %942 : vector<2x64xf32>
    %945 = arith.mulf %943, %944 : vector<2x64xf32>
    %946 = vector.extract_strided_slice %933 {offsets = [0, 64], sizes = [2, 64], strides = [1, 1]} : vector<2x192xf32> to vector<2x64xf32>
    %947 = arith.mulf %946, %907 : vector<2x64xf32>
    %948 = vector.extract_strided_slice %933 {offsets = [0, 0], sizes = [2, 64], strides = [1, 1]} : vector<2x192xf32> to vector<2x64xf32>
    %949 = arith.mulf %948, %937 : vector<2x64xf32>
    %950 = arith.addf %947, %949 : vector<2x64xf32>
    %951 = vector.extract_strided_slice %933 {offsets = [0, 128], sizes = [2, 64], strides = [1, 1]} : vector<2x192xf32> to vector<2x64xf32>
    %952 = math.tanh %950 : vector<2x64xf32>
    %953 = arith.mulf %951, %952 : vector<2x64xf32>
    %954 = tpu.concatenate %945, %953 in 1 : vector<2x64xf32>, vector<2x64xf32> -> vector<2x128xf32>
    %c0_441 = arith.constant 0 : index
    %c0_442 = arith.constant 0 : index
    %955 = vector.load %arg17[%c0_441, %c0_442] : memref<128x512xf32, #tpu.memory_space<vmem>>, vector<128x512xf32>
    %cst_443 = arith.constant dense<0.000000e+00> : vector<2x512xf32>
    %956 = tpu.matmul %954, %955, %cst_443 {dimension_numbers = #tpu.dot_dimension_numbers<[1], [0], [0], [1], [0, 0, 1, 1], [], []>} : vector<2x128xf32>, vector<128x512xf32>, vector<2x512xf32> -> vector<2x512xf32>
    %957 = vector.extract_strided_slice %650 {offsets = [0, 7, 0], sizes = [2, 1, 256], strides = [1, 1, 1]} : vector<2x8x512xf32> to vector<2x1x256xf32>
    %958 = vector.shape_cast %957 : vector<2x1x256xf32> to vector<2x256xf32>
    %959 = vector.extract_strided_slice %956 {offsets = [0, 0], sizes = [2, 256], strides = [1, 1]} : vector<2x512xf32> to vector<2x256xf32>
    %960 = arith.addf %958, %959 : vector<2x256xf32>
    %961 = vector.extract_strided_slice %650 {offsets = [0, 0, 256], sizes = [2, 1, 256], strides = [1, 1, 1]} : vector<2x8x512xf32> to vector<2x1x256xf32>
    %962 = vector.shape_cast %961 : vector<2x1x256xf32> to vector<2x256xf32>
    %963 = vector.extract_strided_slice %956 {offsets = [0, 256], sizes = [2, 256], strides = [1, 1]} : vector<2x512xf32> to vector<2x256xf32>
    %964 = arith.addf %962, %963 : vector<2x256xf32>
    %965 = vector.extract_strided_slice %960 {offsets = [0, 0], sizes = [2, 192], strides = [1, 1]} : vector<2x256xf32> to vector<2x192xf32>
    %966 = arith.negf %965 : vector<2x192xf32>
    %967 = math.exp %966 : vector<2x192xf32>
    %cst_444 = arith.constant 1.000000e+00 : f32
    %968 = vector.broadcast %cst_444 : f32 to vector<2x192xf32>
    %969 = arith.addf %968, %967 : vector<2x192xf32>
    %970 = arith.divf %968, %969 : vector<2x192xf32>
    %971 = vector.extract_strided_slice %964 {offsets = [0, 0], sizes = [2, 192], strides = [1, 1]} : vector<2x256xf32> to vector<2x192xf32>
    %972 = arith.negf %971 : vector<2x192xf32>
    %973 = math.exp %972 : vector<2x192xf32>
    %cst_445 = arith.constant 1.000000e+00 : f32
    %974 = vector.broadcast %cst_445 : f32 to vector<2x192xf32>
    %975 = arith.addf %974, %973 : vector<2x192xf32>
    %976 = arith.divf %974, %975 : vector<2x192xf32>
    %977 = vector.extract_strided_slice %960 {offsets = [0, 192], sizes = [2, 64], strides = [1, 1]} : vector<2x256xf32> to vector<2x64xf32>
    %978 = math.tanh %977 : vector<2x64xf32>
    %979 = vector.extract_strided_slice %964 {offsets = [0, 192], sizes = [2, 64], strides = [1, 1]} : vector<2x256xf32> to vector<2x64xf32>
    %980 = math.tanh %979 : vector<2x64xf32>
    %981 = vector.extract_strided_slice %970 {offsets = [0, 64], sizes = [2, 64], strides = [1, 1]} : vector<2x192xf32> to vector<2x64xf32>
    %982 = arith.mulf %981, %942 : vector<2x64xf32>
    %983 = vector.extract_strided_slice %970 {offsets = [0, 0], sizes = [2, 64], strides = [1, 1]} : vector<2x192xf32> to vector<2x64xf32>
    %984 = arith.mulf %983, %978 : vector<2x64xf32>
    %985 = arith.addf %982, %984 : vector<2x64xf32>
    %986 = vector.extract_strided_slice %970 {offsets = [0, 128], sizes = [2, 64], strides = [1, 1]} : vector<2x192xf32> to vector<2x64xf32>
    %987 = math.tanh %985 : vector<2x64xf32>
    %988 = arith.mulf %986, %987 : vector<2x64xf32>
    %989 = vector.extract_strided_slice %976 {offsets = [0, 64], sizes = [2, 64], strides = [1, 1]} : vector<2x192xf32> to vector<2x64xf32>
    %990 = arith.mulf %989, %950 : vector<2x64xf32>
    %991 = vector.extract_strided_slice %976 {offsets = [0, 0], sizes = [2, 64], strides = [1, 1]} : vector<2x192xf32> to vector<2x64xf32>
    %992 = arith.mulf %991, %980 : vector<2x64xf32>
    %993 = arith.addf %990, %992 : vector<2x64xf32>
    %994 = vector.extract_strided_slice %976 {offsets = [0, 128], sizes = [2, 64], strides = [1, 1]} : vector<2x192xf32> to vector<2x64xf32>
    %995 = math.tanh %993 : vector<2x64xf32>
    %996 = arith.mulf %994, %995 : vector<2x64xf32>
    %997 = tpu.concatenate %687, %996 in 1 : vector<2x64xf32>, vector<2x64xf32> -> vector<2x128xf32>
    %c0_446 = arith.constant 0 : index
    %c0_447 = arith.constant 0 : index
    %c0_448 = arith.constant 0 : index
    %998 = vector.load %arg23[%c0_446, %c0_447, %c0_448] : memref<2x8x128xf32, #tpu.memory_space<vmem>>, vector<2x1x128xf32>
    %999 = vector.shape_cast %998 : vector<2x1x128xf32> to vector<2x128xf32>
    %1000 = vector.shape_cast %997 : vector<2x128xf32> to vector<2x1x128xf32>
    tpu.vector_store %arg23[%c0_446, %c0_447, %c0_448], %1000 {strides = array<i32>} : memref<2x8x128xf32, #tpu.memory_space<vmem>>, vector<2x1x128xf32>,
    %1001 = tpu.concatenate %730, %953 in 1 : vector<2x64xf32>, vector<2x64xf32> -> vector<2x128xf32>
    %c0_449 = arith.constant 0 : index
    %c1_450 = arith.constant 1 : index
    %c0_451 = arith.constant 0 : index
    %1002 = vector.load %arg23[%c0_449, %c1_450, %c0_451] : memref<2x8x128xf32, #tpu.memory_space<vmem>>, vector<2x1x128xf32>
    %1003 = vector.shape_cast %1002 : vector<2x1x128xf32> to vector<2x128xf32>
    %1004 = vector.shape_cast %1001 : vector<2x128xf32> to vector<2x1x128xf32>
    tpu.vector_store %arg23[%c0_449, %c1_450, %c0_451], %1004 {strides = array<i32>} : memref<2x8x128xf32, #tpu.memory_space<vmem>>, vector<2x1x128xf32>,
    %1005 = tpu.concatenate %773, %910 in 1 : vector<2x64xf32>, vector<2x64xf32> -> vector<2x128xf32>
    %c0_452 = arith.constant 0 : index
    %c2_453 = arith.constant 2 : index
    %c0_454 = arith.constant 0 : index
    %1006 = vector.load %arg23[%c0_452, %c2_453, %c0_454] : memref<2x8x128xf32, #tpu.memory_space<vmem>>, vector<2x1x128xf32>
    %1007 = vector.shape_cast %1006 : vector<2x1x128xf32> to vector<2x128xf32>
    %1008 = vector.shape_cast %1005 : vector<2x128xf32> to vector<2x1x128xf32>
    tpu.vector_store %arg23[%c0_452, %c2_453, %c0_454], %1008 {strides = array<i32>} : memref<2x8x128xf32, #tpu.memory_space<vmem>>, vector<2x1x128xf32>,
    %1009 = tpu.concatenate %816, %867 in 1 : vector<2x64xf32>, vector<2x64xf32> -> vector<2x128xf32>
    %c0_455 = arith.constant 0 : index
    %c3_456 = arith.constant 3 : index
    %c0_457 = arith.constant 0 : index
    %1010 = vector.load %arg23[%c0_455, %c3_456, %c0_457] : memref<2x8x128xf32, #tpu.memory_space<vmem>>, vector<2x1x128xf32>
    %1011 = vector.shape_cast %1010 : vector<2x1x128xf32> to vector<2x128xf32>
    %1012 = vector.shape_cast %1009 : vector<2x128xf32> to vector<2x1x128xf32>
    tpu.vector_store %arg23[%c0_455, %c3_456, %c0_457], %1012 {strides = array<i32>} : memref<2x8x128xf32, #tpu.memory_space<vmem>>, vector<2x1x128xf32>,
    %1013 = tpu.concatenate %859, %824 in 1 : vector<2x64xf32>, vector<2x64xf32> -> vector<2x128xf32>
    %c0_458 = arith.constant 0 : index
    %c4_459 = arith.constant 4 : index
    %c0_460 = arith.constant 0 : index
    %1014 = vector.load %arg23[%c0_458, %c4_459, %c0_460] : memref<2x8x128xf32, #tpu.memory_space<vmem>>, vector<2x1x128xf32>
    %1015 = vector.shape_cast %1014 : vector<2x1x128xf32> to vector<2x128xf32>
    %1016 = vector.shape_cast %1013 : vector<2x128xf32> to vector<2x1x128xf32>
    tpu.vector_store %arg23[%c0_458, %c4_459, %c0_460], %1016 {strides = array<i32>} : memref<2x8x128xf32, #tpu.memory_space<vmem>>, vector<2x1x128xf32>,
    %1017 = tpu.concatenate %902, %781 in 1 : vector<2x64xf32>, vector<2x64xf32> -> vector<2x128xf32>
    %c0_461 = arith.constant 0 : index
    %c5_462 = arith.constant 5 : index
    %c0_463 = arith.constant 0 : index
    %1018 = vector.load %arg23[%c0_461, %c5_462, %c0_463] : memref<2x8x128xf32, #tpu.memory_space<vmem>>, vector<2x1x128xf32>
    %1019 = vector.shape_cast %1018 : vector<2x1x128xf32> to vector<2x128xf32>
    %1020 = vector.shape_cast %1017 : vector<2x128xf32> to vector<2x1x128xf32>
    tpu.vector_store %arg23[%c0_461, %c5_462, %c0_463], %1020 {strides = array<i32>} : memref<2x8x128xf32, #tpu.memory_space<vmem>>, vector<2x1x128xf32>,
    %1021 = tpu.concatenate %945, %738 in 1 : vector<2x64xf32>, vector<2x64xf32> -> vector<2x128xf32>
    %c0_464 = arith.constant 0 : index
    %c6_465 = arith.constant 6 : index
    %c0_466 = arith.constant 0 : index
    %1022 = vector.load %arg23[%c0_464, %c6_465, %c0_466] : memref<2x8x128xf32, #tpu.memory_space<vmem>>, vector<2x1x128xf32>
    %1023 = vector.shape_cast %1022 : vector<2x1x128xf32> to vector<2x128xf32>
    %1024 = vector.shape_cast %1021 : vector<2x128xf32> to vector<2x1x128xf32>
    tpu.vector_store %arg23[%c0_464, %c6_465, %c0_466], %1024 {strides = array<i32>} : memref<2x8x128xf32, #tpu.memory_space<vmem>>, vector<2x1x128xf32>,
    %1025 = tpu.concatenate %988, %695 in 1 : vector<2x64xf32>, vector<2x64xf32> -> vector<2x128xf32>
    %c0_467 = arith.constant 0 : index
    %c7_468 = arith.constant 7 : index
    %c0_469 = arith.constant 0 : index
    %1026 = vector.load %arg23[%c0_467, %c7_468, %c0_469] : memref<2x8x128xf32, #tpu.memory_space<vmem>>, vector<2x1x128xf32>
    %1027 = vector.shape_cast %1026 : vector<2x1x128xf32> to vector<2x128xf32>
    %1028 = vector.shape_cast %1025 : vector<2x128xf32> to vector<2x1x128xf32>
    tpu.vector_store %arg23[%c0_467, %c7_468, %c0_469], %1028 {strides = array<i32>} : memref<2x8x128xf32, #tpu.memory_space<vmem>>, vector<2x1x128xf32>,
    %c0_470 = arith.constant 0 : index
    %c0_471 = arith.constant 0 : index
    %c0_472 = arith.constant 0 : index
    %1029 = vector.load %arg23[%c0_470, %c0_471, %c0_472] : memref<2x8x128xf32, #tpu.memory_space<vmem>>, vector<2x8x128xf32>
    %1030 = vector.shape_cast %1029 : vector<2x8x128xf32> to vector<16x128xf32>
    %1031 = tpu.concatenate %1030, %258 in 1 : vector<16x128xf32>, vector<16x32xf32> -> vector<16x160xf32>
    %c0_473 = arith.constant 0 : index
    %c0_474 = arith.constant 0 : index
    %1032 = vector.load %arg18[%c0_473, %c0_474] : memref<160x128xf32, #tpu.memory_space<vmem>>, vector<160x128xf32>
    %cst_475 = arith.constant dense<0.000000e+00> : vector<16x128xf32>
    %1033 = tpu.matmul %1031, %1032, %cst_475 {dimension_numbers = #tpu.dot_dimension_numbers<[1], [0], [0], [1], [0, 0, 1, 1], [], []>} : vector<16x160xf32>, vector<160x128xf32>, vector<16x128xf32> -> vector<16x128xf32>
    %c0_476 = arith.constant 0 : index
    %c0_477 = arith.constant 0 : index
    %1034 = vector.load %arg19[%c0_476, %c0_477] : memref<1x128xf32, #tpu.memory_space<vmem>>, vector<1x128xf32>
    %1035 = vector.broadcast %1034 : vector<1x128xf32> to vector<16x128xf32>
    %1036 = arith.addf %1033, %1035 : vector<16x128xf32>
    %1037 = vector.shape_cast %1036 : vector<16x128xf32> to vector<2x8x128xf32>
    %c0_478 = arith.constant 0 : index
    %c0_479 = arith.constant 0 : index
    %c0_480 = arith.constant 0 : index
    %1038 = vector.load %arg20[%c0_478, %c0_479, %c0_480] : memref<2x8x128xf32, #tpu.memory_space<vmem>>, vector<2x8x128xf32>
    tpu.vector_store %arg20[%c0_478, %c0_479, %c0_480], %1037 {strides = array<i32>} : memref<2x8x128xf32, #tpu.memory_space<vmem>>, vector<2x8x128xf32>,
    return
  }
  func.func @transform_0(%arg0: i32) -> (i32, i32, i32, i32) {
    %c0_i32 = arith.constant 0 : i32
    %c0_i32_0 = arith.constant 0 : i32
    %c0_i32_1 = arith.constant 0 : i32
    %c0_i32_2 = arith.constant 0 : i32
    return %arg0, %c0_i32, %c0_i32_0, %c0_i32_1 : i32, i32, i32, i32
  }
  func.func @transform_1(%arg0: i32) -> (i32, i32) {
    %c0_i32 = arith.constant 0 : i32
    %c0_i32_0 = arith.constant 0 : i32
    %c0_i32_1 = arith.constant 0 : i32
    return %c0_i32, %c0_i32_0 : i32, i32
  }
  func.func @transform_2(%arg0: i32) -> (i32, i32) {
    %c0_i32 = arith.constant 0 : i32
    %c0_i32_0 = arith.constant 0 : i32
    %c0_i32_1 = arith.constant 0 : i32
    return %c0_i32, %c0_i32_0 : i32, i32
  }
  func.func @transform_3(%arg0: i32) -> (i32, i32, i32) {
    %c0_i32 = arith.constant 0 : i32
    %c0_i32_0 = arith.constant 0 : i32
    %c0_i32_1 = arith.constant 0 : i32
    %c0_i32_2 = arith.constant 0 : i32
    return %c0_i32, %c0_i32_0, %c0_i32_1 : i32, i32, i32
  }
  func.func @transform_4(%arg0: i32) -> (i32, i32) {
    %c0_i32 = arith.constant 0 : i32
    %c0_i32_0 = arith.constant 0 : i32
    %c0_i32_1 = arith.constant 0 : i32
    return %c0_i32, %c0_i32_0 : i32, i32
  }
  func.func @transform_5(%arg0: i32) -> (i32, i32, i32) {
    %c0_i32 = arith.constant 0 : i32
    %c0_i32_0 = arith.constant 0 : i32
    %c0_i32_1 = arith.constant 0 : i32
    %c0_i32_2 = arith.constant 0 : i32
    return %c0_i32, %c0_i32_0, %c0_i32_1 : i32, i32, i32
  }
  func.func @transform_6(%arg0: i32) -> (i32, i32) {
    %c0_i32 = arith.constant 0 : i32
    %c0_i32_0 = arith.constant 0 : i32
    %c0_i32_1 = arith.constant 0 : i32
    return %c0_i32, %c0_i32_0 : i32, i32
  }
  func.func @transform_7(%arg0: i32) -> (i32, i32, i32) {
    %c0_i32 = arith.constant 0 : i32
    %c0_i32_0 = arith.constant 0 : i32
    %c0_i32_1 = arith.constant 0 : i32
    %c0_i32_2 = arith.constant 0 : i32
    return %c0_i32, %c0_i32_0, %c0_i32_1 : i32, i32, i32
  }
  func.func @transform_8(%arg0: i32) -> (i32, i32) {
    %c0_i32 = arith.constant 0 : i32
    %c0_i32_0 = arith.constant 0 : i32
    %c0_i32_1 = arith.constant 0 : i32
    return %c0_i32, %c0_i32_0 : i32, i32
  }
  func.func @transform_9(%arg0: i32) -> (i32, i32, i32) {
    %c0_i32 = arith.constant 0 : i32
    %c0_i32_0 = arith.constant 0 : i32
    %c0_i32_1 = arith.constant 0 : i32
    %c0_i32_2 = arith.constant 0 : i32
    return %c0_i32, %c0_i32_0, %c0_i32_1 : i32, i32, i32
  }
  func.func @transform_10(%arg0: i32) -> (i32, i32) {
    %c0_i32 = arith.constant 0 : i32
    %c0_i32_0 = arith.constant 0 : i32
    %c0_i32_1 = arith.constant 0 : i32
    return %c0_i32, %c0_i32_0 : i32, i32
  }
  func.func @transform_11(%arg0: i32) -> (i32, i32) {
    %c0_i32 = arith.constant 0 : i32
    %c0_i32_0 = arith.constant 0 : i32
    %c0_i32_1 = arith.constant 0 : i32
    return %c0_i32, %c0_i32_0 : i32, i32
  }
  func.func @transform_12(%arg0: i32) -> (i32, i32) {
    %c0_i32 = arith.constant 0 : i32
    %c0_i32_0 = arith.constant 0 : i32
    %c0_i32_1 = arith.constant 0 : i32
    return %c0_i32, %c0_i32_0 : i32, i32
  }
  func.func @transform_13(%arg0: i32) -> (i32, i32) {
    %c0_i32 = arith.constant 0 : i32
    %c0_i32_0 = arith.constant 0 : i32
    %c0_i32_1 = arith.constant 0 : i32
    return %c0_i32, %c0_i32_0 : i32, i32
  }
  func.func @transform_14(%arg0: i32) -> (i32, i32) {
    %c0_i32 = arith.constant 0 : i32
    %c0_i32_0 = arith.constant 0 : i32
    %c0_i32_1 = arith.constant 0 : i32
    return %c0_i32, %c0_i32_0 : i32, i32
  }
  func.func @transform_15(%arg0: i32) -> (i32, i32) {
    %c0_i32 = arith.constant 0 : i32
    %c0_i32_0 = arith.constant 0 : i32
    %c0_i32_1 = arith.constant 0 : i32
    return %c0_i32, %c0_i32_0 : i32, i32
  }
  func.func @transform_16(%arg0: i32) -> (i32, i32) {
    %c0_i32 = arith.constant 0 : i32
    %c0_i32_0 = arith.constant 0 : i32
    %c0_i32_1 = arith.constant 0 : i32
    return %c0_i32, %c0_i32_0 : i32, i32
  }
  func.func @transform_17(%arg0: i32) -> (i32, i32) {
    %c0_i32 = arith.constant 0 : i32
    %c0_i32_0 = arith.constant 0 : i32
    %c0_i32_1 = arith.constant 0 : i32
    return %c0_i32, %c0_i32_0 : i32, i32
  }
  func.func @transform_18(%arg0: i32) -> (i32, i32) {
    %c0_i32 = arith.constant 0 : i32
    %c0_i32_0 = arith.constant 0 : i32
    %c0_i32_1 = arith.constant 0 : i32
    return %c0_i32, %c0_i32_0 : i32, i32
  }
  func.func @transform_19(%arg0: i32) -> (i32, i32, i32) {
    %c0_i32 = arith.constant 0 : i32
    %c0_i32_0 = arith.constant 0 : i32
    %c0_i32_1 = arith.constant 0 : i32
    return %arg0, %c0_i32, %c0_i32_0 : i32, i32, i32
  }
}

</mosaic_0001>

<bundles_post_ra>
// kernel: rctc_forward_pallas.1
= control target key start
LH: loop header
LB: loop body
LE: loop exit
PB: predicated region body
PF: predicated region fallthrough
CT: control target
= control target key end

     0   :  { %s20276_s0 = inlined_call_operand.vmem [shape: f32[2,4,8,16], index: 0, kind: input, shape index: {}]   ;;  %s20277_s1 = inlined_call_operand.vmem [shape: f32[16,32], index: 1, kind: input, shape index: {}]   ;;  %s20278_s2 = inlined_call_operand.vmem [shape: f32[1,32], index: 2, kind: input, shape index: {}]   ;;  %s20279_s3 = inlined_call_operand.vmem [shape: f32[9,32,32], index: 3, kind: input, shape index: {}]   ;;  %s20280_s4 = inlined_call_operand.vmem [shape: f32[1,32], index: 4, kind: input, shape index: {}]   ;;  %s20281_s5 = inlined_call_operand.vmem [shape: f32[9,32,32], index: 5, kind: input, shape index: {}]   ;;  %s20282_s6 = inlined_call_operand.vmem [shape: f32[1,32], index: 6, kind: input, shape index: {}]   ;;  %s20283_s7 = inlined_call_operand.vmem [shape: f32[9,32,32], index: 7, kind: input, shape index: {}]   ;;  %s20284_s8 = inlined_call_operand.vmem [shape: f32[1,32], index: 8, kind: input, shape index: {}]   ;;  %s20285_s9 = inlined_call_operand.vmem [shape: f32[9,32,32], index: 9, kind: input, shape index: {}]   ;;  %s20286_s10 = inlined_call_operand.vmem [shape: f32[1,32], index: 10, kind: input, shape index: {}]   ;;  %s20287_s11 = inlined_call_operand.vmem [shape: f32[32,512], index: 11, kind: input, shape index: {}]   ;;  %s20288_s12 = inlined_call_operand.vmem [shape: f32[1,512], index: 12, kind: input, shape index: {}]   ;;  %s20289_s13 = inlined_call_operand.vmem [shape: f32[128,512], index: 13, kind: input, shape index: {}]   ;;  %s20290_s14 = inlined_call_operand.vmem [shape: f32[128,512], index: 14, kind: input, shape index: {}]   ;;  %s20291_s15 = inlined_call_operand.vmem [shape: f32[1,512], index: 15, kind: input, shape index: {}]   ;;  %s20292_s16 = inlined_call_operand.vmem [shape: f32[128,512], index: 16, kind: input, shape index: {}]   ;;  %s20293_s17 = inlined_call_operand.vmem [shape: f32[160,128], index: 17, kind: input, shape index: {}]   ;;  %s20294_s18 = inlined_call_operand.vmem [shape: f32[1,128], index: 18, kind: input, shape index: {}]   ;;  %s20295_s19 = inlined_call_operand.hbm [shape: f32[2,8,128], index: 19, kind: output, shape index: {}]  }
   0x1   :  { %20337 = sst [smem:[#allocation25_spill]] %s20276_s0 }
   0x2   :  { %20338 = sst [smem:[#allocation26_spill]] %s20277_s1 }
   0x3   :  { %20339 = sst [smem:[#allocation27_spill]] %s20278_s2 }
   0x4   :  { %20340 = sst [smem:[#allocation28_spill]] %s20279_s3 }
   0x5   :  { %s20341_s20 = sld [smem:[#allocation26_spill]]  ;;  %s20342_s23 = sld [smem:[#allocation25_spill]]  ;;  %vm80_vm0 = vcmask 130048  }
   0xb   :  { %v71_v0 = vld [vmem:[%s20341_s20] sm:$0xff]  ;;  %v72_v1 = vld [vmem:[%s20341_s20 + $0x8] sm:$0xff] }
   0xc   :  { %v63_v2 = vld [vmem:[%s20342_s23] sm:$0xff]  ;;  %v13825_v3 = vpack.c.bf16 %v72_v1, %v71_v0 }
   0xd   :  { %13093 = vmatprep.mubr.msk.f32.mxu0 %vm80_vm0, %v63_v2 }
   0xe   :  { %13826 = vmatprep.subr.bf16.mxu0 %v13825_v3 }
   0xf   :  { %24 = vsyncpa [#allocation6], 0  ;;  %13828 = vmatpush3.bf16.msra.mxu0 %v13825_v3  ;;  %v64_v4 = vld [vmem:[%s20342_s23 + $0x8] sm:$0xff]  ;;  %v65_v5 = vld [vmem:[%s20342_s23 + $0x10] sm:$0xff]  ;;  %vm218_vm1 = vcmask 261120   ;;  %vm220_vm2 = vcmask 254976  }
  0x10   :  { %v66_v6 = vld [vmem:[%s20342_s23 + $0x18] sm:$0xff]  ;;  %v67_v7 = vld [vmem:[%s20342_s23 + $0x20] sm:$0xff]  ;;  %v68_v8 = vld [vmem:[%s20342_s23 + $0x28] sm:$0xff]  ;;  %s20343_s3 = sld [smem:[#allocation28_spill]]  ;;  %v20301_v13 = vmov 0.0   ;;  %s20344_s24 = sld [smem:[#allocation27_spill]] }
  0x11   :  { %v69_v9 = vld [vmem:[%s20342_s23 + $0x30] sm:$0xff]  ;;  %v70_v10 = vld [vmem:[%s20342_s23 + $0x38] sm:$0xff]  ;;  %224 = vst.msk [vmem:[#allocation2 + $0x20] sm:$0xff] %vm218_vm1, %v20301_v13  ;;  %219 = vst.msk [vmem:[#allocation2] sm:$0xff] %vm218_vm1, %v20301_v13  ;;  %vm6296_vm3 = vcmask 1041409   ;;  %vm6307_vm4 = vcmask 523264  }
  0x12   :  { %13094 = vmatmul.mubr.msk.f32.vlgmr.msra.gmra.mrb[0].mxu0 %vm80_vm0, %v64_v4  ;;  %225 = vst.msk [vmem:[#allocation2 + $0x28] sm:$0x3] %vm220_vm2, %v20301_v13  ;;  %221 = vst.msk [vmem:[#allocation2 + $0x8] sm:$0x3] %vm220_vm2, %v20301_v13  ;;  %v1627_v63 = vld [vmem:[%s20281_s5] sm:$0xff]  ;;  %v1628_v0 = vld [vmem:[%s20281_s5 + $0x8] sm:$0xff] }
  0x13   :  { %13096 = vmatprep.mubr.msk.f32.mxu0 %vm80_vm0, %v65_v5  ;;  %222 = vst.msk [vmem:[#allocation2 + $0x10] sm:$0xff] %vm218_vm1, %v20301_v13  ;;  %226 = vst.msk [vmem:[#allocation2 + $0x30] sm:$0xff] %vm218_vm1, %v20301_v13  ;;  %v13909_v1 = vpack.c.bf16 %v1628_v0, %v1627_v63  ;;  %vm6612_vm5 = vcmask 1042434   ;;  %vm8209_vm6 = vcmask 1047559   ;;  %vm6932_vm7 = vcmask 1043459   ;;  %s16310_s26 = smov [#allocation5]  }
  0x14   :  { %223 = vst.msk [vmem:[#allocation2 + $0x18] sm:$0x3] %vm220_vm2, %v20301_v13  ;;  %227 = vst.msk [vmem:[#allocation2 + $0x38] sm:$0x3] %vm220_vm2, %v20301_v13  ;;  %vm7891_vm8 = vcmask 1046534   ;;  %vm7252_vm9 = vcmask 1044484  }
  0x15   :  { %228 = vst.msk [vmem:[#allocation2 + $0x40] sm:$0xff] %vm218_vm1, %v20301_v13  ;;  %230 = vst.msk [vmem:[#allocation2 + $0x50] sm:$0xff] %vm218_vm1, %v20301_v13  ;;  %13910 = vmatprep.subr.bf16.mxu0 %v13909_v1  ;;  %vm7571_vm10 = vcmask 1045509   ;;  %s12056_s27 = sshll.u32 %s16310_s26, 4  ;;  %s12057_s27 = int_to_ptr.vmem [resolvable:$true] %s12056_s27 }
  0x16   :  { %13097 = vmatmul.mubr.msk.f32.gmra.mrb[2].mxu0 %vm80_vm0, %v66_v6  ;;  %v12076_v11 = vld [vmem:[%s20343_s3 + $0x20] sm:$0xff]  ;;  %v12077_v12 = vld [vmem:[%s20343_s3 + $0x28] sm:$0xff]  ;;  %229 = vst.msk [vmem:[#allocation2 + $0x48] sm:$0x3] %vm220_vm2, %v20301_v13  ;;  %231 = vst.msk [vmem:[#allocation2 + $0x58] sm:$0x3] %vm220_vm2, %v20301_v13  ;;  %p16287_p1 = scmp.lt.s32.totalorder %s12057_s27, %s12057_s27 }
  0x17   :  { %13099 = vmatprep.mubr.msk.f32.mxu0 %vm80_vm0, %v67_v7  ;;  %232 = vst.msk [vmem:[#allocation2 + $0x60] sm:$0xff] %vm218_vm1, %v20301_v13  ;;  %234 = vst.msk [vmem:[#allocation2 + $0x70] sm:$0xff] %vm218_vm1, %v20301_v13  ;;  %v13829_v14 = vpack.c.bf16 %v12077_v12, %v12076_v11  ;;  %v12078_v15 = vld [vmem:[%s20343_s3 + $0x30] sm:$0xff]  ;;  %v12079_v16 = vld [vmem:[%s20343_s3 + $0x38] sm:$0xff]  ;;  %13912 = vmatpush3.bf16.msra.mxu0 %v13909_v1  ;;  %s16282_s23 = scalar_lea.vmem %s12057_s27, 256 }
  0x18   :  { %233 = vst.msk [vmem:[#allocation2 + $0x68] sm:$0x3] %vm220_vm2, %v20301_v13  ;;  %235 = vst.msk [vmem:[#allocation2 + $0x78] sm:$0x3] %vm220_vm2, %v20301_v13  ;;  %v13833_v17 = vpack.c.bf16 %v12079_v16, %v12078_v15  ;;  %v262_v19 = vld [vmem:[%s20343_s3] sm:$0xff]  ;;  %v263_v20 = vld [vmem:[%s20343_s3 + $0x8] sm:$0xff]  ;;  %p16283_p0 = scmp.ne.s32.totalorder %s12057_s27, %s16282_s23  ;;  %p16288_p2 = scmp.lt.s32.totalorder %s16282_s23, %s16282_s23 }
  0x19   :  { %236 = vst.msk [vmem:[#allocation2 + $0x80] sm:$0xff] %vm218_vm1, %v20301_v13  ;;  %238 = vst.msk [vmem:[#allocation2 + $0x90] sm:$0xff] %vm218_vm1, %v20301_v13  ;;  %13830 = vmatprep.subr.bf16.mxu1 %v13829_v14  ;;  %v16511_v18 = vld [vmem:[#allocation2 + $0x1] sm:$0xff]  ;;  %v13837_v21 = vpack.c.bf16 %v263_v20, %v262_v19  ;;  %v12067_v23 = vld [vmem:[%s20344_s24] ss:$0 sm:$0xff] }
  0x1a   :  { %13100 = vmatmul.mubr.msk.f32.gmra.mrb[4].mxu0 %vm80_vm0, %v68_v8  ;;  %237 = vst.msk [vmem:[#allocation2 + $0x88] sm:$0x3] %vm220_vm2, %v20301_v13  ;;  %239 = vst.msk [vmem:[#allocation2 + $0x98] sm:$0x3] %vm220_vm2, %v20301_v13  ;;  %13832 = vmatpush3.bf16.msra.mxu1 %v13829_v14  ;;  %v16521_v22 = vld [vmem:[#allocation2] sm:$0xff]  ;;  %v264_v39 = vld [vmem:[%s20343_s3 + $0x10] sm:$0xff]  ;;  %p16289_p3 = por %p16288_p2, %p16287_p1 }
  0x1b   :  { %13102 = vmatprep.mubr.msk.f32.mxu0 %vm80_vm0, %v69_v9  ;;  %240 = vst.msk [vmem:[#allocation2 + $0xa0] sm:$0xff] %vm218_vm1, %v20301_v13  ;;  %242 = vst.msk [vmem:[#allocation2 + $0xb0] sm:$0xff] %vm218_vm1, %v20301_v13  ;;  %13834 = vmatprep.subr.bf16.mxu1 %v13833_v17  ;;  %v265_v40 = vld [vmem:[%s20343_s3 + $0x18] sm:$0xff]  ;;  %v12096_v49 = vld [vmem:[%s20343_s3 + $0x40] sm:$0xff] }
  0x1c   :  { %241 = vst.msk [vmem:[#allocation2 + $0xa8] sm:$0x3] %vm220_vm2, %v20301_v13  ;;  %243 = vst.msk [vmem:[#allocation2 + $0xb8] sm:$0x3] %vm220_vm2, %v20301_v13  ;;  %13113 = vmatprep.mubr.msk.f32.mxu1 %vm218_vm1, %v16511_v18  ;;  %v13841_v45 = vpack.c.bf16 %v265_v40, %v264_v39  ;;  %v12097_v50 = vld [vmem:[%s20343_s3 + $0x48] sm:$0xff]  ;;  %v12098_v61 = vld [vmem:[%s20343_s3 + $0x50] sm:$0xff]  ;;  %p16290_p4 = pnand %p16289_p3, %p16283_p0 }
  0x1d   :  { %v13845_v56 = vpack.c.bf16 %v12097_v50, %v12096_v49  ;;  %v12099_v62 = vld [vmem:[%s20343_s3 + $0x58] sm:$0xff]  ;;  %v12108_v4 = vld [vmem:[%s20343_s3 + $0x60] sm:$0xff]  ;;  %v12109_v5 = vld [vmem:[%s20343_s3 + $0x68] sm:$0xff] }
  0x1e   :  { %13103 = vmatmul.mubr.msk.f32.gmra.mrb[6].mxu0 %vm80_vm0, %v70_v10  ;;  %13836 = vmatpush3.bf16.msra.mxu1 %v13833_v17  ;;  %v13849_v2 = vpack.c.bf16 %v12099_v62, %v12098_v61  ;;  %v16625_v7 = vld [vmem:[#allocation2 + $0x60] sm:$0xff]  ;;  %v13853_v8 = vpack.c.bf16 %v12109_v5, %v12108_v4  ;;  %v12110_v15 = vld [vmem:[%s20343_s3 + $0x70] sm:$0xff]  ;;  %v12111_v16 = vld [vmem:[%s20343_s3 + $0x78] sm:$0xff] }
  0x1f   :  { %13838 = vmatprep.subr.bf16.mxu1 %v13837_v21  ;;  %13313 = vmatprep.mubr.msk.f32.mxu0 %vm218_vm1, %v16521_v22  ;;  %v16576_v55 = vld [vmem:[#allocation2 + $0x61] sm:$0xff]  ;;  %v13857_v17 = vpack.c.bf16 %v12111_v16, %v12110_v15  ;;  %v12171_v16 = vld [vmem:[%s20343_s3 + $0x118] sm:$0xff] }
  0x20   :  { %v16638_v12 = vld [vmem:[#allocation2 + $0x2] sm:$0xff] }
  0x21   :  { %v12120_v20 = vld [vmem:[%s20343_s3 + $0x80] sm:$0xff]  ;;  %v12157_v62 = vld [vmem:[%s20343_s3 + $0xe8] sm:$0xff] }
  0x22   :  { %v12156_v61 = vld [vmem:[%s20343_s3 + $0xe0] sm:$0xff] }
  0x23   :  { %v13885_v63 = vpack.c.bf16 %v12157_v62, %v12156_v61  ;;  %v12168_v5 = vld [vmem:[%s20343_s3 + $0x100] sm:$0xff] }
  0xe5   :  { %v13095_v24 = vpop.f32.mrb[0].mxu0 }
  0xe6   :  { %v177_v25 = vadd.f32 %v13095_v24, %v12067_v23  ;;  %v171_v26 = vpop.f32.mrb[1].mxu0 }
  0xe7   :  { %v172_v27 = vadd.f32 %v12067_v23, %v171_v26 }
  0xe8   :  { %v16528_v28 = vmax.f32 %v177_v25, 0.0 }
  0xe9   :  { %v16530_v29 = vmax.f32 %v172_v27, 0.0  ;;  %v13098_v30 = vpop.f32.mrb[2].mxu0 }
  0xea   :  { %247 = vst.msk [vmem:[#allocation2 + $0x21] sm:$0xff] %vm218_vm1, %v16528_v28  ;;  %v187_v31 = vadd.f32 %v13098_v30, %v12067_v23  ;;  %v181_v32 = vpop.f32.mrb[3].mxu0 }
  0xeb   :  { %246 = vst.msk [vmem:[#allocation2 + $0x11] sm:$0xff] %vm218_vm1, %v16530_v29  ;;  %v182_v33 = vadd.f32 %v12067_v23, %v181_v32  ;;  %v12123_v32 = vld [vmem:[%s20343_s3 + $0x98] sm:$0xff] }
  0xec   :  { %v16536_v34 = vmax.f32 %v187_v31, 0.0  ;;  %v12122_v31 = vld [vmem:[%s20343_s3 + $0x90] sm:$0xff] }
  0xed   :  { %v16538_v35 = vmax.f32 %v182_v33, 0.0  ;;  %v13101_v36 = vpop.f32.mrb[4].mxu0  ;;  %v13865_v33 = vpack.c.bf16 %v12123_v32, %v12122_v31  ;;  %v12180_v31 = vld [vmem:[%s20280_s4] ss:$0 sm:$0xff] }
  0xee   :  { %249 = vst.msk [vmem:[#allocation2 + $0x41] sm:$0xff] %vm218_vm1, %v16536_v34  ;;  %v197_v37 = vadd.f32 %v13101_v36, %v12067_v23  ;;  %v191_v38 = vpop.f32.mrb[5].mxu0  ;;  %v12132_v36 = vld [vmem:[%s20343_s3 + $0xa0] sm:$0xff] }
  0xef   :  { %248 = vst.msk [vmem:[#allocation2 + $0x31] sm:$0xff] %vm218_vm1, %v16538_v35  ;;  %v192_v41 = vadd.f32 %v12067_v23, %v191_v38 }
  0xf0   :  { %v16550_v42 = vmax.f32 %v197_v37, 0.0  ;;  %v12133_v37 = vld [vmem:[%s20343_s3 + $0xa8] sm:$0xff] }
  0xf1   :  { %v16552_v43 = vmax.f32 %v192_v41, 0.0  ;;  %v13104_v44 = vpop.f32.mrb[6].mxu0  ;;  %v16568_v52 = vld [vmem:[#allocation2 + $0x21] sm:$0xff]  ;;  %v13869_v38 = vpack.c.bf16 %v12133_v37, %v12132_v36  ;;  %v12134_v41 = vld [vmem:[%s20343_s3 + $0xb0] sm:$0xff] }
  0xf2   :  { %251 = vst.msk [vmem:[#allocation2 + $0x81] sm:$0xff] %vm218_vm1, %v16550_v42  ;;  %v207_v46 = vadd.f32 %v13104_v44, %v12067_v23  ;;  %v201_v47 = vpop.f32.mrb[7].mxu0  ;;  %v16556_v48 = vld [vmem:[#allocation2 + $0x11] sm:$0xff]  ;;  %v16621_v6 = vld [vmem:[#allocation2 + $0x20] sm:$0xff] }
  0xf3   :  { %250 = vst.msk [vmem:[#allocation2 + $0x71] sm:$0xff] %vm218_vm1, %v16552_v43  ;;  %v202_v51 = vadd.f32 %v12067_v23, %v201_v47  ;;  %13114 = vmatmul.mubr.msk.f32.vlgmr.msra.gmra.mrb[0].mxu1 %vm218_vm1, %v16556_v48  ;;  %v255_v3 = vld [vmem:[#allocation2 + $0x10] sm:$0xff]  ;;  %v16666_v23 = vld [vmem:[#allocation2 + $0x62] sm:$0xff]  ;;  %v12135_v44 = vld [vmem:[%s20343_s3 + $0xb8] sm:$0xff] }
  0xf4   :  { %v16570_v53 = vmax.f32 %v207_v46, 0.0  ;;  %13840 = vmatpush3.bf16.msra.mxu1 %v13837_v21  ;;  %13116 = vmatprep.mubr.msk.f32.mxu1 %vm218_vm1, %v16568_v52  ;;  %v16652_v19 = vld [vmem:[#allocation2 + $0x12] sm:$0xff]  ;;  %v12121_v21 = vld [vmem:[%s20343_s3 + $0x88] sm:$0xff]  ;;  %v12144_v46 = vld [vmem:[%s20343_s3 + $0xc0] sm:$0xff] }
  0xf5   :  { %v16574_v54 = vmax.f32 %v202_v51, 0.0  ;;  %13842 = vmatprep.subr.bf16.mxu1 %v13841_v45  ;;  %v13861_v24 = vpack.c.bf16 %v12121_v21, %v12120_v20  ;;  %v690_v39 = vld [vmem:[#allocation2 + $0x40] sm:$0xff]  ;;  %v12145_v47 = vld [vmem:[%s20343_s3 + $0xc8] sm:$0xff]  ;;  %v12146_v51 = vld [vmem:[%s20343_s3 + $0xd0] sm:$0xff] }
  0xf6   :  { %253 = vst.msk [vmem:[#allocation2 + $0xa1] sm:$0xff] %vm218_vm1, %v16570_v53  ;;  %v16580_v57 = vld [vmem:[#allocation2 + $0x31] sm:$0xff]  ;;  %v13877_v49 = vpack.c.bf16 %v12145_v47, %v12144_v46  ;;  %v840_v50 = vld [vmem:[#allocation2 + $0x41] sm:$0xff] }
  0xf7   :  { %252 = vst.msk [vmem:[#allocation2 + $0x91] sm:$0xff] %vm218_vm1, %v16574_v54  ;;  %13117 = vmatmul.mubr.msk.f32.gmra.mrb[2].mxu1 %vm218_vm1, %v16580_v57  ;;  %v16627_v9 = vld [vmem:[#allocation2 + $0x30] sm:$0xff]  ;;  %v990_v0 = vld [vmem:[#allocation2 + $0x42] sm:$0xff]  ;;  %v1630_v21 = vld [vmem:[%s20281_s5 + $0x18] sm:$0xff] }
  0xf8   :  { %13119 = vmatprep.mubr.msk.f32.mxu1 %vm218_vm1, %v16576_v55  ;;  %13844 = vmatpush3.bf16.msra.mxu1 %v13841_v45  ;;  %v16668_v25 = vld [vmem:[#allocation2 + $0x32] sm:$0xff]  ;;  %v13873_v45 = vpack.c.bf16 %v12135_v44, %v12134_v41 }
  0xf9   :  { %13846 = vmatprep.subr.bf16.mxu1 %v13845_v56  ;;  %v16592_v59 = vld [vmem:[#allocation2 + $0x81] sm:$0xff]  ;;  %v1629_v20 = vld [vmem:[%s20281_s5 + $0x10] sm:$0xff] }
  0xfa   :  { %v16588_v58 = vld [vmem:[#allocation2 + $0x71] sm:$0xff]  ;;  %v16634_v11 = vld [vmem:[#allocation2 + $0x80] sm:$0xff] }
  0xfb   :  { %13120 = vmatmul.mubr.msk.f32.gmra.mrb[4].mxu1 %vm218_vm1, %v16588_v58  ;;  %v259_v10 = vld [vmem:[#allocation2 + $0x70] sm:$0xff]  ;;  %v16675_v27 = vld [vmem:[#allocation2 + $0x82] sm:$0xff] }
  0xfc   :  { %13122 = vmatprep.mubr.msk.f32.mxu1 %vm218_vm1, %v16592_v59  ;;  %v542_v26 = vld [vmem:[#allocation2 + $0x72] sm:$0xff] }
  0xfd   :  { %v694_v40 = vld [vmem:[#allocation2 + $0xa0] sm:$0xff] }
  0xfe   :  { %v16596_v60 = vld [vmem:[#allocation2 + $0x91] sm:$0xff]  ;;  %v994_v1 = vld [vmem:[#allocation2 + $0xa2] sm:$0xff] }
  0xff   :  { %13123 = vmatmul.mubr.msk.f32.gmra.mrb[6].mxu1 %vm218_vm1, %v16596_v60  ;;  %v16640_v14 = vld [vmem:[#allocation2 + $0x90] sm:$0xff] }
 0x100   :  { %13133 = vmatprep.mubr.msk.f32.mxu1 %vm218_vm1, %v16521_v22  ;;  %v16662_v22 = vld [vmem:[#allocation2 + $0x22] sm:$0xff]  ;;  %v16679_v30 = vld [vmem:[#allocation2 + $0x92] sm:$0xff] }
 0x103   :  { %13134 = vmatmul.mubr.msk.f32.vlgmr.msra.gmra.mrb[0].mxu1 %vm218_vm1, %v255_v3 }
 0x104   :  { %13848 = vmatpush3.bf16.msra.mxu1 %v13845_v56  ;;  %13136 = vmatprep.mubr.msk.f32.mxu1 %vm218_vm1, %v16621_v6  ;;  %v12147_v56 = vld [vmem:[%s20343_s3 + $0xd8] sm:$0xff] }
 0x105   :  { %13850 = vmatprep.subr.bf16.mxu1 %v13849_v2 }
 0x107   :  { %13137 = vmatmul.mubr.msk.f32.gmra.mrb[2].mxu1 %vm218_vm1, %v16627_v9 }
 0x108   :  { %13139 = vmatprep.mubr.msk.f32.mxu1 %vm218_vm1, %v16625_v7  ;;  %13852 = vmatpush3.bf16.msra.mxu1 %v13849_v2  ;;  %v12158_v2 = vld [vmem:[%s20343_s3 + $0xf0] sm:$0xff] }
 0x109   :  { %13854 = vmatprep.subr.bf16.mxu1 %v13853_v8 }
 0x10b   :  { %13140 = vmatmul.mubr.msk.f32.gmra.mrb[4].mxu1 %vm218_vm1, %v259_v10 }
 0x10c   :  { %13142 = vmatprep.mubr.msk.f32.mxu1 %vm218_vm1, %v16634_v11 }
 0x10f   :  { %13143 = vmatmul.mubr.msk.f32.gmra.mrb[6].mxu1 %vm218_vm1, %v16640_v14 }
 0x110   :  { %13153 = vmatprep.mubr.msk.f32.mxu1 %vm218_vm1, %v16638_v12 }
 0x113   :  { %13154 = vmatmul.mubr.msk.f32.vlgmr.msra.gmra.mrb[0].mxu1 %vm218_vm1, %v16652_v19 }
 0x114   :  { %13856 = vmatpush3.bf16.msra.mxu1 %v13853_v8  ;;  %13156 = vmatprep.mubr.msk.f32.mxu1 %vm218_vm1, %v16662_v22  ;;  %v12169_v8 = vld [vmem:[%s20343_s3 + $0x108] sm:$0xff] }
 0x115   :  { %13858 = vmatprep.subr.bf16.mxu1 %v13857_v17  ;;  %v13893_v15 = vpack.c.bf16 %v12169_v8, %v12168_v5 }
 0x117   :  { %13157 = vmatmul.mubr.msk.f32.gmra.mrb[2].mxu1 %vm218_vm1, %v16668_v25 }
 0x118   :  { %13159 = vmatprep.mubr.msk.f32.mxu1 %vm218_vm1, %v16666_v23  ;;  %13860 = vmatpush3.bf16.msra.mxu1 %v13857_v17  ;;  %v12182_v17 = vld [vmem:[%s20281_s5 + $0x28] sm:$0xff] }
 0x119   :  { %13862 = vmatprep.subr.bf16.mxu1 %v13861_v24 }
 0x11b   :  { %13160 = vmatmul.mubr.msk.f32.gmra.mrb[4].mxu1 %vm218_vm1, %v542_v26 }
 0x11c   :  { %13162 = vmatprep.mubr.msk.f32.mxu1 %vm218_vm1, %v16675_v27 }
 0x11f   :  { %13163 = vmatmul.mubr.msk.f32.gmra.mrb[6].mxu1 %vm218_vm1, %v16679_v30 }
 0x120   :  { %13173 = vmatprep.mubr.msk.f32.mxu1 %vm218_vm1, %v255_v3  ;;  %v12159_v3 = vld [vmem:[%s20343_s3 + $0xf8] sm:$0xff] }
 0x121   :  { %v13889_v4 = vpack.c.bf16 %v12159_v3, %v12158_v2 }
 0x123   :  { %13174 = vmatmul.mubr.msk.f32.vlgmr.msra.gmra.mrb[0].mxu1 %vm218_vm1, %v16621_v6 }
 0x124   :  { %13864 = vmatpush3.bf16.msra.mxu1 %v13861_v24  ;;  %13176 = vmatprep.mubr.msk.f32.mxu1 %vm218_vm1, %v16627_v9  ;;  %v12184_v24 = vld [vmem:[%s20281_s5 + $0x38] sm:$0xff] }
 0x125   :  { %13866 = vmatprep.subr.bf16.mxu1 %v13865_v33 }
 0x127   :  { %13177 = vmatmul.mubr.msk.f32.gmra.mrb[2].mxu1 %vm218_vm1, %v690_v39 }
 0x128   :  { %13179 = vmatprep.mubr.msk.f32.mxu1 %vm218_vm1, %v259_v10  ;;  %13868 = vmatpush3.bf16.msra.mxu1 %v13865_v33  ;;  %v16775_v10 = vld [vmem:[#allocation2 + $0x50] sm:$0xff] }
 0x129   :  { %13870 = vmatprep.subr.bf16.mxu1 %v13869_v38 }
 0x12b   :  { %13180 = vmatmul.mubr.msk.f32.gmra.mrb[4].mxu1 %vm218_vm1, %v16634_v11 }
 0x12c   :  { %13182 = vmatprep.mubr.msk.f32.mxu1 %vm218_vm1, %v16640_v14 }
 0x12f   :  { %13183 = vmatmul.mubr.msk.f32.gmra.mrb[6].mxu1 %vm218_vm1, %v694_v40 }
 0x130   :  { %13193 = vmatprep.mubr.msk.f32.mxu1 %vm218_vm1, %v16556_v48  ;;  %v844_v48 = vld [vmem:[#allocation2 + $0xa1] sm:$0xff] }
 0x133   :  { %13194 = vmatmul.mubr.msk.f32.vlgmr.msra.gmra.mrb[0].mxu1 %vm218_vm1, %v16568_v52 }
 0x134   :  { %13872 = vmatpush3.bf16.msra.mxu1 %v13869_v38  ;;  %13196 = vmatprep.mubr.msk.f32.mxu1 %vm218_vm1, %v16580_v57 }
 0x135   :  { %13874 = vmatprep.subr.bf16.mxu1 %v13873_v45 }
 0x137   :  { %13197 = vmatmul.mubr.msk.f32.gmra.mrb[2].mxu1 %vm218_vm1, %v840_v50 }
 0x138   :  { %13199 = vmatprep.mubr.msk.f32.mxu1 %vm218_vm1, %v16588_v58  ;;  %13876 = vmatpush3.bf16.msra.mxu1 %v13873_v45  ;;  %v13881_v58 = vpack.c.bf16 %v12147_v56, %v12146_v51  ;;  %v12203_v51 = vld [vmem:[%s20281_s5 + $0x50] sm:$0xff]  ;;  %v12204_v56 = vld [vmem:[%s20281_s5 + $0x58] sm:$0xff] }
 0x139   :  { %13878 = vmatprep.subr.bf16.mxu1 %v13877_v49 }
 0x13b   :  { %13200 = vmatmul.mubr.msk.f32.gmra.mrb[4].mxu1 %vm218_vm1, %v16592_v59 }
 0x13c   :  { %13202 = vmatprep.mubr.msk.f32.mxu1 %vm218_vm1, %v16596_v60 }
 0x13f   :  { %13203 = vmatmul.mubr.msk.f32.gmra.mrb[6].mxu1 %vm218_vm1, %v844_v48 }
 0x140   :  { %13213 = vmatprep.mubr.msk.f32.mxu1 %vm218_vm1, %v16652_v19 }
 0x143   :  { %13214 = vmatmul.mubr.msk.f32.vlgmr.msra.gmra.mrb[0].mxu1 %vm218_vm1, %v16662_v22 }
 0x144   :  { %13880 = vmatpush3.bf16.msra.mxu1 %v13877_v49  ;;  %13216 = vmatprep.mubr.msk.f32.mxu1 %vm218_vm1, %v16668_v25 }
 0x145   :  { %13882 = vmatprep.subr.bf16.mxu1 %v13881_v58 }
 0x147   :  { %13217 = vmatmul.mubr.msk.f32.gmra.mrb[2].mxu1 %vm218_vm1, %v990_v0 }
 0x148   :  { %13219 = vmatprep.mubr.msk.f32.mxu1 %vm218_vm1, %v542_v26  ;;  %13884 = vmatpush3.bf16.msra.mxu1 %v13881_v58  ;;  %v12201_v26 = vld [vmem:[%s20281_s5 + $0x40] sm:$0xff] }
 0x149   :  { %13886 = vmatprep.subr.bf16.mxu1 %v13885_v63 }
 0x14b   :  { %13220 = vmatmul.mubr.msk.f32.gmra.mrb[4].mxu1 %vm218_vm1, %v16675_v27 }
 0x14c   :  { %13222 = vmatprep.mubr.msk.f32.mxu1 %vm218_vm1, %v16679_v30 }
 0x14f   :  { %13223 = vmatmul.mubr.msk.f32.gmra.mrb[6].mxu1 %vm218_vm1, %v994_v1 }
 0x150   :  { %13233 = vmatprep.mubr.msk.f32.mxu1 %vm218_vm1, %v16621_v6  ;;  %v16784_v6 = vld [vmem:[#allocation2 + $0xb0] sm:$0xff] }
 0x153   :  { %13234 = vmatmul.mubr.msk.f32.vlgmr.msra.gmra.mrb[0].mxu1 %vm218_vm1, %v16627_v9  ;;  %v12170_v9 = vld [vmem:[%s20343_s3 + $0x110] sm:$0xff] }
 0x154   :  { %13888 = vmatpush3.bf16.msra.mxu1 %v13885_v63  ;;  %13236 = vmatprep.mubr.msk.f32.mxu1 %vm218_vm1, %v690_v39 }
 0x155   :  { %13890 = vmatprep.subr.bf16.mxu1 %v13889_v4 }
 0x157   :  { %13237 = vmatmul.mubr.msk.f32.gmra.mrb[2].mxu1 %vm218_vm1, %v16775_v10 }
 0x158   :  { %13239 = vmatprep.mubr.msk.f32.mxu1 %vm218_vm1, %v16634_v11  ;;  %13892 = vmatpush3.bf16.msra.mxu1 %v13889_v4  ;;  %v13897_v11 = vpack.c.bf16 %v12171_v16, %v12170_v9  ;;  %v12214_v9 = vld [vmem:[%s20281_s5 + $0x68] sm:$0xff] }
 0x159   :  { %13894 = vmatprep.subr.bf16.mxu1 %v13893_v15 }
 0x15b   :  { %13240 = vmatmul.mubr.msk.f32.gmra.mrb[4].mxu1 %vm218_vm1, %v16640_v14  ;;  %v16799_v14 = vld [vmem:[#allocation2 + $0x51] sm:$0xff] }
 0x15c   :  { %13242 = vmatprep.mubr.msk.f32.mxu1 %vm218_vm1, %v694_v40 }
 0x15f   :  { %13243 = vmatmul.mubr.msk.f32.gmra.mrb[6].mxu1 %vm218_vm1, %v16784_v6 }
 0x160   :  { %13253 = vmatprep.mubr.msk.f32.mxu1 %vm218_vm1, %v16568_v52  ;;  %v16808_v52 = vld [vmem:[#allocation2 + $0xb1] sm:$0xff] }
 0x163   :  { %13254 = vmatmul.mubr.msk.f32.vlgmr.msra.gmra.mrb[0].mxu1 %vm218_vm1, %v16580_v57  ;;  %v16817_v57 = vld [vmem:[#allocation2 + $0x52] sm:$0xff] }
 0x164   :  { %13896 = vmatpush3.bf16.msra.mxu1 %v13893_v15  ;;  %13256 = vmatprep.mubr.msk.f32.mxu1 %vm218_vm1, %v840_v50  ;;  %v12213_v15 = vld [vmem:[%s20281_s5 + $0x60] sm:$0xff] }
 0x165   :  { %13898 = vmatprep.subr.bf16.mxu1 %v13897_v11 }
 0x167   :  { %13257 = vmatmul.mubr.msk.f32.gmra.mrb[2].mxu1 %vm218_vm1, %v16799_v14 }
 0x168   :  { %13259 = vmatprep.mubr.msk.f32.mxu1 %vm218_vm1, %v16592_v59  ;;  %13900 = vmatpush3.bf16.msra.mxu1 %v13897_v11  ;;  %v16826_v59 = vld [vmem:[#allocation2 + $0xb2] sm:$0xff] }
 0x16b   :  { %13260 = vmatmul.mubr.msk.f32.gmra.mrb[4].mxu1 %vm218_vm1, %v16596_v60  ;;  %v12181_v60 = vld [vmem:[%s20281_s5 + $0x20] sm:$0xff] }
 0x16c   :  { %13262 = vmatprep.mubr.msk.f32.mxu1 %vm218_vm1, %v844_v48  ;;  %v13901_v19 = vpack.c.bf16 %v12182_v17, %v12181_v60 }
 0x16e   :  { %13902 = vmatprep.subr.bf16.mxu1 %v13901_v19 }
 0x16f   :  { %13263 = vmatmul.mubr.msk.f32.gmra.mrb[6].mxu1 %vm218_vm1, %v16808_v52 }
 0x170   :  { %13273 = vmatprep.mubr.msk.f32.mxu1 %vm218_vm1, %v16662_v22  ;;  %v13913_v22 = vpack.c.bf16 %v1630_v21, %v1629_v20  ;;  %v13925_v20 = vpack.c.bf16 %v12214_v9, %v12213_v15 }
 0x172   :  { %13914 = vmatprep.subr.bf16.mxu0 %v13913_v22 }
 0x173   :  { %13274 = vmatmul.mubr.msk.f32.vlgmr.msra.gmra.mrb[0].mxu1 %vm218_vm1, %v16668_v25  ;;  %13916 = vmatpush3.bf16.msra.mxu0 %v13913_v22 }
 0x174   :  { %13276 = vmatprep.mubr.msk.f32.mxu1 %vm218_vm1, %v990_v0  ;;  %13904 = vmatpush3.bf16.msra.mxu1 %v13901_v19  ;;  %v13921_v0 = vpack.c.bf16 %v12204_v56, %v12203_v51  ;;  %v12249_v56 = vld [vmem:[%s20281_s5 + $0xc0] sm:$0xff] }
 0x177   :  { %13277 = vmatmul.mubr.msk.f32.gmra.mrb[2].mxu1 %vm218_vm1, %v16817_v57 }
 0x178   :  { %13279 = vmatprep.mubr.msk.f32.mxu1 %vm218_vm1, %v16675_v27  ;;  %v12202_v27 = vld [vmem:[%s20281_s5 + $0x48] sm:$0xff] }
 0x17b   :  { %13280 = vmatmul.mubr.msk.f32.gmra.mrb[4].mxu1 %vm218_vm1, %v16679_v30  ;;  %v13917_v30 = vpack.c.bf16 %v12202_v27, %v12201_v26  ;;  %v12216_v26 = vld [vmem:[%s20281_s5 + $0x78] sm:$0xff] }
 0x17c   :  { %13282 = vmatprep.mubr.msk.f32.mxu1 %vm218_vm1, %v994_v1 }
 0x17d   :  { %13918 = vmatprep.subr.bf16.mxu0 %v13917_v30 }
 0x17f   :  { %13283 = vmatmul.mubr.msk.f32.gmra.mrb[6].mxu1 %vm218_vm1, %v16826_v59 }
 0x180   :  { %13293 = vmatprep.mubr.msk.f32.mxu1 %vm218_vm1, %v16511_v18  ;;  %v12183_v18 = vld [vmem:[%s20281_s5 + $0x30] sm:$0xff] }
 0x181   :  { %v13905_v25 = vpack.c.bf16 %v12184_v24, %v12183_v18 }
 0x183   :  { %13906 = vmatprep.subr.bf16.mxu1 %v13905_v25 }
 0x184   :  { %13908 = vmatpush3.bf16.msra.mxu1 %v13905_v25 }
 0x246   :  { %v13275_v32 = vpop.f32.mrb[0].mxu1 }
 0x247   :  { %v1595_v33 = vadd.f32 %v13275_v32, %v12180_v31  ;;  %v1541_v36 = vpop.f32.mrb[1].mxu1  ;;  %v12226_v32 = vld [vmem:[%s20281_s5 + $0x88] sm:$0xff] }
 0x248   :  { %v1594_v37 = vadd.f32 %v12180_v31, %v1541_v36 }
 0x249   :  { %v1603_v38 = vmax.f32 %v1595_v33, 0.0 }
 0x24a   :  { %v1602_v39 = vmax.f32 %v1594_v37, 0.0  ;;  %v13278_v40 = vpop.f32.mrb[2].mxu1 }
 0x24b   :  { %1612 = vst.msk [vmem:[#allocation2 + $0x21] sm:$0xff] %vm218_vm1, %v1603_v38  ;;  %v1597_v41 = vadd.f32 %v13278_v40, %v12180_v31  ;;  %v1551_v44 = vpop.f32.mrb[3].mxu1  ;;  %v12227_v40 = vld [vmem:[%s20281_s5 + $0x90] sm:$0xff] }
 0x24c   :  { %1611 = vst.msk [vmem:[#allocation2 + $0x11] sm:$0xff] %vm218_vm1, %v1602_v39  ;;  %v1596_v45 = vadd.f32 %v12180_v31, %v1551_v44  ;;  %v12237_v44 = vld [vmem:[%s20281_s5 + $0xa0] sm:$0xff] }
 0x24d   :  { %v1605_v46 = vmax.f32 %v1597_v41, 0.0 }
 0x24e   :  { %v1604_v47 = vmax.f32 %v1596_v45, 0.0  ;;  %v13281_v49 = vpop.f32.mrb[4].mxu1  ;;  %v12238_v45 = vld [vmem:[%s20281_s5 + $0xa8] sm:$0xff] }
 0x24f   :  { %1614 = vst.msk [vmem:[#allocation2 + $0x41] sm:$0xff] %vm218_vm1, %v1605_v46  ;;  %v1599_v50 = vadd.f32 %v13281_v49, %v12180_v31  ;;  %v1561_v48 = vpop.f32.mrb[5].mxu1  ;;  %v13941_v46 = vpack.c.bf16 %v12238_v45, %v12237_v44 }
 0x250   :  { %1613 = vst.msk [vmem:[#allocation2 + $0x31] sm:$0xff] %vm218_vm1, %v1604_v47  ;;  %v1598_v58 = vadd.f32 %v12180_v31, %v1561_v48  ;;  %v12240_v48 = vld [vmem:[%s20281_s5 + $0xb8] sm:$0xff] }
 0x251   :  { %v1607_v61 = vmax.f32 %v1599_v50, 0.0  ;;  %v12239_v50 = vld [vmem:[%s20281_s5 + $0xb0] sm:$0xff] }
 0x252   :  { %v1606_v62 = vmax.f32 %v1598_v58, 0.0  ;;  %v13284_v63 = vpop.f32.mrb[6].mxu1  ;;  %v16879_v8 = vld [vmem:[#allocation2 + $0x21] sm:$0xff]  ;;  %v13945_v51 = vpack.c.bf16 %v12240_v48, %v12239_v50 }
 0x253   :  { %1616 = vst.msk [vmem:[#allocation2 + $0x81] sm:$0xff] %vm218_vm1, %v1607_v61  ;;  %v1601_v1 = vadd.f32 %v13284_v63, %v12180_v31  ;;  %v1571_v2 = vpop.f32.mrb[7].mxu1  ;;  %v16870_v3 = vld [vmem:[#allocation2 + $0x11] sm:$0xff]  ;;  %v16889_v11 = vld [vmem:[#allocation2 + $0x20] sm:$0xff]  ;;  %v12250_v58 = vld [vmem:[%s20281_s5 + $0xc8] sm:$0xff] }
 0x254   :  { %v16872_v4 = vld [vmem:[#allocation2 + $0x10] sm:$0xff]  ;;  %1615 = vst.msk [vmem:[#allocation2 + $0x71] sm:$0xff] %vm218_vm1, %v1606_v62  ;;  %v1600_v5 = vadd.f32 %v12180_v31, %v1571_v2  ;;  %13294 = vmatmul.mubr.msk.f32.vlgmr.msra.gmra.mrb[8].mxu1 %vm218_vm1, %v16870_v3  ;;  %v12225_v31 = vld [vmem:[%s20281_s5 + $0x80] sm:$0xff]  ;;  %v13949_v61 = vpack.c.bf16 %v12250_v58, %v12249_v56 }
 0x255   :  { %13314 = vmatmul.mubr.msk.f32.vlgmr.msra.gmra.mrb[8].mxu0 %vm218_vm1, %v16872_v4  ;;  %v1609_v16 = vmax.f32 %v1601_v1, 0.0  ;;  %13296 = vmatprep.mubr.msk.f32.mxu1 %vm218_vm1, %v16879_v8  ;;  %v16943_v33 = vld [vmem:[#allocation2 + $0x22] sm:$0xff]  ;;  %v12252_v1 = vld [vmem:[%s20281_s5 + $0xd8] sm:$0xff] }
 0x256   :  { %13920 = vmatpush3.bf16.msra.mxu0 %v13917_v30  ;;  %v1608_v60 = vmax.f32 %v1600_v5, 0.0  ;;  %13316 = vmatprep.mubr.msk.f32.mxu0 %vm218_vm1, %v16889_v11  ;;  %v1903_v30 = vld [vmem:[#allocation2 + $0x12] sm:$0xff]  ;;  %v2055_v47 = vld [vmem:[#allocation2 + $0x40] sm:$0xff] }
 0x257   :  { %13922 = vmatprep.subr.bf16.mxu0 %v13921_v0  ;;  %1618 = vst.msk [vmem:[#allocation2 + $0xa1] sm:$0xff] %vm218_vm1, %v1609_v16  ;;  %v16894_v17 = vld [vmem:[#allocation2 + $0x31] sm:$0xff]  ;;  %v2205_v62 = vld [vmem:[#allocation2 + $0x41] sm:$0xff] }
 0x258   :  { %v16896_v19 = vld [vmem:[#allocation2 + $0x30] sm:$0xff]  ;;  %1617 = vst.msk [vmem:[#allocation2 + $0x91] sm:$0xff] %vm218_vm1, %v1608_v60  ;;  %13297 = vmatmul.mubr.msk.f32.gmra.mrb[10].mxu1 %vm218_vm1, %v16894_v17  ;;  %v2355_v15 = vld [vmem:[#allocation2 + $0x42] sm:$0xff]  ;;  %v12264_v60 = vld [vmem:[%s20281_s5 + $0xf8] sm:$0xff] }
 0x259   :  { %13317 = vmatmul.mubr.msk.f32.gmra.mrb[10].mxu0 %vm218_vm1, %v16896_v19  ;;  %13299 = vmatprep.mubr.msk.f32.mxu1 %vm218_vm1, %v16576_v55  ;;  %v12215_v55 = vld [vmem:[%s20281_s5 + $0x70] sm:$0xff] }
 0x25a   :  { %13319 = vmatprep.mubr.msk.f32.mxu0 %vm218_vm1, %v16625_v7  ;;  %13924 = vmatpush3.bf16.msra.mxu0 %v13921_v0  ;;  %v16912_v22 = vld [vmem:[#allocation2 + $0x81] sm:$0xff]  ;;  %v13929_v27 = vpack.c.bf16 %v12216_v26, %v12215_v55  ;;  %v16947_v36 = vld [vmem:[#allocation2 + $0x32] sm:$0xff] }
 0x25b   :  { %v16907_v21 = vld [vmem:[#allocation2 + $0x71] sm:$0xff]  ;;  %13926 = vmatprep.subr.bf16.mxu0 %v13925_v20  ;;  %v16914_v24 = vld [vmem:[#allocation2 + $0x80] sm:$0xff] }
 0x25c   :  { %v1624_v18 = vld [vmem:[#allocation2 + $0x70] sm:$0xff]  ;;  %13300 = vmatmul.mubr.msk.f32.gmra.mrb[12].mxu1 %vm218_vm1, %v16907_v21  ;;  %v16954_v38 = vld [vmem:[#allocation2 + $0x82] sm:$0xff] }
 0x25d   :  { %13320 = vmatmul.mubr.msk.f32.gmra.mrb[12].mxu0 %vm218_vm1, %v1624_v18  ;;  %13302 = vmatprep.mubr.msk.f32.mxu1 %vm218_vm1, %v16912_v22  ;;  %v1907_v37 = vld [vmem:[#allocation2 + $0x72] sm:$0xff]  ;;  %v2999_v26 = vld [vmem:[%s20283_s7] sm:$0xff] }
 0x25e   :  { %13322 = vmatprep.mubr.msk.f32.mxu0 %vm218_vm1, %v16914_v24  ;;  %v2059_v49 = vld [vmem:[#allocation2 + $0xa0] sm:$0xff]  ;;  %v12251_v0 = vld [vmem:[%s20281_s5 + $0xd0] sm:$0xff] }
 0x25f   :  { %v16923_v7 = vld [vmem:[#allocation2 + $0x91] sm:$0xff]  ;;  %v2209_v63 = vld [vmem:[#allocation2 + $0xa1] sm:$0xff]  ;;  %v13953_v2 = vpack.c.bf16 %v12252_v1, %v12251_v0 }
 0x260   :  { %v16925_v25 = vld [vmem:[#allocation2 + $0x90] sm:$0xff]  ;;  %13303 = vmatmul.mubr.msk.f32.gmra.mrb[14].mxu1 %vm218_vm1, %v16923_v7  ;;  %v2359_v9 = vld [vmem:[#allocation2 + $0xa2] sm:$0xff] }
 0x261   :  { %13323 = vmatmul.mubr.msk.f32.gmra.mrb[14].mxu0 %vm218_vm1, %v16925_v25  ;;  %v16958_v39 = vld [vmem:[#allocation2 + $0x92] sm:$0xff] }
 0x262   :  { %13333 = vmatprep.mubr.msk.f32.mxu0 %vm218_vm1, %v16638_v12  ;;  %v13933_v12 = vpack.c.bf16 %v12226_v32, %v12225_v31  ;;  %v12263_v16 = vld [vmem:[%s20281_s5 + $0xf0] sm:$0xff] }
 0x265   :  { %13334 = vmatmul.mubr.msk.f32.vlgmr.msra.gmra.mrb[8].mxu0 %vm218_vm1, %v1903_v30 }
 0x266   :  { %13928 = vmatpush3.bf16.msra.mxu0 %v13925_v20  ;;  %13336 = vmatprep.mubr.msk.f32.mxu0 %vm218_vm1, %v16943_v33  ;;  %v13961_v20 = vpack.c.bf16 %v12264_v60, %v12263_v16 }
 0x267   :  { %13930 = vmatprep.subr.bf16.mxu0 %v13929_v27 }
 0x269   :  { %13337 = vmatmul.mubr.msk.f32.gmra.mrb[10].mxu0 %vm218_vm1, %v16947_v36 }
 0x26a   :  { %13339 = vmatprep.mubr.msk.f32.mxu0 %vm218_vm1, %v16666_v23  ;;  %13932 = vmatpush3.bf16.msra.mxu0 %v13929_v27  ;;  %v12228_v23 = vld [vmem:[%s20281_s5 + $0x98] sm:$0xff]  ;;  %v3000_v27 = vld [vmem:[%s20283_s7 + $0x8] sm:$0xff] }
 0x26b   :  { %13934 = vmatprep.subr.bf16.mxu0 %v13933_v12  ;;  %v13937_v41 = vpack.c.bf16 %v12228_v23, %v12227_v40 }
 0x26d   :  { %13340 = vmatmul.mubr.msk.f32.gmra.mrb[12].mxu0 %vm218_vm1, %v1907_v37 }
 0x26e   :  { %13342 = vmatprep.mubr.msk.f32.mxu0 %vm218_vm1, %v16954_v38 }
 0x271   :  { %13343 = vmatmul.mubr.msk.f32.gmra.mrb[14].mxu0 %vm218_vm1, %v16958_v39 }
 0x272   :  { %13353 = vmatprep.mubr.msk.f32.mxu0 %vm218_vm1, %v16872_v4  ;;  %v12262_v4 = vld [vmem:[%s20281_s5 + $0xe8] sm:$0xff] }
 0x275   :  { %13354 = vmatmul.mubr.msk.f32.vlgmr.msra.gmra.mrb[8].mxu0 %vm218_vm1, %v16889_v11 }
 0x276   :  { %13936 = vmatpush3.bf16.msra.mxu0 %v13933_v12  ;;  %13356 = vmatprep.mubr.msk.f32.mxu0 %vm218_vm1, %v16896_v19 }
 0x277   :  { %13938 = vmatprep.subr.bf16.mxu0 %v13937_v41 }
 0x279   :  { %13357 = vmatmul.mubr.msk.f32.gmra.mrb[10].mxu0 %vm218_vm1, %v2055_v47 }
 0x27a   :  { %13359 = vmatprep.mubr.msk.f32.mxu0 %vm218_vm1, %v1624_v18  ;;  %13940 = vmatpush3.bf16.msra.mxu0 %v13937_v41  ;;  %v12274_v18 = vld [vmem:[%s20281_s5 + $0x108] sm:$0xff] }
 0x27b   :  { %13942 = vmatprep.subr.bf16.mxu0 %v13941_v46 }
 0x27d   :  { %13360 = vmatmul.mubr.msk.f32.gmra.mrb[12].mxu0 %vm218_vm1, %v16914_v24 }
 0x27e   :  { %13362 = vmatprep.mubr.msk.f32.mxu0 %vm218_vm1, %v16925_v25 }
 0x281   :  { %13363 = vmatmul.mubr.msk.f32.gmra.mrb[14].mxu0 %vm218_vm1, %v2059_v49 }
 0x282   :  { %13373 = vmatprep.mubr.msk.f32.mxu0 %vm218_vm1, %v16870_v3  ;;  %v12261_v3 = vld [vmem:[%s20281_s5 + $0xe0] sm:$0xff] }
 0x283   :  { %v13957_v5 = vpack.c.bf16 %v12262_v4, %v12261_v3 }
 0x285   :  { %13374 = vmatmul.mubr.msk.f32.vlgmr.msra.gmra.mrb[8].mxu0 %vm218_vm1, %v16879_v8 }
 0x286   :  { %13944 = vmatpush3.bf16.msra.mxu0 %v13941_v46  ;;  %13376 = vmatprep.mubr.msk.f32.mxu0 %vm218_vm1, %v16894_v17 }
 0x287   :  { %13946 = vmatprep.subr.bf16.mxu0 %v13945_v51 }
 0x289   :  { %13377 = vmatmul.mubr.msk.f32.gmra.mrb[10].mxu0 %vm218_vm1, %v2205_v62 }
 0x28a   :  { %13379 = vmatprep.mubr.msk.f32.mxu0 %vm218_vm1, %v16907_v21  ;;  %13948 = vmatpush3.bf16.msra.mxu0 %v13945_v51  ;;  %v12273_v21 = vld [vmem:[%s20281_s5 + $0x100] sm:$0xff] }
 0x28b   :  { %13950 = vmatprep.subr.bf16.mxu0 %v13949_v61  ;;  %v13965_v55 = vpack.c.bf16 %v12274_v18, %v12273_v21  ;;  %v3001_v21 = vld [vmem:[%s20283_s7 + $0x10] sm:$0xff]  ;;  %v3002_v18 = vld [vmem:[%s20283_s7 + $0x18] sm:$0xff] }
 0x28d   :  { %13380 = vmatmul.mubr.msk.f32.gmra.mrb[12].mxu0 %vm218_vm1, %v16912_v22 }
 0x28e   :  { %13382 = vmatprep.mubr.msk.f32.mxu0 %vm218_vm1, %v16923_v7 }
 0x291   :  { %13383 = vmatmul.mubr.msk.f32.gmra.mrb[14].mxu0 %vm218_vm1, %v2209_v63 }
 0x292   :  { %13393 = vmatprep.mubr.msk.f32.mxu0 %vm218_vm1, %v1903_v30  ;;  %v13981_v30 = vpack.c.bf16 %v3000_v27, %v2999_v26  ;;  %v17190_v26 = vld [vmem:[#allocation2 + $0x61] sm:$0xff] }
 0x295   :  { %13394 = vmatmul.mubr.msk.f32.vlgmr.msra.gmra.mrb[8].mxu0 %vm218_vm1, %v16943_v33 }
 0x296   :  { %13952 = vmatpush3.bf16.msra.mxu0 %v13949_v61  ;;  %13396 = vmatprep.mubr.msk.f32.mxu0 %vm218_vm1, %v16947_v36 }
 0x297   :  { %13954 = vmatprep.subr.bf16.mxu0 %v13953_v2 }
 0x299   :  { %13397 = vmatmul.mubr.msk.f32.gmra.mrb[10].mxu0 %vm218_vm1, %v2355_v15 }
 0x29a   :  { %13399 = vmatprep.mubr.msk.f32.mxu0 %vm218_vm1, %v1907_v37  ;;  %13956 = vmatpush3.bf16.msra.mxu0 %v13953_v2 }
 0x29b   :  { %13958 = vmatprep.subr.bf16.mxu0 %v13957_v5 }
 0x29d   :  { %13400 = vmatmul.mubr.msk.f32.gmra.mrb[12].mxu0 %vm218_vm1, %v16954_v38 }
 0x29e   :  { %13402 = vmatprep.mubr.msk.f32.mxu0 %vm218_vm1, %v16958_v39 }
 0x2a1   :  { %13403 = vmatmul.mubr.msk.f32.gmra.mrb[14].mxu0 %vm218_vm1, %v2359_v9 }
 0x2a2   :  { %13413 = vmatprep.mubr.msk.f32.mxu0 %vm218_vm1, %v16889_v11  ;;  %v12275_v11 = vld [vmem:[%s20281_s5 + $0x110] sm:$0xff] }
 0x2a5   :  { %13414 = vmatmul.mubr.msk.f32.vlgmr.msra.gmra.mrb[8].mxu0 %vm218_vm1, %v16896_v19  ;;  %v12276_v19 = vld [vmem:[%s20281_s5 + $0x118] sm:$0xff] }
 0x2a6   :  { %13960 = vmatpush3.bf16.msra.mxu0 %v13957_v5  ;;  %13416 = vmatprep.mubr.msk.f32.mxu0 %vm218_vm1, %v2055_v47 }
 0x2a7   :  { %13962 = vmatprep.subr.bf16.mxu0 %v13961_v20 }
 0x2a9   :  { %13417 = vmatmul.mubr.msk.f32.gmra.mrb[10].mxu0 %vm218_vm1, %v16775_v10  ;;  %v13969_v10 = vpack.c.bf16 %v12276_v19, %v12275_v11 }
 0x2aa   :  { %13419 = vmatprep.mubr.msk.f32.mxu0 %vm218_vm1, %v16914_v24  ;;  %13964 = vmatpush3.bf16.msra.mxu0 %v13961_v20  ;;  %v3003_v24 = vld [vmem:[#allocation2 + $0x1] sm:$0xff] }
 0x2ab   :  { %13966 = vmatprep.subr.bf16.mxu0 %v13965_v55  ;;  %13473 = vmatprep.mubr.msk.f32.mxu1 %vm218_vm1, %v3003_v24 }
 0x2ad   :  { %13420 = vmatmul.mubr.msk.f32.gmra.mrb[12].mxu0 %vm218_vm1, %v16925_v25 }
 0x2ae   :  { %13422 = vmatprep.mubr.msk.f32.mxu0 %vm218_vm1, %v2059_v49 }
 0x2b1   :  { %13423 = vmatmul.mubr.msk.f32.gmra.mrb[14].mxu0 %vm218_vm1, %v16784_v6  ;;  %v12286_v6 = vld [vmem:[%s20283_s7 + $0x20] sm:$0xff] }
 0x2b2   :  { %13433 = vmatprep.mubr.msk.f32.mxu0 %vm218_vm1, %v16879_v8  ;;  %v12289_v8 = vld [vmem:[%s20283_s7 + $0x38] sm:$0xff] }
 0x2b5   :  { %13434 = vmatmul.mubr.msk.f32.vlgmr.msra.gmra.mrb[8].mxu0 %vm218_vm1, %v16894_v17 }
 0x2b6   :  { %13968 = vmatpush3.bf16.msra.mxu0 %v13965_v55  ;;  %13436 = vmatprep.mubr.msk.f32.mxu0 %vm218_vm1, %v2205_v62 }
 0x2b7   :  { %13970 = vmatprep.subr.bf16.mxu0 %v13969_v10 }
 0x2b9   :  { %13437 = vmatmul.mubr.msk.f32.gmra.mrb[10].mxu0 %vm218_vm1, %v16799_v14  ;;  %v12287_v14 = vld [vmem:[%s20283_s7 + $0x28] sm:$0xff] }
 0x2ba   :  { %13439 = vmatprep.mubr.msk.f32.mxu0 %vm218_vm1, %v16912_v22  ;;  %13972 = vmatpush3.bf16.msra.mxu0 %v13969_v10 }
 0x2bd   :  { %13440 = vmatmul.mubr.msk.f32.gmra.mrb[12].mxu0 %vm218_vm1, %v16923_v7 }
 0x2be   :  { %13442 = vmatprep.mubr.msk.f32.mxu0 %vm218_vm1, %v2209_v63 }
 0x2c1   :  { %13443 = vmatmul.mubr.msk.f32.gmra.mrb[14].mxu0 %vm218_vm1, %v16808_v52  ;;  %v13973_v52 = vpack.c.bf16 %v12287_v14, %v12286_v6 }
 0x2c2   :  { %13453 = vmatprep.mubr.msk.f32.mxu0 %vm218_vm1, %v16943_v33 }
 0x2c3   :  { %13974 = vmatprep.subr.bf16.mxu1 %v13973_v52 }
 0x2c4   :  { %13976 = vmatpush3.bf16.msra.mxu1 %v13973_v52  ;;  %v13985_v52 = vpack.c.bf16 %v3002_v18, %v3001_v21  ;;  %v12331_v21 = vld [vmem:[%s20283_s7 + $0x88] sm:$0xff] }
 0x2c5   :  { %13454 = vmatmul.mubr.msk.f32.vlgmr.msra.gmra.mrb[8].mxu0 %vm218_vm1, %v16947_v36  ;;  %v12285_v36 = vld [vmem:[%s20282_s6] ss:$0 sm:$0xff] }
 0x2c6   :  { %13456 = vmatprep.mubr.msk.f32.mxu0 %vm218_vm1, %v2355_v15 }
 0x2c9   :  { %13457 = vmatmul.mubr.msk.f32.gmra.mrb[10].mxu0 %vm218_vm1, %v16817_v57  ;;  %v12288_v57 = vld [vmem:[%s20283_s7 + $0x30] sm:$0xff] }
 0x2ca   :  { %13459 = vmatprep.mubr.msk.f32.mxu0 %vm218_vm1, %v16954_v38 }
 0x2cd   :  { %13460 = vmatmul.mubr.msk.f32.gmra.mrb[12].mxu0 %vm218_vm1, %v16958_v39 }
 0x2ce   :  { %13462 = vmatprep.mubr.msk.f32.mxu0 %vm218_vm1, %v2359_v9 }
 0x2d1   :  { %13463 = vmatmul.mubr.msk.f32.gmra.mrb[14].mxu0 %vm218_vm1, %v16826_v59  ;;  %v13977_v59 = vpack.c.bf16 %v12289_v8, %v12288_v57 }
 0x2d2   :  { %13653 = vmatprep.mubr.msk.f32.mxu0 %vm218_vm1, %v3003_v24 }
 0x2d3   :  { %13978 = vmatprep.subr.bf16.mxu1 %v13977_v59 }
 0x2d4   :  { %13980 = vmatpush3.bf16.msra.mxu1 %v13977_v59  ;;  %v12306_v59 = vld [vmem:[%s20283_s7 + $0x40] sm:$0xff] }
 0x2d5   :  { %13982 = vmatprep.subr.bf16.mxu1 %v13981_v30 }
 0x327   :  { %v13295_v17 = vpop.f32.mrb[8].mxu1 }
 0x328   :  { %v1734_v22 = vpop.f32.mrb[9].mxu1 }
 0x32b   :  { %v13298_v7 = vpop.f32.mrb[10].mxu1 }
 0x32c   :  { %v1744_v25 = vpop.f32.mrb[11].mxu1 }
 0x32f   :  { %v13301_v31 = vpop.f32.mrb[12].mxu1 }
 0x330   :  { %v1754_v32 = vpop.f32.mrb[13].mxu1 }
 0x333   :  { %v13304_v33 = vpop.f32.mrb[14].mxu1 }
 0x334   :  { %v1764_v12 = vpop.f32.mrb[15].mxu1 }
 0x398   :  { %v13455_v37 = vpop.f32.mrb[8].mxu0 }
 0x399   :  { %v15251_v38 = vadd.f32 %v13455_v37, %v13295_v17  ;;  %v2905_v39 = vpop.f32.mrb[9].mxu0  ;;  %v12307_v17 = vld [vmem:[%s20283_s7 + $0x48] sm:$0xff]  ;;  %v12309_v37 = vld [vmem:[%s20283_s7 + $0x58] sm:$0xff] }
 0x39a   :  { %v15252_v40 = vadd.f32 %v2905_v39, %v1734_v22  ;;  %v13989_v27 = vpack.c.bf16 %v12307_v17, %v12306_v59  ;;  %v12392_v39 = vld [vmem:[%s20285_s9 + $0x28] sm:$0xff] }
 0x39b   :  { %v2959_v23 = vadd.f32 %v15251_v38, %v12285_v36  ;;  %v12391_v38 = vld [vmem:[%s20285_s9 + $0x20] sm:$0xff] }
 0x39c   :  { %v2958_v41 = vadd.f32 %v15252_v40, %v12285_v36  ;;  %v13458_v44 = vpop.f32.mrb[10].mxu0  ;;  %v14045_v40 = vpack.c.bf16 %v12392_v39, %v12391_v38  ;;  %v12342_v38 = vld [vmem:[%s20283_s7 + $0xa0] sm:$0xff]  ;;  %v12343_v39 = vld [vmem:[%s20283_s7 + $0xa8] sm:$0xff] }
 0x39d   :  { %v17121_v45 = vadd.f32 %v2959_v23, %v16528_v28  ;;  %v15253_v46 = vadd.f32 %v13458_v44, %v13298_v7  ;;  %v2915_v47 = vpop.f32.mrb[11].mxu0  ;;  %v12318_v44 = vld [vmem:[%s20283_s7 + $0x60] sm:$0xff] }
 0x39e   :  { %v17124_v49 = vadd.f32 %v2958_v41, %v16530_v29  ;;  %v15254_v50 = vadd.f32 %v2915_v47, %v1744_v25  ;;  %14046 = vmatprep.subr.bf16.mxu0 %v14045_v40 }
 0x39f   :  { %v2975_v48 = vmax.f32 %v17121_v45, 0.0  ;;  %v2961_v51 = vadd.f32 %v15253_v46, %v12285_v36  ;;  %v12319_v46 = vld [vmem:[%s20283_s7 + $0x68] sm:$0xff]  ;;  %14048 = vmatpush3.bf16.msra.mxu0 %v14045_v40  ;;  %v14013_v40 = vpack.c.bf16 %v12343_v39, %v12342_v38  ;;  %v12368_v38 = vld [vmem:[%s20283_s7 + $0xf0] sm:$0xff]  ;;  %v12369_v39 = vld [vmem:[%s20283_s7 + $0xf8] sm:$0xff] }
 0x3a0   :  { %v2974_v56 = vmax.f32 %v17124_v49, 0.0  ;;  %v2960_v58 = vadd.f32 %v15254_v50, %v12285_v36  ;;  %v13461_v61 = vpop.f32.mrb[12].mxu0  ;;  %v17243_v50 = vld [vmem:[#allocation2 + $0x60] sm:$0xff] }
 0x3a1   :  { %2984 = vst.msk [vmem:[#allocation2 + $0x21] sm:$0xff] %vm218_vm1, %v2975_v48  ;;  %v17132_v62 = vadd.f32 %v2961_v51, %v16536_v34  ;;  %v15255_v63 = vadd.f32 %v13461_v61, %v13301_v31  ;;  %v2925_v0 = vpop.f32.mrb[13].mxu0  ;;  %v13997_v51 = vpack.c.bf16 %v12319_v46, %v12318_v44  ;;  %v12344_v44 = vld [vmem:[%s20283_s7 + $0xb0] sm:$0xff]  ;;  %v12345_v46 = vld [vmem:[%s20283_s7 + $0xb8] sm:$0xff] }
 0x3a2   :  { %2983 = vst.msk [vmem:[#allocation2 + $0x11] sm:$0xff] %vm218_vm1, %v2974_v56  ;;  %v17138_v1 = vadd.f32 %v2960_v58, %v16538_v35  ;;  %v15256_v2 = vadd.f32 %v2925_v0, %v1754_v32  ;;  %v17256_v0 = vld [vmem:[#allocation2 + $0x2] sm:$0xff] }
 0x3a3   :  { %v2977_v3 = vmax.f32 %v17132_v62, 0.0  ;;  %v2963_v4 = vadd.f32 %v15255_v63, %v12285_v36 }
 0x3a4   :  { %v2976_v5 = vmax.f32 %v17138_v1, 0.0  ;;  %v2962_v15 = vadd.f32 %v15256_v2, %v12285_v36  ;;  %v13464_v9 = vpop.f32.mrb[14].mxu0 }
 0x3a5   :  { %2986 = vst.msk [vmem:[#allocation2 + $0x41] sm:$0xff] %vm218_vm1, %v2977_v3  ;;  %v17146_v16 = vadd.f32 %v2963_v4, %v16550_v42  ;;  %v15257_v60 = vadd.f32 %v13464_v9, %v13304_v33  ;;  %v2935_v20 = vpop.f32.mrb[15].mxu0  ;;  %v17212_v33 = vld [vmem:[#allocation2] sm:$0xff]  ;;  %v12320_v4 = vld [vmem:[%s20283_s7 + $0x70] sm:$0xff] }
 0x3a6   :  { %2985 = vst.msk [vmem:[#allocation2 + $0x31] sm:$0xff] %vm218_vm1, %v2976_v5  ;;  %v17158_v55 = vadd.f32 %v2962_v15, %v16552_v43  ;;  %v15258_v11 = vadd.f32 %v2935_v20, %v1764_v12  ;;  %v12321_v15 = vld [vmem:[%s20283_s7 + $0x78] sm:$0xff]  ;;  %v12330_v20 = vld [vmem:[%s20283_s7 + $0x80] sm:$0xff] }
 0x3a7   :  { %v2979_v19 = vmax.f32 %v17146_v16, 0.0  ;;  %v2965_v10 = vadd.f32 %v15257_v60, %v12285_v36  ;;  %v14001_v9 = vpack.c.bf16 %v12321_v15, %v12320_v4  ;;  %v12355_v4 = vld [vmem:[%s20283_s7 + $0xc8] sm:$0xff] }
 0x3a8   :  { %v2978_v6 = vmax.f32 %v17158_v55, 0.0  ;;  %v2964_v14 = vadd.f32 %v15258_v11, %v12285_v36  ;;  %v17184_v24 = vld [vmem:[#allocation2 + $0x21] sm:$0xff]  ;;  %v12308_v36 = vld [vmem:[%s20283_s7 + $0x50] sm:$0xff] }
 0x3a9   :  { %2988 = vst.msk [vmem:[#allocation2 + $0x81] sm:$0xff] %vm218_vm1, %v2979_v19  ;;  %v17166_v57 = vadd.f32 %v2965_v10, %v16570_v53  ;;  %v17168_v8 = vld [vmem:[#allocation2 + $0x11] sm:$0xff]  ;;  %v13993_v23 = vpack.c.bf16 %v12309_v37, %v12308_v36  ;;  %v17239_v47 = vld [vmem:[#allocation2 + $0x20] sm:$0xff]  ;;  %v14005_v10 = vpack.c.bf16 %v12331_v21, %v12330_v20 }
 0x3aa   :  { %2987 = vst.msk [vmem:[#allocation2 + $0x71] sm:$0xff] %vm218_vm1, %v2978_v6  ;;  %v17180_v22 = vadd.f32 %v2964_v14, %v16574_v54  ;;  %13474 = vmatmul.mubr.msk.f32.vlgmr.msra.gmra.mrb[16].mxu1 %vm218_vm1, %v17168_v8  ;;  %v2992_v41 = vld [vmem:[#allocation2 + $0x10] sm:$0xff]  ;;  %v17280_v18 = vld [vmem:[#allocation2 + $0x22] sm:$0xff]  ;;  %v12333_v36 = vld [vmem:[%s20283_s7 + $0x98] sm:$0xff] }
 0x3ab   :  { %v2981_v7 = vmax.f32 %v17166_v57, 0.0  ;;  %13984 = vmatpush3.bf16.msra.mxu1 %v13981_v30  ;;  %13476 = vmatprep.mubr.msk.f32.mxu1 %vm218_vm1, %v17184_v24  ;;  %v17270_v60 = vld [vmem:[#allocation2 + $0x12] sm:$0xff]  ;;  %v17284_v11 = vld [vmem:[#allocation2 + $0x62] sm:$0xff] }
 0x3ac   :  { %v2980_v25 = vmax.f32 %v17180_v22, 0.0  ;;  %13986 = vmatprep.subr.bf16.mxu1 %v13985_v52  ;;  %v12356_v20 = vld [vmem:[%s20283_s7 + $0xd0] sm:$0xff]  ;;  %v12357_v21 = vld [vmem:[%s20283_s7 + $0xd8] sm:$0xff] }
 0x3ad   :  { %2990 = vst.msk [vmem:[#allocation2 + $0xa1] sm:$0xff] %vm218_vm1, %v2981_v7  ;;  %v17195_v31 = vld [vmem:[#allocation2 + $0x31] sm:$0xff] }
 0x3ae   :  { %2989 = vst.msk [vmem:[#allocation2 + $0x91] sm:$0xff] %vm218_vm1, %v2980_v25  ;;  %13477 = vmatmul.mubr.msk.f32.gmra.mrb[18].mxu1 %vm218_vm1, %v17195_v31  ;;  %v17245_v58 = vld [vmem:[#allocation2 + $0x30] sm:$0xff]  ;;  %v5758_v57 = vld [vmem:[%s20287_s11 + $0x78] sm:$0xff] }
 0x3af   :  { %13479 = vmatprep.mubr.msk.f32.mxu1 %vm218_vm1, %v17190_v26  ;;  %13988 = vmatpush3.bf16.msra.mxu1 %v13985_v52  ;;  %v17286_v14 = vld [vmem:[#allocation2 + $0x32] sm:$0xff] }
 0x3b0   :  { %13990 = vmatprep.subr.bf16.mxu1 %v13989_v27  ;;  %v17208_v32 = vld [vmem:[#allocation2 + $0x81] sm:$0xff] }
 0x3b1   :  { %v17204_v30 = vld [vmem:[#allocation2 + $0x71] sm:$0xff]  ;;  %v17252_v63 = vld [vmem:[#allocation2 + $0x80] sm:$0xff] }
 0x3b2   :  { %13480 = vmatmul.mubr.msk.f32.gmra.mrb[20].mxu1 %vm218_vm1, %v17204_v30  ;;  %v2996_v61 = vld [vmem:[#allocation2 + $0x70] sm:$0xff]  ;;  %v17293_v59 = vld [vmem:[#allocation2 + $0x82] sm:$0xff] }
 0x3b3   :  { %13482 = vmatprep.mubr.msk.f32.mxu1 %vm218_vm1, %v17208_v32  ;;  %v3279_v52 = vld [vmem:[#allocation2 + $0x72] sm:$0xff] }
 0x3b5   :  { %v17214_v12 = vld [vmem:[#allocation2 + $0x91] sm:$0xff] }
 0x3b6   :  { %13483 = vmatmul.mubr.msk.f32.gmra.mrb[22].mxu1 %vm218_vm1, %v17214_v12  ;;  %v17258_v2 = vld [vmem:[#allocation2 + $0x90] sm:$0xff] }
 0x3b7   :  { %13493 = vmatprep.mubr.msk.f32.mxu1 %vm218_vm1, %v17212_v33  ;;  %v17297_v17 = vld [vmem:[#allocation2 + $0x92] sm:$0xff] }
 0x3ba   :  { %13494 = vmatmul.mubr.msk.f32.vlgmr.msra.gmra.mrb[16].mxu1 %vm218_vm1, %v2992_v41 }
 0x3bb   :  { %13992 = vmatpush3.bf16.msra.mxu1 %v13989_v27  ;;  %13496 = vmatprep.mubr.msk.f32.mxu1 %vm218_vm1, %v17239_v47  ;;  %v12332_v27 = vld [vmem:[%s20283_s7 + $0x90] sm:$0xff] }
 0x3bc   :  { %13994 = vmatprep.subr.bf16.mxu1 %v13993_v23  ;;  %v14009_v37 = vpack.c.bf16 %v12333_v36, %v12332_v27  ;;  %v12367_v27 = vld [vmem:[%s20283_s7 + $0xe8] sm:$0xff] }
 0x3be   :  { %13497 = vmatmul.mubr.msk.f32.gmra.mrb[18].mxu1 %vm218_vm1, %v17245_v58 }
 0x3bf   :  { %13499 = vmatprep.mubr.msk.f32.mxu1 %vm218_vm1, %v17243_v50  ;;  %13996 = vmatpush3.bf16.msra.mxu1 %v13993_v23  ;;  %v3427_v23 = vld [vmem:[#allocation2 + $0x40] sm:$0xff] }
 0x3c0   :  { %13998 = vmatprep.subr.bf16.mxu1 %v13997_v51 }
 0x3c2   :  { %13500 = vmatmul.mubr.msk.f32.gmra.mrb[20].mxu1 %vm218_vm1, %v2996_v61 }
 0x3c3   :  { %13502 = vmatprep.mubr.msk.f32.mxu1 %vm218_vm1, %v17252_v63 }
 0x3c6   :  { %13503 = vmatmul.mubr.msk.f32.gmra.mrb[22].mxu1 %vm218_vm1, %v17258_v2 }
 0x3c7   :  { %13513 = vmatprep.mubr.msk.f32.mxu1 %vm218_vm1, %v17256_v0 }
 0x3ca   :  { %13514 = vmatmul.mubr.msk.f32.vlgmr.msra.gmra.mrb[16].mxu1 %vm218_vm1, %v17270_v60 }
 0x3cb   :  { %14000 = vmatpush3.bf16.msra.mxu1 %v13997_v51  ;;  %13516 = vmatprep.mubr.msk.f32.mxu1 %vm218_vm1, %v17280_v18  ;;  %v14017_v51 = vpack.c.bf16 %v12345_v46, %v12344_v44  ;;  %v12379_v44 = vld [vmem:[%s20283_s7 + $0x108] sm:$0xff]  ;;  %v17393_v46 = vld [vmem:[#allocation2 + $0x50] sm:$0xff] }
 0x3cc   :  { %14002 = vmatprep.subr.bf16.mxu1 %v14001_v9 }
 0x3ce   :  { %13517 = vmatmul.mubr.msk.f32.gmra.mrb[18].mxu1 %vm218_vm1, %v17286_v14 }
 0x3cf   :  { %13519 = vmatprep.mubr.msk.f32.mxu1 %vm218_vm1, %v17284_v11  ;;  %14004 = vmatpush3.bf16.msra.mxu1 %v14001_v9  ;;  %v3577_v9 = vld [vmem:[#allocation2 + $0x41] sm:$0xff] }
 0x3d0   :  { %14006 = vmatprep.subr.bf16.mxu1 %v14005_v10 }
 0x3d2   :  { %13520 = vmatmul.mubr.msk.f32.gmra.mrb[20].mxu1 %vm218_vm1, %v3279_v52 }
 0x3d3   :  { %13522 = vmatprep.mubr.msk.f32.mxu1 %vm218_vm1, %v17293_v59 }
 0x3d6   :  { %13523 = vmatmul.mubr.msk.f32.gmra.mrb[22].mxu1 %vm218_vm1, %v17297_v17 }
 0x3d7   :  { %13533 = vmatprep.mubr.msk.f32.mxu1 %vm218_vm1, %v2992_v41  ;;  %v3431_v41 = vld [vmem:[#allocation2 + $0xa0] sm:$0xff] }
 0x3da   :  { %13534 = vmatmul.mubr.msk.f32.vlgmr.msra.gmra.mrb[16].mxu1 %vm218_vm1, %v17239_v47 }
 0x3db   :  { %14008 = vmatpush3.bf16.msra.mxu1 %v14005_v10  ;;  %13536 = vmatprep.mubr.msk.f32.mxu1 %vm218_vm1, %v17245_v58  ;;  %v12366_v10 = vld [vmem:[%s20283_s7 + $0xe0] sm:$0xff] }
 0x3dc   :  { %14010 = vmatprep.subr.bf16.mxu1 %v14009_v37  ;;  %v14029_v36 = vpack.c.bf16 %v12367_v27, %v12366_v10 }
 0x3de   :  { %13537 = vmatmul.mubr.msk.f32.gmra.mrb[18].mxu1 %vm218_vm1, %v3427_v23 }
 0x3df   :  { %13539 = vmatprep.mubr.msk.f32.mxu1 %vm218_vm1, %v2996_v61  ;;  %14012 = vmatpush3.bf16.msra.mxu1 %v14009_v37  ;;  %v12354_v61 = vld [vmem:[%s20283_s7 + $0xc0] sm:$0xff] }
 0x3e0   :  { %14014 = vmatprep.subr.bf16.mxu1 %v14013_v40  ;;  %v14021_v15 = vpack.c.bf16 %v12355_v4, %v12354_v61  ;;  %v3727_v37 = vld [vmem:[#allocation2 + $0x42] sm:$0xff]  ;;  %v12390_v61 = vld [vmem:[%s20284_s8] ss:$0 sm:$0xff] }
 0x3e2   :  { %13540 = vmatmul.mubr.msk.f32.gmra.mrb[20].mxu1 %vm218_vm1, %v17252_v63 }
 0x3e3   :  { %13542 = vmatprep.mubr.msk.f32.mxu1 %vm218_vm1, %v17258_v2 }
 0x3e6   :  { %13543 = vmatmul.mubr.msk.f32.gmra.mrb[22].mxu1 %vm218_vm1, %v3431_v41 }
 0x3e7   :  { %13553 = vmatprep.mubr.msk.f32.mxu1 %vm218_vm1, %v17168_v8  ;;  %v3581_v8 = vld [vmem:[#allocation2 + $0xa1] sm:$0xff] }
 0x3ea   :  { %13554 = vmatmul.mubr.msk.f32.vlgmr.msra.gmra.mrb[16].mxu1 %vm218_vm1, %v17184_v24 }
 0x3eb   :  { %14016 = vmatpush3.bf16.msra.mxu1 %v14013_v40  ;;  %13556 = vmatprep.mubr.msk.f32.mxu1 %vm218_vm1, %v17195_v31  ;;  %v12378_v40 = vld [vmem:[%s20283_s7 + $0x100] sm:$0xff] }
 0x3ec   :  { %14018 = vmatprep.subr.bf16.mxu1 %v14017_v51 }
 0x3ee   :  { %13557 = vmatmul.mubr.msk.f32.gmra.mrb[18].mxu1 %vm218_vm1, %v3577_v9 }
 0x3ef   :  { %13559 = vmatprep.mubr.msk.f32.mxu1 %vm218_vm1, %v17204_v30  ;;  %14020 = vmatpush3.bf16.msra.mxu1 %v14017_v51  ;;  %v14025_v30 = vpack.c.bf16 %v12357_v21, %v12356_v20  ;;  %v14037_v51 = vpack.c.bf16 %v12379_v44, %v12378_v40  ;;  %v4365_v40 = vld [vmem:[%s20285_s9 + $0x10] sm:$0xff]  ;;  %v4366_v44 = vld [vmem:[%s20285_s9 + $0x18] sm:$0xff] }
 0x3f0   :  { %14022 = vmatprep.subr.bf16.mxu1 %v14021_v15 }
 0x3f2   :  { %13560 = vmatmul.mubr.msk.f32.gmra.mrb[20].mxu1 %vm218_vm1, %v17208_v32 }
 0x3f3   :  { %13562 = vmatprep.mubr.msk.f32.mxu1 %vm218_vm1, %v17214_v12 }
 0x3f6   :  { %13563 = vmatmul.mubr.msk.f32.gmra.mrb[22].mxu1 %vm218_vm1, %v3581_v8 }
 0x3f7   :  { %13573 = vmatprep.mubr.msk.f32.mxu1 %vm218_vm1, %v17270_v60  ;;  %v3731_v60 = vld [vmem:[#allocation2 + $0xa2] sm:$0xff] }
 0x3fa   :  { %13574 = vmatmul.mubr.msk.f32.vlgmr.msra.gmra.mrb[16].mxu1 %vm218_vm1, %v17280_v18 }
 0x3fb   :  { %14024 = vmatpush3.bf16.msra.mxu1 %v14021_v15  ;;  %13576 = vmatprep.mubr.msk.f32.mxu1 %vm218_vm1, %v17286_v14 }
 0x3fc   :  { %14026 = vmatprep.subr.bf16.mxu1 %v14025_v30 }
 0x3fe   :  { %13577 = vmatmul.mubr.msk.f32.gmra.mrb[18].mxu1 %vm218_vm1, %v3727_v37 }
 0x3ff   :  { %13579 = vmatprep.mubr.msk.f32.mxu1 %vm218_vm1, %v3279_v52  ;;  %14028 = vmatpush3.bf16.msra.mxu1 %v14025_v30  ;;  %v14033_v52 = vpack.c.bf16 %v12369_v39, %v12368_v38 }
 0x400   :  { %14030 = vmatprep.subr.bf16.mxu1 %v14029_v36 }
 0x402   :  { %13580 = vmatmul.mubr.msk.f32.gmra.mrb[20].mxu1 %vm218_vm1, %v17293_v59 }
 0x403   :  { %13582 = vmatprep.mubr.msk.f32.mxu1 %vm218_vm1, %v17297_v17 }
 0x406   :  { %13583 = vmatmul.mubr.msk.f32.gmra.mrb[22].mxu1 %vm218_vm1, %v3731_v60 }
 0x407   :  { %13593 = vmatprep.mubr.msk.f32.mxu1 %vm218_vm1, %v17239_v47  ;;  %v17402_v47 = vld [vmem:[#allocation2 + $0xb0] sm:$0xff] }
 0x40a   :  { %13594 = vmatmul.mubr.msk.f32.vlgmr.msra.gmra.mrb[16].mxu1 %vm218_vm1, %v17245_v58  ;;  %v12380_v58 = vld [vmem:[%s20283_s7 + $0x110] sm:$0xff] }
 0x40b   :  { %14032 = vmatpush3.bf16.msra.mxu1 %v14029_v36  ;;  %13596 = vmatprep.mubr.msk.f32.mxu1 %vm218_vm1, %v3427_v23  ;;  %v12381_v23 = vld [vmem:[%s20283_s7 + $0x118] sm:$0xff] }
 0x40c   :  { %14034 = vmatprep.subr.bf16.mxu1 %v14033_v52 }
 0x40e   :  { %13597 = vmatmul.mubr.msk.f32.gmra.mrb[18].mxu1 %vm218_vm1, %v17393_v46 }
 0x40f   :  { %13599 = vmatprep.mubr.msk.f32.mxu1 %vm218_vm1, %v17252_v63  ;;  %14036 = vmatpush3.bf16.msra.mxu1 %v14033_v52  ;;  %v14041_v63 = vpack.c.bf16 %v12381_v23, %v12380_v58 }
 0x410   :  { %14038 = vmatprep.subr.bf16.mxu1 %v14037_v51 }
 0x412   :  { %13600 = vmatmul.mubr.msk.f32.gmra.mrb[20].mxu1 %vm218_vm1, %v17258_v2  ;;  %v17417_v2 = vld [vmem:[#allocation2 + $0x51] sm:$0xff] }
 0x413   :  { %13602 = vmatprep.mubr.msk.f32.mxu1 %vm218_vm1, %v3431_v41 }
 0x416   :  { %13603 = vmatmul.mubr.msk.f32.gmra.mrb[22].mxu1 %vm218_vm1, %v17402_v47 }
 0x417   :  { %13613 = vmatprep.mubr.msk.f32.mxu1 %vm218_vm1, %v17184_v24  ;;  %v17426_v24 = vld [vmem:[#allocation2 + $0xb1] sm:$0xff] }
 0x41a   :  { %13614 = vmatmul.mubr.msk.f32.vlgmr.msra.gmra.mrb[16].mxu1 %vm218_vm1, %v17195_v31  ;;  %v17435_v31 = vld [vmem:[#allocation2 + $0x52] sm:$0xff] }
 0x41b   :  { %14040 = vmatpush3.bf16.msra.mxu1 %v14037_v51  ;;  %13616 = vmatprep.mubr.msk.f32.mxu1 %vm218_vm1, %v3577_v9 }
 0x41c   :  { %14042 = vmatprep.subr.bf16.mxu1 %v14041_v63 }
 0x41e   :  { %13617 = vmatmul.mubr.msk.f32.gmra.mrb[18].mxu1 %vm218_vm1, %v17417_v2 }
 0x41f   :  { %13619 = vmatprep.mubr.msk.f32.mxu1 %vm218_vm1, %v17208_v32  ;;  %14044 = vmatpush3.bf16.msra.mxu1 %v14041_v63  ;;  %v17444_v32 = vld [vmem:[#allocation2 + $0xb2] sm:$0xff] }
 0x422   :  { %13620 = vmatmul.mubr.msk.f32.gmra.mrb[20].mxu1 %vm218_vm1, %v17214_v12  ;;  %v12393_v12 = vld [vmem:[%s20285_s9 + $0x30] sm:$0xff] }
 0x423   :  { %13622 = vmatprep.mubr.msk.f32.mxu1 %vm218_vm1, %v3581_v8 }
 0x426   :  { %13623 = vmatmul.mubr.msk.f32.gmra.mrb[22].mxu1 %vm218_vm1, %v17426_v24 }
 0x427   :  { %13633 = vmatprep.mubr.msk.f32.mxu1 %vm218_vm1, %v17280_v18  ;;  %v12394_v18 = vld [vmem:[%s20285_s9 + $0x38] sm:$0xff] }
 0x42a   :  { %13634 = vmatmul.mubr.msk.f32.vlgmr.msra.gmra.mrb[16].mxu1 %vm218_vm1, %v17286_v14  ;;  %v14049_v14 = vpack.c.bf16 %v12394_v18, %v12393_v12  ;;  %v14057_v12 = vpack.c.bf16 %v4366_v44, %v4365_v40 }
 0x42b   :  { %13636 = vmatprep.mubr.msk.f32.mxu1 %vm218_vm1, %v3727_v37 }
 0x42c   :  { %14050 = vmatprep.subr.bf16.mxu0 %v14049_v14 }
 0x42d   :  { %14052 = vmatpush3.bf16.msra.mxu0 %v14049_v14 }
 0x42e   :  { %13637 = vmatmul.mubr.msk.f32.gmra.mrb[18].mxu1 %vm218_vm1, %v17435_v31 }
 0x42f   :  { %13639 = vmatprep.mubr.msk.f32.mxu1 %vm218_vm1, %v17293_v59  ;;  %v4363_v59 = vld [vmem:[%s20285_s9] sm:$0xff] }
 0x432   :  { %13640 = vmatmul.mubr.msk.f32.gmra.mrb[20].mxu1 %vm218_vm1, %v17297_v17  ;;  %v4364_v17 = vld [vmem:[%s20285_s9 + $0x8] sm:$0xff] }
 0x433   :  { %13642 = vmatprep.mubr.msk.f32.mxu1 %vm218_vm1, %v3731_v60  ;;  %v14053_v41 = vpack.c.bf16 %v4364_v17, %v4363_v59  ;;  %v12411_v17 = vld [vmem:[%s20285_s9 + $0x40] sm:$0xff] }
 0x435   :  { %14054 = vmatprep.subr.bf16.mxu0 %v14053_v41 }
 0x436   :  { %13643 = vmatmul.mubr.msk.f32.gmra.mrb[22].mxu1 %vm218_vm1, %v17444_v32 }
 0x437   :  { %5851 = vmatprep.mubr.f32.mxu1 %v20301_v13 }
 0x4fd   :  { %v13635_v4 = vpop.f32.mrb[16].mxu1 }
 0x4fe   :  { %v4331_v15 = vadd.f32 %v13635_v4, %v12390_v61  ;;  %v4277_v9 = vpop.f32.mrb[17].mxu1  ;;  %v12412_v4 = vld [vmem:[%s20285_s9 + $0x48] sm:$0xff] }
 0x4ff   :  { %v4330_v8 = vadd.f32 %v12390_v61, %v4277_v9 }
 0x500   :  { %v4339_v20 = vmax.f32 %v4331_v15, 0.0 }
 0x501   :  { %v4338_v21 = vmax.f32 %v4330_v8, 0.0  ;;  %v13638_v30 = vpop.f32.mrb[18].mxu1 }
 0x502   :  { %4348 = vst.msk [vmem:[#allocation2 + $0x21] sm:$0xff] %vm218_vm1, %v4339_v20  ;;  %v4333_v10 = vadd.f32 %v13638_v30, %v12390_v61  ;;  %v4287_v27 = vpop.f32.mrb[19].mxu1 }
 0x503   :  { %4347 = vst.msk [vmem:[#allocation2 + $0x11] sm:$0xff] %vm218_vm1, %v4338_v21  ;;  %v4332_v36 = vadd.f32 %v12390_v61, %v4287_v27  ;;  %v14061_v21 = vpack.c.bf16 %v12412_v4, %v12411_v17  ;;  %v12413_v27 = vld [vmem:[%s20285_s9 + $0x50] sm:$0xff] }
 0x504   :  { %v4341_v37 = vmax.f32 %v4333_v10, 0.0 }
 0x505   :  { %v4340_v60 = vmax.f32 %v4332_v36, 0.0  ;;  %v13641_v38 = vpop.f32.mrb[20].mxu1 }
 0x506   :  { %4350 = vst.msk [vmem:[#allocation2 + $0x41] sm:$0xff] %vm218_vm1, %v4341_v37  ;;  %v4335_v39 = vadd.f32 %v13641_v38, %v12390_v61  ;;  %v4297_v52 = vpop.f32.mrb[21].mxu1  ;;  %v12424_v38 = vld [vmem:[%s20285_s9 + $0x68] sm:$0xff] }
 0x507   :  { %4349 = vst.msk [vmem:[#allocation2 + $0x31] sm:$0xff] %vm218_vm1, %v4340_v60  ;;  %v4334_v51 = vadd.f32 %v12390_v61, %v4297_v52  ;;  %v12423_v60 = vld [vmem:[%s20285_s9 + $0x60] sm:$0xff] }
 0x508   :  { %v4343_v58 = vmax.f32 %v4335_v39, 0.0 }
 0x509   :  { %v4342_v23 = vmax.f32 %v4334_v51, 0.0  ;;  %v13644_v63 = vpop.f32.mrb[22].mxu1  ;;  %v17486_v9 = vld [vmem:[#allocation2 + $0x21] sm:$0xff] }
 0x50a   :  { %4352 = vst.msk [vmem:[#allocation2 + $0x81] sm:$0xff] %vm218_vm1, %v4343_v58  ;;  %v4337_v18 = vadd.f32 %v13644_v63, %v12390_v61  ;;  %v4307_v14 = vpop.f32.mrb[23].mxu1  ;;  %v17475_v59 = vld [vmem:[#allocation2 + $0x11] sm:$0xff]  ;;  %v17525_v39 = vld [vmem:[#allocation2 + $0x20] sm:$0xff] }
 0x50b   :  { %4351 = vst.msk [vmem:[#allocation2 + $0x71] sm:$0xff] %vm218_vm1, %v4342_v23  ;;  %v4336_v15 = vadd.f32 %v12390_v61, %v4307_v14  ;;  %13654 = vmatmul.mubr.msk.f32.vlgmr.msra.gmra.mrb[16].mxu0 %vm218_vm1, %v17475_v59  ;;  %v4356_v37 = vld [vmem:[#allocation2 + $0x10] sm:$0xff]  ;;  %v17559_v14 = vld [vmem:[#allocation2 + $0x22] sm:$0xff] }
 0x50c   :  { %v4345_v8 = vmax.f32 %v4337_v18, 0.0  ;;  %14056 = vmatpush3.bf16.msra.mxu0 %v14053_v41  ;;  %13656 = vmatprep.mubr.msk.f32.mxu0 %vm218_vm1, %v17486_v9  ;;  %v12425_v58 = vld [vmem:[%s20285_s9 + $0x70] sm:$0xff]  ;;  %v12436_v18 = vld [vmem:[%s20285_s9 + $0x88] sm:$0xff] }
 0x50d   :  { %v4344_v20 = vmax.f32 %v4336_v15, 0.0  ;;  %14058 = vmatprep.subr.bf16.mxu0 %v14057_v12  ;;  %v4639_v63 = vld [vmem:[#allocation2 + $0x12] sm:$0xff] }
 0x50e   :  { %4354 = vst.msk [vmem:[#allocation2 + $0xa1] sm:$0xff] %vm218_vm1, %v4345_v8  ;;  %v17491_v30 = vld [vmem:[#allocation2 + $0x31] sm:$0xff] }
 0x50f   :  { %4353 = vst.msk [vmem:[#allocation2 + $0x91] sm:$0xff] %vm218_vm1, %v4344_v20  ;;  %13657 = vmatmul.mubr.msk.f32.gmra.mrb[18].mxu0 %vm218_vm1, %v17491_v30  ;;  %v17529_v52 = vld [vmem:[#allocation2 + $0x30] sm:$0xff] }
 0x510   :  { %13659 = vmatprep.mubr.msk.f32.mxu0 %vm218_vm1, %v17190_v26  ;;  %14060 = vmatpush3.bf16.msra.mxu0 %v14057_v12  ;;  %v12414_v26 = vld [vmem:[%s20285_s9 + $0x58] sm:$0xff]  ;;  %v12435_v12 = vld [vmem:[%s20285_s9 + $0x80] sm:$0xff]  ;;  %v12437_v20 = vld [vmem:[%s20285_s9 + $0x90] sm:$0xff] }
 0x511   :  { %14062 = vmatprep.subr.bf16.mxu0 %v14061_v21  ;;  %v17502_v61 = vld [vmem:[#allocation2 + $0x81] sm:$0xff]  ;;  %v14065_v36 = vpack.c.bf16 %v12414_v26, %v12413_v27  ;;  %v17563_v17 = vld [vmem:[#allocation2 + $0x32] sm:$0xff] }
 0x512   :  { %v17498_v41 = vld [vmem:[#allocation2 + $0x71] sm:$0xff]  ;;  %v17536_v44 = vld [vmem:[#allocation2 + $0x80] sm:$0xff]  ;;  %v12448_v26 = vld [vmem:[%s20285_s9 + $0xa8] sm:$0xff] }
 0x513   :  { %13660 = vmatmul.mubr.msk.f32.gmra.mrb[20].mxu0 %vm218_vm1, %v17498_v41  ;;  %v4360_v40 = vld [vmem:[#allocation2 + $0x70] sm:$0xff]  ;;  %v17570_v15 = vld [vmem:[#allocation2 + $0x82] sm:$0xff] }
 0x514   :  { %13662 = vmatprep.mubr.msk.f32.mxu0 %vm218_vm1, %v17502_v61  ;;  %v4643_v4 = vld [vmem:[#allocation2 + $0x72] sm:$0xff]  ;;  %v12447_v27 = vld [vmem:[%s20285_s9 + $0xa0] sm:$0xff] }
 0x516   :  { %v17506_v10 = vld [vmem:[#allocation2 + $0x91] sm:$0xff] }
 0x517   :  { %13663 = vmatmul.mubr.msk.f32.gmra.mrb[22].mxu0 %vm218_vm1, %v17506_v10  ;;  %v17540_v51 = vld [vmem:[#allocation2 + $0x90] sm:$0xff] }
 0x518   :  { %13673 = vmatprep.mubr.msk.f32.mxu0 %vm218_vm1, %v17212_v33  ;;  %v14069_v33 = vpack.c.bf16 %v12424_v38, %v12423_v60  ;;  %v17574_v8 = vld [vmem:[#allocation2 + $0x92] sm:$0xff]  ;;  %v4791_v60 = vld [vmem:[#allocation2 + $0x40] sm:$0xff] }
 0x519   :  { %v12449_v38 = vld [vmem:[%s20285_s9 + $0xb0] sm:$0xff] }
 0x51b   :  { %13674 = vmatmul.mubr.msk.f32.vlgmr.msra.gmra.mrb[16].mxu0 %vm218_vm1, %v4356_v37 }
 0x51c   :  { %14064 = vmatpush3.bf16.msra.mxu0 %v14061_v21  ;;  %13676 = vmatprep.mubr.msk.f32.mxu0 %vm218_vm1, %v17525_v39 }
 0x51d   :  { %14066 = vmatprep.subr.bf16.mxu0 %v14065_v36 }
 0x51f   :  { %13677 = vmatmul.mubr.msk.f32.gmra.mrb[18].mxu0 %vm218_vm1, %v17529_v52 }
 0x520   :  { %13679 = vmatprep.mubr.msk.f32.mxu0 %vm218_vm1, %v17243_v50  ;;  %14068 = vmatpush3.bf16.msra.mxu0 %v14065_v36  ;;  %v12426_v50 = vld [vmem:[%s20285_s9 + $0x78] sm:$0xff]  ;;  %v14085_v36 = vpack.c.bf16 %v12448_v26, %v12447_v27  ;;  %v5091_v27 = vld [vmem:[#allocation2 + $0x42] sm:$0xff]  ;;  %v12473_v26 = vld [vmem:[%s20285_s9 + $0xf0] sm:$0xff] }
 0x521   :  { %14070 = vmatprep.subr.bf16.mxu0 %v14069_v33  ;;  %v14073_v23 = vpack.c.bf16 %v12426_v50, %v12425_v58  ;;  %v12459_v58 = vld [vmem:[%s20285_s9 + $0xc0] sm:$0xff]  ;;  %v12460_v50 = vld [vmem:[%s20285_s9 + $0xc8] sm:$0xff] }
 0x523   :  { %13680 = vmatmul.mubr.msk.f32.gmra.mrb[20].mxu0 %vm218_vm1, %v4360_v40 }
 0x524   :  { %13682 = vmatprep.mubr.msk.f32.mxu0 %vm218_vm1, %v17536_v44 }
 0x527   :  { %13683 = vmatmul.mubr.msk.f32.gmra.mrb[22].mxu0 %vm218_vm1, %v17540_v51 }
 0x528   :  { %13693 = vmatprep.mubr.msk.f32.mxu0 %vm218_vm1, %v17256_v0  ;;  %v14077_v0 = vpack.c.bf16 %v12436_v18, %v12435_v12  ;;  %v4941_v12 = vld [vmem:[#allocation2 + $0x41] sm:$0xff]  ;;  %v12461_v18 = vld [vmem:[%s20285_s9 + $0xd0] sm:$0xff] }
 0x52b   :  { %13694 = vmatmul.mubr.msk.f32.vlgmr.msra.gmra.mrb[16].mxu0 %vm218_vm1, %v4639_v63 }
 0x52c   :  { %14072 = vmatpush3.bf16.msra.mxu0 %v14069_v33  ;;  %13696 = vmatprep.mubr.msk.f32.mxu0 %vm218_vm1, %v17559_v14  ;;  %v12450_v33 = vld [vmem:[%s20285_s9 + $0xb8] sm:$0xff] }
 0x52d   :  { %14074 = vmatprep.subr.bf16.mxu0 %v14073_v23 }
 0x52f   :  { %13697 = vmatmul.mubr.msk.f32.gmra.mrb[18].mxu0 %vm218_vm1, %v17563_v17 }
 0x530   :  { %13699 = vmatprep.mubr.msk.f32.mxu0 %vm218_vm1, %v17284_v11  ;;  %14076 = vmatpush3.bf16.msra.mxu0 %v14073_v23  ;;  %v12438_v11 = vld [vmem:[%s20285_s9 + $0x98] sm:$0xff]  ;;  %v14093_v23 = vpack.c.bf16 %v12460_v50, %v12459_v58  ;;  %v5953_v58 = vld [vmem:[%s20289_s13 + $0x60] sm:$0xff]  ;;  %v5958_v50 = vld [vmem:[%s20289_s13 + $0x88] sm:$0xff] }
 0x531   :  { %14078 = vmatprep.subr.bf16.mxu0 %v14077_v0  ;;  %v14081_v21 = vpack.c.bf16 %v12438_v11, %v12437_v20  ;;  %v12471_v20 = vld [vmem:[%s20285_s9 + $0xe0] sm:$0xff]  ;;  %v12472_v11 = vld [vmem:[%s20285_s9 + $0xe8] sm:$0xff] }
 0x533   :  { %13700 = vmatmul.mubr.msk.f32.gmra.mrb[20].mxu0 %vm218_vm1, %v4643_v4 }
 0x534   :  { %13702 = vmatprep.mubr.msk.f32.mxu0 %vm218_vm1, %v17570_v15 }
 0x537   :  { %13703 = vmatmul.mubr.msk.f32.gmra.mrb[22].mxu0 %vm218_vm1, %v17574_v8 }
 0x538   :  { %13713 = vmatprep.mubr.msk.f32.mxu0 %vm218_vm1, %v4356_v37  ;;  %v4795_v37 = vld [vmem:[#allocation2 + $0xa0] sm:$0xff] }
 0x53b   :  { %13714 = vmatmul.mubr.msk.f32.vlgmr.msra.gmra.mrb[16].mxu0 %vm218_vm1, %v17525_v39 }
 0x53c   :  { %14080 = vmatpush3.bf16.msra.mxu0 %v14077_v0  ;;  %13716 = vmatprep.mubr.msk.f32.mxu0 %vm218_vm1, %v17529_v52  ;;  %v12462_v0 = vld [vmem:[%s20285_s9 + $0xd8] sm:$0xff] }
 0x53d   :  { %14082 = vmatprep.subr.bf16.mxu0 %v14081_v21 }
 0x53f   :  { %13717 = vmatmul.mubr.msk.f32.gmra.mrb[18].mxu0 %vm218_vm1, %v4791_v60 }
 0x540   :  { %13719 = vmatprep.mubr.msk.f32.mxu0 %vm218_vm1, %v4360_v40  ;;  %14084 = vmatpush3.bf16.msra.mxu0 %v14081_v21  ;;  %v14089_v40 = vpack.c.bf16 %v12450_v33, %v12449_v38  ;;  %v14101_v21 = vpack.c.bf16 %v12472_v11, %v12471_v20  ;;  %v12483_v38 = vld [vmem:[%s20285_s9 + $0x100] sm:$0xff]  ;;  %v12484_v33 = vld [vmem:[%s20285_s9 + $0x108] sm:$0xff] }
 0x541   :  { %14086 = vmatprep.subr.bf16.mxu0 %v14085_v36  ;;  %v5978_v20 = vld [vmem:[%s20289_s13 + $0x128] sm:$0xff] }
 0x543   :  { %13720 = vmatmul.mubr.msk.f32.gmra.mrb[20].mxu0 %vm218_vm1, %v17536_v44 }
 0x544   :  { %13722 = vmatprep.mubr.msk.f32.mxu0 %vm218_vm1, %v17540_v51 }
 0x547   :  { %13723 = vmatmul.mubr.msk.f32.gmra.mrb[22].mxu0 %vm218_vm1, %v4795_v37 }
 0x548   :  { %13733 = vmatprep.mubr.msk.f32.mxu0 %vm218_vm1, %v17475_v59  ;;  %v4945_v59 = vld [vmem:[#allocation2 + $0xa1] sm:$0xff] }
 0x54b   :  { %13734 = vmatmul.mubr.msk.f32.vlgmr.msra.gmra.mrb[16].mxu0 %vm218_vm1, %v17486_v9 }
 0x54c   :  { %14088 = vmatpush3.bf16.msra.mxu0 %v14085_v36  ;;  %13736 = vmatprep.mubr.msk.f32.mxu0 %vm218_vm1, %v17491_v30  ;;  %v12474_v36 = vld [vmem:[%s20285_s9 + $0xf8] sm:$0xff] }
 0x54d   :  { %14090 = vmatprep.subr.bf16.mxu0 %v14089_v40 }
 0x54f   :  { %13737 = vmatmul.mubr.msk.f32.gmra.mrb[18].mxu0 %vm218_vm1, %v4941_v12 }
 0x550   :  { %13739 = vmatprep.mubr.msk.f32.mxu0 %vm218_vm1, %v17498_v41  ;;  %14092 = vmatpush3.bf16.msra.mxu0 %v14089_v40  ;;  %v14097_v41 = vpack.c.bf16 %v12462_v0, %v12461_v18  ;;  %v14109_v40 = vpack.c.bf16 %v12484_v33, %v12483_v38  ;;  %v5969_v18 = vld [vmem:[%s20289_s13 + $0xe0] sm:$0xff] }
 0x551   :  { %14094 = vmatprep.subr.bf16.mxu0 %v14093_v23  ;;  %v5981_v38 = vld [vmem:[%s20289_s13 + $0x140] sm:$0xff] }
 0x552   :  { %v5985_v33 = vld [vmem:[%s20289_s13 + $0x160] sm:$0xff] }
 0x553   :  { %13740 = vmatmul.mubr.msk.f32.gmra.mrb[20].mxu0 %vm218_vm1, %v17502_v61 }
 0x554   :  { %13742 = vmatprep.mubr.msk.f32.mxu0 %vm218_vm1, %v17506_v10 }
 0x557   :  { %13743 = vmatmul.mubr.msk.f32.gmra.mrb[22].mxu0 %vm218_vm1, %v4945_v59 }
 0x558   :  { %13753 = vmatprep.mubr.msk.f32.mxu0 %vm218_vm1, %v4639_v63  ;;  %v5095_v63 = vld [vmem:[#allocation2 + $0xa2] sm:$0xff] }
 0x55b   :  { %13754 = vmatmul.mubr.msk.f32.vlgmr.msra.gmra.mrb[16].mxu0 %vm218_vm1, %v17559_v14 }
 0x55c   :  { %14096 = vmatpush3.bf16.msra.mxu0 %v14093_v23  ;;  %13756 = vmatprep.mubr.msk.f32.mxu0 %vm218_vm1, %v17563_v17 }
 0x55d   :  { %14098 = vmatprep.subr.bf16.mxu0 %v14097_v41 }
 0x55f   :  { %13757 = vmatmul.mubr.msk.f32.gmra.mrb[18].mxu0 %vm218_vm1, %v5091_v27 }
 0x560   :  { %13759 = vmatprep.mubr.msk.f32.mxu0 %vm218_vm1, %v4643_v4  ;;  %14100 = vmatpush3.bf16.msra.mxu0 %v14097_v41  ;;  %v14105_v4 = vpack.c.bf16 %v12474_v36, %v12473_v26  ;;  %v5974_v41 = vld [vmem:[%s20289_s13 + $0x108] sm:$0xff] }
 0x561   :  { %14102 = vmatprep.subr.bf16.mxu0 %v14101_v21  ;;  %v17791_v11 = vpack.c.bf16 %v5978_v20, %v5974_v41  ;;  %v5982_v26 = vld [vmem:[%s20289_s13 + $0x148] sm:$0xff] }
 0x562   :  { %v5986_v36 = vld [vmem:[%s20289_s13 + $0x168] sm:$0xff] }
 0x563   :  { %13760 = vmatmul.mubr.msk.f32.gmra.mrb[20].mxu0 %vm218_vm1, %v17570_v15  ;;  %v6002_v41 = vld [vmem:[%s20289_s13 + $0x1e8] sm:$0xff] }
 0x564   :  { %13762 = vmatprep.mubr.msk.f32.mxu0 %vm218_vm1, %v17574_v8 }
 0x567   :  { %13763 = vmatmul.mubr.msk.f32.gmra.mrb[22].mxu0 %vm218_vm1, %v5095_v63 }
 0x568   :  { %13773 = vmatprep.mubr.msk.f32.mxu0 %vm218_vm1, %v17525_v39  ;;  %v12485_v39 = vld [vmem:[%s20285_s9 + $0x110] sm:$0xff] }
 0x56b   :  { %13774 = vmatmul.mubr.msk.f32.vlgmr.msra.gmra.mrb[16].mxu0 %vm218_vm1, %v17529_v52  ;;  %v12486_v52 = vld [vmem:[%s20285_s9 + $0x118] sm:$0xff] }
 0x56c   :  { %14104 = vmatpush3.bf16.msra.mxu0 %v14101_v21  ;;  %13776 = vmatprep.mubr.msk.f32.mxu0 %vm218_vm1, %v4791_v60  ;;  %v5973_v21 = vld [vmem:[%s20289_s13 + $0x100] sm:$0xff] }
 0x56d   :  { %14106 = vmatprep.subr.bf16.mxu0 %v14105_v4 }
 0x56f   :  { %13777 = vmatmul.mubr.msk.f32.gmra.mrb[18].mxu0 %vm218_vm1, %v17393_v46  ;;  %v14113_v46 = vpack.c.bf16 %v12486_v52, %v12485_v39  ;;  %v5748_v39 = vld [vmem:[%s20287_s11 + $0x28] sm:$0xff]  ;;  %v17823_v52 = vpack.c.bf16 %v5985_v33, %v5981_v38  ;;  %v5750_v38 = vld [vmem:[%s20287_s11 + $0x38] sm:$0xff] }
 0x570   :  { %13779 = vmatprep.mubr.msk.f32.mxu0 %vm218_vm1, %v17536_v44  ;;  %14108 = vmatpush3.bf16.msra.mxu0 %v14105_v4  ;;  %v5942_v44 = vld [vmem:[%s20289_s13 + $0x8] sm:$0xff]  ;;  %v17809_v4 = vpack.c.bf16 %v5986_v36, %v5982_v26  ;;  %v5746_v36 = vld [vmem:[%s20287_s11 + $0x18] sm:$0xff] }
 0x571   :  { %14110 = vmatprep.subr.bf16.mxu0 %v14109_v40  ;;  %v14125_v33 = vpack.c.bf16 %v5750_v38, %v5746_v36 }
 0x573   :  { %13780 = vmatmul.mubr.msk.f32.gmra.mrb[20].mxu0 %vm218_vm1, %v17540_v51  ;;  %v5946_v51 = vld [vmem:[%s20289_s13 + $0x28] sm:$0xff] }
 0x574   :  { %13782 = vmatprep.mubr.msk.f32.mxu0 %vm218_vm1, %v4795_v37  ;;  %v5949_v37 = vld [vmem:[%s20289_s13 + $0x40] sm:$0xff] }
 0x577   :  { %13783 = vmatmul.mubr.msk.f32.gmra.mrb[22].mxu0 %vm218_vm1, %v17402_v47  ;;  %v17695_v47 = vpack.c.bf16 %v5946_v51, %v5942_v44  ;;  %v5743_v44 = vld [vmem:[%s20287_s11] sm:$0xff] }
 0x578   :  { %13793 = vmatprep.mubr.msk.f32.mxu0 %vm218_vm1, %v17486_v9  ;;  %v5941_v9 = vld [vmem:[%s20289_s13] sm:$0xff] }
 0x579   :  { %v5747_v51 = vld [vmem:[%s20287_s11 + $0x20] sm:$0xff] }
 0x57b   :  { %13794 = vmatmul.mubr.msk.f32.vlgmr.msra.gmra.mrb[16].mxu0 %vm218_vm1, %v17491_v30  ;;  %v5945_v30 = vld [vmem:[%s20289_s13 + $0x20] sm:$0xff] }
 0x57c   :  { %14112 = vmatpush3.bf16.msra.mxu0 %v14109_v40  ;;  %13796 = vmatprep.mubr.msk.f32.mxu0 %vm218_vm1, %v4941_v12  ;;  %v5744_v40 = vld [vmem:[%s20287_s11 + $0x8] sm:$0xff] }
 0x57d   :  { %14114 = vmatprep.subr.bf16.mxu0 %v14113_v46 }
 0x57f   :  { %13797 = vmatmul.mubr.msk.f32.gmra.mrb[18].mxu0 %vm218_vm1, %v17417_v2  ;;  %v5950_v2 = vld [vmem:[%s20289_s13 + $0x48] sm:$0xff] }
 0x580   :  { %13799 = vmatprep.mubr.msk.f32.mxu0 %vm218_vm1, %v17502_v61  ;;  %14116 = vmatpush3.bf16.msra.mxu0 %v14113_v46  ;;  %v5954_v61 = vld [vmem:[%s20289_s13 + $0x68] sm:$0xff]  ;;  %v14117_v46 = vpack.c.bf16 %v5748_v39, %v5744_v40  ;;  %v12495_v40 = vld [vmem:[%s20286_s10] ss:$0 sm:$0xff] }
 0x581   :  { %14134 = vmatprep.subr.bf16.mxu0 %v17695_v47  ;;  %v17723_v60 = vpack.c.bf16 %v5954_v61, %v5950_v2  ;;  %v5994_v2 = vld [vmem:[%s20289_s13 + $0x1a8] sm:$0xff] }
 0x582   :  { %14118 = vmatprep.subr.bf16.mxu1 %v14117_v46 }
 0x583   :  { %13800 = vmatmul.mubr.msk.f32.gmra.mrb[20].mxu0 %vm218_vm1, %v17506_v10  ;;  %v17721_v10 = vpack.c.bf16 %v5945_v30, %v5941_v9  ;;  %v14119_v9 = vpack.c.bf16 %v5747_v51, %v5743_v44  ;;  %v5990_v30 = vld [vmem:[%s20289_s13 + $0x188] sm:$0xff] }
 0x584   :  { %13802 = vmatprep.mubr.msk.f32.mxu0 %vm218_vm1, %v4945_v59  ;;  %v5965_v59 = vld [vmem:[%s20289_s13 + $0xc0] sm:$0xff]  ;;  %v17839_v61 = vpack.c.bf16 %v5994_v2, %v5990_v30 }
 0x585   :  { %v17781_v0 = vpack.c.bf16 %v5969_v18, %v5965_v59  ;;  %14120 = vmatpush1.bf16.msra.mxu1 %v14119_v9  ;;  %v5998_v18 = vld [vmem:[%s20289_s13 + $0x1c8] sm:$0xff] }
 0x586   :  { %v17869_v20 = vpack.c.bf16 %v6002_v41, %v5998_v18 }
 0x587   :  { %13803 = vmatmul.mubr.msk.f32.gmra.mrb[22].mxu0 %vm218_vm1, %v17426_v24  ;;  %v5962_v24 = vld [vmem:[%s20289_s13 + $0xa8] sm:$0xff] }
 0x588   :  { %13813 = vmatprep.mubr.msk.f32.mxu0 %vm218_vm1, %v17559_v14  ;;  %v17741_v14 = vpack.c.bf16 %v5953_v58, %v5949_v37  ;;  %v17744_v23 = vpack.c.bf16 %v5962_v24, %v5958_v50  ;;  %v5989_v37 = vld [vmem:[%s20289_s13 + $0x180] sm:$0xff]  ;;  %v5752_v50 = vld [vmem:[%s20287_s11 + $0x48] sm:$0xff] }
 0x589   :  { %v5993_v58 = vld [vmem:[%s20289_s13 + $0x1a0] sm:$0xff]  ;;  %v5756_v24 = vld [vmem:[%s20287_s11 + $0x68] sm:$0xff] }
 0x58b   :  { %13814 = vmatmul.mubr.msk.f32.vlgmr.msra.gmra.mrb[16].mxu0 %vm218_vm1, %v17563_v17  ;;  %v5961_v17 = vld [vmem:[%s20289_s13 + $0xa0] sm:$0xff] }
 0x58c   :  { %13816 = vmatprep.mubr.msk.f32.mxu0 %vm218_vm1, %v5091_v27  ;;  %14136 = vmatpush1.bf16.msra.mxu0 %v17721_v10  ;;  %v5977_v27 = vld [vmem:[%s20289_s13 + $0x120] sm:$0xff] }
 0x58d   :  { %14138 = vmatprep.subr.bf16.mxu0 %v17723_v60 }
 0x58f   :  { %13817 = vmatmul.mubr.msk.f32.gmra.mrb[18].mxu0 %vm218_vm1, %v17435_v31  ;;  %v5957_v31 = vld [vmem:[%s20289_s13 + $0x80] sm:$0xff] }
 0x590   :  { %13819 = vmatprep.mubr.msk.f32.mxu0 %vm218_vm1, %v17570_v15  ;;  %14140 = vmatpush1.bf16.msra.mxu0 %v17741_v14  ;;  %v17764_v15 = vpack.c.bf16 %v5961_v17, %v5957_v31  ;;  %v17853_v31 = vpack.c.bf16 %v5993_v58, %v5989_v37  ;;  %v14121_v17 = vpack.c.bf16 %v5756_v24, %v5752_v50 }
 0x591   :  { %14142 = vmatprep.subr.bf16.mxu0 %v17744_v23 }
 0x592   :  { %14122 = vmatprep.subr.bf16.mxu1 %v14121_v17 }
 0x593   :  { %13820 = vmatmul.mubr.msk.f32.gmra.mrb[20].mxu0 %vm218_vm1, %v17574_v8  ;;  %v5966_v8 = vld [vmem:[%s20289_s13 + $0xc8] sm:$0xff] }
 0x594   :  { %13822 = vmatprep.mubr.msk.f32.mxu0 %vm218_vm1, %v5095_v63  ;;  %14144 = vmatpush1.bf16.msra.mxu0 %v17764_v15  ;;  %v17799_v63 = vpack.c.bf16 %v5977_v27, %v5973_v21  ;;  %v5997_v21 = vld [vmem:[%s20289_s13 + $0x1c0] sm:$0xff] }
 0x595   :  { %v6001_v27 = vld [vmem:[%s20289_s13 + $0x1e0] sm:$0xff] }
 0x596   :  { %v17877_v26 = vpack.c.bf16 %v6001_v27, %v5997_v21 }
 0x597   :  { %13823 = vmatmul.mubr.msk.f32.gmra.mrb[22].mxu0 %vm218_vm1, %v17444_v32  ;;  %v5970_v32 = vld [vmem:[%s20289_s13 + $0xe8] sm:$0xff] }
 0x598   :  { %6069 = vmatprep.mubr.f32.mxu0 %v20301_v13  ;;  %v17773_v12 = vpack.c.bf16 %v5970_v32, %v5966_v8  ;;  %v5751_v8 = vld [vmem:[%s20287_s11 + $0x40] sm:$0xff] }
 0x599   :  { %v5755_v32 = vld [vmem:[%s20287_s11 + $0x60] sm:$0xff] }
 0x59a   :  { %14146 = vmatprep.subr.bf16.mxu0 %v17773_v12  ;;  %v14123_v59 = vpack.c.bf16 %v5755_v32, %v5751_v8 }
 0x59b   :  { %14148 = vmatpush1.bf16.msra.mxu0 %v17781_v0 }
 0x59c   :  { %14150 = vmatprep.subr.bf16.mxu0 %v17791_v11  ;;  %14124 = vmatpush1.bf16.msra.mxu1 %v14123_v59 }
 0x59d   :  { %14126 = vmatprep.subr.bf16.mxu1 %v14125_v33 }
 0x59f   :  { %14152 = vmatpush1.bf16.msra.mxu0 %v17799_v63 }
 0x5a0   :  { %14154 = vmatprep.subr.bf16.mxu0 %v17809_v4 }
 0x5a3   :  { %14156 = vmatpush1.bf16.msra.mxu0 %v17823_v52 }
 0x5a4   :  { %14158 = vmatprep.subr.bf16.mxu0 %v17839_v61 }
 0x5a7   :  { %14160 = vmatpush1.bf16.msra.mxu0 %v17853_v31 }
 0x5a8   :  { %14162 = vmatprep.subr.bf16.mxu0 %v17869_v20 }
 0x5ab   :  { %14164 = vmatpush1.bf16.msra.mxu0 %v17877_v26 }
 0x5ac   :  { %14198 = vmatprep.subr.bf16.mxu0 %v17695_v47 }
 0x5ae   :  { %6070 = vmatmul.mubr.f32.vlgmr.msra.gmra.mrb[24].mxu0 %v20301_v13 }
 0x5af   :  { %14200 = vmatpush1.bf16.msra.mxu0 %v17721_v10  ;;  %6373 = vmatprep.mubr.f32.mxu0 %v20301_v13 }
 0x5b0   :  { %14202 = vmatprep.subr.bf16.mxu0 %v17723_v60 }
 0x5b3   :  { %14204 = vmatpush1.bf16.msra.mxu0 %v17741_v14 }
 0x5b4   :  { %14206 = vmatprep.subr.bf16.mxu0 %v17744_v23 }
 0x5b7   :  { %14208 = vmatpush1.bf16.msra.mxu0 %v17764_v15 }
 0x5b8   :  { %14210 = vmatprep.subr.bf16.mxu0 %v17773_v12 }
 0x5bb   :  { %14212 = vmatpush1.bf16.msra.mxu0 %v17781_v0 }
 0x5bc   :  { %14214 = vmatprep.subr.bf16.mxu0 %v17791_v11 }
 0x5bf   :  { %14216 = vmatpush1.bf16.msra.mxu0 %v17799_v63 }
 0x5c0   :  { %14218 = vmatprep.subr.bf16.mxu0 %v17809_v4 }
 0x5c3   :  { %14220 = vmatpush1.bf16.msra.mxu0 %v17823_v52 }
 0x5c4   :  { %14222 = vmatprep.subr.bf16.mxu0 %v17839_v61 }
 0x5c7   :  { %14224 = vmatpush1.bf16.msra.mxu0 %v17853_v31 }
 0x5c8   :  { %14226 = vmatprep.subr.bf16.mxu0 %v17869_v20 }
 0x5cb   :  { %14228 = vmatpush1.bf16.msra.mxu0 %v17877_v26 }
 0x5cc   :  { %14262 = vmatprep.subr.bf16.mxu0 %v17695_v47 }
 0x65e   :  { %v13815_v39 = vpop.f32.mrb[16].mxu0 }
 0x65f   :  { %v5695_v46 = vadd.f32 %v13815_v39, %v12495_v40  ;;  %v5641_v44 = vpop.f32.mrb[17].mxu0 }
 0x660   :  { %v5694_v51 = vadd.f32 %v12495_v40, %v5641_v44 }
 0x661   :  { %v5703_v9 = vadd.f32 %v5695_v46, %v2975_v48 }
 0x662   :  { %v5702_v30 = vadd.f32 %v5694_v51, %v2974_v56  ;;  %v13818_v2 = vpop.f32.mrb[18].mxu0 }
 0x663   :  { %v5711_v37 = vmax.f32 %v5703_v9, 0.0  ;;  %v5697_v58 = vadd.f32 %v13818_v2, %v12495_v40  ;;  %v5651_v50 = vpop.f32.mrb[19].mxu0 }
 0x664   :  { %v5710_v24 = vmax.f32 %v5702_v30, 0.0  ;;  %v5696_v17 = vadd.f32 %v12495_v40, %v5651_v50 }
 0x665   :  { %v5719_v8 = vadd.f32 %v5711_v37, %v16528_v28  ;;  %v5705_v32 = vadd.f32 %v5697_v58, %v2977_v3 }
 0x666   :  { %v5718_v59 = vadd.f32 %v5710_v24, %v16530_v29  ;;  %v5704_v45 = vadd.f32 %v5696_v17, %v2976_v5  ;;  %v13821_v48 = vpop.f32.mrb[20].mxu0  ;;  %v5753_v24 = vld [vmem:[%s20287_s11 + $0x50] sm:$0xff] }
 0x667   :  { %v5727_v49 = vsel %vm218_vm1, %v5719_v8, 0.0  ;;  %v5713_v56 = vmax.f32 %v5705_v32, 0.0  ;;  %v5699_v18 = vadd.f32 %v13821_v48, %v12495_v40  ;;  %v5661_v41 = vpop.f32.mrb[21].mxu0  ;;  %v5757_v17 = vld [vmem:[%s20287_s11 + $0x70] sm:$0xff] }
 0x668   :  { %v5726_v21 = vsel %vm218_vm1, %v5718_v59, 0.0  ;;  %v5712_v27 = vmax.f32 %v5704_v45, 0.0  ;;  %v5698_v36 = vadd.f32 %v12495_v40, %v5661_v41  ;;  %v5944_v59 = vld [vmem:[%s20289_s13 + $0x18] sm:$0xff] }
 0x669   :  { %v5728_v38 = vadd.f32 %v5727_v49, %v5726_v21  ;;  %v5707_v28 = vadd.f32 %v5699_v18, %v2979_v19  ;;  %v5721_v62 = vadd.f32 %v5713_v56, %v16536_v34  ;;  %v5745_v34 = vld [vmem:[%s20287_s11 + $0x10] sm:$0xff]  ;;  %v5948_v45 = vld [vmem:[%s20289_s13 + $0x38] sm:$0xff]  ;;  %v14131_v49 = vpack.c.bf16 %v5757_v17, %v5753_v24 }
 0x66a   :  { %v5720_v29 = vadd.f32 %v5712_v27, %v16538_v35  ;;  %v5706_v1 = vadd.f32 %v5698_v36, %v2978_v6  ;;  %v13824_v3 = vpop.f32.mrb[22].mxu0  ;;  %v5749_v35 = vld [vmem:[%s20287_s11 + $0x30] sm:$0xff]  ;;  %v5952_v36 = vld [vmem:[%s20289_s13 + $0x58] sm:$0xff] }
 0x66b   :  { %v5715_v5 = vmax.f32 %v5707_v28, 0.0  ;;  %v5701_v33 = vadd.f32 %v13824_v3, %v12495_v40  ;;  %v5671_v39 = vpop.f32.mrb[23].mxu0  ;;  %v5731_v55 = vsel %vm218_vm1, %v5721_v62, 0.0  ;;  %v14127_v50 = vpack.c.bf16 %v5749_v35, %v5745_v34  ;;  %v5943_v21 = vld [vmem:[%s20289_s13 + $0x10] sm:$0xff]  ;;  %v5960_v3 = vld [vmem:[%s20289_s13 + $0x98] sm:$0xff] }
 0x66c   :  { %v5729_v46 = vsel %vm218_vm1, %v5720_v29, 0.0  ;;  %v5714_v44 = vmax.f32 %v5706_v1, 0.0  ;;  %v5700_v51 = vadd.f32 %v12495_v40, %v5671_v39  ;;  %v5947_v27 = vld [vmem:[%s20289_s13 + $0x30] sm:$0xff]  ;;  %v5996_v24 = vld [vmem:[%s20289_s13 + $0x1b8] sm:$0xff] }
 0x66d   :  { %v5730_v9 = vadd.f32 %v5729_v46, %v5728_v38  ;;  %v5723_v30 = vadd.f32 %v5715_v5, %v16550_v42  ;;  %v5709_v16 = vadd.f32 %v5701_v33, %v2981_v7  ;;  %v5754_v42 = vld [vmem:[%s20287_s11 + $0x58] sm:$0xff]  ;;  %v17990_v28 = vpack.c.bf16 %v5947_v27, %v5943_v21  ;;  %v5951_v29 = vld [vmem:[%s20289_s13 + $0x50] sm:$0xff] }
 0x66e   :  { %v5722_v19 = vadd.f32 %v5714_v44, %v16552_v43  ;;  %v5708_v6 = vadd.f32 %v5700_v51, %v2980_v25  ;;  %v14129_v25 = vpack.c.bf16 %v5758_v57, %v5754_v42  ;;  %v5956_v38 = vld [vmem:[%s20289_s13 + $0x78] sm:$0xff]  ;;  %v5955_v1 = vld [vmem:[%s20289_s13 + $0x70] sm:$0xff] }
 0x66f   :  { %v5732_v7 = vadd.f32 %v5731_v55, %v5730_v9  ;;  %v5734_v40 = vsel %vm218_vm1, %v5723_v30, 0.0  ;;  %v5717_v2 = vmax.f32 %v5709_v16, 0.0  ;;  %v17992_v62 = vpack.c.bf16 %v5956_v38, %v5952_v36  ;;  %v5964_v5 = vld [vmem:[%s20289_s13 + $0xb8] sm:$0xff]  ;;  %v5959_v46 = vld [vmem:[%s20289_s13 + $0x90] sm:$0xff] }
 0x670   :  { %v5733_v37 = vsel %vm218_vm1, %v5722_v19, 0.0  ;;  %v5716_v58 = vmax.f32 %v5708_v6, 0.0  ;;  %v18010_v33 = vpack.c.bf16 %v5955_v1, %v5951_v29  ;;  %v18013_v39 = vpack.c.bf16 %v5964_v5, %v5960_v3  ;;  %v5963_v44 = vld [vmem:[%s20289_s13 + $0xb0] sm:$0xff]  ;;  %v5968_v51 = vld [vmem:[%s20289_s13 + $0xd8] sm:$0xff] }
 0x671   :  { %v17949_v43 = vmul.f32 0.25, %v5732_v7  ;;  %v5735_v22 = vadd.f32 %v5734_v40, %v5733_v37  ;;  %v5725_v8 = vadd.f32 %v5717_v2, %v16570_v53  ;;  %v5972_v9 = vld [vmem:[%s20289_s13 + $0xf8] sm:$0xff]  ;;  %v18030_v30 = vpack.c.bf16 %v5963_v44, %v5959_v46  ;;  %v5967_v34 = vld [vmem:[%s20289_s13 + $0xd0] sm:$0xff]  ;;  %v5759_v46 = vld [vmem:[%s20288_s12] sm:$0xf]  ;;  %s16307_s12 = smov 64  }
 0x672   :  { %v5724_v32 = vadd.f32 %v5716_v58, %v16574_v54  ;;  %v17969_v54 = vpack.c.bf16 %v5948_v45, %v5944_v59  ;;  %v18034_v16 = vpack.c.bf16 %v5972_v9, %v5968_v51  ;;  %v5971_v35 = vld [vmem:[%s20289_s13 + $0xf0] sm:$0xff]  ;;  %v5976_v55 = vld [vmem:[%s20289_s13 + $0x118] sm:$0xff]  ;;  %v5761_v38 = vlaneseq }
 0x673   :  { %20345 = vst [vmem:[#allocation8_spill] sm:$0xff] %v17949_v43  ;;  %12496 = vmatmul.mubr.msk.f32.vlgmr.msra.gmra.mrb[24].mxu1 %vm218_vm1, %v17949_v43  ;;  %v5738_v56 = vsel %vm218_vm1, %v5725_v8, 0.0  ;;  %v5980_v19 = vld [vmem:[%s20289_s13 + $0x138] sm:$0xff]  ;;  %v18049_v6 = vpack.c.bf16 %v5971_v35, %v5967_v34  ;;  %v5975_v57 = vld [vmem:[%s20289_s13 + $0x110] sm:$0xff] }
 0x674   :  { %v5736_v48 = vsel %vm218_vm1, %v5724_v32, 0.0  ;;  %14128 = vmatpush1.bf16.msra.mxu1 %v14127_v50  ;;  %5857 = vmatprep.mubr.f32.mxu1 %v20301_v13  ;;  %v18052_v42 = vpack.c.bf16 %v5980_v19, %v5976_v55  ;;  %v5979_v7 = vld [vmem:[%s20289_s13 + $0x130] sm:$0xff]  ;;  %v5984_v40 = vld [vmem:[%s20289_s13 + $0x158] sm:$0xff]  ;;  %v18138_v29 = vshrl.u32 %v5761_v38, 7 }
 0x675   :  { %v5737_v53 = vadd.f32 %v5736_v48, %v5735_v22  ;;  %14130 = vmatprep.subr.bf16.mxu1 %v14129_v25  ;;  %v5988_v2 = vld [vmem:[%s20289_s13 + $0x178] sm:$0xff]  ;;  %v18067_v37 = vpack.c.bf16 %v5979_v7, %v5975_v57  ;;  %v5983_v50 = vld [vmem:[%s20289_s13 + $0x150] sm:$0xff] }
 0x676   :  { %v18070_v58 = vpack.c.bf16 %v5988_v2, %v5984_v40  ;;  %v5987_v22 = vld [vmem:[%s20289_s13 + $0x170] sm:$0xff]  ;;  %v5992_v25 = vld [vmem:[%s20289_s13 + $0x198] sm:$0xff]  ;;  %20347 = vst [vmem:[#allocation10_spill] sm:$0xff] %v18138_v29  ;;  %v20299_v5 = vsub.s32 1, %v18138_v29 }
 0x677   :  { %v5739_v18 = vadd.f32 %v5738_v56, %v5737_v53  ;;  %v18085_v17 = vpack.c.bf16 %v5987_v22, %v5983_v50  ;;  %v18088_v8 = vpack.c.bf16 %v5996_v24, %v5992_v25  ;;  %v5991_v32 = vld [vmem:[%s20289_s13 + $0x190] sm:$0xff]  ;;  %v6000_v45 = vld [vmem:[%s20289_s13 + $0x1d8] sm:$0xff]  ;;  %v20300_v24 = vsub.s32 3, %v18138_v29 }
 0x678   :  { %14132 = vmatpush1.bf16.msra.mxu1 %v14131_v49  ;;  %v5995_v59 = vld [vmem:[%s20289_s13 + $0x1b0] sm:$0xff]  ;;  %v6004_v48 = vld [vmem:[%s20289_s13 + $0x1f8] sm:$0xff]  ;;  %v5768_v44 = vrot.slane %v5759_v46, %v20299_v5 }
 0x679   :  { %v17972_v41 = vmul.f32 0.25, %v5739_v18  ;;  %14166 = vmatprep.subr.bf16.mxu1 %v17969_v54  ;;  %v18103_v49 = vpack.c.bf16 %v5995_v59, %v5991_v32  ;;  %v18106_v53 = vpack.c.bf16 %v6004_v48, %v6000_v45  ;;  %v5999_v56 = vld [vmem:[%s20289_s13 + $0x1d0] sm:$0xff]  ;;  %v5776_v32 = vrot.slane %v5759_v46, %v20300_v24 }
 0x67a   :  { %v6003_v18 = vld [vmem:[%s20289_s13 + $0x1f0] sm:$0xff] }
 0x67b   :  { %20346 = vst [vmem:[#allocation9_spill] sm:$0xff] %v17972_v41  ;;  %12497 = vmatmul.mubr.msk.f32.gmra.mrb[26].mxu1 %vm218_vm1, %v17972_v41  ;;  %v18115_v21 = vpack.c.bf16 %v6003_v18, %v5999_v56 }
 0x67c   :  { %5928 = vmatprep.mubr.f32.mxu1 %v20301_v13 }
 0x67f   :  { %12498 = vmatmul.mubr.msk.f32.vlgmr.msra.gmra.mrb[28].mxu1 %vm218_vm1, %v17949_v43 }
 0x680   :  { %14168 = vmatpush1.bf16.msra.mxu1 %v17990_v28  ;;  %5934 = vmatprep.mubr.f32.mxu1 %v20301_v13 }
 0x681   :  { %14170 = vmatprep.subr.bf16.mxu1 %v17992_v62  ;;  %v6071_v27 = vpop.f32.mrb[24].mxu0 }
 0x682   :  { %v6073_v36 = vpop.f32.mrb[25].mxu0 }
 0x683   :  { %12499 = vmatmul.mubr.msk.f32.gmra.mrb[30].mxu1 %vm218_vm1, %v17972_v41  ;;  %v6150_v51 = vrot.slane %v6073_v36, 1 }
 0x684   :  { %14172 = vmatpush1.bf16.msra.mxu1 %v18010_v33  ;;  %6140 = vmatprep.mubr.f32.mxu1 %v20301_v13 }
 0x685   :  { %14174 = vmatprep.subr.bf16.mxu1 %v18013_v39 }
 0x688   :  { %14176 = vmatpush1.bf16.msra.mxu1 %v18030_v30 }
 0x689   :  { %14178 = vmatprep.subr.bf16.mxu1 %v18034_v16 }
 0x68c   :  { %14180 = vmatpush1.bf16.msra.mxu1 %v18049_v6 }
 0x68d   :  { %14182 = vmatprep.subr.bf16.mxu1 %v18052_v42 }
 0x690   :  { %14184 = vmatpush1.bf16.msra.mxu1 %v18067_v37 }
 0x691   :  { %14186 = vmatprep.subr.bf16.mxu1 %v18070_v58 }
 0x694   :  { %14188 = vmatpush1.bf16.msra.mxu1 %v18085_v17 }
 0x695   :  { %14190 = vmatprep.subr.bf16.mxu1 %v18088_v8 }
 0x698   :  { %14192 = vmatpush1.bf16.msra.mxu1 %v18103_v49 }
 0x699   :  { %14194 = vmatprep.subr.bf16.mxu1 %v18106_v53 }
 0x69c   :  { %14196 = vmatpush1.bf16.msra.mxu1 %v18115_v21 }
 0x69d   :  { %14230 = vmatprep.subr.bf16.mxu1 %v17969_v54 }
 0x69f   :  { %6141 = vmatmul.mubr.f32.vlgmr.msra.gmra.mrb[32].mxu1 %v20301_v13 }
 0x6a0   :  { %14232 = vmatpush1.bf16.msra.mxu1 %v17990_v28  ;;  %6444 = vmatprep.mubr.f32.mxu1 %v20301_v13 }
 0x6a1   :  { %14234 = vmatprep.subr.bf16.mxu1 %v17992_v62 }
 0x6a4   :  { %14236 = vmatpush1.bf16.msra.mxu1 %v18010_v33 }
 0x6a5   :  { %14238 = vmatprep.subr.bf16.mxu1 %v18013_v39 }
 0x6a8   :  { %14240 = vmatpush1.bf16.msra.mxu1 %v18030_v30 }
 0x6a9   :  { %14242 = vmatprep.subr.bf16.mxu1 %v18034_v16 }
 0x6ac   :  { %14244 = vmatpush1.bf16.msra.mxu1 %v18049_v6 }
 0x6ad   :  { %14246 = vmatprep.subr.bf16.mxu1 %v18052_v42 }
 0x6b0   :  { %14248 = vmatpush1.bf16.msra.mxu1 %v18067_v37 }
 0x6b1   :  { %14250 = vmatprep.subr.bf16.mxu1 %v18070_v58 }
 0x6b4   :  { %14252 = vmatpush1.bf16.msra.mxu1 %v18085_v17 }
 0x6b5   :  { %14254 = vmatprep.subr.bf16.mxu1 %v18088_v8 }
 0x6b8   :  { %14256 = vmatpush1.bf16.msra.mxu1 %v18103_v49 }
 0x6b9   :  { %14258 = vmatprep.subr.bf16.mxu1 %v18106_v53 }
 0x6bc   :  { %14260 = vmatpush1.bf16.msra.mxu1 %v18115_v21 }
 0x6bd   :  { %14294 = vmatprep.subr.bf16.mxu1 %v17969_v54 }
 0x746   :  { %v5853_v1 = vpop.f32.mrb[24].mxu1 }
 0x747   :  { %v5855_v3 = vpop.f32.mrb[25].mxu1 }
 0x748   :  { %v18146_v35 = vadd.f32 %v5855_v3, %v5768_v44 }
 0x74a   :  { %20348 = vst [vmem:[#allocation11_spill] sm:$0xff] %v18146_v35  ;;  %v18154_v40 = vadd.f32 %v6073_v36, %v18146_v35 }
 0x74e   :  { %v5859_v9 = vpop.f32.mrb[26].mxu1 }
 0x74f   :  { %v5861_v34 = vpop.f32.mrb[27].mxu1 }
 0x750   :  { %v18148_v55 = vadd.f32 %v5861_v34, %v5768_v44  ;;  %v20303_v34 = vsub.s32 2, %v18138_v29 }
 0x752   :  { %20349 = vst [vmem:[#allocation12_spill] sm:$0xff] %v18148_v55  ;;  %v5930_v19 = vpop.f32.mrb[28].mxu1  ;;  %v18151_v57 = vadd.f32 %v6150_v51, %v18148_v55 }
 0x753   :  { %v5932_v7 = vpop.f32.mrb[29].mxu1 }
 0x754   :  { %15514 = vtanh.f32 %v18151_v57  ;;  %v18163_v48 = vadd.f32 %v5932_v7, %v5776_v32  ;;  %v20305_v7 = vsub.s32 0, %v18138_v29 }
 0x755   :  { %15516 = vtanh.f32 %v18154_v40 }
 0x756   :  { %v5936_v2 = vpop.f32.mrb[30].mxu1 }
 0x757   :  { %v5938_v50 = vpop.f32.mrb[31].mxu1 }
 0x758   :  { %v18168_v38 = vadd.f32 %v5938_v50, %v5776_v32  ;;  %v5772_v50 = vrot.slane %v5759_v46, %v20303_v34 }
 0x75a   :  { %v18183_v32 = vadd.f32 %v5930_v19, %v5772_v50 }
 0x75c   :  { %20350 = vst [vmem:[#allocation13_spill] sm:$0xff] %v18183_v32 }
 0x75e   :  { %v15515_v22 = vpop.eup %15514 }
 0x75f   :  { %6231 = vrot.lane.b32.xlu1 %v15515_v22, %s16307_s12  ;;  %v15517_v25 = vpop.eup %15516 }
 0x763   :  { %6229 = vrot.lane.b32.xlu1 %v15517_v25, %s16307_s12  ;;  %v5764_v25 = vrot.slane %v5759_v46, %v20305_v7 }
 0x765   :  { %v18191_v13 = vadd.f32 %v5853_v1, %v5764_v25 }
 0x767   :  { %v6155_v46 = vadd.f32 %v6071_v27, %v18191_v13 }
 0x772   :  { %v6142_v59 = vpop.f32.mrb[32].mxu1 }
 0x773   :  { %v6144_v45 = vpop.f32.mrb[33].mxu1  ;;  %v6161_v22 = vrot.slane %v6142_v59, 1 }
 0x774   :  { %v6162_v56 = vrot.slane %v6144_v45, 1  ;;  %v6164_v18 = vrot.slane %v6144_v45, 2  ;;  %v6149_v45 = vrot.slane %v6071_v27, 1 }
 0x776   :  { %v18166_v36 = vadd.f32 %v6162_v56, %v18163_v48  ;;  %v18172_v3 = vadd.f32 %v6164_v18, %v18168_v38  ;;  %v18185_v56 = vadd.f32 %v5859_v9, %v5764_v25  ;;  %v6169_v18 = vadd.f32 %v6161_v22, %v18183_v32 }
 0x777   :  { %v12500_v9 = vmul.f32 -1.442695, %v6155_v46 }
 0x778   :  { %15518 = vtanh.f32 %v18166_v36  ;;  %v12504_v5 = vmul.f32 -1.442695, %v6169_v18  ;;  %v6157_v24 = vadd.f32 %v6149_v45, %v18185_v56 }
 0x779   :  { %15520 = vtanh.f32 %v18172_v3 }
 0x77a   :  { %15522 = vpow2.f32 %v12504_v5  ;;  %v12502_v41 = vmul.f32 -1.442695, %v6157_v24 }
 0x77c   :  { %15524 = vpow2.f32 %v12502_v41 }
 0x782   :  { %v15519_v44 = vpop.eup %15518 }
 0x783   :  { %6263 = vrot.lane.b32.xlu0 %v15519_v44, %s16307_s12  ;;  %v15521_v51 = vpop.eup %15520  ;;  %v6163_v44 = vrot.slane %v6142_v59, 2 }
 0x784   :  { %v15523_v22 = vpop.eup %15522 }
 0x785   :  { %v6209_v59 = vadd.f32 1.0, %v15523_v22 }
 0x787   :  { %6265 = vrot.lane.b32.xlu0 %v15521_v51, %s16307_s12  ;;  %v18188_v51 = vadd.f32 %v5936_v2, %v5772_v50  ;;  %v15525_v2 = vpop.eup %15524 }
 0x788   :  { %v6187_v18 = vadd.f32 1.0, %v15525_v2 }
 0x789   :  { %v6171_v34 = vadd.f32 %v6163_v44, %v18188_v51 }
 0x78b   :  { %v12506_v19 = vmul.f32 -1.442695, %v6171_v34 }
 0x78d   :  { %15526 = vpow2.f32 %v12506_v19 }
 0x78e   :  { %15528 = vpow2.f32 %v12500_v9 }
 0x78f   :  { %15530 = vrcp.f32 %v6209_v59 }
 0x790   :  { %15532 = vrcp.f32 %v6187_v18 }
 0x797   :  { %v15527_v50 = vpop.eup %15526 }
 0x798   :  { %v6211_v45 = vadd.f32 1.0, %v15527_v50  ;;  %v15529_v1 = vpop.eup %15528 }
 0x799   :  { %v6185_v25 = vadd.f32 1.0, %v15529_v1  ;;  %v15531_v5 = vpop.eup %15530 }
 0x79a   :  { %15534 = vrcp.f32 %v6211_v45  ;;  %v15533_v41 = vpop.eup %15532  ;;  %v6259_v50 = vmul.f32 0.0, %v15531_v5 }
 0x79b   :  { %15536 = vrcp.f32 %v6185_v25  ;;  %v6226_v1 = vmul.f32 0.0, %v15533_v41 }
 0x7a4   :  { %v15535_v44 = vpop.eup %15534 }
 0x7a5   :  { %v15537_v59 = vpop.eup %15536  ;;  %v6260_v25 = vmul.f32 0.0, %v15535_v44 }
 0x7d1   :  { %v6232_v27 = vpop.permute.xlu1 %6231 }
 0x7d2   :  { %v6236_v46 = vmul.f32 %v15533_v41, %v6232_v27 }
 0x7d5   :  { %v6230_v22 = vpop.permute.xlu1 %6229 }
 0x7d6   :  { %v6235_v2 = vmul.f32 %v15537_v59, %v6230_v22 }
 0x7f5   :  { %v6264_v24 = vpop.permute.xlu0 %6263 }
 0x7f6   :  { %v6269_v34 = vmul.f32 %v15531_v5, %v6264_v24 }
 0x7f8   :  { %6273 = vrot.lane.b32.xlu0 %v6269_v34, %s16307_s12 }
 0x7f9   :  { %v6266_v19 = vpop.permute.xlu0 %6265 }
 0x7fa   :  { %v6270_v9 = vmul.f32 %v15535_v44, %v6266_v19 }
 0x7fc   :  { %6241 = vrot.lane.b32.xlu0 %v6236_v46, %s16307_s12  ;;  %6275 = vrot.lane.b32.xlu1 %v6270_v9, %s16307_s12  ;;  %v6225_v46 = vmul.f32 0.0, %v15537_v59  ;;  %v12503_v59 = vmul.f32 -1.442695, %v18151_v57 }
 0x800   :  { %6239 = vrot.lane.b32.xlu1 %v6235_v2, %s16307_s12 }
 0x86a   :  { %v6274_v18 = vpop.permute.xlu0 %6273 }
 0x86b   :  { %v18199_v45 = vadd.f32 %v6274_v18, %v6259_v50  ;;  %v12505_v50 = vmul.f32 -1.442695, %v18166_v36  ;;  %v12507_v18 = vmul.f32 -1.442695, %v18172_v3 }
 0x86d   :  { %15538 = vtanh.f32 %v18199_v45 }
 0x86e   :  { %v6242_v24 = vpop.permute.xlu0 %6241  ;;  %v6276_v27 = vpop.permute.xlu1 %6275 }
 0x86f   :  { %v18202_v34 = vadd.f32 %v6242_v24, %v6226_v1  ;;  %v18204_v19 = vadd.f32 %v6276_v27, %v6260_v25  ;;  %v12501_v1 = vmul.f32 -1.442695, %v18154_v40 }
 0x871   :  { %15540 = vtanh.f32 %v18202_v34 }
 0x872   :  { %15542 = vtanh.f32 %v18204_v19  ;;  %v6240_v9 = vpop.permute.xlu1 %6239 }
 0x873   :  { %v18208_v5 = vadd.f32 %v6240_v9, %v6225_v46 }
 0x875   :  { %15544 = vtanh.f32 %v18208_v5 }
 0x876   :  { %15546 = vpow2.f32 %v12505_v50 }
 0x877   :  { %v15539_v22 = vpop.eup %15538  ;;  %15548 = vpow2.f32 %v12503_v59 }
 0x878   :  { %6285 = vrot.lane.b32.xlu0 %v15539_v22, %s16307_s12  ;;  %15550 = vpow2.f32 %v12507_v18 }
 0x879   :  { %15552 = vpow2.f32 %v12501_v1 }
 0x87b   :  { %v15541_v41 = vpop.eup %15540 }
 0x87c   :  { %v15543_v44 = vpop.eup %15542  ;;  %6253 = vrot.lane.b32.xlu0 %v15541_v41, %s16307_s12 }
 0x87d   :  { %6287 = vrot.lane.b32.xlu1 %v15543_v44, %s16307_s12 }
 0x87f   :  { %v15545_v2 = vpop.eup %15544 }
 0x880   :  { %v15547_v25 = vpop.eup %15546 }
 0x881   :  { %6251 = vrot.lane.b32.xlu1 %v15545_v2, %s16307_s12  ;;  %v15549_v24 = vpop.eup %15548  ;;  %v6210_v46 = vadd.f32 1.0, %v15547_v25 }
 0x882   :  { %v15551_v27 = vpop.eup %15550  ;;  %v6188_v9 = vadd.f32 1.0, %v15549_v24 }
 0x883   :  { %v6212_v22 = vadd.f32 1.0, %v15551_v27  ;;  %v15553_v41 = vpop.eup %15552  ;;  %15554 = vrcp.f32 %v6210_v46 }
 0x884   :  { %15556 = vrcp.f32 %v6188_v9  ;;  %v6186_v36 = vadd.f32 1.0, %v15553_v41 }
 0x885   :  { %15558 = vrcp.f32 %v6212_v22 }
 0x886   :  { %15560 = vrcp.f32 %v6186_v36 }
 0x88d   :  { %v15555_v3 = vpop.eup %15554 }
 0x88e   :  { %v15557_v44 = vpop.eup %15556 }
 0x88f   :  { %v15559_v50 = vpop.eup %15558 }
 0x890   :  { %v15561_v27 = vpop.eup %15560 }
 0x8ea   :  { %v6286_v57 = vpop.permute.xlu0 %6285 }
 0x8eb   :  { %v18219_v2 = vmul.f32 %v15555_v3, %v6286_v57 }
 0x8ed   :  { %20351 = vst [vmem:[#allocation14_spill] sm:$0xff] %v18219_v2  ;;  %v6301_v25 = vrot.slane %v18219_v2, 7 }
 0x8ee   :  { %v6254_v40 = vpop.permute.xlu0 %6253 }
 0x8ef   :  { %v6288_v59 = vpop.permute.xlu1 %6287  ;;  %v6258_v1 = vmul.f32 %v15557_v44, %v6254_v40  ;;  %v20354_v44 = vmov 0.0  }
 0x8f0   :  { %v18221_v18 = vmul.f32 %v15559_v50, %v6288_v59 }
 0x8f1   :  { %v6295_v9 = vrot.slane %v6258_v1, 7 }
 0x8f2   :  { %20352 = vst [vmem:[#allocation15_spill] sm:$0xff] %v18221_v18  ;;  %v6302_v24 = vrot.slane %v18221_v18, 6 }
 0x8f3   :  { %v6252_v46 = vpop.permute.xlu1 %6251 }
 0x8f4   :  { %v6257_v22 = vmul.f32 %v15561_v27, %v6252_v46  ;;  %v6303_v41 = vsel %vm6296_vm3, %v6302_v24, %v6301_v25 }
 0x8f5   :  { %6304 = vrot.lane.b32.xlu0 %v6303_v41, %s16307_s12 }
 0x8f6   :  { %v18228_v36 = vsel %vm6296_vm3, %v6295_v9, %v6257_v22 }
 0x8f7   :  { %20353 = vst [vmem:[#allocation16_spill] sm:$0xff] %v18228_v36 }
 0x967   :  { %v6305_v57 = vpop.permute.xlu0 %6304 }
 0x968   :  { %v6308_v3 = vsel %vm6307_vm4, %v18228_v36, %v6305_v57 }
 0x969   :  { %6374 = vmatmul.mubr.f32.vlgmr.msra.gmra.mrb[26].mxu0 %v6308_v3  ;;  %6445 = vmatmul.mubr.f32.vlgmr.msra.gmra.mrb[34].mxu1 %v6308_v3 }
 0x96a   :  { %14264 = vmatpush1.bf16.msra.mxu0 %v17721_v10  ;;  %14296 = vmatpush1.bf16.msra.mxu1 %v17990_v28 }
 0x96b   :  { %14266 = vmatprep.subr.bf16.mxu0 %v17723_v60  ;;  %14298 = vmatprep.subr.bf16.mxu1 %v17992_v62 }
 0x96c   :  { %6691 = vmatprep.mubr.f32.mxu0 %v20354_v44  ;;  %6762 = vmatprep.mubr.f32.mxu1 %v20354_v44 }
 0x96e   :  { %14268 = vmatpush1.bf16.msra.mxu0 %v17741_v14  ;;  %14300 = vmatpush1.bf16.msra.mxu1 %v18010_v33 }
 0x96f   :  { %14270 = vmatprep.subr.bf16.mxu0 %v17744_v23  ;;  %14302 = vmatprep.subr.bf16.mxu1 %v18013_v39 }
 0x972   :  { %14272 = vmatpush1.bf16.msra.mxu0 %v17764_v15  ;;  %14304 = vmatpush1.bf16.msra.mxu1 %v18030_v30 }
 0x973   :  { %14274 = vmatprep.subr.bf16.mxu0 %v17773_v12  ;;  %14306 = vmatprep.subr.bf16.mxu1 %v18034_v16 }
 0x976   :  { %14276 = vmatpush1.bf16.msra.mxu0 %v17781_v0  ;;  %14308 = vmatpush1.bf16.msra.mxu1 %v18049_v6 }
 0x977   :  { %14278 = vmatprep.subr.bf16.mxu0 %v17791_v11  ;;  %14310 = vmatprep.subr.bf16.mxu1 %v18052_v42 }
 0x97a   :  { %14280 = vmatpush1.bf16.msra.mxu0 %v17799_v63  ;;  %14312 = vmatpush1.bf16.msra.mxu1 %v18067_v37 }
 0x97b   :  { %14282 = vmatprep.subr.bf16.mxu0 %v17809_v4  ;;  %14314 = vmatprep.subr.bf16.mxu1 %v18070_v58 }
 0x97e   :  { %14284 = vmatpush1.bf16.msra.mxu0 %v17823_v52  ;;  %14316 = vmatpush1.bf16.msra.mxu1 %v18085_v17 }
 0x97f   :  { %14286 = vmatprep.subr.bf16.mxu0 %v17839_v61  ;;  %14318 = vmatprep.subr.bf16.mxu1 %v18088_v8 }
 0x982   :  { %14288 = vmatpush1.bf16.msra.mxu0 %v17853_v31  ;;  %14320 = vmatpush1.bf16.msra.mxu1 %v18103_v49 }
 0x983   :  { %14290 = vmatprep.subr.bf16.mxu0 %v17869_v20  ;;  %14322 = vmatprep.subr.bf16.mxu1 %v18106_v53 }
 0x986   :  { %14292 = vmatpush1.bf16.msra.mxu0 %v17877_v26  ;;  %14324 = vmatpush1.bf16.msra.mxu1 %v18115_v21 }
 0x987   :  { %14326 = vmatprep.subr.bf16.mxu0 %v17695_v47  ;;  %14358 = vmatprep.subr.bf16.mxu1 %v17969_v54 }
 0xa3c   :  { %v6375_v40 = vpop.f32.mrb[26].mxu0  ;;  %v6446_v50 = vpop.f32.mrb[34].mxu1 }
 0xa3d   :  { %v6377_v59 = vpop.f32.mrb[27].mxu0  ;;  %v6448_v1 = vpop.f32.mrb[35].mxu1  ;;  %v6453_v7 = vrot.slane %v6375_v40, 7  ;;  %v6461_v36 = vadd.f32 %v6375_v40, %v18185_v56 }
 0xa3e   :  { %v6466_v25 = vrot.slane %v6448_v1, 2  ;;  %v6468_v24 = vrot.slane %v6448_v1, 3  ;;  %v6454_v46 = vrot.slane %v6377_v59, 7  ;;  %v18273_v22 = vadd.f32 %v6377_v59, %v18148_v55 }
 0xa40   :  { %v18267_v27 = vadd.f32 %v6466_v25, %v18163_v48  ;;  %v18270_v9 = vadd.f32 %v6468_v24, %v18168_v38  ;;  %v18277_v41 = vadd.f32 %v6454_v46, %v18146_v35  ;;  %v6465_v25 = vrot.slane %v6446_v50, 2 }
 0xa41   :  { %v6467_v24 = vrot.slane %v6446_v50, 3 }
 0xa42   :  { %15562 = vtanh.f32 %v18267_v27  ;;  %v6473_v46 = vadd.f32 %v6465_v25, %v18183_v32 }
 0xa43   :  { %15564 = vtanh.f32 %v18270_v9  ;;  %v6475_v43 = vadd.f32 %v6467_v24, %v18188_v51 }
 0xa44   :  { %15566 = vtanh.f32 %v18273_v22  ;;  %v12512_v18 = vmul.f32 -1.442695, %v6473_v46 }
 0xa45   :  { %15568 = vtanh.f32 %v18277_v41  ;;  %v12514_v29 = vmul.f32 -1.442695, %v6475_v43 }
 0xa46   :  { %15570 = vpow2.f32 %v12512_v18 }
 0xa47   :  { %15572 = vpow2.f32 %v12514_v29 }
 0xa4c   :  { %v15563_v57 = vpop.eup %15562 }
 0xa4d   :  { %v15565_v3 = vpop.eup %15564  ;;  %6579 = vrot.lane.b32.xlu1 %v15563_v57, %s16307_s12  ;;  %v6459_v57 = vadd.f32 %v6453_v7, %v18191_v13 }
 0xa4e   :  { %6581 = vrot.lane.b32.xlu0 %v15565_v3, %s16307_s12  ;;  %v15567_v1 = vpop.eup %15566  ;;  %v12510_v3 = vmul.f32 -1.442695, %v6461_v36 }
 0xa4f   :  { %v15569_v59 = vpop.eup %15568  ;;  %v12508_v2 = vmul.f32 -1.442695, %v6459_v57 }
 0xa50   :  { %15574 = vpow2.f32 %v12510_v3 }
 0xa51   :  { %6541 = vrot.lane.b32.xlu1 %v15567_v1, %s16307_s12  ;;  %15576 = vpow2.f32 %v12508_v2  ;;  %v15571_v1 = vpop.eup %15570 }
 0xa52   :  { %6539 = vrot.lane.b32.xlu0 %v15569_v59, %s16307_s12  ;;  %v15573_v59 = vpop.eup %15572  ;;  %v6513_v50 = vadd.f32 1.0, %v15571_v1 }
 0xa53   :  { %v6515_v25 = vadd.f32 1.0, %v15573_v59 }
 0xa54   :  { %15578 = vrcp.f32 %v6513_v50 }
 0xa55   :  { %15580 = vrcp.f32 %v6515_v25 }
 0xa5a   :  { %v15575_v35 = vpop.eup %15574 }
 0xa5b   :  { %v15577_v32 = vpop.eup %15576  ;;  %v6491_v55 = vadd.f32 1.0, %v15575_v35 }
 0xa5c   :  { %v6489_v24 = vadd.f32 1.0, %v15577_v32  ;;  %v6572_v32 = vrot.slane %v18204_v19, 1 }
 0xa5d   :  { %15582 = vrcp.f32 %v6491_v55  ;;  %v6571_v55 = vrot.slane %v18199_v45, 1 }
 0xa5e   :  { %15584 = vrcp.f32 %v6489_v24  ;;  %v15579_v7 = vpop.eup %15578  ;;  %v6532_v24 = vrot.slane %v18202_v34, 7 }
 0xa5f   :  { %v15581_v36 = vpop.eup %15580  ;;  %v6575_v59 = vmul.f32 %v15579_v7, %v6571_v55  ;;  %v12511_v55 = vmul.f32 -1.442695, %v18273_v22 }
 0xa60   :  { %v6576_v25 = vmul.f32 %v15581_v36, %v6572_v32  ;;  %v12509_v32 = vmul.f32 -1.442695, %v18277_v41 }
 0xa67   :  { %v15583_v2 = vpop.eup %15582 }
 0xa68   :  { %v15585_v57 = vpop.eup %15584 }
 0xabf   :  { %v6580_v43 = vpop.permute.xlu1 %6579 }
 0xac0   :  { %v6582_v18 = vpop.permute.xlu0 %6581  ;;  %v6585_v40 = vmul.f32 %v15579_v7, %v6580_v43 }
 0xac1   :  { %v6586_v29 = vmul.f32 %v15581_v36, %v6582_v18 }
 0xac2   :  { %6589 = vrot.lane.b32.xlu1 %v6585_v40, %s16307_s12  ;;  %v6531_v40 = vrot.slane %v18208_v5, 7 }
 0xac3   :  { %6591 = vrot.lane.b32.xlu0 %v6586_v29, %s16307_s12  ;;  %v6542_v46 = vpop.permute.xlu1 %6541 }
 0xac4   :  { %v6546_v3 = vmul.f32 %v15583_v2, %v6542_v46  ;;  %v6540_v35 = vpop.permute.xlu0 %6539  ;;  %v6536_v46 = vmul.f32 %v15583_v2, %v6532_v24 }
 0xac5   :  { %v6545_v1 = vmul.f32 %v15585_v57, %v6540_v35 }
 0xac6   :  { %6551 = vrot.lane.b32.xlu1 %v6546_v3, %s16307_s12  ;;  %v6535_v3 = vmul.f32 %v15585_v57, %v6531_v40  ;;  %v12513_v57 = vmul.f32 -1.442695, %v18267_v27 }
 0xac7   :  { %6549 = vrot.lane.b32.xlu0 %v6545_v1, %s16307_s12  ;;  %v12515_v1 = vmul.f32 -1.442695, %v18270_v9 }
 0xb34   :  { %v6590_v50 = vpop.permute.xlu1 %6589 }
 0xb35   :  { %v18297_v43 = vadd.f32 %v6590_v50, %v6575_v59  ;;  %v6592_v18 = vpop.permute.xlu0 %6591 }
 0xb36   :  { %v18300_v29 = vadd.f32 %v6592_v18, %v6576_v25 }
 0xb37   :  { %15586 = vtanh.f32 %v18297_v43 }
 0xb38   :  { %15588 = vtanh.f32 %v18300_v29  ;;  %v6552_v45 = vpop.permute.xlu1 %6551 }
 0xb39   :  { %v18304_v19 = vadd.f32 %v6552_v45, %v6536_v46  ;;  %v6550_v7 = vpop.permute.xlu0 %6549 }
 0xb3a   :  { %v18306_v36 = vadd.f32 %v6550_v7, %v6535_v3 }
 0xb3b   :  { %15590 = vtanh.f32 %v18304_v19 }
 0xb3c   :  { %15592 = vtanh.f32 %v18306_v36 }
 0xb3d   :  { %15594 = vpow2.f32 %v12513_v57 }
 0xb3e   :  { %15596 = vpow2.f32 %v12515_v1 }
 0xb3f   :  { %15598 = vpow2.f32 %v12511_v55 }
 0xb40   :  { %15600 = vpow2.f32 %v12509_v32 }
 0xb41   :  { %v15587_v34 = vpop.eup %15586 }
 0xb42   :  { %v15589_v5 = vpop.eup %15588  ;;  %6601 = vrot.lane.b32.xlu1 %v15587_v34, %s16307_s12 }
 0xb43   :  { %6603 = vrot.lane.b32.xlu0 %v15589_v5, %s16307_s12 }
 0xb45   :  { %v15591_v2 = vpop.eup %15590 }
 0xb46   :  { %v15593_v35 = vpop.eup %15592  ;;  %6563 = vrot.lane.b32.xlu1 %v15591_v2, %s16307_s12 }
 0xb47   :  { %6561 = vrot.lane.b32.xlu0 %v15593_v35, %s16307_s12  ;;  %v15595_v59 = vpop.eup %15594 }
 0xb48   :  { %v15597_v50 = vpop.eup %15596  ;;  %v6514_v25 = vadd.f32 1.0, %v15595_v59 }
 0xb49   :  { %v15599_v24 = vpop.eup %15598  ;;  %v6516_v18 = vadd.f32 1.0, %v15597_v50 }
 0xb4a   :  { %v15601_v40 = vpop.eup %15600  ;;  %v6492_v46 = vadd.f32 1.0, %v15599_v24  ;;  %15602 = vrcp.f32 %v6514_v25 }
 0xb4b   :  { %15604 = vrcp.f32 %v6516_v18  ;;  %v6490_v27 = vadd.f32 1.0, %v15601_v40 }
 0xb4c   :  { %15606 = vrcp.f32 %v6492_v46 }
 0xb4d   :  { %15608 = vrcp.f32 %v6490_v27 }
 0xb54   :  { %v15603_v9 = vpop.eup %15602 }
 0xb55   :  { %v15605_v45 = vpop.eup %15604 }
 0xb56   :  { %v15607_v5 = vpop.eup %15606 }
 0xb57   :  { %v15609_v32 = vpop.eup %15608 }
 0xbb4   :  { %v6602_v22 = vpop.permute.xlu1 %6601 }
 0xbb5   :  { %v6607_v3 = vmul.f32 %v15603_v9, %v6602_v22  ;;  %v6604_v7 = vpop.permute.xlu0 %6603 }
 0xbb6   :  { %v6608_v41 = vmul.f32 %v15605_v45, %v6604_v7 }
 0xbb7   :  { %v6617_v34 = vrot.slane %v6607_v3, 5 }
 0xbb8   :  { %v6618_v2 = vrot.slane %v6608_v41, 4  ;;  %v8739_v35 = vrot.slane %v6608_v41, 7  ;;  %v6564_v57 = vpop.permute.xlu1 %6563 }
 0xbb9   :  { %v6568_v1 = vmul.f32 %v15607_v5, %v6564_v57  ;;  %v6562_v55 = vpop.permute.xlu0 %6561  ;;  %v20357_v57 = vld [vmem:[#allocation12_spill] sm:$0xff] }
 0xbba   :  { %v6619_v59 = vsel %vm6612_vm5, %v6618_v2, %v6617_v34  ;;  %v18320_v50 = vsel %vm8209_vm6, %v8739_v35, %v6607_v3  ;;  %v6567_v24 = vmul.f32 %v15609_v32, %v6562_v55  ;;  %v20358_v55 = vld [vmem:[#allocation11_spill] sm:$0xff] }
 0xbbb   :  { %20355 = vst [vmem:[#allocation17_spill] sm:$0xff] %v18320_v50  ;;  %v6611_v25 = vrot.slane %v6568_v1, 7  ;;  %6620 = vrot.lane.b32.xlu1 %v6619_v59, %s16307_s12 }
 0xbbd   :  { %v18324_v18 = vsel %vm6612_vm5, %v6611_v25, %v6567_v24 }
 0xbbe   :  { %20356 = vst [vmem:[#allocation18_spill] sm:$0xff] %v18324_v18 }
 0xc2d   :  { %v6621_v40 = vpop.permute.xlu1 %6620 }
 0xc2e   :  { %v6623_v46 = vsel %vm6307_vm4, %v18324_v18, %v6621_v40 }
 0xc2f   :  { %v6625_v27 = vrot.slane %v6623_v46, 1 }
 0xc31   :  { %6692 = vmatmul.mubr.f32.vlgmr.msra.gmra.mrb[28].mxu0 %v6625_v27  ;;  %6763 = vmatmul.mubr.f32.vlgmr.msra.gmra.mrb[36].mxu1 %v6625_v27 }
 0xc32   :  { %14328 = vmatpush1.bf16.msra.mxu0 %v17721_v10  ;;  %14360 = vmatpush1.bf16.msra.mxu1 %v17990_v28 }
 0xc33   :  { %14330 = vmatprep.subr.bf16.mxu0 %v17723_v60  ;;  %14362 = vmatprep.subr.bf16.mxu1 %v17992_v62 }
 0xc34   :  { %7011 = vmatprep.mubr.f32.mxu0 %v20354_v44  ;;  %7082 = vmatprep.mubr.f32.mxu1 %v20354_v44 }
 0xc36   :  { %14332 = vmatpush1.bf16.msra.mxu0 %v17741_v14  ;;  %14364 = vmatpush1.bf16.msra.mxu1 %v18010_v33 }
 0xc37   :  { %14334 = vmatprep.subr.bf16.mxu0 %v17744_v23  ;;  %14366 = vmatprep.subr.bf16.mxu1 %v18013_v39 }
 0xc3a   :  { %14336 = vmatpush1.bf16.msra.mxu0 %v17764_v15  ;;  %14368 = vmatpush1.bf16.msra.mxu1 %v18030_v30 }
 0xc3b   :  { %14338 = vmatprep.subr.bf16.mxu0 %v17773_v12  ;;  %14370 = vmatprep.subr.bf16.mxu1 %v18034_v16 }
 0xc3e   :  { %14340 = vmatpush1.bf16.msra.mxu0 %v17781_v0  ;;  %14372 = vmatpush1.bf16.msra.mxu1 %v18049_v6 }
 0xc3f   :  { %14342 = vmatprep.subr.bf16.mxu0 %v17791_v11  ;;  %14374 = vmatprep.subr.bf16.mxu1 %v18052_v42 }
 0xc42   :  { %14344 = vmatpush1.bf16.msra.mxu0 %v17799_v63  ;;  %14376 = vmatpush1.bf16.msra.mxu1 %v18067_v37 }
 0xc43   :  { %14346 = vmatprep.subr.bf16.mxu0 %v17809_v4  ;;  %14378 = vmatprep.subr.bf16.mxu1 %v18070_v58 }
 0xc46   :  { %14348 = vmatpush1.bf16.msra.mxu0 %v17823_v52  ;;  %14380 = vmatpush1.bf16.msra.mxu1 %v18085_v17 }
 0xc47   :  { %14350 = vmatprep.subr.bf16.mxu0 %v17839_v61  ;;  %14382 = vmatprep.subr.bf16.mxu1 %v18088_v8 }
 0xc4a   :  { %14352 = vmatpush1.bf16.msra.mxu0 %v17853_v31  ;;  %14384 = vmatpush1.bf16.msra.mxu1 %v18103_v49 }
 0xc4b   :  { %14354 = vmatprep.subr.bf16.mxu0 %v17869_v20  ;;  %14386 = vmatprep.subr.bf16.mxu1 %v18106_v53 }
 0xc4e   :  { %14356 = vmatpush1.bf16.msra.mxu0 %v17877_v26  ;;  %14388 = vmatpush1.bf16.msra.mxu1 %v18115_v21 }
 0xc4f   :  { %14390 = vmatprep.subr.bf16.mxu0 %v17695_v47  ;;  %14422 = vmatprep.subr.bf16.mxu1 %v17969_v54 }
 0xd04   :  { %v6693_v9 = vpop.f32.mrb[28].mxu0  ;;  %v6764_v22 = vpop.f32.mrb[36].mxu1 }
 0xd05   :  { %v6695_v45 = vpop.f32.mrb[29].mxu0  ;;  %v6766_v3 = vpop.f32.mrb[37].mxu1  ;;  %v6785_v46 = vrot.slane %v6764_v22, 3  ;;  %v6787_v27 = vrot.slane %v6764_v22, 4 }
 0xd06   :  { %v6786_v7 = vrot.slane %v6766_v3, 3  ;;  %v6788_v41 = vrot.slane %v6766_v3, 4  ;;  %v6774_v34 = vrot.slane %v6695_v45, 7  ;;  %v6772_v2 = vrot.slane %v6695_v45, 6  ;;  %v20359_v3 = vld [vmem:[#allocation13_spill] sm:$0xff] }
 0xd07   :  { %v6773_v45 = vrot.slane %v6693_v9, 7 }
 0xd08   :  { %v18363_v5 = vadd.f32 %v6786_v7, %v18163_v48  ;;  %v18366_v35 = vadd.f32 %v6788_v41, %v18168_v38  ;;  %v18369_v1 = vadd.f32 %v6774_v34, %v20357_v57  ;;  %v18373_v32 = vadd.f32 %v6772_v2, %v20358_v55 }
 0xd09   :  { %v6793_v7 = vadd.f32 %v6785_v46, %v20359_v3  ;;  %v6771_v41 = vrot.slane %v6693_v9, 6  ;;  %v6795_v34 = vadd.f32 %v6787_v27, %v18188_v51  ;;  %v6781_v2 = vadd.f32 %v6773_v45, %v18185_v56 }
 0xd0a   :  { %15610 = vtanh.f32 %v18363_v5 }
 0xd0b   :  { %15612 = vtanh.f32 %v18366_v35  ;;  %v12520_v18 = vmul.f32 -1.442695, %v6793_v7  ;;  %v12518_v50 = vmul.f32 -1.442695, %v6781_v2 }
 0xd0c   :  { %15614 = vtanh.f32 %v18369_v1 }
 0xd0d   :  { %15616 = vtanh.f32 %v18373_v32 }
 0xd0e   :  { %15618 = vpow2.f32 %v12520_v18 }
 0xd14   :  { %v15611_v59 = vpop.eup %15610 }
 0xd15   :  { %v15613_v25 = vpop.eup %15612  ;;  %6899 = vrot.lane.b32.xlu0 %v15611_v59, %s16307_s12  ;;  %v6779_v59 = vadd.f32 %v6771_v41, %v18191_v13 }
 0xd16   :  { %6901 = vrot.lane.b32.xlu1 %v15613_v25, %s16307_s12  ;;  %v15615_v24 = vpop.eup %15614  ;;  %v12522_v25 = vmul.f32 -1.442695, %v6795_v34 }
 0xd17   :  { %v15617_v40 = vpop.eup %15616  ;;  %v12516_v55 = vmul.f32 -1.442695, %v6779_v59 }
 0xd18   :  { %15620 = vpow2.f32 %v12522_v25 }
 0xd19   :  { %6861 = vrot.lane.b32.xlu0 %v15615_v24, %s16307_s12  ;;  %15622 = vpow2.f32 %v12518_v50  ;;  %v15619_v24 = vpop.eup %15618 }
 0xd1a   :  { %6859 = vrot.lane.b32.xlu1 %v15617_v40, %s16307_s12  ;;  %15624 = vpow2.f32 %v12516_v55  ;;  %v6833_v40 = vadd.f32 1.0, %v15619_v24 }
 0xd1c   :  { %15626 = vrcp.f32 %v6833_v40 }
 0xd22   :  { %v15621_v22 = vpop.eup %15620 }
 0xd23   :  { %v15623_v57 = vpop.eup %15622  ;;  %v6835_v46 = vadd.f32 1.0, %v15621_v22  ;;  %v6892_v22 = vrot.slane %v18300_v29, 1 }
 0xd24   :  { %v15625_v9 = vpop.eup %15624  ;;  %v6811_v3 = vadd.f32 1.0, %v15623_v57 }
 0xd25   :  { %v6809_v27 = vadd.f32 1.0, %v15625_v9  ;;  %15628 = vrcp.f32 %v6835_v46 }
 0xd26   :  { %15630 = vrcp.f32 %v6811_v3  ;;  %v15627_v45 = vpop.eup %15626  ;;  %v6891_v3 = vrot.slane %v18297_v43, 1 }
 0xd27   :  { %15632 = vrcp.f32 %v6809_v27  ;;  %v6852_v27 = vrot.slane %v18304_v19, 7 }
 0xd28   :  { %v6895_v40 = vmul.f32 %v15627_v45, %v6891_v3  ;;  %v12519_v3 = vmul.f32 -1.442695, %v18369_v1 }
 0xd2f   :  { %v15629_v41 = vpop.eup %15628 }
 0xd30   :  { %v15631_v50 = vpop.eup %15630  ;;  %v6896_v9 = vmul.f32 %v15629_v41, %v6892_v22  ;;  %v12517_v22 = vmul.f32 -1.442695, %v18373_v32 }
 0xd31   :  { %v15633_v59 = vpop.eup %15632 }
 0xd87   :  { %v6900_v7 = vpop.permute.xlu0 %6899 }
 0xd88   :  { %v6902_v18 = vpop.permute.xlu1 %6901  ;;  %v6905_v34 = vmul.f32 %v15627_v45, %v6900_v7 }
 0xd89   :  { %v6906_v2 = vmul.f32 %v15629_v41, %v6902_v18 }
 0xd8a   :  { %6909 = vrot.lane.b32.xlu0 %v6905_v34, %s16307_s12  ;;  %v6851_v34 = vrot.slane %v18306_v36, 7 }
 0xd8b   :  { %6911 = vrot.lane.b32.xlu1 %v6906_v2, %s16307_s12  ;;  %v6862_v55 = vpop.permute.xlu0 %6861 }
 0xd8c   :  { %v6866_v25 = vmul.f32 %v15631_v50, %v6862_v55  ;;  %v6860_v57 = vpop.permute.xlu1 %6859  ;;  %v6856_v55 = vmul.f32 %v15631_v50, %v6852_v27 }
 0xd8d   :  { %v6865_v24 = vmul.f32 %v15633_v59, %v6860_v57 }
 0xd8e   :  { %6871 = vrot.lane.b32.xlu0 %v6866_v25, %s16307_s12  ;;  %v6855_v25 = vmul.f32 %v15633_v59, %v6851_v34  ;;  %v12521_v59 = vmul.f32 -1.442695, %v18363_v5 }
 0xd8f   :  { %6869 = vrot.lane.b32.xlu1 %v6865_v24, %s16307_s12  ;;  %v12523_v24 = vmul.f32 -1.442695, %v18366_v35 }
 0xdfc   :  { %v6910_v46 = vpop.permute.xlu0 %6909 }
 0xdfd   :  { %v18393_v7 = vadd.f32 %v6910_v46, %v6895_v40  ;;  %v6912_v18 = vpop.permute.xlu1 %6911 }
 0xdfe   :  { %v18396_v2 = vadd.f32 %v6912_v18, %v6896_v9 }
 0xdff   :  { %15634 = vtanh.f32 %v18393_v7 }
 0xe00   :  { %15636 = vtanh.f32 %v18396_v2  ;;  %v6872_v43 = vpop.permute.xlu0 %6871 }
 0xe01   :  { %v18400_v29 = vadd.f32 %v6872_v43, %v6856_v55  ;;  %v6870_v45 = vpop.permute.xlu1 %6869 }
 0xe02   :  { %v18402_v41 = vadd.f32 %v6870_v45, %v6855_v25 }
 0xe03   :  { %15638 = vtanh.f32 %v18400_v29 }
 0xe04   :  { %15640 = vtanh.f32 %v18402_v41 }
 0xe05   :  { %15642 = vpow2.f32 %v12521_v59 }
 0xe06   :  { %15644 = vpow2.f32 %v12523_v24 }
 0xe07   :  { %15646 = vpow2.f32 %v12519_v3 }
 0xe08   :  { %15648 = vpow2.f32 %v12517_v22 }
 0xe09   :  { %v15635_v19 = vpop.eup %15634 }
 0xe0a   :  { %v15637_v36 = vpop.eup %15636  ;;  %6921 = vrot.lane.b32.xlu0 %v15635_v19, %s16307_s12 }
 0xe0b   :  { %6923 = vrot.lane.b32.xlu1 %v15637_v36, %s16307_s12 }
 0xe0d   :  { %v15639_v50 = vpop.eup %15638 }
 0xe0e   :  { %v15641_v57 = vpop.eup %15640  ;;  %6883 = vrot.lane.b32.xlu0 %v15639_v50, %s16307_s12 }
 0xe0f   :  { %6881 = vrot.lane.b32.xlu1 %v15641_v57, %s16307_s12  ;;  %v15643_v40 = vpop.eup %15642 }
 0xe10   :  { %v15645_v46 = vpop.eup %15644  ;;  %v6834_v9 = vadd.f32 1.0, %v15643_v40 }
 0xe11   :  { %v15647_v27 = vpop.eup %15646  ;;  %v6836_v18 = vadd.f32 1.0, %v15645_v46 }
 0xe12   :  { %v15649_v34 = vpop.eup %15648  ;;  %v6812_v55 = vadd.f32 1.0, %v15647_v27  ;;  %15650 = vrcp.f32 %v6834_v9 }
 0xe13   :  { %15652 = vrcp.f32 %v6836_v18  ;;  %v6810_v5 = vadd.f32 1.0, %v15649_v34 }
 0xe14   :  { %15654 = vrcp.f32 %v6812_v55 }
 0xe15   :  { %15656 = vrcp.f32 %v6810_v5 }
 0xe1c   :  { %v15651_v35 = vpop.eup %15650 }
 0xe1d   :  { %v15653_v43 = vpop.eup %15652 }
 0xe1e   :  { %v15655_v36 = vpop.eup %15654 }
 0xe1f   :  { %v15657_v22 = vpop.eup %15656 }
 0xe7c   :  { %v6922_v1 = vpop.permute.xlu0 %6921 }
 0xe7d   :  { %v6927_v25 = vmul.f32 %v15651_v35, %v6922_v1  ;;  %v6924_v45 = vpop.permute.xlu1 %6923 }
 0xe7e   :  { %v6928_v32 = vmul.f32 %v15653_v43, %v6924_v45 }
 0xe7f   :  { %v6937_v19 = vrot.slane %v6927_v25, 3 }
 0xe80   :  { %v6938_v50 = vrot.slane %v6928_v32, 2  ;;  %v8704_v57 = vrot.slane %v6928_v32, 7  ;;  %v6884_v59 = vpop.permute.xlu0 %6883 }
 0xe81   :  { %v6888_v24 = vmul.f32 %v15655_v36, %v6884_v59  ;;  %v6882_v3 = vpop.permute.xlu1 %6881  ;;  %v20362_v59 = vld [vmem:[#allocation12_spill] sm:$0xff] }
 0xe82   :  { %v6939_v40 = vsel %vm6932_vm7, %v6938_v50, %v6937_v19  ;;  %v18416_v46 = vsel %vm7891_vm8, %v8704_v57, %v6927_v25  ;;  %v6887_v27 = vmul.f32 %v15657_v22, %v6882_v3  ;;  %v20363_v3 = vld [vmem:[#allocation11_spill] sm:$0xff] }
 0xe83   :  { %20360 = vst [vmem:[#allocation19_spill] sm:$0xff] %v18416_v46  ;;  %v6931_v9 = vrot.slane %v6888_v24, 7  ;;  %6940 = vrot.lane.b32.xlu0 %v6939_v40, %s16307_s12 }
 0xe85   :  { %v18420_v18 = vsel %vm6932_vm7, %v6931_v9, %v6887_v27 }
 0xe86   :  { %20361 = vst [vmem:[#allocation20_spill] sm:$0xff] %v18420_v18 }
 0xef5   :  { %v6941_v34 = vpop.permute.xlu0 %6940 }
 0xef6   :  { %v6943_v55 = vsel %vm6307_vm4, %v18420_v18, %v6941_v34 }
 0xef7   :  { %v6945_v5 = vrot.slane %v6943_v55, 2 }
 0xef9   :  { %7012 = vmatmul.mubr.f32.vlgmr.msra.gmra.mrb[30].mxu0 %v6945_v5  ;;  %7083 = vmatmul.mubr.f32.vlgmr.msra.gmra.mrb[38].mxu1 %v6945_v5 }
 0xefa   :  { %14392 = vmatpush1.bf16.msra.mxu0 %v17721_v10  ;;  %14424 = vmatpush1.bf16.msra.mxu1 %v17990_v28 }
 0xefb   :  { %14394 = vmatprep.subr.bf16.mxu0 %v17723_v60  ;;  %14426 = vmatprep.subr.bf16.mxu1 %v17992_v62 }
 0xefc   :  { %7330 = vmatprep.mubr.f32.mxu0 %v20354_v44  ;;  %7401 = vmatprep.mubr.f32.mxu1 %v20354_v44 }
 0xefe   :  { %14396 = vmatpush1.bf16.msra.mxu0 %v17741_v14  ;;  %14428 = vmatpush1.bf16.msra.mxu1 %v18010_v33 }
 0xeff   :  { %14398 = vmatprep.subr.bf16.mxu0 %v17744_v23  ;;  %14430 = vmatprep.subr.bf16.mxu1 %v18013_v39 }
 0xf02   :  { %14400 = vmatpush1.bf16.msra.mxu0 %v17764_v15  ;;  %14432 = vmatpush1.bf16.msra.mxu1 %v18030_v30 }
 0xf03   :  { %14402 = vmatprep.subr.bf16.mxu0 %v17773_v12  ;;  %14434 = vmatprep.subr.bf16.mxu1 %v18034_v16 }
 0xf06   :  { %14404 = vmatpush1.bf16.msra.mxu0 %v17781_v0  ;;  %14436 = vmatpush1.bf16.msra.mxu1 %v18049_v6 }
 0xf07   :  { %14406 = vmatprep.subr.bf16.mxu0 %v17791_v11  ;;  %14438 = vmatprep.subr.bf16.mxu1 %v18052_v42 }
 0xf0a   :  { %14408 = vmatpush1.bf16.msra.mxu0 %v17799_v63  ;;  %14440 = vmatpush1.bf16.msra.mxu1 %v18067_v37 }
 0xf0b   :  { %14410 = vmatprep.subr.bf16.mxu0 %v17809_v4  ;;  %14442 = vmatprep.subr.bf16.mxu1 %v18070_v58 }
 0xf0e   :  { %14412 = vmatpush1.bf16.msra.mxu0 %v17823_v52  ;;  %14444 = vmatpush1.bf16.msra.mxu1 %v18085_v17 }
 0xf0f   :  { %14414 = vmatprep.subr.bf16.mxu0 %v17839_v61  ;;  %14446 = vmatprep.subr.bf16.mxu1 %v18088_v8 }
 0xf12   :  { %14416 = vmatpush1.bf16.msra.mxu0 %v17853_v31  ;;  %14448 = vmatpush1.bf16.msra.mxu1 %v18103_v49 }
 0xf13   :  { %14418 = vmatprep.subr.bf16.mxu0 %v17869_v20  ;;  %14450 = vmatprep.subr.bf16.mxu1 %v18106_v53 }
 0xf16   :  { %14420 = vmatpush1.bf16.msra.mxu0 %v17877_v26  ;;  %14452 = vmatpush1.bf16.msra.mxu1 %v18115_v21 }
 0xf17   :  { %14454 = vmatprep.subr.bf16.mxu0 %v17695_v47  ;;  %14486 = vmatprep.subr.bf16.mxu1 %v17969_v54 }
 0xfcc   :  { %v7013_v35 = vpop.f32.mrb[30].mxu0  ;;  %v7084_v1 = vpop.f32.mrb[38].mxu1 }
 0xfcd   :  { %v7015_v43 = vpop.f32.mrb[31].mxu0  ;;  %v7086_v25 = vpop.f32.mrb[39].mxu1  ;;  %v7105_v55 = vrot.slane %v7084_v1, 4  ;;  %v7107_v5 = vrot.slane %v7084_v1, 5 }
 0xfce   :  { %v7106_v45 = vrot.slane %v7086_v25, 4  ;;  %v7108_v32 = vrot.slane %v7086_v25, 5  ;;  %v7094_v19 = vrot.slane %v7015_v43, 6  ;;  %v7092_v50 = vrot.slane %v7015_v43, 5  ;;  %v20364_v25 = vld [vmem:[#allocation13_spill] sm:$0xff] }
 0xfcf   :  { %v7093_v43 = vrot.slane %v7013_v35, 6 }
 0xfd0   :  { %v18459_v36 = vadd.f32 %v7106_v45, %v18163_v48  ;;  %v18462_v57 = vadd.f32 %v7108_v32, %v18168_v38  ;;  %v18465_v24 = vadd.f32 %v7094_v19, %v20362_v59  ;;  %v18469_v22 = vadd.f32 %v7092_v50, %v20363_v3 }
 0xfd1   :  { %v7113_v45 = vadd.f32 %v7105_v55, %v20364_v25  ;;  %v7091_v32 = vrot.slane %v7013_v35, 5  ;;  %v7115_v19 = vadd.f32 %v7107_v5, %v18188_v51  ;;  %v7101_v50 = vadd.f32 %v7093_v43, %v18185_v56 }
 0xfd2   :  { %15658 = vtanh.f32 %v18459_v36 }
 0xfd3   :  { %15660 = vtanh.f32 %v18462_v57  ;;  %v12528_v18 = vmul.f32 -1.442695, %v7113_v45  ;;  %v12526_v46 = vmul.f32 -1.442695, %v7101_v50 }
 0xfd4   :  { %15662 = vtanh.f32 %v18465_v24 }
 0xfd5   :  { %15664 = vtanh.f32 %v18469_v22 }
 0xfd6   :  { %15666 = vpow2.f32 %v12528_v18 }
 0xfdc   :  { %v15659_v40 = vpop.eup %15658 }
 0xfdd   :  { %v15661_v9 = vpop.eup %15660  ;;  %7219 = vrot.lane.b32.xlu1 %v15659_v40, %s16307_s12  ;;  %v7099_v40 = vadd.f32 %v7091_v32, %v18191_v13 }
 0xfde   :  { %7221 = vrot.lane.b32.xlu0 %v15661_v9, %s16307_s12  ;;  %v15663_v27 = vpop.eup %15662  ;;  %v12530_v9 = vmul.f32 -1.442695, %v7115_v19 }
 0xfdf   :  { %v15665_v34 = vpop.eup %15664  ;;  %v12524_v3 = vmul.f32 -1.442695, %v7099_v40 }
 0xfe0   :  { %15668 = vpow2.f32 %v12530_v9 }
 0xfe1   :  { %7181 = vrot.lane.b32.xlu1 %v15663_v27, %s16307_s12  ;;  %15670 = vpow2.f32 %v12526_v46  ;;  %v15667_v27 = vpop.eup %15666 }
 0xfe2   :  { %7179 = vrot.lane.b32.xlu0 %v15665_v34, %s16307_s12  ;;  %15672 = vpow2.f32 %v12524_v3  ;;  %v7153_v34 = vadd.f32 1.0, %v15667_v27 }
 0xfe4   :  { %15674 = vrcp.f32 %v7153_v34 }
 0xfea   :  { %v15669_v1 = vpop.eup %15668 }
 0xfeb   :  { %v15671_v59 = vpop.eup %15670  ;;  %v7155_v55 = vadd.f32 1.0, %v15669_v1  ;;  %v7212_v1 = vrot.slane %v18396_v2, 1 }
 0xfec   :  { %v15673_v35 = vpop.eup %15672  ;;  %v7131_v25 = vadd.f32 1.0, %v15671_v59 }
 0xfed   :  { %v7129_v5 = vadd.f32 1.0, %v15673_v35  ;;  %15676 = vrcp.f32 %v7155_v55 }
 0xfee   :  { %15678 = vrcp.f32 %v7131_v25  ;;  %v15675_v43 = vpop.eup %15674  ;;  %v7211_v25 = vrot.slane %v18393_v7, 1 }
 0xfef   :  { %15680 = vrcp.f32 %v7129_v5  ;;  %v7172_v5 = vrot.slane %v18400_v29, 7 }
 0xff0   :  { %v7215_v34 = vmul.f32 %v15675_v43, %v7211_v25  ;;  %v12527_v25 = vmul.f32 -1.442695, %v18465_v24 }
 0xff7   :  { %v15677_v32 = vpop.eup %15676 }
 0xff8   :  { %v15679_v46 = vpop.eup %15678  ;;  %v7216_v35 = vmul.f32 %v15677_v32, %v7212_v1  ;;  %v12525_v1 = vmul.f32 -1.442695, %v18469_v22 }
 0xff9   :  { %v15681_v40 = vpop.eup %15680 }
0x104f   :  { %v7220_v45 = vpop.permute.xlu1 %7219 }
0x1050   :  { %v7222_v18 = vpop.permute.xlu0 %7221  ;;  %v7225_v19 = vmul.f32 %v15675_v43, %v7220_v45 }
0x1051   :  { %v7226_v50 = vmul.f32 %v15677_v32, %v7222_v18 }
0x1052   :  { %7229 = vrot.lane.b32.xlu1 %v7225_v19, %s16307_s12  ;;  %v7171_v19 = vrot.slane %v18402_v41, 7 }
0x1053   :  { %7231 = vrot.lane.b32.xlu0 %v7226_v50, %s16307_s12  ;;  %v7182_v3 = vpop.permute.xlu1 %7181 }
0x1054   :  { %v7186_v9 = vmul.f32 %v15679_v46, %v7182_v3  ;;  %v7180_v59 = vpop.permute.xlu0 %7179  ;;  %v7176_v3 = vmul.f32 %v15679_v46, %v7172_v5 }
0x1055   :  { %v7185_v27 = vmul.f32 %v15681_v40, %v7180_v59 }
0x1056   :  { %7191 = vrot.lane.b32.xlu1 %v7186_v9, %s16307_s12  ;;  %v7175_v9 = vmul.f32 %v15681_v40, %v7171_v19  ;;  %v12529_v40 = vmul.f32 -1.442695, %v18459_v36 }
0x1057   :  { %7189 = vrot.lane.b32.xlu0 %v7185_v27, %s16307_s12  ;;  %v12531_v27 = vmul.f32 -1.442695, %v18462_v57 }
0x10c4   :  { %v7230_v55 = vpop.permute.xlu1 %7229 }
0x10c5   :  { %v18489_v45 = vadd.f32 %v7230_v55, %v7215_v34  ;;  %v7232_v18 = vpop.permute.xlu0 %7231 }
0x10c6   :  { %v18492_v50 = vadd.f32 %v7232_v18, %v7216_v35 }
0x10c7   :  { %15682 = vtanh.f32 %v18489_v45 }
0x10c8   :  { %15684 = vtanh.f32 %v18492_v50  ;;  %v7192_v7 = vpop.permute.xlu1 %7191 }
0x10c9   :  { %v18496_v2 = vadd.f32 %v7192_v7, %v7176_v3  ;;  %v7190_v43 = vpop.permute.xlu0 %7189 }
0x10ca   :  { %v18498_v32 = vadd.f32 %v7190_v43, %v7175_v9 }
0x10cb   :  { %15686 = vtanh.f32 %v18496_v2 }
0x10cc   :  { %15688 = vtanh.f32 %v18498_v32 }
0x10cd   :  { %15690 = vpow2.f32 %v12529_v40 }
0x10ce   :  { %15692 = vpow2.f32 %v12531_v27 }
0x10cf   :  { %15694 = vpow2.f32 %v12527_v25 }
0x10d0   :  { %15696 = vpow2.f32 %v12525_v1 }
0x10d1   :  { %v15683_v29 = vpop.eup %15682 }
0x10d2   :  { %v15685_v41 = vpop.eup %15684  ;;  %7241 = vrot.lane.b32.xlu1 %v15683_v29, %s16307_s12 }
0x10d3   :  { %7243 = vrot.lane.b32.xlu0 %v15685_v41, %s16307_s12 }
0x10d5   :  { %v15687_v46 = vpop.eup %15686 }
0x10d6   :  { %v15689_v59 = vpop.eup %15688  ;;  %7203 = vrot.lane.b32.xlu1 %v15687_v46, %s16307_s12 }
0x10d7   :  { %7201 = vrot.lane.b32.xlu0 %v15689_v59, %s16307_s12  ;;  %v15691_v34 = vpop.eup %15690 }
0x10d8   :  { %v15693_v55 = vpop.eup %15692  ;;  %v7154_v35 = vadd.f32 1.0, %v15691_v34 }
0x10d9   :  { %v15695_v5 = vpop.eup %15694  ;;  %v7156_v18 = vadd.f32 1.0, %v15693_v55 }
0x10da   :  { %v15697_v19 = vpop.eup %15696  ;;  %v7132_v3 = vadd.f32 1.0, %v15695_v5  ;;  %15698 = vrcp.f32 %v7154_v35 }
0x10db   :  { %15700 = vrcp.f32 %v7156_v18  ;;  %v7130_v36 = vadd.f32 1.0, %v15697_v19 }
0x10dc   :  { %15702 = vrcp.f32 %v7132_v3 }
0x10dd   :  { %15704 = vrcp.f32 %v7130_v36 }
0x10e4   :  { %v15699_v57 = vpop.eup %15698 }
0x10e5   :  { %v15701_v7 = vpop.eup %15700 }
0x10e6   :  { %v15703_v41 = vpop.eup %15702 }
0x10e7   :  { %v15705_v1 = vpop.eup %15704 }
0x1144   :  { %v7242_v24 = vpop.permute.xlu1 %7241 }
0x1145   :  { %v7247_v9 = vmul.f32 %v15699_v57, %v7242_v24  ;;  %v7244_v43 = vpop.permute.xlu0 %7243 }
0x1146   :  { %v7248_v22 = vmul.f32 %v15701_v7, %v7244_v43 }
0x1147   :  { %v7257_v29 = vrot.slane %v7247_v9, 1 }
0x1148   :  { %v8670_v46 = vrot.slane %v7248_v22, 7  ;;  %v7204_v59 = vpop.permute.xlu1 %7203 }
0x1149   :  { %v7208_v40 = vmul.f32 %v15703_v41, %v7204_v59  ;;  %v7202_v27 = vpop.permute.xlu0 %7201  ;;  %v7258_v25 = vsel %vm7252_vm9, %v7248_v22, %v7257_v29  ;;  %v20367_v59 = vld [vmem:[#allocation12_spill] sm:$0xff] }
0x114a   :  { %7259 = vrot.lane.b32.xlu1 %v7258_v25, %s16307_s12  ;;  %v18513_v34 = vsel %vm7571_vm10, %v8670_v46, %v7247_v9  ;;  %v7207_v35 = vmul.f32 %v15705_v1, %v7202_v27  ;;  %v20368_v27 = vld [vmem:[#allocation11_spill] sm:$0xff] }
0x114b   :  { %20365 = vst [vmem:[#allocation21_spill] sm:$0xff] %v18513_v34  ;;  %v7251_v55 = vrot.slane %v7208_v40, 7 }
0x114d   :  { %v18516_v5 = vsel %vm7252_vm9, %v7251_v55, %v7207_v35 }
0x114e   :  { %20366 = vst [vmem:[#allocation22_spill] sm:$0xff] %v18516_v5 }
0x11bc   :  { %v7260_v18 = vpop.permute.xlu1 %7259 }
0x11bd   :  { %v7262_v19 = vsel %vm6307_vm4, %v18516_v5, %v7260_v18 }
0x11be   :  { %v7264_v3 = vrot.slane %v7262_v19, 3 }
0x11c0   :  { %7331 = vmatmul.mubr.f32.vlgmr.msra.gmra.mrb[32].mxu0 %v7264_v3  ;;  %7402 = vmatmul.mubr.f32.vlgmr.msra.gmra.mrb[40].mxu1 %v7264_v3 }
0x11c1   :  { %14456 = vmatpush1.bf16.msra.mxu0 %v17721_v10  ;;  %14488 = vmatpush1.bf16.msra.mxu1 %v17990_v28 }
0x11c2   :  { %14458 = vmatprep.subr.bf16.mxu0 %v17723_v60  ;;  %14490 = vmatprep.subr.bf16.mxu1 %v17992_v62 }
0x11c3   :  { %7650 = vmatprep.mubr.f32.mxu0 %v20354_v44  ;;  %7721 = vmatprep.mubr.f32.mxu1 %v20354_v44 }
0x11c5   :  { %14460 = vmatpush1.bf16.msra.mxu0 %v17741_v14  ;;  %14492 = vmatpush1.bf16.msra.mxu1 %v18010_v33 }
0x11c6   :  { %14462 = vmatprep.subr.bf16.mxu0 %v17744_v23  ;;  %14494 = vmatprep.subr.bf16.mxu1 %v18013_v39 }
0x11c9   :  { %14464 = vmatpush1.bf16.msra.mxu0 %v17764_v15  ;;  %14496 = vmatpush1.bf16.msra.mxu1 %v18030_v30 }
0x11ca   :  { %14466 = vmatprep.subr.bf16.mxu0 %v17773_v12  ;;  %14498 = vmatprep.subr.bf16.mxu1 %v18034_v16 }
0x11cd   :  { %14468 = vmatpush1.bf16.msra.mxu0 %v17781_v0  ;;  %14500 = vmatpush1.bf16.msra.mxu1 %v18049_v6 }
0x11ce   :  { %14470 = vmatprep.subr.bf16.mxu0 %v17791_v11  ;;  %14502 = vmatprep.subr.bf16.mxu1 %v18052_v42 }
0x11d1   :  { %14472 = vmatpush1.bf16.msra.mxu0 %v17799_v63  ;;  %14504 = vmatpush1.bf16.msra.mxu1 %v18067_v37 }
0x11d2   :  { %14474 = vmatprep.subr.bf16.mxu0 %v17809_v4  ;;  %14506 = vmatprep.subr.bf16.mxu1 %v18070_v58 }
0x11d5   :  { %14476 = vmatpush1.bf16.msra.mxu0 %v17823_v52  ;;  %14508 = vmatpush1.bf16.msra.mxu1 %v18085_v17 }
0x11d6   :  { %14478 = vmatprep.subr.bf16.mxu0 %v17839_v61  ;;  %14510 = vmatprep.subr.bf16.mxu1 %v18088_v8 }
0x11d9   :  { %14480 = vmatpush1.bf16.msra.mxu0 %v17853_v31  ;;  %14512 = vmatpush1.bf16.msra.mxu1 %v18103_v49 }
0x11da   :  { %14482 = vmatprep.subr.bf16.mxu0 %v17869_v20  ;;  %14514 = vmatprep.subr.bf16.mxu1 %v18106_v53 }
0x11dd   :  { %14484 = vmatpush1.bf16.msra.mxu0 %v17877_v26  ;;  %14516 = vmatpush1.bf16.msra.mxu1 %v18115_v21 }
0x11de   :  { %14518 = vmatprep.subr.bf16.mxu0 %v17695_v47  ;;  %14550 = vmatprep.subr.bf16.mxu1 %v17969_v54 }
0x1293   :  { %v7332_v36 = vpop.f32.mrb[32].mxu0  ;;  %v7403_v57 = vpop.f32.mrb[40].mxu1 }
0x1294   :  { %v7334_v24 = vpop.f32.mrb[33].mxu0  ;;  %v7405_v7 = vpop.f32.mrb[41].mxu1  ;;  %v7424_v19 = vrot.slane %v7403_v57, 5  ;;  %v7426_v3 = vrot.slane %v7403_v57, 6 }
0x1295   :  { %v7425_v9 = vrot.slane %v7405_v7, 5  ;;  %v7427_v43 = vrot.slane %v7405_v7, 6  ;;  %v7413_v22 = vrot.slane %v7334_v24, 5  ;;  %v7411_v41 = vrot.slane %v7334_v24, 4  ;;  %v20369_v7 = vld [vmem:[#allocation13_spill] sm:$0xff] }
0x1296   :  { %v7412_v24 = vrot.slane %v7332_v36, 5 }
0x1297   :  { %v18555_v29 = vadd.f32 %v7425_v9, %v18163_v48  ;;  %v18558_v46 = vadd.f32 %v7427_v43, %v18168_v38  ;;  %v18561_v40 = vadd.f32 %v7413_v22, %v20367_v59  ;;  %v18565_v25 = vadd.f32 %v7411_v41, %v20368_v27 }
0x1298   :  { %v7432_v9 = vadd.f32 %v7424_v19, %v20369_v7  ;;  %v7410_v43 = vrot.slane %v7332_v36, 4  ;;  %v7434_v22 = vadd.f32 %v7426_v3, %v18188_v51  ;;  %v7420_v41 = vadd.f32 %v7412_v24, %v18185_v56 }
0x1299   :  { %15706 = vtanh.f32 %v18555_v29 }
0x129a   :  { %15708 = vtanh.f32 %v18558_v46  ;;  %v12536_v5 = vmul.f32 -1.442695, %v7432_v9  ;;  %v12534_v34 = vmul.f32 -1.442695, %v7420_v41 }
0x129b   :  { %15710 = vtanh.f32 %v18561_v40 }
0x129c   :  { %15712 = vtanh.f32 %v18565_v25 }
0x129d   :  { %15714 = vpow2.f32 %v12536_v5 }
0x12a3   :  { %v15707_v1 = vpop.eup %15706 }
0x12a4   :  { %v15709_v55 = vpop.eup %15708  ;;  %7538 = vrot.lane.b32.xlu0 %v15707_v1, %s16307_s12  ;;  %v7418_v1 = vadd.f32 %v7410_v43, %v18191_v13 }
0x12a5   :  { %7540 = vrot.lane.b32.xlu1 %v15709_v55, %s16307_s12  ;;  %v15711_v35 = vpop.eup %15710  ;;  %v12538_v55 = vmul.f32 -1.442695, %v7434_v22 }
0x12a6   :  { %v15713_v18 = vpop.eup %15712  ;;  %v12532_v27 = vmul.f32 -1.442695, %v7418_v1 }
0x12a7   :  { %15716 = vpow2.f32 %v12538_v55 }
0x12a8   :  { %7500 = vrot.lane.b32.xlu0 %v15711_v35, %s16307_s12  ;;  %15718 = vpow2.f32 %v12534_v34  ;;  %v15715_v35 = vpop.eup %15714 }
0x12a9   :  { %7498 = vrot.lane.b32.xlu1 %v15713_v18, %s16307_s12  ;;  %15720 = vpow2.f32 %v12532_v27  ;;  %v7472_v18 = vadd.f32 1.0, %v15715_v35 }
0x12ab   :  { %15722 = vrcp.f32 %v7472_v18 }
0x12b1   :  { %v15717_v57 = vpop.eup %15716 }
0x12b2   :  { %v15719_v59 = vpop.eup %15718  ;;  %v7474_v19 = vadd.f32 1.0, %v15717_v57  ;;  %v7531_v57 = vrot.slane %v18492_v50, 1 }
0x12b3   :  { %v15721_v36 = vpop.eup %15720  ;;  %v7450_v7 = vadd.f32 1.0, %v15719_v59 }
0x12b4   :  { %v7448_v3 = vadd.f32 1.0, %v15721_v36  ;;  %15724 = vrcp.f32 %v7474_v19 }
0x12b5   :  { %15726 = vrcp.f32 %v7450_v7  ;;  %v15723_v24 = vpop.eup %15722  ;;  %v7530_v7 = vrot.slane %v18489_v45, 1 }
0x12b6   :  { %15728 = vrcp.f32 %v7448_v3  ;;  %v7491_v3 = vrot.slane %v18496_v2, 7 }
0x12b7   :  { %v7534_v18 = vmul.f32 %v15723_v24, %v7530_v7  ;;  %v12535_v7 = vmul.f32 -1.442695, %v18561_v40 }
0x12be   :  { %v15725_v43 = vpop.eup %15724 }
0x12bf   :  { %v15727_v34 = vpop.eup %15726  ;;  %v7535_v36 = vmul.f32 %v15725_v43, %v7531_v57  ;;  %v12533_v57 = vmul.f32 -1.442695, %v18565_v25 }
0x12c0   :  { %v15729_v1 = vpop.eup %15728 }
0x1316   :  { %v7539_v9 = vpop.permute.xlu0 %7538 }
0x1317   :  { %v7541_v5 = vpop.permute.xlu1 %7540  ;;  %v7544_v22 = vmul.f32 %v15723_v24, %v7539_v9 }
0x1318   :  { %v7545_v41 = vmul.f32 %v15725_v43, %v7541_v5 }
0x1319   :  { %7548 = vrot.lane.b32.xlu0 %v7544_v22, %s16307_s12  ;;  %v7490_v22 = vrot.slane %v18498_v32, 7 }
0x131a   :  { %7550 = vrot.lane.b32.xlu1 %v7545_v41, %s16307_s12  ;;  %v7501_v27 = vpop.permute.xlu0 %7500 }
0x131b   :  { %v7505_v55 = vmul.f32 %v15727_v34, %v7501_v27  ;;  %v7499_v59 = vpop.permute.xlu1 %7498  ;;  %v7495_v27 = vmul.f32 %v15727_v34, %v7491_v3 }
0x131c   :  { %v7504_v35 = vmul.f32 %v15729_v1, %v7499_v59 }
0x131d   :  { %7510 = vrot.lane.b32.xlu0 %v7505_v55, %s16307_s12  ;;  %v7494_v55 = vmul.f32 %v15729_v1, %v7490_v22  ;;  %v12537_v1 = vmul.f32 -1.442695, %v18555_v29 }
0x131e   :  { %7508 = vrot.lane.b32.xlu1 %v7504_v35, %s16307_s12  ;;  %v12539_v35 = vmul.f32 -1.442695, %v18558_v46 }
0x138b   :  { %v7549_v19 = vpop.permute.xlu0 %7548 }
0x138c   :  { %v18585_v9 = vadd.f32 %v7549_v19, %v7534_v18  ;;  %v7551_v5 = vpop.permute.xlu1 %7550 }
0x138d   :  { %v18588_v41 = vadd.f32 %v7551_v5, %v7535_v36 }
0x138e   :  { %15730 = vtanh.f32 %v18585_v9 }
0x138f   :  { %15732 = vtanh.f32 %v18588_v41  ;;  %v7511_v45 = vpop.permute.xlu0 %7510 }
0x1390   :  { %v18592_v50 = vadd.f32 %v7511_v45, %v7495_v27  ;;  %v7509_v24 = vpop.permute.xlu1 %7508 }
0x1391   :  { %v18594_v43 = vadd.f32 %v7509_v24, %v7494_v55 }
0x1392   :  { %15734 = vtanh.f32 %v18592_v50 }
0x1393   :  { %15736 = vtanh.f32 %v18594_v43 }
0x1394   :  { %15738 = vpow2.f32 %v12537_v1 }
0x1395   :  { %15740 = vpow2.f32 %v12539_v35 }
0x1396   :  { %15742 = vpow2.f32 %v12535_v7 }
0x1397   :  { %15744 = vpow2.f32 %v12533_v57 }
0x1398   :  { %v15731_v2 = vpop.eup %15730 }
0x1399   :  { %v15733_v32 = vpop.eup %15732  ;;  %7560 = vrot.lane.b32.xlu0 %v15731_v2, %s16307_s12 }
0x139a   :  { %7562 = vrot.lane.b32.xlu1 %v15733_v32, %s16307_s12 }
0x139c   :  { %v15735_v34 = vpop.eup %15734 }
0x139d   :  { %v15737_v59 = vpop.eup %15736  ;;  %7522 = vrot.lane.b32.xlu0 %v15735_v34, %s16307_s12 }
0x139e   :  { %7520 = vrot.lane.b32.xlu1 %v15737_v59, %s16307_s12  ;;  %v15739_v18 = vpop.eup %15738 }
0x139f   :  { %v15741_v19 = vpop.eup %15740  ;;  %v7473_v36 = vadd.f32 1.0, %v15739_v18 }
0x13a0   :  { %v15743_v3 = vpop.eup %15742  ;;  %v7475_v5 = vadd.f32 1.0, %v15741_v19 }
0x13a1   :  { %v15745_v22 = vpop.eup %15744  ;;  %v7451_v27 = vadd.f32 1.0, %v15743_v3  ;;  %15746 = vrcp.f32 %v7473_v36 }
0x13a2   :  { %15748 = vrcp.f32 %v7475_v5  ;;  %v7449_v29 = vadd.f32 1.0, %v15745_v22 }
0x13a3   :  { %15750 = vrcp.f32 %v7451_v27 }
0x13a4   :  { %15752 = vrcp.f32 %v7449_v29 }
0x13ab   :  { %v15747_v46 = vpop.eup %15746 }
0x13ac   :  { %v15749_v45 = vpop.eup %15748 }
0x13ad   :  { %v15751_v32 = vpop.eup %15750 }
0x13ae   :  { %v15753_v57 = vpop.eup %15752 }
0x140b   :  { %v7561_v40 = vpop.permute.xlu0 %7560 }
0x140c   :  { %v7566_v55 = vmul.f32 %v15747_v46, %v7561_v40  ;;  %v7563_v24 = vpop.permute.xlu1 %7562 }
0x140d   :  { %v7567_v25 = vmul.f32 %v15749_v45, %v7563_v24 }
0x140e   :  { %v7576_v2 = vrot.slane %v7566_v55, 7 }
0x140f   :  { %v7577_v34 = vrot.slane %v7567_v25, 6  ;;  %v8628_v59 = vrot.slane %v7567_v25, 7  ;;  %v7523_v1 = vpop.permute.xlu0 %7522 }
0x1410   :  { %v7527_v35 = vmul.f32 %v15751_v32, %v7523_v1  ;;  %v7521_v7 = vpop.permute.xlu1 %7520  ;;  %v20372_v1 = vld [vmem:[#allocation12_spill] sm:$0xff] }
0x1411   :  { %v7578_v18 = vsel %vm7571_vm10, %v7577_v34, %v7576_v2  ;;  %v18608_v19 = vsel %vm7252_vm9, %v8628_v59, %v7566_v55  ;;  %v7526_v3 = vmul.f32 %v15753_v57, %v7521_v7 }
0x1412   :  { %20370 = vst [vmem:[#allocation23_spill] sm:$0xff] %v18608_v19  ;;  %v7570_v36 = vrot.slane %v7527_v35, 7  ;;  %7579 = vrot.lane.b32.xlu0 %v7578_v18, %s16307_s12 }
0x1414   :  { %v18612_v5 = vsel %vm7571_vm10, %v7570_v36, %v7526_v3 }
0x1415   :  { %20371 = vst [vmem:[#allocation24_spill] sm:$0xff] %v18612_v5 }
0x1484   :  { %v7580_v22 = vpop.permute.xlu0 %7579 }
0x1485   :  { %v7582_v27 = vsel %vm6307_vm4, %v18612_v5, %v7580_v22 }
0x1486   :  { %v7584_v29 = vrot.slane %v7582_v27, 4 }
0x1488   :  { %7651 = vmatmul.mubr.f32.vlgmr.msra.gmra.mrb[34].mxu0 %v7584_v29  ;;  %7722 = vmatmul.mubr.f32.vlgmr.msra.gmra.mrb[42].mxu1 %v7584_v29  ;;  %v20374_v29 = vld [vmem:[#allocation13_spill] sm:$0xff] }
0x1489   :  { %14520 = vmatpush1.bf16.msra.mxu0 %v17721_v10  ;;  %14552 = vmatpush1.bf16.msra.mxu1 %v17990_v28 }
0x148a   :  { %14522 = vmatprep.subr.bf16.mxu0 %v17723_v60  ;;  %14554 = vmatprep.subr.bf16.mxu1 %v17992_v62 }
0x148b   :  { %7970 = vmatprep.mubr.f32.mxu0 %v20354_v44  ;;  %8041 = vmatprep.mubr.f32.mxu1 %v20354_v44 }
0x148d   :  { %14524 = vmatpush1.bf16.msra.mxu0 %v17741_v14  ;;  %14556 = vmatpush1.bf16.msra.mxu1 %v18010_v33 }
0x148e   :  { %14526 = vmatprep.subr.bf16.mxu0 %v17744_v23  ;;  %14558 = vmatprep.subr.bf16.mxu1 %v18013_v39 }
0x1491   :  { %14528 = vmatpush1.bf16.msra.mxu0 %v17764_v15  ;;  %14560 = vmatpush1.bf16.msra.mxu1 %v18030_v30 }
0x1492   :  { %14530 = vmatprep.subr.bf16.mxu0 %v17773_v12  ;;  %14562 = vmatprep.subr.bf16.mxu1 %v18034_v16 }
0x1495   :  { %14532 = vmatpush1.bf16.msra.mxu0 %v17781_v0  ;;  %14564 = vmatpush1.bf16.msra.mxu1 %v18049_v6 }
0x1496   :  { %14534 = vmatprep.subr.bf16.mxu0 %v17791_v11  ;;  %14566 = vmatprep.subr.bf16.mxu1 %v18052_v42 }
0x1499   :  { %14536 = vmatpush1.bf16.msra.mxu0 %v17799_v63  ;;  %14568 = vmatpush1.bf16.msra.mxu1 %v18067_v37 }
0x149a   :  { %14538 = vmatprep.subr.bf16.mxu0 %v17809_v4  ;;  %14570 = vmatprep.subr.bf16.mxu1 %v18070_v58 }
0x149d   :  { %14540 = vmatpush1.bf16.msra.mxu0 %v17823_v52  ;;  %14572 = vmatpush1.bf16.msra.mxu1 %v18085_v17 }
0x149e   :  { %14542 = vmatprep.subr.bf16.mxu0 %v17839_v61  ;;  %14574 = vmatprep.subr.bf16.mxu1 %v18088_v8 }
0x14a1   :  { %14544 = vmatpush1.bf16.msra.mxu0 %v17853_v31  ;;  %14576 = vmatpush1.bf16.msra.mxu1 %v18103_v49 }
0x14a2   :  { %14546 = vmatprep.subr.bf16.mxu0 %v17869_v20  ;;  %14578 = vmatprep.subr.bf16.mxu1 %v18106_v53 }
0x14a5   :  { %14548 = vmatpush1.bf16.msra.mxu0 %v17877_v26  ;;  %14580 = vmatpush1.bf16.msra.mxu1 %v18115_v21 }
0x14a6   :  { %14582 = vmatprep.subr.bf16.mxu0 %v17695_v47  ;;  %14614 = vmatprep.subr.bf16.mxu1 %v17969_v54  ;;  %v20373_v47 = vld [vmem:[#allocation11_spill] sm:$0xff] }
0x155b   :  { %v7652_v46 = vpop.f32.mrb[34].mxu0  ;;  %v7723_v40 = vpop.f32.mrb[42].mxu1 }
0x155c   :  { %v7654_v45 = vpop.f32.mrb[35].mxu0  ;;  %v7725_v55 = vpop.f32.mrb[43].mxu1  ;;  %v7744_v3 = vrot.slane %v7723_v40, 6  ;;  %v7746_v22 = vrot.slane %v7723_v40, 7  ;;  %v7732_v27 = vrot.slane %v7652_v46, 4 }
0x155d   :  { %v7745_v24 = vrot.slane %v7725_v55, 6  ;;  %v7747_v25 = vrot.slane %v7725_v55, 7  ;;  %v7733_v2 = vrot.slane %v7654_v45, 4  ;;  %v7731_v34 = vrot.slane %v7654_v45, 3 }
0x155e   :  { %v7752_v45 = vadd.f32 %v7744_v3, %v20374_v29  ;;  %v7730_v55 = vrot.slane %v7652_v46, 3 }
0x155f   :  { %v18651_v32 = vadd.f32 %v7745_v24, %v18163_v48  ;;  %v18654_v59 = vadd.f32 %v7747_v25, %v18168_v38  ;;  %v18657_v35 = vadd.f32 %v7733_v2, %v20372_v1  ;;  %v18661_v54 = vadd.f32 %v7731_v34, %v20373_v47 }
0x1560   :  { %v7754_v24 = vadd.f32 %v7746_v22, %v18188_v51  ;;  %v7740_v25 = vadd.f32 %v7732_v27, %v18185_v56  ;;  %v12544_v2 = vmul.f32 -1.442695, %v7752_v45  ;;  %v7738_v34 = vadd.f32 %v7730_v55, %v18191_v13 }
0x1561   :  { %15754 = vtanh.f32 %v18651_v32 }
0x1562   :  { %15756 = vtanh.f32 %v18654_v59  ;;  %v12540_v5 = vmul.f32 -1.442695, %v7738_v34 }
0x1563   :  { %15758 = vtanh.f32 %v18657_v35 }
0x1564   :  { %15760 = vtanh.f32 %v18661_v54 }
0x1565   :  { %15762 = vpow2.f32 %v12544_v2 }
0x156b   :  { %v15755_v7 = vpop.eup %15754 }
0x156c   :  { %v15757_v57 = vpop.eup %15756  ;;  %7858 = vrot.lane.b32.xlu1 %v15755_v7, %s16307_s12  ;;  %v12546_v7 = vmul.f32 -1.442695, %v7754_v24 }
0x156d   :  { %7860 = vrot.lane.b32.xlu0 %v15757_v57, %s16307_s12  ;;  %v15759_v18 = vpop.eup %15758  ;;  %v12542_v57 = vmul.f32 -1.442695, %v7740_v25 }
0x156e   :  { %v15761_v36 = vpop.eup %15760  ;;  %15764 = vpow2.f32 %v12546_v7 }
0x156f   :  { %15766 = vpow2.f32 %v12542_v57 }
0x1570   :  { %7820 = vrot.lane.b32.xlu1 %v15759_v18, %s16307_s12  ;;  %15768 = vpow2.f32 %v12540_v5  ;;  %v15763_v18 = vpop.eup %15762 }
0x1571   :  { %7818 = vrot.lane.b32.xlu0 %v15761_v36, %s16307_s12  ;;  %v7792_v36 = vadd.f32 1.0, %v15763_v18 }
0x1573   :  { %15770 = vrcp.f32 %v7792_v36 }
0x1578   :  { %v15765_v40 = vpop.eup %15764 }
0x1579   :  { %v15767_v19 = vpop.eup %15766  ;;  %v7794_v3 = vadd.f32 1.0, %v15765_v40  ;;  %v7851_v40 = vrot.slane %v18588_v41, 1 }
0x157a   :  { %v15769_v46 = vpop.eup %15768  ;;  %v7770_v29 = vadd.f32 1.0, %v15767_v19 }
0x157b   :  { %v7768_v22 = vadd.f32 1.0, %v15769_v46  ;;  %15772 = vrcp.f32 %v7794_v3 }
0x157c   :  { %15774 = vrcp.f32 %v7770_v29  ;;  %v7850_v29 = vrot.slane %v18585_v9, 1 }
0x157d   :  { %15776 = vrcp.f32 %v7768_v22  ;;  %v15771_v27 = vpop.eup %15770  ;;  %v7811_v22 = vrot.slane %v18592_v50, 7 }
0x157e   :  { %v7854_v36 = vmul.f32 %v15771_v27, %v7850_v29  ;;  %v12543_v29 = vmul.f32 -1.442695, %v18657_v35 }
0x1585   :  { %v15773_v55 = vpop.eup %15772 }
0x1586   :  { %v15775_v5 = vpop.eup %15774  ;;  %v7855_v46 = vmul.f32 %v15773_v55, %v7851_v40  ;;  %v12541_v40 = vmul.f32 -1.442695, %v18661_v54 }
0x1587   :  { %v15777_v7 = vpop.eup %15776 }
0x15de   :  { %v7859_v45 = vpop.permute.xlu1 %7858 }
0x15df   :  { %v7861_v24 = vpop.permute.xlu0 %7860  ;;  %v7864_v25 = vmul.f32 %v15771_v27, %v7859_v45 }
0x15e0   :  { %v7865_v2 = vmul.f32 %v15773_v55, %v7861_v24 }
0x15e1   :  { %7868 = vrot.lane.b32.xlu1 %v7864_v25, %s16307_s12  ;;  %v7810_v25 = vrot.slane %v18594_v43, 7 }
0x15e2   :  { %7870 = vrot.lane.b32.xlu0 %v7865_v2, %s16307_s12  ;;  %v7821_v34 = vpop.permute.xlu1 %7820 }
0x15e3   :  { %v7825_v57 = vmul.f32 %v15775_v5, %v7821_v34  ;;  %v7819_v19 = vpop.permute.xlu0 %7818  ;;  %v7815_v34 = vmul.f32 %v15775_v5, %v7811_v22 }
0x15e4   :  { %v7824_v18 = vmul.f32 %v15777_v7, %v7819_v19 }
0x15e5   :  { %7830 = vrot.lane.b32.xlu1 %v7825_v57, %s16307_s12  ;;  %v7814_v57 = vmul.f32 %v15777_v7, %v7810_v25  ;;  %v12545_v7 = vmul.f32 -1.442695, %v18651_v32 }
0x15e6   :  { %7828 = vrot.lane.b32.xlu0 %v7824_v18, %s16307_s12  ;;  %v12547_v18 = vmul.f32 -1.442695, %v18654_v59 }
0x1653   :  { %v7869_v3 = vpop.permute.xlu1 %7868 }
0x1654   :  { %v18681_v45 = vadd.f32 %v7869_v3, %v7854_v36  ;;  %v7871_v24 = vpop.permute.xlu0 %7870 }
0x1655   :  { %v18684_v2 = vadd.f32 %v7871_v24, %v7855_v46 }
0x1656   :  { %15778 = vtanh.f32 %v18681_v45 }
0x1657   :  { %15780 = vtanh.f32 %v18684_v2  ;;  %v7831_v9 = vpop.permute.xlu1 %7830 }
0x1658   :  { %v18688_v41 = vadd.f32 %v7831_v9, %v7815_v34  ;;  %v7829_v27 = vpop.permute.xlu0 %7828 }
0x1659   :  { %v18690_v55 = vadd.f32 %v7829_v27, %v7814_v57 }
0x165a   :  { %15782 = vtanh.f32 %v18688_v41 }
0x165b   :  { %15784 = vtanh.f32 %v18690_v55 }
0x165c   :  { %15786 = vpow2.f32 %v12545_v7 }
0x165d   :  { %15788 = vpow2.f32 %v12547_v18 }
0x165e   :  { %15790 = vpow2.f32 %v12543_v29 }
0x165f   :  { %15792 = vpow2.f32 %v12541_v40 }
0x1660   :  { %v15779_v50 = vpop.eup %15778 }
0x1661   :  { %v15781_v43 = vpop.eup %15780  ;;  %7880 = vrot.lane.b32.xlu1 %v15779_v50, %s16307_s12 }
0x1662   :  { %7882 = vrot.lane.b32.xlu0 %v15781_v43, %s16307_s12 }
0x1664   :  { %v15783_v5 = vpop.eup %15782 }
0x1665   :  { %v15785_v19 = vpop.eup %15784  ;;  %7842 = vrot.lane.b32.xlu1 %v15783_v5, %s16307_s12 }
0x1666   :  { %7840 = vrot.lane.b32.xlu0 %v15785_v19, %s16307_s12  ;;  %v15787_v36 = vpop.eup %15786 }
0x1667   :  { %v15789_v3 = vpop.eup %15788  ;;  %v7793_v46 = vadd.f32 1.0, %v15787_v36 }
0x1668   :  { %v15791_v22 = vpop.eup %15790  ;;  %v7795_v24 = vadd.f32 1.0, %v15789_v3 }
0x1669   :  { %v15793_v25 = vpop.eup %15792  ;;  %v7771_v34 = vadd.f32 1.0, %v15791_v22  ;;  %15794 = vrcp.f32 %v7793_v46 }
0x166a   :  { %15796 = vrcp.f32 %v7795_v24  ;;  %v7769_v32 = vadd.f32 1.0, %v15793_v25 }
0x166b   :  { %15798 = vrcp.f32 %v7771_v34 }
0x166c   :  { %15800 = vrcp.f32 %v7769_v32 }
0x1673   :  { %v15795_v59 = vpop.eup %15794 }
0x1674   :  { %v15797_v9 = vpop.eup %15796 }
0x1675   :  { %v15799_v43 = vpop.eup %15798 }
0x1676   :  { %v15801_v40 = vpop.eup %15800 }
0x16d3   :  { %v7881_v35 = vpop.permute.xlu1 %7880 }
0x16d4   :  { %v7886_v57 = vmul.f32 %v15795_v59, %v7881_v35  ;;  %v7883_v27 = vpop.permute.xlu0 %7882 }
0x16d5   :  { %v7887_v54 = vmul.f32 %v15797_v9, %v7883_v27 }
0x16d6   :  { %v7896_v50 = vrot.slane %v7886_v57, 5 }
0x16d7   :  { %v7897_v5 = vrot.slane %v7887_v54, 4  ;;  %v8593_v19 = vrot.slane %v7887_v54, 7  ;;  %v7843_v7 = vpop.permute.xlu1 %7842 }
0x16d8   :  { %v7847_v18 = vmul.f32 %v15799_v43, %v7843_v7  ;;  %v7841_v29 = vpop.permute.xlu0 %7840 }
0x16d9   :  { %v7898_v36 = vsel %vm7891_vm8, %v7897_v5, %v7896_v50  ;;  %v18704_v3 = vsel %vm6932_vm7, %v8593_v19, %v7886_v57  ;;  %v7846_v22 = vmul.f32 %v15801_v40, %v7841_v29 }
0x16da   :  { %v7890_v46 = vrot.slane %v7847_v18, 7  ;;  %7899 = vrot.lane.b32.xlu1 %v7898_v36, %s16307_s12 }
0x16dc   :  { %v18708_v24 = vsel %vm7891_vm8, %v7890_v46, %v7846_v22 }
0x174c   :  { %v7900_v25 = vpop.permute.xlu1 %7899 }
0x174d   :  { %v7902_v34 = vsel %vm6307_vm4, %v18708_v24, %v7900_v25  ;;  %v8168_v25 = vrot.slane %v18681_v45, 1 }
0x174e   :  { %v7904_v32 = vrot.slane %v7902_v34, 5  ;;  %v8169_v34 = vrot.slane %v18684_v2, 1 }
0x1750   :  { %7971 = vmatmul.mubr.f32.vlgmr.msra.gmra.mrb[36].mxu0 %v7904_v32  ;;  %8042 = vmatmul.mubr.f32.vlgmr.msra.gmra.mrb[44].mxu1 %v7904_v32 }
0x1751   :  { %14584 = vmatpush1.bf16.msra.mxu0 %v17721_v10  ;;  %14616 = vmatpush1.bf16.msra.mxu1 %v17990_v28 }
0x1752   :  { %14586 = vmatprep.subr.bf16.mxu0 %v17723_v60  ;;  %14618 = vmatprep.subr.bf16.mxu1 %v17992_v62 }
0x1753   :  { %8288 = vmatprep.mubr.f32.mxu0 %v20354_v44  ;;  %8359 = vmatprep.mubr.f32.mxu1 %v20354_v44 }
0x1755   :  { %14588 = vmatpush1.bf16.msra.mxu0 %v17741_v14  ;;  %14620 = vmatpush1.bf16.msra.mxu1 %v18010_v33  ;;  %v20375_v33 = vld [vmem:[#allocation13_spill] sm:$0xff] }
0x1756   :  { %14590 = vmatprep.subr.bf16.mxu0 %v17744_v23  ;;  %14622 = vmatprep.subr.bf16.mxu1 %v18013_v39 }
0x1759   :  { %14592 = vmatpush1.bf16.msra.mxu0 %v17764_v15  ;;  %14624 = vmatpush1.bf16.msra.mxu1 %v18030_v30 }
0x175a   :  { %14594 = vmatprep.subr.bf16.mxu0 %v17773_v12  ;;  %14626 = vmatprep.subr.bf16.mxu1 %v18034_v16 }
0x175d   :  { %14596 = vmatpush1.bf16.msra.mxu0 %v17781_v0  ;;  %14628 = vmatpush1.bf16.msra.mxu1 %v18049_v6 }
0x175e   :  { %14598 = vmatprep.subr.bf16.mxu0 %v17791_v11  ;;  %14630 = vmatprep.subr.bf16.mxu1 %v18052_v42 }
0x1761   :  { %14600 = vmatpush1.bf16.msra.mxu0 %v17799_v63  ;;  %14632 = vmatpush1.bf16.msra.mxu1 %v18067_v37 }
0x1762   :  { %14602 = vmatprep.subr.bf16.mxu0 %v17809_v4  ;;  %14634 = vmatprep.subr.bf16.mxu1 %v18070_v58 }
0x1765   :  { %14604 = vmatpush1.bf16.msra.mxu0 %v17823_v52  ;;  %14636 = vmatpush1.bf16.msra.mxu1 %v18085_v17 }
0x1766   :  { %14606 = vmatprep.subr.bf16.mxu0 %v17839_v61  ;;  %14638 = vmatprep.subr.bf16.mxu1 %v18088_v8 }
0x1769   :  { %14608 = vmatpush1.bf16.msra.mxu0 %v17853_v31  ;;  %14640 = vmatpush1.bf16.msra.mxu1 %v18103_v49 }
0x176a   :  { %14610 = vmatprep.subr.bf16.mxu0 %v17869_v20  ;;  %14642 = vmatprep.subr.bf16.mxu1 %v18106_v53 }
0x176d   :  { %14612 = vmatpush1.bf16.msra.mxu0 %v17877_v26  ;;  %14644 = vmatpush1.bf16.msra.mxu1 %v18115_v21 }
0x1823   :  { %v7972_v10 = vpop.f32.mrb[36].mxu0  ;;  %v8043_v60 = vpop.f32.mrb[44].mxu1 }
0x1824   :  { %v7974_v14 = vpop.f32.mrb[37].mxu0  ;;  %v8045_v23 = vpop.f32.mrb[45].mxu1  ;;  %v8064_v28 = vrot.slane %v8043_v60, 7  ;;  %v8052_v62 = vrot.slane %v7972_v10, 3  ;;  %v8050_v30 = vrot.slane %v7972_v10, 2  ;;  %v8072_v16 = vadd.f32 %v8043_v60, %v18188_v51 }
0x1825   :  { %v8065_v15 = vrot.slane %v8045_v23, 7  ;;  %v8053_v12 = vrot.slane %v7974_v14, 3  ;;  %v8051_v11 = vrot.slane %v7974_v14, 2  ;;  %v18748_v63 = vadd.f32 %v8045_v23, %v18168_v38 }
0x1826   :  { %v8070_v39 = vadd.f32 %v8064_v28, %v20375_v33  ;;  %v8060_v6 = vadd.f32 %v8052_v62, %v18185_v56  ;;  %v8058_v37 = vadd.f32 %v8050_v30, %v18191_v13  ;;  %v12554_v58 = vmul.f32 -1.442695, %v8072_v16 }
0x1827   :  { %v18745_v0 = vadd.f32 %v8065_v15, %v18163_v48  ;;  %v18751_v4 = vadd.f32 %v8053_v12, %v20372_v1  ;;  %v18755_v52 = vadd.f32 %v8051_v11, %v20373_v47  ;;  %v8129_v14 = vrot.slane %v18688_v41, 7 }
0x1828   :  { %v12552_v42 = vmul.f32 -1.442695, %v8070_v39  ;;  %v12550_v17 = vmul.f32 -1.442695, %v8060_v6  ;;  %v12548_v8 = vmul.f32 -1.442695, %v8058_v37 }
0x1829   :  { %15802 = vtanh.f32 %v18745_v0  ;;  %v8128_v12 = vrot.slane %v18690_v55, 7  ;;  %v12553_v39 = vmul.f32 -1.442695, %v18745_v0  ;;  %v12555_v30 = vmul.f32 -1.442695, %v18748_v63 }
0x182a   :  { %15804 = vtanh.f32 %v18748_v63  ;;  %v12551_v16 = vmul.f32 -1.442695, %v18751_v4  ;;  %v12549_v6 = vmul.f32 -1.442695, %v18755_v52 }
0x182b   :  { %15806 = vtanh.f32 %v18751_v4 }
0x182c   :  { %15808 = vtanh.f32 %v18755_v52 }
0x182d   :  { %15810 = vpow2.f32 %v12552_v42 }
0x182e   :  { %15812 = vpow2.f32 %v12554_v58 }
0x182f   :  { %15814 = vpow2.f32 %v12550_v17 }
0x1830   :  { %15816 = vpow2.f32 %v12548_v8 }
0x1833   :  { %v15803_v61 = vpop.eup %15802 }
0x1834   :  { %v15805_v31 = vpop.eup %15804  ;;  %8176 = vrot.lane.b32.xlu0 %v15803_v61, %s16307_s12 }
0x1835   :  { %8178 = vrot.lane.b32.xlu1 %v15805_v31, %s16307_s12  ;;  %v15807_v20 = vpop.eup %15806 }
0x1836   :  { %v15809_v26 = vpop.eup %15808 }
0x1837   :  { %v15811_v49 = vpop.eup %15810 }
0x1838   :  { %8138 = vrot.lane.b32.xlu0 %v15807_v20, %s16307_s12  ;;  %v15813_v53 = vpop.eup %15812  ;;  %v8110_v21 = vadd.f32 1.0, %v15811_v49 }
0x1839   :  { %8136 = vrot.lane.b32.xlu1 %v15809_v26, %s16307_s12  ;;  %v15815_v59 = vpop.eup %15814  ;;  %v8112_v35 = vadd.f32 1.0, %v15813_v53 }
0x183a   :  { %v15817_v9 = vpop.eup %15816  ;;  %v8088_v57 = vadd.f32 1.0, %v15815_v59  ;;  %15818 = vrcp.f32 %v8110_v21 }
0x183b   :  { %v8086_v27 = vadd.f32 1.0, %v15817_v9  ;;  %15820 = vrcp.f32 %v8112_v35 }
0x183c   :  { %15822 = vrcp.f32 %v8088_v57 }
0x183d   :  { %15824 = vrcp.f32 %v8086_v27 }
0x1844   :  { %v15819_v54 = vpop.eup %15818 }
0x1845   :  { %v15821_v43 = vpop.eup %15820  ;;  %v8172_v32 = vmul.f32 %v15819_v54, %v8168_v25 }
0x1846   :  { %v15823_v18 = vpop.eup %15822  ;;  %v8173_v10 = vmul.f32 %v15821_v43, %v8169_v34 }
0x1847   :  { %v15825_v40 = vpop.eup %15824  ;;  %v8133_v61 = vmul.f32 %v15823_v18, %v8129_v14 }
0x1848   :  { %v8132_v45 = vmul.f32 %v15825_v40, %v8128_v12 }
0x18a6   :  { %v8177_v50 = vpop.permute.xlu0 %8176 }
0x18a7   :  { %v8179_v5 = vpop.permute.xlu1 %8178  ;;  %v8182_v19 = vmul.f32 %v15819_v54, %v8177_v50 }
0x18a8   :  { %v8183_v7 = vmul.f32 %v15821_v43, %v8179_v5 }
0x18a9   :  { %8186 = vrot.lane.b32.xlu0 %v8182_v19, %s16307_s12 }
0x18aa   :  { %8188 = vrot.lane.b32.xlu1 %v8183_v7, %s16307_s12  ;;  %v8139_v29 = vpop.permute.xlu0 %8138 }
0x18ab   :  { %v8137_v36 = vpop.permute.xlu1 %8136  ;;  %v8143_v46 = vmul.f32 %v15823_v18, %v8139_v29 }
0x18ac   :  { %v8142_v22 = vmul.f32 %v15825_v40, %v8137_v36 }
0x18ad   :  { %8148 = vrot.lane.b32.xlu0 %v8143_v46, %s16307_s12 }
0x18ae   :  { %8146 = vrot.lane.b32.xlu1 %v8142_v22, %s16307_s12 }
0x191b   :  { %v8187_v60 = vpop.permute.xlu0 %8186 }
0x191c   :  { %v8189_v23 = vpop.permute.xlu1 %8188  ;;  %v18775_v15 = vadd.f32 %v8187_v60, %v8172_v32 }
0x191d   :  { %v18778_v11 = vadd.f32 %v8189_v23, %v8173_v10 }
0x191e   :  { %15826 = vtanh.f32 %v18775_v15 }
0x191f   :  { %15828 = vtanh.f32 %v18778_v11  ;;  %v8149_v31 = vpop.permute.xlu0 %8148 }
0x1920   :  { %v8147_v2 = vpop.permute.xlu1 %8146  ;;  %v18782_v20 = vadd.f32 %v8149_v31, %v8133_v61 }
0x1921   :  { %v18784_v26 = vadd.f32 %v8147_v2, %v8132_v45 }
0x1922   :  { %15830 = vtanh.f32 %v18782_v20 }
0x1923   :  { %15832 = vtanh.f32 %v18784_v26 }
0x1924   :  { %15834 = vpow2.f32 %v12553_v39 }
0x1925   :  { %15836 = vpow2.f32 %v12555_v30 }
0x1926   :  { %15838 = vpow2.f32 %v12551_v16 }
0x1927   :  { %15840 = vpow2.f32 %v12549_v6 }
0x1928   :  { %v15827_v41 = vpop.eup %15826 }
0x1929   :  { %v15829_v55 = vpop.eup %15828  ;;  %8198 = vrot.lane.b32.xlu0 %v15827_v41, %s16307_s12 }
0x192a   :  { %8200 = vrot.lane.b32.xlu1 %v15829_v55, %s16307_s12 }
0x192c   :  { %v15831_v28 = vpop.eup %15830 }
0x192d   :  { %v15833_v62 = vpop.eup %15832  ;;  %8160 = vrot.lane.b32.xlu0 %v15831_v28, %s16307_s12 }
0x192e   :  { %8158 = vrot.lane.b32.xlu1 %v15833_v62, %s16307_s12  ;;  %v15835_v42 = vpop.eup %15834 }
0x192f   :  { %v15837_v37 = vpop.eup %15836  ;;  %v8111_v58 = vadd.f32 1.0, %v15835_v42 }
0x1930   :  { %v15839_v17 = vpop.eup %15838  ;;  %v8113_v8 = vadd.f32 1.0, %v15837_v37 }
0x1931   :  { %v15841_v49 = vpop.eup %15840  ;;  %v8089_v53 = vadd.f32 1.0, %v15839_v17  ;;  %15842 = vrcp.f32 %v8111_v58 }
0x1932   :  { %15844 = vrcp.f32 %v8113_v8  ;;  %v8087_v0 = vadd.f32 1.0, %v15841_v49 }
0x1933   :  { %15846 = vrcp.f32 %v8089_v53 }
0x1934   :  { %15848 = vrcp.f32 %v8087_v0 }
0x193b   :  { %v15843_v63 = vpop.eup %15842 }
0x193c   :  { %v15845_v21 = vpop.eup %15844 }
0x193d   :  { %v15847_v57 = vpop.eup %15846 }
0x193e   :  { %v15849_v19 = vpop.eup %15848 }
0x199b   :  { %v8199_v4 = vpop.permute.xlu0 %8198 }
0x199c   :  { %v8201_v59 = vpop.permute.xlu1 %8200  ;;  %v8204_v35 = vmul.f32 %v15843_v63, %v8199_v4 }
0x199d   :  { %v8205_v52 = vmul.f32 %v15845_v21, %v8201_v59 }
0x199e   :  { %v8214_v9 = vrot.slane %v8204_v35, 3 }
0x199f   :  { %v8215_v27 = vrot.slane %v8205_v52, 2  ;;  %v8559_v54 = vrot.slane %v8205_v52, 7  ;;  %v8161_v50 = vpop.permute.xlu0 %8160 }
0x19a0   :  { %v8159_v43 = vpop.permute.xlu1 %8158  ;;  %v8165_v5 = vmul.f32 %v15847_v57, %v8161_v50  ;;  %v8486_v57 = vrot.slane %v18775_v15, 1 }
0x19a1   :  { %v8216_v7 = vsel %vm8209_vm6, %v8215_v27, %v8214_v9  ;;  %v18798_v18 = vsel %vm6612_vm5, %v8559_v54, %v8204_v35  ;;  %v8164_v29 = vmul.f32 %v15849_v19, %v8159_v43  ;;  %v8487_v27 = vrot.slane %v18778_v11, 1 }
0x19a2   :  { %v8208_v40 = vrot.slane %v8165_v5, 7  ;;  %8217 = vrot.lane.b32.xlu0 %v8216_v7, %s16307_s12 }
0x19a4   :  { %v18802_v36 = vsel %vm8209_vm6, %v8208_v40, %v8164_v29 }
0x1a14   :  { %v8218_v46 = vpop.permute.xlu0 %8217 }
0x1a15   :  { %v8220_v22 = vsel %vm6307_vm4, %v18802_v36, %v8218_v46  ;;  %v8446_v46 = vrot.slane %v18784_v26, 7  ;;  %v20376_v26 = vld [vmem:[#allocation23_spill] sm:$0xff] }
0x1a16   :  { %v8222_v25 = vrot.slane %v8220_v22, 6 }
0x1a18   :  { %8289 = vmatmul.mubr.f32.vlgmr.msra.gmra.mrb[38].mxu0 %v8222_v25  ;;  %8360 = vmatmul.mubr.f32.vlgmr.msra.gmra.mrb[46].mxu1 %v8222_v25 }
0x1a19   :  { %8978 = vmatprep.mubr.f32.mxu0 %v20354_v44  ;;  %9055 = vmatprep.mubr.f32.mxu1 %v20354_v44 }
0x1aeb   :  { %v8290_v34 = vpop.f32.mrb[38].mxu0  ;;  %v8361_v32 = vpop.f32.mrb[46].mxu1 }
0x1aec   :  { %v8292_v10 = vpop.f32.mrb[39].mxu0  ;;  %v8363_v60 = vpop.f32.mrb[47].mxu1  ;;  %v8388_v41 = vadd.f32 %v8361_v32, %v20375_v33  ;;  %v8368_v55 = vrot.slane %v8290_v34, 1 }
0x1aed   :  { %v8383_v14 = vrot.slane %v8363_v60, 1  ;;  %v18809_v23 = vadd.f32 %v8363_v60, %v18163_v48  ;;  %v8369_v12 = vrot.slane %v8292_v10, 1  ;;  %v8371_v17 = vrot.slane %v8292_v10, 2 }
0x1aee   :  { %v12560_v28 = vmul.f32 -1.442695, %v8388_v41  ;;  %v8376_v62 = vadd.f32 %v8368_v55, %v18191_v13  ;;  %v8828_v41 = vld [vmem:[%s20290_s14] sm:$0xff] }
0x1aef   :  { %v18812_v61 = vadd.f32 %v8383_v14, %v18168_v38  ;;  %15850 = vtanh.f32 %v18809_v23  ;;  %v18816_v45 = vadd.f32 %v8369_v12, %v20373_v47  ;;  %v8382_v38 = vrot.slane %v8361_v32, 1  ;;  %v20377_v14 = vld [vmem:[#allocation14_spill] sm:$0xff]  ;;  %v20378_v12 = vld [vmem:[#allocation17_spill] sm:$0xff] }
0x1af0   :  { %v12556_v30 = vmul.f32 -1.442695, %v8376_v62  ;;  %v18827_v33 = vadd.f32 %v8371_v17, %v20372_v1  ;;  %v8370_v1 = vrot.slane %v8290_v34, 2  ;;  %v8832_v55 = vld [vmem:[%s20290_s14 + $0x20] sm:$0xff] }
0x1af1   :  { %15852 = vtanh.f32 %v18812_v61  ;;  %v8390_v47 = vadd.f32 %v8382_v38, %v18188_v51  ;;  %v14647_v62 = vpack.c.bf16 %v8832_v55, %v8828_v41  ;;  %v8869_v41 = vld [vmem:[%s20290_s14 + $0x148] sm:$0xff] }
0x1af2   :  { %15854 = vtanh.f32 %v18816_v45  ;;  %v8378_v52 = vadd.f32 %v8370_v1, %v18185_v56  ;;  %v8851_v1 = vld [vmem:[%s20290_s14 + $0xb8] sm:$0xff]  ;;  %v8873_v55 = vld [vmem:[%s20290_s14 + $0x168] sm:$0xff] }
0x1af3   :  { %v12562_v39 = vmul.f32 -1.442695, %v8390_v47  ;;  %15856 = vpow2.f32 %v12560_v28  ;;  %v20379_v47 = vld [vmem:[#allocation19_spill] sm:$0xff] }
0x1af4   :  { %v12558_v9 = vmul.f32 -1.442695, %v8378_v52  ;;  %v8844_v52 = vld [vmem:[%s20290_s14 + $0x80] sm:$0xff] }
0x1af5   :  { %15858 = vpow2.f32 %v12562_v39  ;;  %v8834_v39 = vld [vmem:[%s20290_s14 + $0x30] sm:$0xff] }
0x1af6   :  { %15860 = vpow2.f32 %v12556_v30  ;;  %v8837_v30 = vld [vmem:[%s20290_s14 + $0x48] sm:$0xff] }
0x1af9   :  { %v15851_v31 = vpop.eup %15850 }
0x1afa   :  { %8494 = vrot.lane.b32.xlu0 %v15851_v31, %s16307_s12  ;;  %v8829_v31 = vld [vmem:[%s20290_s14 + $0x8] sm:$0xff] }
0x1afb   :  { %v15853_v2 = vpop.eup %15852 }
0x1afc   :  { %8496 = vrot.lane.b32.xlu1 %v15853_v2, %s16307_s12  ;;  %v15855_v48 = vpop.eup %15854  ;;  %v8833_v2 = vld [vmem:[%s20290_s14 + $0x28] sm:$0xff] }
0x1afd   :  { %v15857_v16 = vpop.eup %15856  ;;  %v14645_v38 = vpack.c.bf16 %v8833_v2, %v8829_v31  ;;  %v8860_v31 = vld [vmem:[%s20290_s14 + $0x100] sm:$0xff] }
0x1afe   :  { %v8428_v42 = vadd.f32 1.0, %v15857_v16  ;;  %v8864_v2 = vld [vmem:[%s20290_s14 + $0x120] sm:$0xff] }
0x1aff   :  { %v15859_v6 = vpop.eup %15858  ;;  %14646 = vmatprep.subr.bf16.mxu0 %v14645_v38 }
0x1b00   :  { %8454 = vrot.lane.b32.xlu1 %v15855_v48, %s16307_s12  ;;  %v8430_v37 = vadd.f32 1.0, %v15859_v6  ;;  %v15861_v58 = vpop.eup %15860  ;;  %15862 = vrcp.f32 %v8428_v42  ;;  %v8831_v48 = vld [vmem:[%s20290_s14 + $0x18] sm:$0xff]  ;;  %v8841_v6 = vld [vmem:[%s20290_s14 + $0x68] sm:$0xff]  ;;  %14648 = vmatpush1.bf16.msra.mxu0 %v14647_v62  ;;  %v14663_v62 = vpack.c.bf16 %v8864_v2, %v8860_v31  ;;  %v20381_v31 = vld [vmem:[#allocation10_spill] sm:$0xff] }
0x1b01   :  { %v8404_v8 = vadd.f32 1.0, %v15861_v58  ;;  %v8839_v42 = vld [vmem:[%s20290_s14 + $0x58] sm:$0xff]  ;;  %v14649_v58 = vpack.c.bf16 %v8841_v6, %v8837_v30  ;;  %v8868_v30 = vld [vmem:[%s20290_s14 + $0x140] sm:$0xff] }
0x1b02   :  { %15864 = vrcp.f32 %v8430_v37  ;;  %v8843_v37 = vld [vmem:[%s20290_s14 + $0x78] sm:$0xff] }
0x1b03   :  { %15866 = vrcp.f32 %v8404_v8  ;;  %v14681_v17 = vpack.c.bf16 %v8843_v37, %v8839_v42  ;;  %v8836_v8 = vld [vmem:[%s20290_s14 + $0x40] sm:$0xff]  ;;  %14650 = vmatprep.subr.bf16.mxu0 %v14649_v58  ;;  %v8870_v42 = vld [vmem:[%s20290_s14 + $0x150] sm:$0xff] }
0x1b04   :  { %15868 = vtanh.f32 %v18827_v33  ;;  %v8874_v37 = vld [vmem:[%s20290_s14 + $0x170] sm:$0xff] }
0x1b05   :  { %15870 = vpow2.f32 %v12558_v9 }
0x1b0a   :  { %v15863_v13 = vpop.eup %15862 }
0x1b0b   :  { %v8490_v50 = vmul.f32 %v15863_v13, %v8486_v57  ;;  %v8848_v57 = vld [vmem:[%s20290_s14 + $0xa0] sm:$0xff] }
0x1b0c   :  { %v15865_v49 = vpop.eup %15864 }
0x1b0d   :  { %v15867_v4 = vpop.eup %15866  ;;  %v8491_v5 = vmul.f32 %v15865_v49, %v8487_v27  ;;  %v8846_v27 = vld [vmem:[%s20290_s14 + $0x90] sm:$0xff] }
0x1b0e   :  { %v15869_v35 = vpop.eup %15868  ;;  %v8450_v22 = vmul.f32 %v15867_v4, %v8446_v46  ;;  %v8852_v46 = vld [vmem:[%s20290_s14 + $0xc0] sm:$0xff] }
0x1b0f   :  { %v15871_v54 = vpop.eup %15870 }
0x1b10   :  { %v8406_v29 = vadd.f32 1.0, %v15871_v54  ;;  %v8850_v54 = vld [vmem:[%s20290_s14 + $0xb0] sm:$0xff] }
0x1b6c   :  { %v8495_v51 = vpop.permute.xlu0 %8494 }
0x1b6d   :  { %v8500_v53 = vmul.f32 %v15863_v13, %v8495_v51  ;;  %v8840_v13 = vld [vmem:[%s20290_s14 + $0x60] sm:$0xff]  ;;  %v8838_v51 = vld [vmem:[%s20290_s14 + $0x50] sm:$0xff] }
0x1b6e   :  { %v8497_v0 = vpop.permute.xlu1 %8496 }
0x1b6f   :  { %v8501_v63 = vmul.f32 %v15865_v49, %v8497_v0  ;;  %8504 = vrot.lane.b32.xlu1 %v8500_v53, %s16307_s12  ;;  %v14651_v49 = vpack.c.bf16 %v8840_v13, %v8836_v8  ;;  %v8842_v53 = vld [vmem:[%s20290_s14 + $0x70] sm:$0xff]  ;;  %v8845_v0 = vld [vmem:[%s20290_s14 + $0x88] sm:$0xff]  ;;  %v12563_v8 = vmul.f32 -1.442695, %v18812_v61  ;;  %v12561_v13 = vmul.f32 -1.442695, %v18809_v23 }
0x1b70   :  { %v8877_v61 = vld [vmem:[%s20290_s14 + $0x188] sm:$0xff] }
0x1b71   :  { %8506 = vrot.lane.b32.xlu0 %v8501_v63, %s16307_s12  ;;  %v8849_v63 = vld [vmem:[%s20290_s14 + $0xa8] sm:$0xff]  ;;  %14652 = vmatpush1.bf16.msra.mxu0 %v14651_v49 }
0x1b72   :  { %v8455_v21 = vpop.permute.xlu1 %8454  ;;  %v8881_v23 = vld [vmem:[%s20290_s14 + $0x1a8] sm:$0xff] }
0x1b73   :  { %v8460_v59 = vmul.f32 %v15867_v4, %v8455_v21  ;;  %v20380_v4 = vld [vmem:[#allocation21_spill] sm:$0xff]  ;;  %v14683_v21 = vpack.c.bf16 %v8842_v53, %v8838_v51  ;;  %v12557_v51 = vmul.f32 -1.442695, %v18816_v45 }
0x1b74   :  { %v8879_v45 = vld [vmem:[%s20290_s14 + $0x198] sm:$0xff] }
0x1b75   :  { %8456 = vrot.lane.b32.xlu0 %v15869_v35, %s16307_s12  ;;  %8464 = vrot.lane.b32.xlu1 %v8460_v59, %s16307_s12  ;;  %v14653_v59 = vpack.c.bf16 %v8849_v63, %v8845_v0  ;;  %v8847_v35 = vld [vmem:[%s20290_s14 + $0x98] sm:$0xff] }
0x1b76   :  { %v14685_v9 = vpack.c.bf16 %v8851_v1, %v8847_v35  ;;  %v14669_v1 = vpack.c.bf16 %v8881_v23, %v8877_v61 }
0x1b77   :  { %14654 = vmatprep.subr.bf16.mxu0 %v14653_v59 }
0x1be1   :  { %v8505_v43 = vpop.permute.xlu1 %8504 }
0x1be2   :  { %v8510_v19 = vadd.f32 %v8505_v43, %v8490_v50  ;;  %v14655_v50 = vpack.c.bf16 %v8848_v57, %v8844_v52  ;;  %v8853_v43 = vld [vmem:[%s20290_s14 + $0xc8] sm:$0xff]  ;;  %v8883_v52 = vld [vmem:[%s20290_s14 + $0x1b8] sm:$0xff]  ;;  %v8880_v57 = vld [vmem:[%s20290_s14 + $0x1a0] sm:$0xff] }
0x1be3   :  { %v8507_v7 = vpop.permute.xlu0 %8506 }
0x1be4   :  { %v8511_v40 = vadd.f32 %v8507_v7, %v8491_v5  ;;  %15872 = vtanh.f32 %v8510_v19  ;;  %v8857_v5 = vld [vmem:[%s20290_s14 + $0xe8] sm:$0xff]  ;;  %v8855_v19 = vld [vmem:[%s20290_s14 + $0xd8] sm:$0xff]  ;;  %v14687_v7 = vpack.c.bf16 %v8850_v54, %v8846_v27  ;;  %14656 = vmatpush1.bf16.msra.mxu0 %v14655_v50  ;;  %v14701_v27 = vpack.c.bf16 %v8883_v52, %v8879_v45  ;;  %v8878_v50 = vld [vmem:[%s20290_s14 + $0x190] sm:$0xff] }
0x1be6   :  { %15874 = vtanh.f32 %v8511_v40  ;;  %v8859_v40 = vld [vmem:[%s20290_s14 + $0xf8] sm:$0xff] }
0x1be7   :  { %v8465_v56 = vpop.permute.xlu1 %8464  ;;  %15876 = vrcp.f32 %v8406_v29  ;;  %v8457_v11 = vpop.permute.xlu0 %8456  ;;  %v14657_v29 = vpack.c.bf16 %v8857_v5, %v8853_v43  ;;  %v8882_v43 = vld [vmem:[%s20290_s14 + $0x1b0] sm:$0xff] }
0x1be8   :  { %v8470_v25 = vadd.f32 %v8465_v56, %v8450_v22  ;;  %v8856_v22 = vld [vmem:[%s20290_s14 + $0xe0] sm:$0xff]  ;;  %v14689_v56 = vpack.c.bf16 %v8859_v40, %v8855_v19  ;;  %v14703_v19 = vpack.c.bf16 %v8882_v43, %v8878_v50  ;;  %v8887_v40 = vld [vmem:[%s20290_s14 + $0x1d8] sm:$0xff] }
0x1be9   :  { %14658 = vmatprep.subr.bf16.mxu0 %v14657_v29  ;;  %v8889_v29 = vld [vmem:[%s20290_s14 + $0x1e8] sm:$0xff] }
0x1bea   :  { %15878 = vtanh.f32 %v8470_v25  ;;  %v8854_v25 = vld [vmem:[%s20290_s14 + $0xd0] sm:$0xff] }
0x1beb   :  { %15880 = vpow2.f32 %v12563_v8 }
0x1bec   :  { %15882 = vpow2.f32 %v12561_v13 }
0x1bed   :  { %15884 = vpow2.f32 %v12557_v51 }
0x1bee   :  { %v15873_v15 = vpop.eup %15872 }
0x1bef   :  { %8516 = vrot.lane.b32.xlu1 %v15873_v15, %s16307_s12  ;;  %v8858_v15 = vld [vmem:[%s20290_s14 + $0xf0] sm:$0xff] }
0x1bf0   :  { %v15875_v34 = vpop.eup %15874 }
0x1bf1   :  { %8518 = vrot.lane.b32.xlu0 %v15875_v34, %s16307_s12  ;;  %v18840_v32 = vpop.eup %15876  ;;  %v8861_v34 = vld [vmem:[%s20290_s14 + $0x108] sm:$0xff] }
0x1bf2   :  { %v8461_v10 = vmul.f32 %v18840_v32, %v8457_v11  ;;  %v8865_v11 = vld [vmem:[%s20290_s14 + $0x128] sm:$0xff] }
0x1bf3   :  { %8630 = vrot.lane.b32.xlu1 %v20376_v26, %s16307_s12  ;;  %v8867_v26 = vld [vmem:[%s20290_s14 + $0x138] sm:$0xff] }
0x1bf4   :  { %v15879_v60 = vpop.eup %15878 }
0x1bf5   :  { %8466 = vrot.lane.b32.xlu0 %v8461_v10, %s16307_s12  ;;  %v8863_v10 = vld [vmem:[%s20290_s14 + $0x118] sm:$0xff]  ;;  %v15881_v49 = vpop.eup %15880 }
0x1bf6   :  { %v14693_v38 = vpack.c.bf16 %v8867_v26, %v8863_v10  ;;  %v15883_v53 = vpop.eup %15882  ;;  %v8431_v0 = vadd.f32 1.0, %v15881_v49 }
0x1bf7   :  { %8476 = vrot.lane.b32.xlu1 %v15879_v60, %s16307_s12  ;;  %v14659_v60 = vpack.c.bf16 %v8856_v22, %v8852_v46  ;;  %v8429_v63 = vadd.f32 1.0, %v15883_v53 }
0x1bf8   :  { %15886 = vrcp.f32 %v8431_v0  ;;  %v20384_v0 = vld [vmem:[#allocation15_spill] sm:$0xff] }
0x1bf9   :  { %8781 = vrot.lane.b32.xlu0 %v20377_v14, %s16307_s12  ;;  %v14691_v14 = vpack.c.bf16 %v8858_v15, %v8854_v25  ;;  %14660 = vmatpush1.bf16.msra.mxu0 %v14659_v60  ;;  %15888 = vrcp.f32 %v8429_v63  ;;  %v8884_v25 = vld [vmem:[%s20290_s14 + $0x1c0] sm:$0xff]  ;;  %v8886_v60 = vld [vmem:[%s20290_s14 + $0x1d0] sm:$0xff]  ;;  %v8780_v63 = vrot.slane %v20384_v0, 7 }
0x1bfa   :  { %v8888_v15 = vld [vmem:[%s20290_s14 + $0x1e0] sm:$0xff] }
0x1bfb   :  { %8595 = vrot.lane.b32.xlu1 %v18704_v3, %s16307_s12  ;;  %v8835_v3 = vld [vmem:[%s20290_s14 + $0x38] sm:$0xff]  ;;  %v14675_v26 = vpack.c.bf16 %v8888_v15, %v8884_v25 }
0x1bfc   :  { %v14677_v28 = vpack.c.bf16 %v8835_v3, %v8831_v48  ;;  %v8862_v48 = vld [vmem:[%s20290_s14 + $0x110] sm:$0xff] }
0x1bfd   :  { %8741 = vrot.lane.b32.xlu0 %v20378_v12, %s16307_s12  ;;  %v14661_v12 = vpack.c.bf16 %v8865_v11, %v8861_v34  ;;  %v8866_v3 = vld [vmem:[%s20290_s14 + $0x130] sm:$0xff] }
0x1bfe   :  { %14678 = vmatprep.subr.bf16.mxu1 %v14677_v28  ;;  %v8875_v28 = vld [vmem:[%s20290_s14 + $0x178] sm:$0xff] }
0x1bff   :  { %8561 = vrot.lane.b32.xlu1 %v18798_v18, %s16307_s12  ;;  %v8830_v18 = vld [vmem:[%s20290_s14 + $0x10] sm:$0xff]  ;;  %14662 = vmatprep.subr.bf16.mxu0 %v14661_v12  ;;  %v9069_v12 = vld [vmem:[%s20292_s16 + $0x8] sm:$0xff] }
0x1c00   :  { %v14679_v16 = vpack.c.bf16 %v8834_v39, %v8830_v18  ;;  %v14695_v18 = vpack.c.bf16 %v8866_v3, %v8862_v48  ;;  %v14665_v39 = vpack.c.bf16 %v8873_v55, %v8869_v41  ;;  %14664 = vmatpush1.bf16.msra.mxu0 %v14663_v62  ;;  %v8447_v48 = vrot.slane %v18782_v20, 7  ;;  %v9073_v41 = vld [vmem:[%s20292_s16 + $0x28] sm:$0xff]  ;;  %v9071_v55 = vld [vmem:[%s20292_s16 + $0x18] sm:$0xff] }
0x1c01   :  { %8706 = vrot.lane.b32.xlu0 %v20379_v47, %s16307_s12  ;;  %v8871_v47 = vld [vmem:[%s20290_s14 + $0x158] sm:$0xff]  ;;  %v19070_v62 = vpack.c.bf16 %v9073_v41, %v9069_v12 }
0x1c02   :  { %14680 = vmatpush1.bf16.msra.mxu1 %v14679_v16  ;;  %v8872_v16 = vld [vmem:[%s20290_s14 + $0x160] sm:$0xff]  ;;  %v14697_v6 = vpack.c.bf16 %v8875_v28, %v8871_v47  ;;  %14666 = vmatprep.subr.bf16.mxu0 %v14665_v39  ;;  %v9075_v47 = vld [vmem:[%s20292_s16 + $0x38] sm:$0xff] }
0x1c03   :  { %14682 = vmatprep.subr.bf16.mxu1 %v14681_v17  ;;  %v14667_v58 = vpack.c.bf16 %v8872_v16, %v8868_v30  ;;  %v14699_v17 = vpack.c.bf16 %v8874_v37, %v8870_v42  ;;  %v19072_v20 = vpack.c.bf16 %v9075_v47, %v9071_v55  ;;  %v8451_v16 = vmul.f32 %v18840_v32, %v8447_v48 }
0x1c05   :  { %8672 = vrot.lane.b32.xlu0 %v20380_v4, %s16307_s12  ;;  %14668 = vmatpush1.bf16.msra.mxu0 %v14667_v58  ;;  %v15885_v4 = vpop.eup %15884 }
0x1c06   :  { %14684 = vmatpush1.bf16.msra.mxu1 %v14683_v21  ;;  %v16308_v21 = vmov 1966171168   ;;  %v8405_v35 = vadd.f32 1.0, %v15885_v4  ;;  %14670 = vmatprep.subr.bf16.mxu0 %v14669_v1  ;;  %v15887_v34 = vpop.eup %15886  ;;  %v20385_v1 = vld [vmem:[#allocation20_spill] sm:$0xff] }
0x1c07   :  { %14686 = vmatprep.subr.bf16.mxu1 %v14685_v9  ;;  %v8534_v59 = vunpack.c.l.s4 %v16308_v21  ;;  %v8876_v9 = vld [vmem:[%s20290_s14 + $0x180] sm:$0xff]  ;;  %v15889_v28 = vpop.eup %15888 }
0x1c08   :  { %v14671_v54 = vpack.c.bf16 %v8880_v57, %v8876_v9  ;;  %15890 = vrcp.f32 %v8405_v35 }
0x1c09   :  { %v8535_v5 = vunpack.c.0.s8 %v8534_v59 }
0x1c0a   :  { %14688 = vmatpush1.bf16.msra.mxu1 %v14687_v7  ;;  %14672 = vmatpush1.bf16.msra.mxu0 %v14671_v54  ;;  %v8885_v7 = vld [vmem:[%s20290_s14 + $0x1c8] sm:$0xff] }
0x1c0b   :  { %14690 = vmatprep.subr.bf16.mxu1 %v14689_v56  ;;  %v14673_v22 = vpack.c.bf16 %v8889_v29, %v8885_v7  ;;  %v8891_v56 = vld [vmem:[%s20290_s14 + $0x1f8] sm:$0xff]  ;;  %v19058_v2 = vsub.s32 %v8535_v5, %v20381_v31 }
0x1c0c   :  { %v14705_v10 = vpack.c.bf16 %v8891_v56, %v8887_v40  ;;  %v20386_v40 = vld [vmem:[#allocation18_spill] sm:$0xff] }
0x1c0d   :  { %20382 = vst [vmem:[#allocation12_spill] sm:$0xff] %v19058_v2  ;;  %14674 = vmatprep.subr.bf16.mxu0 %v14673_v22 }
0x1c0e   :  { %14692 = vmatpush1.bf16.msra.mxu1 %v14691_v14  ;;  %v8890_v14 = vld [vmem:[%s20290_s14 + $0x1f0] sm:$0xff]  ;;  %14676 = vmatpush1.bf16.msra.mxu0 %v14675_v26 }
0x1c0f   :  { %14694 = vmatprep.subr.bf16.mxu1 %v14693_v38  ;;  %v14707_v3 = vpack.c.bf16 %v8890_v14, %v8886_v60  ;;  %14710 = vmatprep.subr.bf16.mxu0 %v19070_v62 }
0x1c12   :  { %14696 = vmatpush1.bf16.msra.mxu1 %v14695_v18  ;;  %v15891_v51 = vpop.eup %15890 }
0x1c13   :  { %14698 = vmatprep.subr.bf16.mxu1 %v14697_v6  ;;  %v20383_v6 = vld [vmem:[#allocation22_spill] sm:$0xff] }
0x1c16   :  { %14700 = vmatpush1.bf16.msra.mxu1 %v14699_v17 }
0x1c17   :  { %14702 = vmatprep.subr.bf16.mxu1 %v14701_v27 }
0x1c1a   :  { %14704 = vmatpush1.bf16.msra.mxu1 %v14703_v19 }
0x1c1b   :  { %14706 = vmatprep.subr.bf16.mxu1 %v14705_v10 }
0x1c1e   :  { %14708 = vmatpush1.bf16.msra.mxu1 %v14707_v3 }
0x1c1f   :  { %14742 = vmatprep.subr.bf16.mxu1 %v19072_v20 }
0x1c61   :  { %v8517_v46 = vpop.permute.xlu1 %8516 }
0x1c62   :  { %v8522_v18 = vmul.f32 %v15889_v28, %v8517_v46  ;;  %v20387_v28 = vld [vmem:[#allocation24_spill] sm:$0xff] }
0x1c63   :  { %v8519_v11 = vpop.permute.xlu0 %8518 }
0x1c64   :  { %v8523_v38 = vmul.f32 %v15887_v34, %v8519_v11 }
0x1c65   :  { %v8631_v30 = vpop.permute.xlu1 %8630 }
0x1c66   :  { %v8526_v39 = vrot.slane %v8523_v38, 7  ;;  %v8633_v42 = vsel %vm6307_vm4, %v20383_v6, %v8631_v30 }
0x1c67   :  { %v8467_v37 = vpop.permute.xlu0 %8466  ;;  %v8635_v58 = vcombine.high %v8633_v42, %v8633_v42  ;;  %v8642_v17 = vrot.slane %v8633_v42, %v19058_v2 }
0x1c68   :  { %v8471_v8 = vadd.f32 %v8467_v37, %v8451_v16  ;;  %v8527_v13 = vsel %vm6296_vm3, %v8526_v39, %v8522_v18 }
0x1c69   :  { %8528 = vrot.lane.b32.xlu1 %v8527_v13, %s16307_s12  ;;  %v8649_v32 = vrot.slane %v8635_v58, %v19058_v2  ;;  %v8650_v49 = vcombine.high %v8642_v17, %v8642_v17  ;;  %v8477_v53 = vpop.permute.xlu1 %8476  ;;  %v12559_v17 = vmul.f32 -1.442695, %v18827_v33  ;;  %v9072_v33 = vld [vmem:[%s20292_s16 + $0x20] sm:$0xff] }
0x1c6a   :  { %15892 = vtanh.f32 %v8471_v8  ;;  %v8482_v4 = vmul.f32 %v15891_v51, %v8477_v53 }
0x1c6b   :  { %v8782_v21 = vpop.permute.xlu0 %8781  ;;  %v8664_v59 = vrot.slane %v8650_v49, %v19058_v2  ;;  %12567 = vst.sshfl [vmem:[#allocation3 + $0xb] sm:$0x1 pattern:$0x73625140] %v8649_v32  ;;  %15894 = vpow2.f32 %v12559_v17  ;;  %v20388_v32 = vld [vmem:[#allocation16_spill] sm:$0xff]  ;;  %v9107_v17 = vld [vmem:[%s20292_s16 + $0x138] sm:$0xff] }
0x1c6c   :  { %v8787_v35 = vsel %vm6307_vm4, %v8482_v4, %v8782_v21  ;;  %v9070_v4 = vld [vmem:[%s20292_s16 + $0x10] sm:$0xff] }
0x1c6d   :  { %8783 = vrot.lane.b32.xlu1 %v8780_v63, %s16307_s12  ;;  %v8665_v61 = vcombine.high %v8664_v59, %v8664_v59  ;;  %v8791_v23 = vcombine.high %v8787_v35, %v8787_v35  ;;  %v8596_v45 = vpop.permute.xlu1 %8595  ;;  %v9068_v63 = vld [vmem:[%s20292_s16] sm:$0xff]  ;;  %v9074_v21 = vld [vmem:[%s20292_s16 + $0x30] sm:$0xff]  ;;  %v9077_v59 = vld [vmem:[%s20292_s16 + $0x48] sm:$0xff] }
0x1c6e   :  { %v8598_v52 = vsel %vm6307_vm4, %v20385_v1, %v8596_v45  ;;  %v9081_v35 = vld [vmem:[%s20292_s16 + $0x68] sm:$0xff]  ;;  %v19139_v45 = vpack.c.bf16 %v9072_v33, %v9068_v63  ;;  %v19141_v1 = vpack.c.bf16 %v9074_v21, %v9070_v4  ;;  %v9106_v63 = vld [vmem:[%s20292_s16 + $0x130] sm:$0xff]  ;;  %v9111_v21 = vld [vmem:[%s20292_s16 + $0x158] sm:$0xff] }
0x1c6f   :  { %v8742_v9 = vpop.permute.xlu0 %8741  ;;  %8668 = vst [vmem:[#allocation3 + $0x3] sm:$0x1] %v8665_v61  ;;  %v8798_v57 = vrot.slane %v8791_v23, %v19058_v2  ;;  %v8606_v27 = vrot.slane %v8598_v52, %v19058_v2  ;;  %v9079_v61 = vld [vmem:[%s20292_s16 + $0x58] sm:$0xff]  ;;  %v9076_v52 = vld [vmem:[%s20292_s16 + $0x40] sm:$0xff]  ;;  %v9109_v33 = vld [vmem:[%s20292_s16 + $0x148] sm:$0xff] }
0x1c70   :  { %v8744_v54 = vsel %vm6307_vm4, %v18802_v36, %v8742_v9  ;;  %v9083_v23 = vld [vmem:[%s20292_s16 + $0x78] sm:$0xff]  ;;  %v9080_v9 = vld [vmem:[%s20292_s16 + $0x60] sm:$0xff]  ;;  %v9113_v4 = vld [vmem:[%s20292_s16 + $0x168] sm:$0xff] }
0x1c71   :  { %v8746_v50 = vcombine.high %v8744_v54, %v8744_v54  ;;  %v8799_v43 = vcombine.high %v8798_v57, %v8798_v57  ;;  %v8607_v5 = vcombine.high %v8606_v27, %v8606_v27  ;;  %v8614_v19 = vrot.slane %v8606_v27, %v19058_v2  ;;  %v8562_v7 = vpop.permute.xlu1 %8561  ;;  %v9078_v57 = vld [vmem:[%s20292_s16 + $0x50] sm:$0xff] }
0x1c72   :  { %v8564_v46 = vsel %vm6307_vm4, %v20386_v40, %v8562_v7  ;;  %v19152_v27 = vpack.c.bf16 %v9081_v35, %v9077_v59  ;;  %v19154_v54 = vpack.c.bf16 %v9083_v23, %v9079_v61  ;;  %v9087_v7 = vld [vmem:[%s20292_s16 + $0x98] sm:$0xff]  ;;  %v9108_v23 = vld [vmem:[%s20292_s16 + $0x140] sm:$0xff] }
0x1c73   :  { %v8753_v29 = vrot.slane %v8746_v50, %v19058_v2  ;;  %v8707_v22 = vpop.permute.xlu0 %8706  ;;  %v8806_v25 = vrot.slane %v8799_v43, %v19058_v2  ;;  %v8621_v15 = vrot.slane %v8607_v5, %v19058_v2  ;;  %v8622_v34 = vcombine.high %v8614_v19, %v8614_v19  ;;  %v9082_v50 = vld [vmem:[%s20292_s16 + $0x70] sm:$0xff]  ;;  %v9085_v43 = vld [vmem:[%s20292_s16 + $0x88] sm:$0xff]  ;;  %v9115_v59 = vld [vmem:[%s20292_s16 + $0x178] sm:$0xff] }
0x1c74   :  { %v15893_v56 = vpop.eup %15892  ;;  %v8572_v36 = vrot.slane %v8564_v46, %v19058_v2  ;;  %v8709_v26 = vsel %vm6307_vm4, %v18708_v24, %v8707_v22  ;;  %v9089_v5 = vld [vmem:[%s20292_s16 + $0xa8] sm:$0xff] }
0x1c75   :  { %v8754_v11 = vcombine.high %v8753_v29, %v8753_v29  ;;  %v8761_v10 = vrot.slane %v8753_v29, %v19058_v2  ;;  %8478 = vrot.lane.b32.xlu0 %v15893_v56, %s16307_s12  ;;  %v8807_v60 = vcombine.high %v8806_v25, %v8806_v25  ;;  %v8623_v14 = vcombine.high %v8621_v15, %v8621_v15  ;;  %v15895_v8 = vpop.eup %15894  ;;  %v9091_v29 = vld [vmem:[%s20292_s16 + $0xb8] sm:$0xff]  ;;  %v9084_v15 = vld [vmem:[%s20292_s16 + $0x80] sm:$0xff] }
0x1c76   :  { %8626 = vst [vmem:[#allocation3 + $0x2] sm:$0x1] %v8622_v34  ;;  %v8573_v12 = vcombine.high %v8572_v36, %v8572_v36  ;;  %v8580_v48 = vrot.slane %v8572_v36, %v19058_v2  ;;  %v8711_v41 = vcombine.high %v8709_v26, %v8709_v26  ;;  %v8407_v13 = vadd.f32 1.0, %v15895_v8  ;;  %v9088_v34 = vld [vmem:[%s20292_s16 + $0xa0] sm:$0xff]  ;;  %v9090_v26 = vld [vmem:[%s20292_s16 + $0xb0] sm:$0xff] }
0x1c77   :  { %v8768_v38 = vrot.slane %v8754_v11, %v19058_v2  ;;  %v8769_v3 = vcombine.high %v8761_v10, %v8761_v10  ;;  %v8673_v55 = vpop.permute.xlu0 %8672  ;;  %8824 = vst [vmem:[#allocation3 + $0x7] sm:$0x1] %v8807_v60  ;;  %8627 = vst [vmem:[#allocation3 + $0xa] sm:$0x1] %v8623_v14  ;;  %v19173_v56 = vpack.c.bf16 %v9080_v9, %v9076_v52  ;;  %v9086_v10 = vld [vmem:[%s20292_s16 + $0x90] sm:$0xff]  ;;  %v9093_v60 = vld [vmem:[%s20292_s16 + $0xc8] sm:$0xff] }
0x1c78   :  { %v8588_v47 = vcombine.high %v8580_v48, %v8580_v48  ;;  %12566 = vst.sshfl [vmem:[#allocation3 + $0x1] sm:$0x1 pattern:$0x73625140] %v8573_v12  ;;  %v8675_v24 = vsel %vm6307_vm4, %v20387_v28, %v8673_v55  ;;  %v8718_v39 = vrot.slane %v8711_v41, %v19058_v2  ;;  %15896 = vrcp.f32 %v8407_v13  ;;  %v9097_v12 = vld [vmem:[%s20292_s16 + $0xe8] sm:$0xff]  ;;  %v9095_v48 = vld [vmem:[%s20292_s16 + $0xd8] sm:$0xff] }
0x1c79   :  { %v8770_v18 = vcombine.high %v8768_v38, %v8768_v38  ;;  %8773 = vst [vmem:[#allocation3 + $0x6] sm:$0x1] %v8769_v3  ;;  %v8677_v30 = vcombine.high %v8675_v24, %v8675_v24  ;;  %v19175_v25 = vpack.c.bf16 %v9082_v50, %v9078_v57  ;;  %v19185_v36 = vpack.c.bf16 %v9089_v5, %v9085_v43  ;;  %v9099_v38 = vld [vmem:[%s20292_s16 + $0xf8] sm:$0xff]  ;;  %v9092_v28 = vld [vmem:[%s20292_s16 + $0xc0] sm:$0xff]  ;;  %v9110_v9 = vld [vmem:[%s20292_s16 + $0x150] sm:$0xff] }
0x1c7a   :  { %8592 = vst [vmem:[#allocation3 + $0x9] sm:$0x1] %v8588_v47  ;;  %v8719_v16 = vcombine.high %v8718_v39, %v8718_v39  ;;  %v8726_v6 = vrot.slane %v8718_v39, %v19058_v2  ;;  %v19187_v11 = vpack.c.bf16 %v9091_v29, %v9087_v7  ;;  %v19212_v55 = vpack.c.bf16 %v9088_v34, %v9084_v15  ;;  %v9096_v24 = vld [vmem:[%s20292_s16 + $0xe0] sm:$0xff]  ;;  %v9114_v43 = vld [vmem:[%s20292_s16 + $0x170] sm:$0xff]  ;;  %v9117_v5 = vld [vmem:[%s20292_s16 + $0x188] sm:$0xff] }
0x1c7b   :  { %8774 = vst [vmem:[#allocation3 + $0xe] sm:$0x1] %v8770_v18  ;;  %v8684_v42 = vrot.slane %v8677_v30, %v19058_v2  ;;  %v19214_v47 = vpack.c.bf16 %v9090_v26, %v9086_v10  ;;  %v19225_v39 = vpack.c.bf16 %v9097_v12, %v9093_v60  ;;  %v19227_v30 = vpack.c.bf16 %v9099_v38, %v9095_v48  ;;  %v9112_v52 = vld [vmem:[%s20292_s16 + $0x160] sm:$0xff]  ;;  %v9119_v29 = vld [vmem:[%s20292_s16 + $0x198] sm:$0xff]  ;;  %v9118_v60 = vld [vmem:[%s20292_s16 + $0x190] sm:$0xff] }
0x1c7c   :  { %v8734_v37 = vcombine.high %v8726_v6, %v8726_v6  ;;  %12570 = vst.sshfl [vmem:[#allocation3 + $0x5] sm:$0x1 pattern:$0x73625140] %v8719_v16  ;;  %v9094_v16 = vld [vmem:[%s20292_s16 + $0xd0] sm:$0xff]  ;;  %v19249_v8 = vpack.c.bf16 %v9096_v24, %v9092_v28  ;;  %v19300_v57 = vpack.c.bf16 %v9113_v4, %v9109_v33  ;;  %v19302_v50 = vpack.c.bf16 %v9115_v59, %v9111_v21  ;;  %v9116_v15 = vld [vmem:[%s20292_s16 + $0x180] sm:$0xff] }
0x1c7d   :  { %v8685_v58 = vcombine.high %v8684_v42, %v8684_v42  ;;  %12568 = vst.sshfl [vmem:[#allocation3 + $0x4] sm:$0x1 pattern:$0x73625140] %v8684_v42  ;;  %v9098_v6 = vld [vmem:[%s20292_s16 + $0xf0] sm:$0xff]  ;;  %v9101_v42 = vld [vmem:[%s20292_s16 + $0x108] sm:$0xff] }
0x1c7e   :  { %8738 = vst [vmem:[#allocation3 + $0xd] sm:$0x1] %v8734_v37  ;;  %v9105_v37 = vld [vmem:[%s20292_s16 + $0x128] sm:$0xff]  ;;  %v19251_v13 = vpack.c.bf16 %v9098_v6, %v9094_v16  ;;  %v9120_v34 = vld [vmem:[%s20292_s16 + $0x1a0] sm:$0xff]  ;;  %v9127_v38 = vld [vmem:[%s20292_s16 + $0x1d8] sm:$0xff] }
0x1c7f   :  { %12569 = vst.sshfl [vmem:[#allocation3 + $0xc] sm:$0x1 pattern:$0x73625140] %v8685_v58  ;;  %v9103_v58 = vld [vmem:[%s20292_s16 + $0x118] sm:$0xff]  ;;  %v9125_v12 = vld [vmem:[%s20292_s16 + $0x1c8] sm:$0xff] }
0x1c80   :  { %v9129_v48 = vld [vmem:[%s20292_s16 + $0x1e8] sm:$0xff]  ;;  %v9124_v24 = vld [vmem:[%s20292_s16 + $0x1c0] sm:$0xff] }
0x1c81   :  { %v9128_v6 = vld [vmem:[%s20292_s16 + $0x1e0] sm:$0xff] }
0x1c82   :  { %v15897_v40 = vpop.eup %15896 }
0x1cdb   :  { %v8529_v51 = vpop.permute.xlu1 %8528 }
0x1cdc   :  { %v8531_v49 = vsel %vm6307_vm4, %v20388_v32, %v8529_v51  ;;  %v9100_v51 = vld [vmem:[%s20292_s16 + $0x100] sm:$0xff] }
0x1cdd   :  { %v8539_v53 = vrot.slane %v8531_v49, %v19058_v2  ;;  %v9104_v32 = vld [vmem:[%s20292_s16 + $0x120] sm:$0xff]  ;;  %v19261_v49 = vpack.c.bf16 %v9105_v37, %v9101_v42  ;;  %v9126_v42 = vld [vmem:[%s20292_s16 + $0x1d0] sm:$0xff] }
0x1cde   :  { %v19285_v35 = vpack.c.bf16 %v9104_v32, %v9100_v51  ;;  %v9130_v37 = vld [vmem:[%s20292_s16 + $0x1f0] sm:$0xff] }
0x1cdf   :  { %v8540_v0 = vcombine.high %v8539_v53, %v8539_v53  ;;  %12564 = vst.sshfl [vmem:[#allocation3] sm:$0x1 pattern:$0x73625140] %v8539_v53  ;;  %v8784_v3 = vpop.permute.xlu1 %8783  ;;  %v19263_v53 = vpack.c.bf16 %v9107_v17, %v9103_v58  ;;  %v19383_v58 = vpack.c.bf16 %v9128_v6, %v9124_v24  ;;  %v19385_v17 = vpack.c.bf16 %v9130_v37, %v9126_v42 }
0x1ce1   :  { %12565 = vst.sshfl [vmem:[#allocation3 + $0x8] sm:$0x1 pattern:$0x73625140] %v8540_v0  ;;  %v9102_v0 = vld [vmem:[%s20292_s16 + $0x110] sm:$0xff] }
0x1ce2   :  { %v19287_v61 = vpack.c.bf16 %v9106_v63, %v9102_v0 }
0x1ce6   :  { %v8826_v19 = vld [vmem:[#allocation3] sm:$0xff] }
0x1ce7   :  { %v8479_v46 = vpop.permute.xlu0 %8478  ;;  %8979 = vmatmul.mubr.f32.vlgmr.msra.gmra.mrb[40].mxu0 %v8826_v19  ;;  %9056 = vmatmul.mubr.f32.vlgmr.msra.gmra.mrb[48].mxu1 %v8826_v19  ;;  %v9121_v19 = vld [vmem:[%s20292_s16 + $0x1a8] sm:$0xff] }
0x1ce8   :  { %v8483_v22 = vmul.f32 %v15897_v40, %v8479_v46  ;;  %14712 = vmatpush1.bf16.msra.mxu0 %v19139_v45  ;;  %14744 = vmatpush1.bf16.msra.mxu1 %v19141_v1  ;;  %v9123_v40 = vld [vmem:[%s20292_s16 + $0x1b8] sm:$0xff]  ;;  %v19321_v46 = vpack.c.bf16 %v9112_v52, %v9108_v23  ;;  %v19333_v10 = vpack.c.bf16 %v9121_v19, %v9117_v5  ;;  %v20389_v19 = vsub.s32 3, %v20381_v31 }
0x1ce9   :  { %14714 = vmatprep.subr.bf16.mxu0 %v19152_v27  ;;  %14746 = vmatprep.subr.bf16.mxu1 %v19154_v54  ;;  %v19335_v26 = vpack.c.bf16 %v9123_v40, %v9119_v29 }
0x1cea   :  { %v8777_v14 = vrot.slane %v8483_v22, 7  ;;  %8984 = vmatprep.mubr.f32.mxu0 %v20354_v44  ;;  %9061 = vmatprep.mubr.f32.mxu1 %v20354_v44  ;;  %v19323_v22 = vpack.c.bf16 %v9114_v43, %v9110_v9  ;;  %v8892_v9 = vld [vmem:[%s20291_s15] sm:$0xf] }
0x1cec   :  { %v8788_v41 = vsel %vm6307_vm4, %v8777_v14, %v8784_v3  ;;  %14716 = vmatpush1.bf16.msra.mxu0 %v19173_v56  ;;  %14748 = vmatpush1.bf16.msra.mxu1 %v19175_v25  ;;  %v9122_v14 = vld [vmem:[%s20292_s16 + $0x1b0] sm:$0xff]  ;;  %v9131_v3 = vld [vmem:[%s20292_s16 + $0x1f8] sm:$0xff] }
0x1ced   :  { %v8814_v18 = vrot.slane %v8788_v41, %v19058_v2  ;;  %14718 = vmatprep.subr.bf16.mxu0 %v19185_v36  ;;  %14750 = vmatprep.subr.bf16.mxu1 %v19187_v11  ;;  %v19359_v41 = vpack.c.bf16 %v9120_v34, %v9116_v15  ;;  %v19361_v28 = vpack.c.bf16 %v9122_v14, %v9118_v60  ;;  %v20390_v34 = vsub.s32 1, %v20381_v31 }
0x1cee   :  { %v19370_v16 = vpack.c.bf16 %v9131_v3, %v9127_v38 }
0x1cef   :  { %12571 = vst.sshfl [vmem:[#allocation3 + $0xf] sm:$0x1 pattern:$0x73625140] %v8814_v18  ;;  %v19368_v18 = vpack.c.bf16 %v9129_v48, %v9125_v12  ;;  %v8901_v60 = vrot.slane %v8892_v9, %v20390_v34 }
0x1cf0   :  { %14720 = vmatpush1.bf16.msra.mxu0 %v19212_v55  ;;  %14752 = vmatpush1.bf16.msra.mxu1 %v19214_v47 }
0x1cf1   :  { %14722 = vmatprep.subr.bf16.mxu0 %v19225_v39  ;;  %14754 = vmatprep.subr.bf16.mxu1 %v19227_v30 }
0x1cf4   :  { %14724 = vmatpush1.bf16.msra.mxu0 %v19249_v8  ;;  %14756 = vmatpush1.bf16.msra.mxu1 %v19251_v13 }
0x1cf5   :  { %14726 = vmatprep.subr.bf16.mxu0 %v19261_v49  ;;  %14758 = vmatprep.subr.bf16.mxu1 %v19263_v53 }
0x1cf6   :  { %v8827_v7 = vld [vmem:[#allocation3 + $0x8] sm:$0xff] }
0x1cf7   :  { %8985 = vmatmul.mubr.f32.gmra.mrb[42].mxu0 %v8827_v7  ;;  %9062 = vmatmul.mubr.f32.gmra.mrb[50].mxu1 %v8827_v7  ;;  %v8909_v7 = vrot.slane %v8892_v9, %v20389_v19 }
0x1cf8   :  { %14728 = vmatpush1.bf16.msra.mxu0 %v19285_v35  ;;  %14760 = vmatpush1.bf16.msra.mxu1 %v19287_v61 }
0x1cf9   :  { %14730 = vmatprep.subr.bf16.mxu0 %v19300_v57  ;;  %14762 = vmatprep.subr.bf16.mxu1 %v19302_v50 }
0x1cfa   :  { %9196 = vmatprep.mubr.f32.mxu0 %v20354_v44  ;;  %9267 = vmatprep.mubr.f32.mxu1 %v20354_v44 }
0x1cfc   :  { %14732 = vmatpush1.bf16.msra.mxu0 %v19321_v46  ;;  %14764 = vmatpush1.bf16.msra.mxu1 %v19323_v22 }
0x1cfd   :  { %14734 = vmatprep.subr.bf16.mxu0 %v19333_v10  ;;  %14766 = vmatprep.subr.bf16.mxu1 %v19335_v26 }
0x1d00   :  { %14736 = vmatpush1.bf16.msra.mxu0 %v19359_v41  ;;  %14768 = vmatpush1.bf16.msra.mxu1 %v19361_v28 }
0x1d01   :  { %14738 = vmatprep.subr.bf16.mxu0 %v19368_v18  ;;  %14770 = vmatprep.subr.bf16.mxu1 %v19370_v16 }
0x1d04   :  { %14740 = vmatpush1.bf16.msra.mxu0 %v19383_v58  ;;  %14772 = vmatpush1.bf16.msra.mxu1 %v19385_v17 }
0x1d05   :  { %14774 = vmatprep.subr.bf16.mxu0 %v19070_v62  ;;  %14806 = vmatprep.subr.bf16.mxu1 %v19072_v20 }
0x1d07   :  { %9197 = vmatmul.mubr.f32.vlgmr.msra.gmra.mrb[44].mxu0 %v20354_v44  ;;  %9268 = vmatmul.mubr.f32.vlgmr.msra.gmra.mrb[52].mxu1 %v20354_v44 }
0x1d08   :  { %14776 = vmatpush1.bf16.msra.mxu0 %v19139_v45  ;;  %14808 = vmatpush1.bf16.msra.mxu1 %v19141_v1 }
0x1d09   :  { %14778 = vmatprep.subr.bf16.mxu0 %v19152_v27  ;;  %14810 = vmatprep.subr.bf16.mxu1 %v19154_v54 }
0x1d0a   :  { %9498 = vmatprep.mubr.f32.mxu0 %v20354_v44  ;;  %9569 = vmatprep.mubr.f32.mxu1 %v20354_v44 }
0x1d0c   :  { %14780 = vmatpush1.bf16.msra.mxu0 %v19173_v56  ;;  %14812 = vmatpush1.bf16.msra.mxu1 %v19175_v25 }
0x1d0d   :  { %14782 = vmatprep.subr.bf16.mxu0 %v19185_v36  ;;  %14814 = vmatprep.subr.bf16.mxu1 %v19187_v11 }
0x1d10   :  { %14784 = vmatpush1.bf16.msra.mxu0 %v19212_v55  ;;  %14816 = vmatpush1.bf16.msra.mxu1 %v19214_v47 }
0x1d11   :  { %14786 = vmatprep.subr.bf16.mxu0 %v19225_v39  ;;  %14818 = vmatprep.subr.bf16.mxu1 %v19227_v30 }
0x1d14   :  { %14788 = vmatpush1.bf16.msra.mxu0 %v19249_v8  ;;  %14820 = vmatpush1.bf16.msra.mxu1 %v19251_v13 }
0x1d15   :  { %14790 = vmatprep.subr.bf16.mxu0 %v19261_v49  ;;  %14822 = vmatprep.subr.bf16.mxu1 %v19263_v53 }
0x1d18   :  { %14792 = vmatpush1.bf16.msra.mxu0 %v19285_v35  ;;  %14824 = vmatpush1.bf16.msra.mxu1 %v19287_v61 }
0x1d19   :  { %14794 = vmatprep.subr.bf16.mxu0 %v19300_v57  ;;  %14826 = vmatprep.subr.bf16.mxu1 %v19302_v50 }
0x1d1c   :  { %14796 = vmatpush1.bf16.msra.mxu0 %v19321_v46  ;;  %14828 = vmatpush1.bf16.msra.mxu1 %v19323_v22 }
0x1d1d   :  { %14798 = vmatprep.subr.bf16.mxu0 %v19333_v10  ;;  %14830 = vmatprep.subr.bf16.mxu1 %v19335_v26 }
0x1d20   :  { %14800 = vmatpush1.bf16.msra.mxu0 %v19359_v41  ;;  %14832 = vmatpush1.bf16.msra.mxu1 %v19361_v28 }
0x1d21   :  { %14802 = vmatprep.subr.bf16.mxu0 %v19368_v18  ;;  %14834 = vmatprep.subr.bf16.mxu1 %v19370_v16 }
0x1d24   :  { %14804 = vmatpush1.bf16.msra.mxu0 %v19383_v58  ;;  %14836 = vmatpush1.bf16.msra.mxu1 %v19385_v17 }
0x1d25   :  { %14838 = vmatprep.subr.bf16.mxu0 %v19070_v62  ;;  %14870 = vmatprep.subr.bf16.mxu1 %v19072_v20 }
0x1dba   :  { %v8980_v51 = vpop.f32.mrb[40].mxu0  ;;  %v9057_v32 = vpop.f32.mrb[48].mxu1 }
0x1dbb   :  { %v8982_v0 = vpop.f32.mrb[41].mxu0  ;;  %v9059_v63 = vpop.f32.mrb[49].mxu1 }
0x1dbc   :  { %v19434_v15 = vadd.f32 %v9059_v63, %v8909_v7  ;;  %v19448_v24 = vadd.f32 %v8982_v0, %v8901_v60 }
0x1dbe   :  { %20392 = vst [vmem:[#allocation13_spill] sm:$0xff] %v19448_v24 }
0x1dca   :  { %v8986_v33 = vpop.f32.mrb[42].mxu0  ;;  %v9063_v4 = vpop.f32.mrb[50].mxu1 }
0x1dcb   :  { %v8988_v21 = vpop.f32.mrb[43].mxu0  ;;  %v9065_v59 = vpop.f32.mrb[51].mxu1 }
0x1dcc   :  { %v19438_v14 = vadd.f32 %v9065_v59, %v8909_v7  ;;  %v19446_v3 = vadd.f32 %v8988_v21, %v8901_v60  ;;  %v20393_v59 = vsub.s32 2, %v20381_v31 }
0x1dce   :  { %20391 = vst [vmem:[#allocation11_spill] sm:$0xff] %v19446_v3 }
0x1dda   :  { %v9198_v23 = vpop.f32.mrb[44].mxu0  ;;  %v9269_v52 = vpop.f32.mrb[52].mxu1 }
0x1ddb   :  { %v9200_v43 = vpop.f32.mrb[45].mxu0  ;;  %v9271_v5 = vpop.f32.mrb[53].mxu1  ;;  %v9290_v19 = vrot.slane %v9269_v52, 2  ;;  %v9276_v60 = vrot.slane %v9198_v23, 1 }
0x1ddc   :  { %v9289_v29 = vrot.slane %v9271_v5, 1  ;;  %v9291_v40 = vrot.slane %v9271_v5, 2  ;;  %v9277_v12 = vrot.slane %v9200_v43, 1  ;;  %v19455_v42 = vadd.f32 %v9200_v43, %v19448_v24 }
0x1ddd   :  { %v8905_v43 = vrot.slane %v8892_v9, %v20393_v59  ;;  %v9288_v5 = vrot.slane %v9269_v52, 1 }
0x1dde   :  { %v19441_v48 = vadd.f32 %v9289_v29, %v19434_v15  ;;  %v19444_v38 = vadd.f32 %v9291_v40, %v19438_v14  ;;  %v19451_v6 = vadd.f32 %v9277_v12, %v19446_v3  ;;  %v20395_v29 = vsub.s32 0, %v20381_v31 }
0x1ddf   :  { %v19466_v7 = vadd.f32 %v9057_v32, %v8905_v43  ;;  %v19470_v34 = vadd.f32 %v9063_v4, %v8905_v43 }
0x1de0   :  { %15898 = vtanh.f32 %v19441_v48  ;;  %v8897_v40 = vrot.slane %v8892_v9, %v20395_v29 }
0x1de1   :  { %15900 = vtanh.f32 %v19444_v38  ;;  %20394 = vst [vmem:[#allocation23_spill] sm:$0xff] %v19466_v7  ;;  %v9296_v12 = vadd.f32 %v9288_v5, %v19466_v7 }
0x1de2   :  { %15902 = vtanh.f32 %v19451_v6 }
0x1de3   :  { %15904 = vtanh.f32 %v19455_v42  ;;  %v12576_v59 = vmul.f32 -1.442695, %v9296_v12 }
0x1de5   :  { %15906 = vpow2.f32 %v12576_v59 }
0x1dea   :  { %v15899_v37 = vpop.eup %15898 }
0x1deb   :  { %v15901_v63 = vpop.eup %15900  ;;  %9390 = vrot.lane.b32.xlu0 %v15899_v37, %s16307_s12  ;;  %v9298_v37 = vadd.f32 %v9290_v19, %v19470_v34 }
0x1dec   :  { %9392 = vrot.lane.b32.xlu1 %v15901_v63, %s16307_s12  ;;  %v15903_v0 = vpop.eup %15902  ;;  %v19474_v63 = vadd.f32 %v8986_v33, %v8897_v40 }
0x1ded   :  { %v15905_v21 = vpop.eup %15904  ;;  %v12578_v52 = vmul.f32 -1.442695, %v9298_v37 }
0x1def   :  { %9358 = vrot.lane.b32.xlu0 %v15903_v0, %s16307_s12  ;;  %v19476_v0 = vadd.f32 %v8980_v51, %v8897_v40  ;;  %15908 = vpow2.f32 %v12578_v52  ;;  %v15907_v4 = vpop.eup %15906 }
0x1df0   :  { %9356 = vrot.lane.b32.xlu1 %v15905_v21, %s16307_s12  ;;  %v9284_v21 = vadd.f32 %v9276_v60, %v19474_v63  ;;  %v9336_v43 = vadd.f32 1.0, %v15907_v4 }
0x1df1   :  { %v9282_v32 = vadd.f32 %v9198_v23, %v19476_v0 }
0x1df2   :  { %v12574_v2 = vmul.f32 -1.442695, %v9284_v21 }
0x1df3   :  { %v12572_v31 = vmul.f32 -1.442695, %v9282_v32 }
0x1df4   :  { %15910 = vpow2.f32 %v12574_v2 }
0x1df5   :  { %15912 = vpow2.f32 %v12572_v31 }
0x1df6   :  { %15914 = vrcp.f32 %v9336_v43 }
0x1df9   :  { %v15909_v9 = vpop.eup %15908 }
0x1dfa   :  { %v9338_v33 = vadd.f32 1.0, %v15909_v9 }
0x1dfc   :  { %15916 = vrcp.f32 %v9338_v33 }
0x1dfe   :  { %v15911_v5 = vpop.eup %15910 }
0x1dff   :  { %v15913_v19 = vpop.eup %15912  ;;  %v9314_v51 = vadd.f32 1.0, %v15911_v5 }
0x1e00   :  { %v9312_v29 = vadd.f32 1.0, %v15913_v19  ;;  %v15915_v23 = vpop.eup %15914 }
0x1e01   :  { %15918 = vrcp.f32 %v9314_v51  ;;  %v9386_v9 = vmul.f32 0.0, %v15915_v23 }
0x1e02   :  { %15920 = vrcp.f32 %v9312_v29 }
0x1e06   :  { %v15917_v60 = vpop.eup %15916 }
0x1e07   :  { %v9387_v5 = vmul.f32 0.0, %v15917_v60 }
0x1e0b   :  { %v15919_v2 = vpop.eup %15918 }
0x1e0c   :  { %v15921_v32 = vpop.eup %15920  ;;  %v9353_v29 = vmul.f32 0.0, %v15919_v2 }
0x1e5d   :  { %v9391_v40 = vpop.permute.xlu0 %9390 }
0x1e5e   :  { %v9393_v12 = vpop.permute.xlu1 %9392  ;;  %v9396_v37 = vmul.f32 %v15915_v23, %v9391_v40 }
0x1e5f   :  { %v9397_v21 = vmul.f32 %v15917_v60, %v9393_v12  ;;  %v9352_v12 = vmul.f32 0.0, %v15921_v32 }
0x1e60   :  { %9400 = vrot.lane.b32.xlu0 %v9396_v37, %s16307_s12 }
0x1e61   :  { %9402 = vrot.lane.b32.xlu1 %v9397_v21, %s16307_s12  ;;  %v9359_v59 = vpop.permute.xlu0 %9358 }
0x1e62   :  { %v9363_v52 = vmul.f32 %v15919_v2, %v9359_v59  ;;  %v9357_v31 = vpop.permute.xlu1 %9356 }
0x1e63   :  { %v9362_v4 = vmul.f32 %v15921_v32, %v9357_v31  ;;  %v12577_v32 = vmul.f32 -1.442695, %v19441_v48  ;;  %v12579_v31 = vmul.f32 -1.442695, %v19444_v38 }
0x1e64   :  { %9368 = vrot.lane.b32.xlu0 %v9363_v52, %s16307_s12 }
0x1e65   :  { %9366 = vrot.lane.b32.xlu1 %v9362_v4, %s16307_s12  ;;  %v12575_v4 = vmul.f32 -1.442695, %v19451_v6 }
0x1ed2   :  { %v9401_v43 = vpop.permute.xlu0 %9400 }
0x1ed3   :  { %v19484_v33 = vadd.f32 %v9401_v43, %v9386_v9  ;;  %v9403_v19 = vpop.permute.xlu1 %9402  ;;  %v12573_v9 = vmul.f32 -1.442695, %v19455_v42 }
0x1ed4   :  { %v19486_v51 = vadd.f32 %v9403_v19, %v9387_v5 }
0x1ed5   :  { %15922 = vtanh.f32 %v19484_v33 }
0x1ed6   :  { %15924 = vtanh.f32 %v19486_v51  ;;  %v9369_v40 = vpop.permute.xlu0 %9368 }
0x1ed7   :  { %v19490_v37 = vadd.f32 %v9369_v40, %v9353_v29  ;;  %v9367_v21 = vpop.permute.xlu1 %9366 }
0x1ed8   :  { %v19492_v59 = vadd.f32 %v9367_v21, %v9352_v12 }
0x1ed9   :  { %15926 = vtanh.f32 %v19490_v37 }
0x1eda   :  { %15928 = vtanh.f32 %v19492_v59 }
0x1edb   :  { %15930 = vpow2.f32 %v12577_v32 }
0x1edc   :  { %15932 = vpow2.f32 %v12579_v31 }
0x1edd   :  { %15934 = vpow2.f32 %v12575_v4 }
0x1ede   :  { %15936 = vpow2.f32 %v12573_v9 }
0x1edf   :  { %v15923_v23 = vpop.eup %15922 }
0x1ee0   :  { %v15925_v60 = vpop.eup %15924  ;;  %9412 = vrot.lane.b32.xlu0 %v15923_v23, %s16307_s12 }
0x1ee1   :  { %9414 = vrot.lane.b32.xlu1 %v15925_v60, %s16307_s12 }
0x1ee3   :  { %v15927_v2 = vpop.eup %15926 }
0x1ee4   :  { %v15929_v52 = vpop.eup %15928  ;;  %9380 = vrot.lane.b32.xlu0 %v15927_v2, %s16307_s12 }
0x1ee5   :  { %9378 = vrot.lane.b32.xlu1 %v15929_v52, %s16307_s12  ;;  %v15931_v43 = vpop.eup %15930 }
0x1ee6   :  { %v15933_v5 = vpop.eup %15932  ;;  %v9337_v19 = vadd.f32 1.0, %v15931_v43 }
0x1ee7   :  { %v15935_v29 = vpop.eup %15934  ;;  %v9339_v40 = vadd.f32 1.0, %v15933_v5 }
0x1ee8   :  { %v15937_v12 = vpop.eup %15936  ;;  %v9315_v21 = vadd.f32 1.0, %v15935_v29  ;;  %15938 = vrcp.f32 %v9337_v19 }
0x1ee9   :  { %15940 = vrcp.f32 %v9339_v40  ;;  %v9313_v48 = vadd.f32 1.0, %v15937_v12 }
0x1eea   :  { %15942 = vrcp.f32 %v9315_v21 }
0x1eeb   :  { %15944 = vrcp.f32 %v9313_v48 }
0x1ef2   :  { %v15939_v38 = vpop.eup %15938 }
0x1ef3   :  { %v15941_v23 = vpop.eup %15940 }
0x1ef4   :  { %v15943_v32 = vpop.eup %15942 }
0x1ef5   :  { %v15945_v5 = vpop.eup %15944 }
0x1f52   :  { %v9413_v6 = vpop.permute.xlu0 %9412 }
0x1f53   :  { %v19504_v60 = vmul.f32 %v15939_v38, %v9413_v6  ;;  %v9415_v42 = vpop.permute.xlu1 %9414 }
0x1f54   :  { %v19506_v2 = vmul.f32 %v15941_v23, %v9415_v42 }
0x1f55   :  { %20396 = vst [vmem:[#allocation14_spill] sm:$0xff] %v19504_v60  ;;  %v9427_v52 = vrot.slane %v19504_v60, 7 }
0x1f56   :  { %20397 = vst [vmem:[#allocation17_spill] sm:$0xff] %v19506_v2  ;;  %v9428_v31 = vrot.slane %v19506_v2, 6  ;;  %v9381_v4 = vpop.permute.xlu0 %9380 }
0x1f57   :  { %v9385_v9 = vmul.f32 %v15943_v32, %v9381_v4  ;;  %v9379_v43 = vpop.permute.xlu1 %9378 }
0x1f58   :  { %v9429_v19 = vsel %vm6296_vm3, %v9428_v31, %v9427_v52  ;;  %v9384_v40 = vmul.f32 %v15945_v5, %v9379_v43 }
0x1f59   :  { %v9422_v29 = vrot.slane %v9385_v9, 7  ;;  %9430 = vrot.lane.b32.xlu0 %v9429_v19, %s16307_s12 }
0x1f5b   :  { %v19513_v12 = vsel %vm6296_vm3, %v9422_v29, %v9384_v40 }
0x1f5c   :  { %20398 = vst [vmem:[#allocation19_spill] sm:$0xff] %v19513_v12 }
0x1fcb   :  { %v9431_v21 = vpop.permute.xlu0 %9430 }
0x1fcc   :  { %v9433_v48 = vsel %vm6307_vm4, %v19513_v12, %v9431_v21 }
0x1fcd   :  { %9499 = vmatmul.mubr.f32.vlgmr.msra.gmra.mrb[46].mxu0 %v9433_v48  ;;  %9570 = vmatmul.mubr.f32.vlgmr.msra.gmra.mrb[54].mxu1 %v9433_v48 }
0x1fce   :  { %14840 = vmatpush1.bf16.msra.mxu0 %v19139_v45  ;;  %14872 = vmatpush1.bf16.msra.mxu1 %v19141_v1 }
0x1fcf   :  { %14842 = vmatprep.subr.bf16.mxu0 %v19152_v27  ;;  %14874 = vmatprep.subr.bf16.mxu1 %v19154_v54 }
0x1fd0   :  { %9815 = vmatprep.mubr.f32.mxu0 %v20354_v44  ;;  %9886 = vmatprep.mubr.f32.mxu1 %v20354_v44 }
0x1fd2   :  { %14844 = vmatpush1.bf16.msra.mxu0 %v19173_v56  ;;  %14876 = vmatpush1.bf16.msra.mxu1 %v19175_v25 }
0x1fd3   :  { %14846 = vmatprep.subr.bf16.mxu0 %v19185_v36  ;;  %14878 = vmatprep.subr.bf16.mxu1 %v19187_v11 }
0x1fd6   :  { %14848 = vmatpush1.bf16.msra.mxu0 %v19212_v55  ;;  %14880 = vmatpush1.bf16.msra.mxu1 %v19214_v47 }
0x1fd7   :  { %14850 = vmatprep.subr.bf16.mxu0 %v19225_v39  ;;  %14882 = vmatprep.subr.bf16.mxu1 %v19227_v30 }
0x1fda   :  { %14852 = vmatpush1.bf16.msra.mxu0 %v19249_v8  ;;  %14884 = vmatpush1.bf16.msra.mxu1 %v19251_v13 }
0x1fdb   :  { %14854 = vmatprep.subr.bf16.mxu0 %v19261_v49  ;;  %14886 = vmatprep.subr.bf16.mxu1 %v19263_v53 }
0x1fde   :  { %14856 = vmatpush1.bf16.msra.mxu0 %v19285_v35  ;;  %14888 = vmatpush1.bf16.msra.mxu1 %v19287_v61 }
0x1fdf   :  { %14858 = vmatprep.subr.bf16.mxu0 %v19300_v57  ;;  %14890 = vmatprep.subr.bf16.mxu1 %v19302_v50 }
0x1fe2   :  { %14860 = vmatpush1.bf16.msra.mxu0 %v19321_v46  ;;  %14892 = vmatpush1.bf16.msra.mxu1 %v19323_v22 }
0x1fe3   :  { %14862 = vmatprep.subr.bf16.mxu0 %v19333_v10  ;;  %14894 = vmatprep.subr.bf16.mxu1 %v19335_v26 }
0x1fe6   :  { %14864 = vmatpush1.bf16.msra.mxu0 %v19359_v41  ;;  %14896 = vmatpush1.bf16.msra.mxu1 %v19361_v28 }
0x1fe7   :  { %14866 = vmatprep.subr.bf16.mxu0 %v19368_v18  ;;  %14898 = vmatprep.subr.bf16.mxu1 %v19370_v16 }
0x1fea   :  { %14868 = vmatpush1.bf16.msra.mxu0 %v19383_v58  ;;  %14900 = vmatpush1.bf16.msra.mxu1 %v19385_v17 }
0x1feb   :  { %14902 = vmatprep.subr.bf16.mxu0 %v19070_v62  ;;  %14934 = vmatprep.subr.bf16.mxu1 %v19072_v20 }
0x20a0   :  { %v9500_v38 = vpop.f32.mrb[46].mxu0  ;;  %v9571_v6 = vpop.f32.mrb[54].mxu1 }
0x20a1   :  { %v9502_v23 = vpop.f32.mrb[47].mxu0  ;;  %v9573_v42 = vpop.f32.mrb[55].mxu1  ;;  %v9590_v48 = vrot.slane %v9571_v6, 2 }
0x20a2   :  { %v9591_v52 = vrot.slane %v9573_v42, 2  ;;  %v9593_v32 = vrot.slane %v9573_v42, 3  ;;  %v9579_v4 = vrot.slane %v9502_v23, 7  ;;  %v19558_v43 = vadd.f32 %v9502_v23, %v19446_v3 }
0x20a3   :  { %v9592_v23 = vrot.slane %v9571_v6, 3  ;;  %v9598_v42 = vadd.f32 %v9590_v48, %v19466_v7 }
0x20a4   :  { %v19552_v31 = vadd.f32 %v9591_v52, %v19434_v15  ;;  %v19555_v9 = vadd.f32 %v9593_v32, %v19438_v14  ;;  %v19562_v5 = vadd.f32 %v9579_v4, %v19448_v24  ;;  %v9578_v52 = vrot.slane %v9500_v38, 7 }
0x20a5   :  { %v9600_v32 = vadd.f32 %v9592_v23, %v19470_v34  ;;  %v9586_v4 = vadd.f32 %v9500_v38, %v19474_v63  ;;  %v12584_v12 = vmul.f32 -1.442695, %v9598_v42 }
0x20a6   :  { %15946 = vtanh.f32 %v19552_v31 }
0x20a7   :  { %15948 = vtanh.f32 %v19555_v9  ;;  %v12586_v2 = vmul.f32 -1.442695, %v9600_v32 }
0x20a8   :  { %15950 = vtanh.f32 %v19558_v43 }
0x20a9   :  { %15952 = vtanh.f32 %v19562_v5 }
0x20aa   :  { %15954 = vpow2.f32 %v12584_v12 }
0x20ab   :  { %15956 = vpow2.f32 %v12586_v2 }
0x20b0   :  { %v15947_v19 = vpop.eup %15946 }
0x20b1   :  { %v15949_v29 = vpop.eup %15948  ;;  %9704 = vrot.lane.b32.xlu1 %v15947_v19, %s16307_s12  ;;  %v9584_v19 = vadd.f32 %v9578_v52, %v19476_v0 }
0x20b2   :  { %9706 = vrot.lane.b32.xlu0 %v15949_v29, %s16307_s12  ;;  %v15951_v40 = vpop.eup %15950  ;;  %v12582_v29 = vmul.f32 -1.442695, %v9586_v4 }
0x20b3   :  { %v15953_v21 = vpop.eup %15952  ;;  %v12580_v60 = vmul.f32 -1.442695, %v9584_v19 }
0x20b4   :  { %15958 = vpow2.f32 %v12582_v29 }
0x20b5   :  { %9666 = vrot.lane.b32.xlu1 %v15951_v40, %s16307_s12  ;;  %15960 = vpow2.f32 %v12580_v60  ;;  %v15955_v40 = vpop.eup %15954 }
0x20b6   :  { %9664 = vrot.lane.b32.xlu0 %v15953_v21, %s16307_s12  ;;  %v15957_v21 = vpop.eup %15956  ;;  %v9638_v6 = vadd.f32 1.0, %v15955_v40 }
0x20b7   :  { %v9640_v48 = vadd.f32 1.0, %v15957_v21 }
0x20b8   :  { %15962 = vrcp.f32 %v9638_v6 }
0x20b9   :  { %15964 = vrcp.f32 %v9640_v48 }
0x20be   :  { %v15959_v24 = vpop.eup %15958 }
0x20bf   :  { %v15961_v7 = vpop.eup %15960  ;;  %v9616_v3 = vadd.f32 1.0, %v15959_v24 }
0x20c0   :  { %v9614_v23 = vadd.f32 1.0, %v15961_v7  ;;  %v9697_v7 = vrot.slane %v19486_v51, 1 }
0x20c1   :  { %15966 = vrcp.f32 %v9616_v3  ;;  %v9696_v3 = vrot.slane %v19484_v33, 1 }
0x20c2   :  { %15968 = vrcp.f32 %v9614_v23  ;;  %v15963_v38 = vpop.eup %15962  ;;  %v9657_v23 = vrot.slane %v19490_v37, 7 }
0x20c3   :  { %v15965_v52 = vpop.eup %15964  ;;  %v9700_v21 = vmul.f32 %v15963_v38, %v9696_v3  ;;  %v12583_v3 = vmul.f32 -1.442695, %v19558_v43 }
0x20c4   :  { %v9701_v48 = vmul.f32 %v15965_v52, %v9697_v7  ;;  %v12581_v7 = vmul.f32 -1.442695, %v19562_v5 }
0x20cb   :  { %v15967_v60 = vpop.eup %15966 }
0x20cc   :  { %v15969_v19 = vpop.eup %15968 }
0x2123   :  { %v9705_v42 = vpop.permute.xlu1 %9704 }
0x2124   :  { %v9707_v12 = vpop.permute.xlu0 %9706  ;;  %v9710_v32 = vmul.f32 %v15963_v38, %v9705_v42 }
0x2125   :  { %v9711_v2 = vmul.f32 %v15965_v52, %v9707_v12 }
0x2126   :  { %9714 = vrot.lane.b32.xlu1 %v9710_v32, %s16307_s12  ;;  %v9656_v32 = vrot.slane %v19492_v59, 7 }
0x2127   :  { %9716 = vrot.lane.b32.xlu0 %v9711_v2, %s16307_s12  ;;  %v9667_v4 = vpop.permute.xlu1 %9666 }
0x2128   :  { %v9671_v29 = vmul.f32 %v15967_v60, %v9667_v4  ;;  %v9665_v24 = vpop.permute.xlu0 %9664  ;;  %v9661_v4 = vmul.f32 %v15967_v60, %v9657_v23 }
0x2129   :  { %v9670_v40 = vmul.f32 %v15969_v19, %v9665_v24 }
0x212a   :  { %9676 = vrot.lane.b32.xlu1 %v9671_v29, %s16307_s12  ;;  %v9660_v29 = vmul.f32 %v15969_v19, %v9656_v32  ;;  %v12585_v19 = vmul.f32 -1.442695, %v19552_v31 }
0x212b   :  { %9674 = vrot.lane.b32.xlu0 %v9670_v40, %s16307_s12  ;;  %v12587_v40 = vmul.f32 -1.442695, %v19555_v9 }
0x2198   :  { %v9715_v6 = vpop.permute.xlu1 %9714 }
0x2199   :  { %v19582_v42 = vadd.f32 %v9715_v6, %v9700_v21  ;;  %v9717_v12 = vpop.permute.xlu0 %9716 }
0x219a   :  { %v19585_v2 = vadd.f32 %v9717_v12, %v9701_v48 }
0x219b   :  { %15970 = vtanh.f32 %v19582_v42 }
0x219c   :  { %15972 = vtanh.f32 %v19585_v2  ;;  %v9677_v33 = vpop.permute.xlu1 %9676 }
0x219d   :  { %v19589_v51 = vadd.f32 %v9677_v33, %v9661_v4  ;;  %v9675_v38 = vpop.permute.xlu0 %9674 }
0x219e   :  { %v19591_v52 = vadd.f32 %v9675_v38, %v9660_v29 }
0x219f   :  { %15974 = vtanh.f32 %v19589_v51 }
0x21a0   :  { %15976 = vtanh.f32 %v19591_v52 }
0x21a1   :  { %15978 = vpow2.f32 %v12585_v19 }
0x21a2   :  { %15980 = vpow2.f32 %v12587_v40 }
0x21a3   :  { %15982 = vpow2.f32 %v12583_v3 }
0x21a4   :  { %15984 = vpow2.f32 %v12581_v7 }
0x21a5   :  { %v15971_v37 = vpop.eup %15970 }
0x21a6   :  { %v15973_v59 = vpop.eup %15972  ;;  %9726 = vrot.lane.b32.xlu1 %v15971_v37, %s16307_s12 }
0x21a7   :  { %9728 = vrot.lane.b32.xlu0 %v15973_v59, %s16307_s12 }
0x21a9   :  { %v15975_v60 = vpop.eup %15974 }
0x21aa   :  { %v15977_v24 = vpop.eup %15976  ;;  %9688 = vrot.lane.b32.xlu1 %v15975_v60, %s16307_s12 }
0x21ab   :  { %9686 = vrot.lane.b32.xlu0 %v15977_v24, %s16307_s12  ;;  %v15979_v21 = vpop.eup %15978 }
0x21ac   :  { %v15981_v6 = vpop.eup %15980  ;;  %v9639_v48 = vadd.f32 1.0, %v15979_v21 }
0x21ad   :  { %v15983_v23 = vpop.eup %15982  ;;  %v9641_v12 = vadd.f32 1.0, %v15981_v6 }
0x21ae   :  { %v15985_v32 = vpop.eup %15984  ;;  %v9617_v4 = vadd.f32 1.0, %v15983_v23  ;;  %15986 = vrcp.f32 %v9639_v48 }
0x21af   :  { %15988 = vrcp.f32 %v9641_v12  ;;  %v9615_v31 = vadd.f32 1.0, %v15985_v32 }
0x21b0   :  { %15990 = vrcp.f32 %v9617_v4 }
0x21b1   :  { %15992 = vrcp.f32 %v9615_v31 }
0x21b8   :  { %v15987_v9 = vpop.eup %15986 }
0x21b9   :  { %v15989_v33 = vpop.eup %15988 }
0x21ba   :  { %v15991_v59 = vpop.eup %15990 }
0x21bb   :  { %v15993_v7 = vpop.eup %15992 }
0x2218   :  { %v9727_v43 = vpop.permute.xlu1 %9726 }
0x2219   :  { %v9732_v29 = vmul.f32 %v15987_v9, %v9727_v43  ;;  %v9729_v38 = vpop.permute.xlu0 %9728 }
0x221a   :  { %v9733_v5 = vmul.f32 %v15989_v33, %v9729_v38 }
0x221b   :  { %v9741_v37 = vrot.slane %v9732_v29, 5 }
0x221c   :  { %v9742_v60 = vrot.slane %v9733_v5, 4  ;;  %v11858_v24 = vrot.slane %v9733_v5, 7  ;;  %v9689_v19 = vpop.permute.xlu1 %9688 }
0x221d   :  { %v9693_v40 = vmul.f32 %v15991_v59, %v9689_v19  ;;  %v9687_v3 = vpop.permute.xlu0 %9686  ;;  %v20401_v19 = vld [vmem:[#allocation11_spill] sm:$0xff] }
0x221e   :  { %v9743_v21 = vsel %vm6612_vm5, %v9742_v60, %v9741_v37  ;;  %v19605_v6 = vsel %vm8209_vm6, %v11858_v24, %v9732_v29  ;;  %v9692_v23 = vmul.f32 %v15993_v7, %v9687_v3  ;;  %v20402_v3 = vld [vmem:[#allocation13_spill] sm:$0xff] }
0x221f   :  { %20399 = vst [vmem:[#allocation21_spill] sm:$0xff] %v19605_v6  ;;  %v9736_v48 = vrot.slane %v9693_v40, 7  ;;  %9744 = vrot.lane.b32.xlu1 %v9743_v21, %s16307_s12 }
0x2221   :  { %v19609_v12 = vsel %vm6612_vm5, %v9736_v48, %v9692_v23 }
0x2222   :  { %20400 = vst [vmem:[#allocation10_spill] sm:$0xff] %v19609_v12 }
0x2291   :  { %v9745_v32 = vpop.permute.xlu1 %9744 }
0x2292   :  { %v9747_v4 = vsel %vm6307_vm4, %v19609_v12, %v9745_v32 }
0x2293   :  { %v9749_v31 = vrot.slane %v9747_v4, 1 }
0x2295   :  { %9816 = vmatmul.mubr.f32.vlgmr.msra.gmra.mrb[48].mxu0 %v9749_v31  ;;  %9887 = vmatmul.mubr.f32.vlgmr.msra.gmra.mrb[56].mxu1 %v9749_v31 }
0x2296   :  { %14904 = vmatpush1.bf16.msra.mxu0 %v19139_v45  ;;  %14936 = vmatpush1.bf16.msra.mxu1 %v19141_v1 }
0x2297   :  { %14906 = vmatprep.subr.bf16.mxu0 %v19152_v27  ;;  %14938 = vmatprep.subr.bf16.mxu1 %v19154_v54 }
0x2298   :  { %10134 = vmatprep.mubr.f32.mxu0 %v20354_v44  ;;  %10205 = vmatprep.mubr.f32.mxu1 %v20354_v44 }
0x229a   :  { %14908 = vmatpush1.bf16.msra.mxu0 %v19173_v56  ;;  %14940 = vmatpush1.bf16.msra.mxu1 %v19175_v25 }
0x229b   :  { %14910 = vmatprep.subr.bf16.mxu0 %v19185_v36  ;;  %14942 = vmatprep.subr.bf16.mxu1 %v19187_v11 }
0x229e   :  { %14912 = vmatpush1.bf16.msra.mxu0 %v19212_v55  ;;  %14944 = vmatpush1.bf16.msra.mxu1 %v19214_v47 }
0x229f   :  { %14914 = vmatprep.subr.bf16.mxu0 %v19225_v39  ;;  %14946 = vmatprep.subr.bf16.mxu1 %v19227_v30 }
0x22a2   :  { %14916 = vmatpush1.bf16.msra.mxu0 %v19249_v8  ;;  %14948 = vmatpush1.bf16.msra.mxu1 %v19251_v13 }
0x22a3   :  { %14918 = vmatprep.subr.bf16.mxu0 %v19261_v49  ;;  %14950 = vmatprep.subr.bf16.mxu1 %v19263_v53 }
0x22a6   :  { %14920 = vmatpush1.bf16.msra.mxu0 %v19285_v35  ;;  %14952 = vmatpush1.bf16.msra.mxu1 %v19287_v61 }
0x22a7   :  { %14922 = vmatprep.subr.bf16.mxu0 %v19300_v57  ;;  %14954 = vmatprep.subr.bf16.mxu1 %v19302_v50 }
0x22aa   :  { %14924 = vmatpush1.bf16.msra.mxu0 %v19321_v46  ;;  %14956 = vmatpush1.bf16.msra.mxu1 %v19323_v22 }
0x22ab   :  { %14926 = vmatprep.subr.bf16.mxu0 %v19333_v10  ;;  %14958 = vmatprep.subr.bf16.mxu1 %v19335_v26 }
0x22ae   :  { %14928 = vmatpush1.bf16.msra.mxu0 %v19359_v41  ;;  %14960 = vmatpush1.bf16.msra.mxu1 %v19361_v28 }
0x22af   :  { %14930 = vmatprep.subr.bf16.mxu0 %v19368_v18  ;;  %14962 = vmatprep.subr.bf16.mxu1 %v19370_v16 }
0x22b2   :  { %14932 = vmatpush1.bf16.msra.mxu0 %v19383_v58  ;;  %14964 = vmatpush1.bf16.msra.mxu1 %v19385_v17 }
0x22b3   :  { %14966 = vmatprep.subr.bf16.mxu0 %v19070_v62  ;;  %14998 = vmatprep.subr.bf16.mxu1 %v19072_v20 }
0x2368   :  { %v9817_v9 = vpop.f32.mrb[48].mxu0  ;;  %v9888_v43 = vpop.f32.mrb[56].mxu1 }
0x2369   :  { %v9819_v33 = vpop.f32.mrb[49].mxu0  ;;  %v9890_v29 = vpop.f32.mrb[57].mxu1  ;;  %v9909_v4 = vrot.slane %v9888_v43, 3  ;;  %v9911_v31 = vrot.slane %v9888_v43, 4 }
0x236a   :  { %v9910_v38 = vrot.slane %v9890_v29, 3  ;;  %v9912_v5 = vrot.slane %v9890_v29, 4  ;;  %v9898_v37 = vrot.slane %v9819_v33, 7  ;;  %v9896_v60 = vrot.slane %v9819_v33, 6  ;;  %v20403_v29 = vld [vmem:[#allocation23_spill] sm:$0xff] }
0x236b   :  { %v9897_v33 = vrot.slane %v9817_v9, 7 }
0x236c   :  { %v19648_v59 = vadd.f32 %v9910_v38, %v19434_v15  ;;  %v19651_v24 = vadd.f32 %v9912_v5, %v19438_v14  ;;  %v19654_v40 = vadd.f32 %v9898_v37, %v20401_v19  ;;  %v19658_v7 = vadd.f32 %v9896_v60, %v20402_v3 }
0x236d   :  { %v9917_v38 = vadd.f32 %v9909_v4, %v20403_v29  ;;  %v9895_v5 = vrot.slane %v9817_v9, 6  ;;  %v9919_v37 = vadd.f32 %v9911_v31, %v19470_v34  ;;  %v9905_v60 = vadd.f32 %v9897_v33, %v19474_v63 }
0x236e   :  { %15994 = vtanh.f32 %v19648_v59 }
0x236f   :  { %15996 = vtanh.f32 %v19651_v24  ;;  %v12592_v12 = vmul.f32 -1.442695, %v9917_v38  ;;  %v12590_v6 = vmul.f32 -1.442695, %v9905_v60 }
0x2370   :  { %15998 = vtanh.f32 %v19654_v40 }
0x2371   :  { %16000 = vtanh.f32 %v19658_v7 }
0x2372   :  { %16002 = vpow2.f32 %v12592_v12 }
0x2378   :  { %v15995_v21 = vpop.eup %15994 }
0x2379   :  { %v15997_v48 = vpop.eup %15996  ;;  %10023 = vrot.lane.b32.xlu0 %v15995_v21, %s16307_s12  ;;  %v9903_v21 = vadd.f32 %v9895_v5, %v19476_v0 }
0x237a   :  { %10025 = vrot.lane.b32.xlu1 %v15997_v48, %s16307_s12  ;;  %v15999_v23 = vpop.eup %15998  ;;  %v12594_v48 = vmul.f32 -1.442695, %v9919_v37 }
0x237b   :  { %v16001_v32 = vpop.eup %16000  ;;  %v12588_v3 = vmul.f32 -1.442695, %v9903_v21 }
0x237c   :  { %16004 = vpow2.f32 %v12594_v48 }
0x237d   :  { %9985 = vrot.lane.b32.xlu0 %v15999_v23, %s16307_s12  ;;  %16006 = vpow2.f32 %v12590_v6  ;;  %v16003_v23 = vpop.eup %16002 }
0x237e   :  { %9983 = vrot.lane.b32.xlu1 %v16001_v32, %s16307_s12  ;;  %16008 = vpow2.f32 %v12588_v3  ;;  %v9957_v32 = vadd.f32 1.0, %v16003_v23 }
0x2380   :  { %16010 = vrcp.f32 %v9957_v32 }
0x2386   :  { %v16005_v43 = vpop.eup %16004 }
0x2387   :  { %v16007_v19 = vpop.eup %16006  ;;  %v9959_v4 = vadd.f32 1.0, %v16005_v43  ;;  %v10016_v43 = vrot.slane %v19585_v2, 1 }
0x2388   :  { %v16009_v9 = vpop.eup %16008  ;;  %v9935_v29 = vadd.f32 1.0, %v16007_v19 }
0x2389   :  { %v9933_v31 = vadd.f32 1.0, %v16009_v9  ;;  %16012 = vrcp.f32 %v9959_v4 }
0x238a   :  { %16014 = vrcp.f32 %v9935_v29  ;;  %v16011_v33 = vpop.eup %16010  ;;  %v10015_v29 = vrot.slane %v19582_v42, 1 }
0x238b   :  { %16016 = vrcp.f32 %v9933_v31  ;;  %v9976_v31 = vrot.slane %v19589_v51, 7 }
0x238c   :  { %v10019_v32 = vmul.f32 %v16011_v33, %v10015_v29  ;;  %v12591_v29 = vmul.f32 -1.442695, %v19654_v40 }
0x2393   :  { %v16013_v5 = vpop.eup %16012 }
0x2394   :  { %v16015_v6 = vpop.eup %16014  ;;  %v10020_v9 = vmul.f32 %v16013_v5, %v10016_v43  ;;  %v12589_v43 = vmul.f32 -1.442695, %v19658_v7 }
0x2395   :  { %v16017_v21 = vpop.eup %16016 }
0x23eb   :  { %v10024_v38 = vpop.permute.xlu0 %10023 }
0x23ec   :  { %v10026_v12 = vpop.permute.xlu1 %10025  ;;  %v10029_v37 = vmul.f32 %v16011_v33, %v10024_v38 }
0x23ed   :  { %v10030_v60 = vmul.f32 %v16013_v5, %v10026_v12 }
0x23ee   :  { %10033 = vrot.lane.b32.xlu0 %v10029_v37, %s16307_s12  ;;  %v9975_v37 = vrot.slane %v19591_v52, 7 }
0x23ef   :  { %10035 = vrot.lane.b32.xlu1 %v10030_v60, %s16307_s12  ;;  %v9986_v3 = vpop.permute.xlu0 %9985 }
0x23f0   :  { %v9990_v48 = vmul.f32 %v16015_v6, %v9986_v3  ;;  %v9984_v19 = vpop.permute.xlu1 %9983  ;;  %v9980_v3 = vmul.f32 %v16015_v6, %v9976_v31 }
0x23f1   :  { %v9989_v23 = vmul.f32 %v16017_v21, %v9984_v19 }
0x23f2   :  { %9995 = vrot.lane.b32.xlu0 %v9990_v48, %s16307_s12  ;;  %v9979_v48 = vmul.f32 %v16017_v21, %v9975_v37  ;;  %v12593_v21 = vmul.f32 -1.442695, %v19648_v59 }
0x23f3   :  { %9993 = vrot.lane.b32.xlu1 %v9989_v23, %s16307_s12  ;;  %v12595_v23 = vmul.f32 -1.442695, %v19651_v24 }
0x2460   :  { %v10034_v4 = vpop.permute.xlu0 %10033 }
0x2461   :  { %v19678_v38 = vadd.f32 %v10034_v4, %v10019_v32  ;;  %v10036_v12 = vpop.permute.xlu1 %10035 }
0x2462   :  { %v19681_v60 = vadd.f32 %v10036_v12, %v10020_v9 }
0x2463   :  { %16018 = vtanh.f32 %v19678_v38 }
0x2464   :  { %16020 = vtanh.f32 %v19681_v60  ;;  %v9996_v42 = vpop.permute.xlu0 %9995 }
0x2465   :  { %v19685_v2 = vadd.f32 %v9996_v42, %v9980_v3  ;;  %v9994_v33 = vpop.permute.xlu1 %9993 }
0x2466   :  { %v19687_v5 = vadd.f32 %v9994_v33, %v9979_v48 }
0x2467   :  { %16022 = vtanh.f32 %v19685_v2 }
0x2468   :  { %16024 = vtanh.f32 %v19687_v5 }
0x2469   :  { %16026 = vpow2.f32 %v12593_v21 }
0x246a   :  { %16028 = vpow2.f32 %v12595_v23 }
0x246b   :  { %16030 = vpow2.f32 %v12591_v29 }
0x246c   :  { %16032 = vpow2.f32 %v12589_v43 }
0x246d   :  { %v16019_v51 = vpop.eup %16018 }
0x246e   :  { %v16021_v52 = vpop.eup %16020  ;;  %10045 = vrot.lane.b32.xlu0 %v16019_v51, %s16307_s12 }
0x246f   :  { %10047 = vrot.lane.b32.xlu1 %v16021_v52, %s16307_s12 }
0x2471   :  { %v16023_v6 = vpop.eup %16022 }
0x2472   :  { %v16025_v19 = vpop.eup %16024  ;;  %10007 = vrot.lane.b32.xlu0 %v16023_v6, %s16307_s12 }
0x2473   :  { %10005 = vrot.lane.b32.xlu1 %v16025_v19, %s16307_s12  ;;  %v16027_v32 = vpop.eup %16026 }
0x2474   :  { %v16029_v4 = vpop.eup %16028  ;;  %v9958_v9 = vadd.f32 1.0, %v16027_v32 }
0x2475   :  { %v16031_v31 = vpop.eup %16030  ;;  %v9960_v12 = vadd.f32 1.0, %v16029_v4 }
0x2476   :  { %v16033_v37 = vpop.eup %16032  ;;  %v9936_v3 = vadd.f32 1.0, %v16031_v31  ;;  %16034 = vrcp.f32 %v9958_v9 }
0x2477   :  { %16036 = vrcp.f32 %v9960_v12  ;;  %v9934_v59 = vadd.f32 1.0, %v16033_v37 }
0x2478   :  { %16038 = vrcp.f32 %v9936_v3 }
0x2479   :  { %16040 = vrcp.f32 %v9934_v59 }
0x2480   :  { %v16035_v24 = vpop.eup %16034 }
0x2481   :  { %v16037_v42 = vpop.eup %16036 }
0x2482   :  { %v16039_v52 = vpop.eup %16038 }
0x2483   :  { %v16041_v43 = vpop.eup %16040 }
0x24e0   :  { %v10046_v40 = vpop.permute.xlu0 %10045 }
0x24e1   :  { %v10051_v48 = vmul.f32 %v16035_v24, %v10046_v40  ;;  %v10048_v33 = vpop.permute.xlu1 %10047 }
0x24e2   :  { %v10052_v7 = vmul.f32 %v16037_v42, %v10048_v33 }
0x24e3   :  { %v10060_v51 = vrot.slane %v10051_v48, 3 }
0x24e4   :  { %v10061_v6 = vrot.slane %v10052_v7, 2  ;;  %v11823_v19 = vrot.slane %v10052_v7, 7  ;;  %v10008_v21 = vpop.permute.xlu0 %10007 }
0x24e5   :  { %v10012_v23 = vmul.f32 %v16039_v52, %v10008_v21  ;;  %v10006_v29 = vpop.permute.xlu1 %10005  ;;  %v20406_v21 = vld [vmem:[#allocation11_spill] sm:$0xff] }
0x24e6   :  { %v10062_v32 = vsel %vm6932_vm7, %v10061_v6, %v10060_v51  ;;  %v19701_v4 = vsel %vm7891_vm8, %v11823_v19, %v10051_v48  ;;  %v10011_v31 = vmul.f32 %v16041_v43, %v10006_v29  ;;  %v20407_v29 = vld [vmem:[#allocation13_spill] sm:$0xff] }
0x24e7   :  { %20404 = vst [vmem:[#allocation22_spill] sm:$0xff] %v19701_v4  ;;  %v10055_v9 = vrot.slane %v10012_v23, 7  ;;  %10063 = vrot.lane.b32.xlu0 %v10062_v32, %s16307_s12 }
0x24e9   :  { %v19705_v12 = vsel %vm6932_vm7, %v10055_v9, %v10011_v31 }
0x24ea   :  { %20405 = vst [vmem:[#allocation15_spill] sm:$0xff] %v19705_v12 }
0x2559   :  { %v10064_v37 = vpop.permute.xlu0 %10063 }
0x255a   :  { %v10066_v3 = vsel %vm6307_vm4, %v19705_v12, %v10064_v37 }
0x255b   :  { %v10068_v59 = vrot.slane %v10066_v3, 2 }
0x255d   :  { %10135 = vmatmul.mubr.f32.vlgmr.msra.gmra.mrb[50].mxu0 %v10068_v59  ;;  %10206 = vmatmul.mubr.f32.vlgmr.msra.gmra.mrb[58].mxu1 %v10068_v59 }
0x255e   :  { %14968 = vmatpush1.bf16.msra.mxu0 %v19139_v45  ;;  %15000 = vmatpush1.bf16.msra.mxu1 %v19141_v1 }
0x255f   :  { %14970 = vmatprep.subr.bf16.mxu0 %v19152_v27  ;;  %15002 = vmatprep.subr.bf16.mxu1 %v19154_v54 }
0x2560   :  { %10452 = vmatprep.mubr.f32.mxu0 %v20354_v44  ;;  %10523 = vmatprep.mubr.f32.mxu1 %v20354_v44 }
0x2562   :  { %14972 = vmatpush1.bf16.msra.mxu0 %v19173_v56  ;;  %15004 = vmatpush1.bf16.msra.mxu1 %v19175_v25 }
0x2563   :  { %14974 = vmatprep.subr.bf16.mxu0 %v19185_v36  ;;  %15006 = vmatprep.subr.bf16.mxu1 %v19187_v11 }
0x2566   :  { %14976 = vmatpush1.bf16.msra.mxu0 %v19212_v55  ;;  %15008 = vmatpush1.bf16.msra.mxu1 %v19214_v47 }
0x2567   :  { %14978 = vmatprep.subr.bf16.mxu0 %v19225_v39  ;;  %15010 = vmatprep.subr.bf16.mxu1 %v19227_v30 }
0x256a   :  { %14980 = vmatpush1.bf16.msra.mxu0 %v19249_v8  ;;  %15012 = vmatpush1.bf16.msra.mxu1 %v19251_v13 }
0x256b   :  { %14982 = vmatprep.subr.bf16.mxu0 %v19261_v49  ;;  %15014 = vmatprep.subr.bf16.mxu1 %v19263_v53 }
0x256e   :  { %14984 = vmatpush1.bf16.msra.mxu0 %v19285_v35  ;;  %15016 = vmatpush1.bf16.msra.mxu1 %v19287_v61 }
0x256f   :  { %14986 = vmatprep.subr.bf16.mxu0 %v19300_v57  ;;  %15018 = vmatprep.subr.bf16.mxu1 %v19302_v50 }
0x2572   :  { %14988 = vmatpush1.bf16.msra.mxu0 %v19321_v46  ;;  %15020 = vmatpush1.bf16.msra.mxu1 %v19323_v22 }
0x2573   :  { %14990 = vmatprep.subr.bf16.mxu0 %v19333_v10  ;;  %15022 = vmatprep.subr.bf16.mxu1 %v19335_v26 }
0x2576   :  { %14992 = vmatpush1.bf16.msra.mxu0 %v19359_v41  ;;  %15024 = vmatpush1.bf16.msra.mxu1 %v19361_v28 }
0x2577   :  { %14994 = vmatprep.subr.bf16.mxu0 %v19368_v18  ;;  %15026 = vmatprep.subr.bf16.mxu1 %v19370_v16 }
0x257a   :  { %14996 = vmatpush1.bf16.msra.mxu0 %v19383_v58  ;;  %15028 = vmatpush1.bf16.msra.mxu1 %v19385_v17 }
0x257b   :  { %15030 = vmatprep.subr.bf16.mxu0 %v19070_v62  ;;  %15062 = vmatprep.subr.bf16.mxu1 %v19072_v20 }
0x2630   :  { %v10136_v24 = vpop.f32.mrb[50].mxu0  ;;  %v10207_v40 = vpop.f32.mrb[58].mxu1 }
0x2631   :  { %v10138_v42 = vpop.f32.mrb[51].mxu0  ;;  %v10209_v48 = vpop.f32.mrb[59].mxu1  ;;  %v10228_v3 = vrot.slane %v10207_v40, 4  ;;  %v10230_v59 = vrot.slane %v10207_v40, 5 }
0x2632   :  { %v10229_v33 = vrot.slane %v10209_v48, 4  ;;  %v10231_v7 = vrot.slane %v10209_v48, 5  ;;  %v10217_v51 = vrot.slane %v10138_v42, 6  ;;  %v10215_v6 = vrot.slane %v10138_v42, 5  ;;  %v20408_v48 = vld [vmem:[#allocation23_spill] sm:$0xff] }
0x2633   :  { %v10216_v42 = vrot.slane %v10136_v24, 6 }
0x2634   :  { %v19744_v52 = vadd.f32 %v10229_v33, %v19434_v15  ;;  %v19747_v19 = vadd.f32 %v10231_v7, %v19438_v14  ;;  %v19750_v23 = vadd.f32 %v10217_v51, %v20406_v21  ;;  %v19754_v43 = vadd.f32 %v10215_v6, %v20407_v29 }
0x2635   :  { %v10236_v33 = vadd.f32 %v10228_v3, %v20408_v48  ;;  %v10214_v7 = vrot.slane %v10136_v24, 5  ;;  %v10238_v51 = vadd.f32 %v10230_v59, %v19470_v34  ;;  %v10224_v6 = vadd.f32 %v10216_v42, %v19474_v63 }
0x2636   :  { %16042 = vtanh.f32 %v19744_v52 }
0x2637   :  { %16044 = vtanh.f32 %v19747_v19  ;;  %v12600_v12 = vmul.f32 -1.442695, %v10236_v33  ;;  %v12598_v4 = vmul.f32 -1.442695, %v10224_v6 }
0x2638   :  { %16046 = vtanh.f32 %v19750_v23 }
0x2639   :  { %16048 = vtanh.f32 %v19754_v43 }
0x263a   :  { %16050 = vpow2.f32 %v12600_v12 }
0x2640   :  { %v16043_v32 = vpop.eup %16042 }
0x2641   :  { %v16045_v9 = vpop.eup %16044  ;;  %10342 = vrot.lane.b32.xlu1 %v16043_v32, %s16307_s12  ;;  %v10222_v32 = vadd.f32 %v10214_v7, %v19476_v0 }
0x2642   :  { %10344 = vrot.lane.b32.xlu0 %v16045_v9, %s16307_s12  ;;  %v16047_v31 = vpop.eup %16046  ;;  %v12602_v9 = vmul.f32 -1.442695, %v10238_v51 }
0x2643   :  { %v16049_v37 = vpop.eup %16048  ;;  %v12596_v29 = vmul.f32 -1.442695, %v10222_v32 }
0x2644   :  { %16052 = vpow2.f32 %v12602_v9 }
0x2645   :  { %10304 = vrot.lane.b32.xlu1 %v16047_v31, %s16307_s12  ;;  %16054 = vpow2.f32 %v12598_v4  ;;  %v16051_v31 = vpop.eup %16050 }
0x2646   :  { %10302 = vrot.lane.b32.xlu0 %v16049_v37, %s16307_s12  ;;  %16056 = vpow2.f32 %v12596_v29  ;;  %v10276_v37 = vadd.f32 1.0, %v16051_v31 }
0x2648   :  { %16058 = vrcp.f32 %v10276_v37 }
0x264e   :  { %v16053_v40 = vpop.eup %16052 }
0x264f   :  { %v16055_v21 = vpop.eup %16054  ;;  %v10278_v3 = vadd.f32 1.0, %v16053_v40  ;;  %v10335_v40 = vrot.slane %v19681_v60, 1 }
0x2650   :  { %v16057_v24 = vpop.eup %16056  ;;  %v10254_v48 = vadd.f32 1.0, %v16055_v21 }
0x2651   :  { %v10252_v59 = vadd.f32 1.0, %v16057_v24  ;;  %16060 = vrcp.f32 %v10278_v3 }
0x2652   :  { %16062 = vrcp.f32 %v10254_v48  ;;  %v16059_v42 = vpop.eup %16058  ;;  %v10334_v48 = vrot.slane %v19678_v38, 1 }
0x2653   :  { %16064 = vrcp.f32 %v10252_v59  ;;  %v10295_v59 = vrot.slane %v19685_v2, 7 }
0x2654   :  { %v10338_v37 = vmul.f32 %v16059_v42, %v10334_v48  ;;  %v12599_v48 = vmul.f32 -1.442695, %v19750_v23 }
0x265b   :  { %v16061_v7 = vpop.eup %16060 }
0x265c   :  { %v16063_v4 = vpop.eup %16062  ;;  %v10339_v24 = vmul.f32 %v16061_v7, %v10335_v40  ;;  %v12597_v40 = vmul.f32 -1.442695, %v19754_v43 }
0x265d   :  { %v16065_v32 = vpop.eup %16064 }
0x26b3   :  { %v10343_v33 = vpop.permute.xlu1 %10342 }
0x26b4   :  { %v10345_v12 = vpop.permute.xlu0 %10344  ;;  %v10348_v51 = vmul.f32 %v16059_v42, %v10343_v33 }
0x26b5   :  { %v10349_v6 = vmul.f32 %v16061_v7, %v10345_v12 }
0x26b6   :  { %10352 = vrot.lane.b32.xlu1 %v10348_v51, %s16307_s12  ;;  %v10294_v51 = vrot.slane %v19687_v5, 7 }
0x26b7   :  { %10354 = vrot.lane.b32.xlu0 %v10349_v6, %s16307_s12  ;;  %v10305_v29 = vpop.permute.xlu1 %10304 }
0x26b8   :  { %v10309_v9 = vmul.f32 %v16063_v4, %v10305_v29  ;;  %v10303_v21 = vpop.permute.xlu0 %10302  ;;  %v10299_v29 = vmul.f32 %v16063_v4, %v10295_v59 }
0x26b9   :  { %v10308_v31 = vmul.f32 %v16065_v32, %v10303_v21 }
0x26ba   :  { %10314 = vrot.lane.b32.xlu1 %v10309_v9, %s16307_s12  ;;  %v10298_v9 = vmul.f32 %v16065_v32, %v10294_v51  ;;  %v12601_v32 = vmul.f32 -1.442695, %v19744_v52 }
0x26bb   :  { %10312 = vrot.lane.b32.xlu0 %v10308_v31, %s16307_s12  ;;  %v12603_v31 = vmul.f32 -1.442695, %v19747_v19 }
0x2728   :  { %v10353_v3 = vpop.permute.xlu1 %10352 }
0x2729   :  { %v19774_v33 = vadd.f32 %v10353_v3, %v10338_v37  ;;  %v10355_v12 = vpop.permute.xlu0 %10354 }
0x272a   :  { %v19777_v6 = vadd.f32 %v10355_v12, %v10339_v24 }
0x272b   :  { %16066 = vtanh.f32 %v19774_v33 }
0x272c   :  { %16068 = vtanh.f32 %v19777_v6  ;;  %v10315_v38 = vpop.permute.xlu1 %10314 }
0x272d   :  { %v19781_v60 = vadd.f32 %v10315_v38, %v10299_v29  ;;  %v10313_v42 = vpop.permute.xlu0 %10312 }
0x272e   :  { %v19783_v7 = vadd.f32 %v10313_v42, %v10298_v9 }
0x272f   :  { %16070 = vtanh.f32 %v19781_v60 }
0x2730   :  { %16072 = vtanh.f32 %v19783_v7 }
0x2731   :  { %16074 = vpow2.f32 %v12601_v32 }
0x2732   :  { %16076 = vpow2.f32 %v12603_v31 }
0x2733   :  { %16078 = vpow2.f32 %v12599_v48 }
0x2734   :  { %16080 = vpow2.f32 %v12597_v40 }
0x2735   :  { %v16067_v2 = vpop.eup %16066 }
0x2736   :  { %v16069_v5 = vpop.eup %16068  ;;  %10364 = vrot.lane.b32.xlu1 %v16067_v2, %s16307_s12 }
0x2737   :  { %10366 = vrot.lane.b32.xlu0 %v16069_v5, %s16307_s12 }
0x2739   :  { %v16071_v4 = vpop.eup %16070 }
0x273a   :  { %v16073_v21 = vpop.eup %16072  ;;  %10326 = vrot.lane.b32.xlu1 %v16071_v4, %s16307_s12 }
0x273b   :  { %10324 = vrot.lane.b32.xlu0 %v16073_v21, %s16307_s12  ;;  %v16075_v37 = vpop.eup %16074 }
0x273c   :  { %v16077_v3 = vpop.eup %16076  ;;  %v10277_v24 = vadd.f32 1.0, %v16075_v37 }
0x273d   :  { %v16079_v59 = vpop.eup %16078  ;;  %v10279_v12 = vadd.f32 1.0, %v16077_v3 }
0x273e   :  { %v16081_v51 = vpop.eup %16080  ;;  %v10255_v29 = vadd.f32 1.0, %v16079_v59  ;;  %16082 = vrcp.f32 %v10277_v24 }
0x273f   :  { %16084 = vrcp.f32 %v10279_v12  ;;  %v10253_v52 = vadd.f32 1.0, %v16081_v51 }
0x2740   :  { %16086 = vrcp.f32 %v10255_v29 }
0x2741   :  { %16088 = vrcp.f32 %v10253_v52 }
0x2748   :  { %v16083_v19 = vpop.eup %16082 }
0x2749   :  { %v16085_v38 = vpop.eup %16084 }
0x274a   :  { %v16087_v5 = vpop.eup %16086 }
0x274b   :  { %v16089_v40 = vpop.eup %16088 }
0x27a8   :  { %v10365_v23 = vpop.permute.xlu1 %10364 }
0x27a9   :  { %v10370_v9 = vmul.f32 %v16083_v19, %v10365_v23  ;;  %v10367_v42 = vpop.permute.xlu0 %10366 }
0x27aa   :  { %v10371_v43 = vmul.f32 %v16085_v38, %v10367_v42 }
0x27ab   :  { %v10379_v2 = vrot.slane %v10370_v9, 1 }
0x27ac   :  { %v11789_v4 = vrot.slane %v10371_v43, 7  ;;  %v10327_v21 = vpop.permute.xlu1 %10326 }
0x27ad   :  { %v10331_v32 = vmul.f32 %v16087_v5, %v10327_v21  ;;  %v10325_v31 = vpop.permute.xlu0 %10324  ;;  %v10380_v48 = vsel %vm7252_vm9, %v10371_v43, %v10379_v2  ;;  %v20411_v21 = vld [vmem:[#allocation11_spill] sm:$0xff] }
0x27ae   :  { %10381 = vrot.lane.b32.xlu1 %v10380_v48, %s16307_s12  ;;  %v19798_v37 = vsel %vm7571_vm10, %v11789_v4, %v10370_v9  ;;  %v10330_v24 = vmul.f32 %v16089_v40, %v10325_v31  ;;  %v20412_v31 = vld [vmem:[#allocation13_spill] sm:$0xff] }
0x27af   :  { %20409 = vst [vmem:[#allocation20_spill] sm:$0xff] %v19798_v37  ;;  %v10374_v3 = vrot.slane %v10331_v32, 7 }
0x27b1   :  { %v19801_v59 = vsel %vm7252_vm9, %v10374_v3, %v10330_v24 }
0x27b2   :  { %20410 = vst [vmem:[#allocation18_spill] sm:$0xff] %v19801_v59 }
0x2820   :  { %v10382_v12 = vpop.permute.xlu1 %10381 }
0x2821   :  { %v10384_v51 = vsel %vm6307_vm4, %v19801_v59, %v10382_v12 }
0x2822   :  { %v10386_v29 = vrot.slane %v10384_v51, 3 }
0x2824   :  { %10453 = vmatmul.mubr.f32.vlgmr.msra.gmra.mrb[52].mxu0 %v10386_v29  ;;  %10524 = vmatmul.mubr.f32.vlgmr.msra.gmra.mrb[60].mxu1 %v10386_v29 }
0x2825   :  { %15032 = vmatpush1.bf16.msra.mxu0 %v19139_v45  ;;  %15064 = vmatpush1.bf16.msra.mxu1 %v19141_v1 }
0x2826   :  { %15034 = vmatprep.subr.bf16.mxu0 %v19152_v27  ;;  %15066 = vmatprep.subr.bf16.mxu1 %v19154_v54 }
0x2827   :  { %10771 = vmatprep.mubr.f32.mxu0 %v20354_v44  ;;  %10842 = vmatprep.mubr.f32.mxu1 %v20354_v44 }
0x2829   :  { %15036 = vmatpush1.bf16.msra.mxu0 %v19173_v56  ;;  %15068 = vmatpush1.bf16.msra.mxu1 %v19175_v25 }
0x282a   :  { %15038 = vmatprep.subr.bf16.mxu0 %v19185_v36  ;;  %15070 = vmatprep.subr.bf16.mxu1 %v19187_v11 }
0x282d   :  { %15040 = vmatpush1.bf16.msra.mxu0 %v19212_v55  ;;  %15072 = vmatpush1.bf16.msra.mxu1 %v19214_v47 }
0x282e   :  { %15042 = vmatprep.subr.bf16.mxu0 %v19225_v39  ;;  %15074 = vmatprep.subr.bf16.mxu1 %v19227_v30 }
0x2831   :  { %15044 = vmatpush1.bf16.msra.mxu0 %v19249_v8  ;;  %15076 = vmatpush1.bf16.msra.mxu1 %v19251_v13 }
0x2832   :  { %15046 = vmatprep.subr.bf16.mxu0 %v19261_v49  ;;  %15078 = vmatprep.subr.bf16.mxu1 %v19263_v53 }
0x2835   :  { %15048 = vmatpush1.bf16.msra.mxu0 %v19285_v35  ;;  %15080 = vmatpush1.bf16.msra.mxu1 %v19287_v61 }
0x2836   :  { %15050 = vmatprep.subr.bf16.mxu0 %v19300_v57  ;;  %15082 = vmatprep.subr.bf16.mxu1 %v19302_v50 }
0x2839   :  { %15052 = vmatpush1.bf16.msra.mxu0 %v19321_v46  ;;  %15084 = vmatpush1.bf16.msra.mxu1 %v19323_v22 }
0x283a   :  { %15054 = vmatprep.subr.bf16.mxu0 %v19333_v10  ;;  %15086 = vmatprep.subr.bf16.mxu1 %v19335_v26 }
0x283d   :  { %15056 = vmatpush1.bf16.msra.mxu0 %v19359_v41  ;;  %15088 = vmatpush1.bf16.msra.mxu1 %v19361_v28 }
0x283e   :  { %15058 = vmatprep.subr.bf16.mxu0 %v19368_v18  ;;  %15090 = vmatprep.subr.bf16.mxu1 %v19370_v16 }
0x2841   :  { %15060 = vmatpush1.bf16.msra.mxu0 %v19383_v58  ;;  %15092 = vmatpush1.bf16.msra.mxu1 %v19385_v17 }
0x2842   :  { %15094 = vmatprep.subr.bf16.mxu0 %v19070_v62  ;;  %15126 = vmatprep.subr.bf16.mxu1 %v19072_v20 }
0x28f7   :  { %v10454_v52 = vpop.f32.mrb[52].mxu0  ;;  %v10525_v19 = vpop.f32.mrb[60].mxu1 }
0x28f8   :  { %v10456_v23 = vpop.f32.mrb[53].mxu0  ;;  %v10527_v38 = vpop.f32.mrb[61].mxu1  ;;  %v10546_v51 = vrot.slane %v10525_v19, 5  ;;  %v10548_v29 = vrot.slane %v10525_v19, 6 }
0x28f9   :  { %v10547_v9 = vrot.slane %v10527_v38, 5  ;;  %v10549_v42 = vrot.slane %v10527_v38, 6  ;;  %v10535_v43 = vrot.slane %v10456_v23, 5  ;;  %v10533_v5 = vrot.slane %v10456_v23, 4  ;;  %v20413_v38 = vld [vmem:[#allocation23_spill] sm:$0xff] }
0x28fa   :  { %v10534_v23 = vrot.slane %v10454_v52, 5 }
0x28fb   :  { %v19840_v2 = vadd.f32 %v10547_v9, %v19434_v15  ;;  %v19843_v4 = vadd.f32 %v10549_v42, %v19438_v14  ;;  %v19846_v32 = vadd.f32 %v10535_v43, %v20411_v21  ;;  %v19850_v48 = vadd.f32 %v10533_v5, %v20412_v31 }
0x28fc   :  { %v10554_v9 = vadd.f32 %v10546_v51, %v20413_v38  ;;  %v10532_v42 = vrot.slane %v10454_v52, 4  ;;  %v10556_v43 = vadd.f32 %v10548_v29, %v19470_v34  ;;  %v10542_v5 = vadd.f32 %v10534_v23, %v19474_v63 }
0x28fd   :  { %16090 = vtanh.f32 %v19840_v2 }
0x28fe   :  { %16092 = vtanh.f32 %v19843_v4  ;;  %v12608_v59 = vmul.f32 -1.442695, %v10554_v9  ;;  %v12606_v37 = vmul.f32 -1.442695, %v10542_v5 }
0x28ff   :  { %16094 = vtanh.f32 %v19846_v32 }
0x2900   :  { %16096 = vtanh.f32 %v19850_v48 }
0x2901   :  { %16098 = vpow2.f32 %v12608_v59 }
0x2907   :  { %v16091_v40 = vpop.eup %16090 }
0x2908   :  { %v16093_v3 = vpop.eup %16092  ;;  %10660 = vrot.lane.b32.xlu0 %v16091_v40, %s16307_s12  ;;  %v10540_v40 = vadd.f32 %v10532_v42, %v19476_v0 }
0x2909   :  { %10662 = vrot.lane.b32.xlu1 %v16093_v3, %s16307_s12  ;;  %v16095_v24 = vpop.eup %16094  ;;  %v12610_v3 = vmul.f32 -1.442695, %v10556_v43 }
0x290a   :  { %v16097_v12 = vpop.eup %16096  ;;  %v12604_v31 = vmul.f32 -1.442695, %v10540_v40 }
0x290b   :  { %16100 = vpow2.f32 %v12610_v3 }
0x290c   :  { %10622 = vrot.lane.b32.xlu0 %v16095_v24, %s16307_s12  ;;  %16102 = vpow2.f32 %v12606_v37  ;;  %v16099_v24 = vpop.eup %16098 }
0x290d   :  { %10620 = vrot.lane.b32.xlu1 %v16097_v12, %s16307_s12  ;;  %16104 = vpow2.f32 %v12604_v31  ;;  %v10594_v12 = vadd.f32 1.0, %v16099_v24 }
0x290f   :  { %16106 = vrcp.f32 %v10594_v12 }
0x2915   :  { %v16101_v19 = vpop.eup %16100 }
0x2916   :  { %v16103_v21 = vpop.eup %16102  ;;  %v10596_v51 = vadd.f32 1.0, %v16101_v19  ;;  %v10653_v19 = vrot.slane %v19777_v6, 1 }
0x2917   :  { %v16105_v52 = vpop.eup %16104  ;;  %v10572_v38 = vadd.f32 1.0, %v16103_v21 }
0x2918   :  { %v10570_v29 = vadd.f32 1.0, %v16105_v52  ;;  %16108 = vrcp.f32 %v10596_v51 }
0x2919   :  { %16110 = vrcp.f32 %v10572_v38  ;;  %v16107_v23 = vpop.eup %16106  ;;  %v10652_v38 = vrot.slane %v19774_v33, 1 }
0x291a   :  { %16112 = vrcp.f32 %v10570_v29  ;;  %v10613_v29 = vrot.slane %v19781_v60, 7 }
0x291b   :  { %v10656_v12 = vmul.f32 %v16107_v23, %v10652_v38  ;;  %v12607_v38 = vmul.f32 -1.442695, %v19846_v32 }
0x2922   :  { %v16109_v42 = vpop.eup %16108 }
0x2923   :  { %v16111_v37 = vpop.eup %16110  ;;  %v10657_v52 = vmul.f32 %v16109_v42, %v10653_v19  ;;  %v12605_v19 = vmul.f32 -1.442695, %v19850_v48 }
0x2924   :  { %v16113_v40 = vpop.eup %16112 }
0x297a   :  { %v10661_v9 = vpop.permute.xlu0 %10660 }
0x297b   :  { %v10663_v59 = vpop.permute.xlu1 %10662  ;;  %v10666_v43 = vmul.f32 %v16107_v23, %v10661_v9 }
0x297c   :  { %v10667_v5 = vmul.f32 %v16109_v42, %v10663_v59 }
0x297d   :  { %10670 = vrot.lane.b32.xlu0 %v10666_v43, %s16307_s12  ;;  %v10612_v43 = vrot.slane %v19783_v7, 7 }
0x297e   :  { %10672 = vrot.lane.b32.xlu1 %v10667_v5, %s16307_s12  ;;  %v10623_v31 = vpop.permute.xlu0 %10622 }
0x297f   :  { %v10627_v3 = vmul.f32 %v16111_v37, %v10623_v31  ;;  %v10621_v21 = vpop.permute.xlu1 %10620  ;;  %v10617_v31 = vmul.f32 %v16111_v37, %v10613_v29 }
0x2980   :  { %v10626_v24 = vmul.f32 %v16113_v40, %v10621_v21 }
0x2981   :  { %10632 = vrot.lane.b32.xlu0 %v10627_v3, %s16307_s12  ;;  %v10616_v3 = vmul.f32 %v16113_v40, %v10612_v43  ;;  %v12609_v40 = vmul.f32 -1.442695, %v19840_v2 }
0x2982   :  { %10630 = vrot.lane.b32.xlu1 %v10626_v24, %s16307_s12  ;;  %v12611_v24 = vmul.f32 -1.442695, %v19843_v4 }
0x29ef   :  { %v10671_v51 = vpop.permute.xlu0 %10670 }
0x29f0   :  { %v19870_v9 = vadd.f32 %v10671_v51, %v10656_v12  ;;  %v10673_v59 = vpop.permute.xlu1 %10672 }
0x29f1   :  { %v19873_v5 = vadd.f32 %v10673_v59, %v10657_v52 }
0x29f2   :  { %16114 = vtanh.f32 %v19870_v9 }
0x29f3   :  { %16116 = vtanh.f32 %v19873_v5  ;;  %v10633_v33 = vpop.permute.xlu0 %10632 }
0x29f4   :  { %v19877_v6 = vadd.f32 %v10633_v33, %v10617_v31  ;;  %v10631_v23 = vpop.permute.xlu1 %10630 }
0x29f5   :  { %v19879_v42 = vadd.f32 %v10631_v23, %v10616_v3 }
0x29f6   :  { %16118 = vtanh.f32 %v19877_v6 }
0x29f7   :  { %16120 = vtanh.f32 %v19879_v42 }
0x29f8   :  { %16122 = vpow2.f32 %v12609_v40 }
0x29f9   :  { %16124 = vpow2.f32 %v12611_v24 }
0x29fa   :  { %16126 = vpow2.f32 %v12607_v38 }
0x29fb   :  { %16128 = vpow2.f32 %v12605_v19 }
0x29fc   :  { %v16115_v60 = vpop.eup %16114 }
0x29fd   :  { %v16117_v7 = vpop.eup %16116  ;;  %10682 = vrot.lane.b32.xlu0 %v16115_v60, %s16307_s12 }
0x29fe   :  { %10684 = vrot.lane.b32.xlu1 %v16117_v7, %s16307_s12 }
0x2a00   :  { %v16119_v37 = vpop.eup %16118 }
0x2a01   :  { %v16121_v21 = vpop.eup %16120  ;;  %10644 = vrot.lane.b32.xlu0 %v16119_v37, %s16307_s12 }
0x2a02   :  { %10642 = vrot.lane.b32.xlu1 %v16121_v21, %s16307_s12  ;;  %v16123_v12 = vpop.eup %16122 }
0x2a03   :  { %v16125_v51 = vpop.eup %16124  ;;  %v10595_v52 = vadd.f32 1.0, %v16123_v12 }
0x2a04   :  { %v16127_v29 = vpop.eup %16126  ;;  %v10597_v59 = vadd.f32 1.0, %v16125_v51 }
0x2a05   :  { %v16129_v43 = vpop.eup %16128  ;;  %v10573_v31 = vadd.f32 1.0, %v16127_v29  ;;  %16130 = vrcp.f32 %v10595_v52 }
0x2a06   :  { %16132 = vrcp.f32 %v10597_v59  ;;  %v10571_v2 = vadd.f32 1.0, %v16129_v43 }
0x2a07   :  { %16134 = vrcp.f32 %v10573_v31 }
0x2a08   :  { %16136 = vrcp.f32 %v10571_v2 }
0x2a0f   :  { %v16131_v4 = vpop.eup %16130 }
0x2a10   :  { %v16133_v33 = vpop.eup %16132 }
0x2a11   :  { %v16135_v7 = vpop.eup %16134 }
0x2a12   :  { %v16137_v19 = vpop.eup %16136 }
0x2a6f   :  { %v10683_v32 = vpop.permute.xlu0 %10682 }
0x2a70   :  { %v10688_v3 = vmul.f32 %v16131_v4, %v10683_v32  ;;  %v10685_v23 = vpop.permute.xlu1 %10684 }
0x2a71   :  { %v10689_v48 = vmul.f32 %v16133_v33, %v10685_v23 }
0x2a72   :  { %v10697_v60 = vrot.slane %v10688_v3, 7 }
0x2a73   :  { %v10698_v37 = vrot.slane %v10689_v48, 6  ;;  %v11747_v21 = vrot.slane %v10689_v48, 7  ;;  %v10645_v40 = vpop.permute.xlu0 %10644 }
0x2a74   :  { %v10649_v24 = vmul.f32 %v16135_v7, %v10645_v40  ;;  %v10643_v38 = vpop.permute.xlu1 %10642  ;;  %v20416_v40 = vld [vmem:[#allocation11_spill] sm:$0xff] }
0x2a75   :  { %v10699_v12 = vsel %vm7571_vm10, %v10698_v37, %v10697_v60  ;;  %v19893_v51 = vsel %vm7252_vm9, %v11747_v21, %v10688_v3  ;;  %v10648_v29 = vmul.f32 %v16137_v19, %v10643_v38 }
0x2a76   :  { %20414 = vst [vmem:[#allocation24_spill] sm:$0xff] %v19893_v51  ;;  %v10692_v52 = vrot.slane %v10649_v24, 7  ;;  %10700 = vrot.lane.b32.xlu0 %v10699_v12, %s16307_s12 }
0x2a78   :  { %v19897_v59 = vsel %vm7571_vm10, %v10692_v52, %v10648_v29 }
0x2a79   :  { %20415 = vst [vmem:[#allocation16_spill] sm:$0xff] %v19897_v59 }
0x2ae8   :  { %v10701_v43 = vpop.permute.xlu0 %10700 }
0x2ae9   :  { %v10703_v31 = vsel %vm6307_vm4, %v19897_v59, %v10701_v43 }
0x2aea   :  { %v10705_v2 = vrot.slane %v10703_v31, 4 }
0x2aec   :  { %10772 = vmatmul.mubr.f32.vlgmr.msra.gmra.mrb[54].mxu0 %v10705_v2  ;;  %10843 = vmatmul.mubr.f32.vlgmr.msra.gmra.mrb[62].mxu1 %v10705_v2  ;;  %v20418_v2 = vld [vmem:[#allocation23_spill] sm:$0xff] }
0x2aed   :  { %15096 = vmatpush1.bf16.msra.mxu0 %v19139_v45  ;;  %15128 = vmatpush1.bf16.msra.mxu1 %v19141_v1 }
0x2aee   :  { %15098 = vmatprep.subr.bf16.mxu0 %v19152_v27  ;;  %15130 = vmatprep.subr.bf16.mxu1 %v19154_v54 }
0x2aef   :  { %11090 = vmatprep.mubr.f32.mxu0 %v20354_v44  ;;  %11161 = vmatprep.mubr.f32.mxu1 %v20354_v44 }
0x2af1   :  { %15100 = vmatpush1.bf16.msra.mxu0 %v19173_v56  ;;  %15132 = vmatpush1.bf16.msra.mxu1 %v19175_v25 }
0x2af2   :  { %15102 = vmatprep.subr.bf16.mxu0 %v19185_v36  ;;  %15134 = vmatprep.subr.bf16.mxu1 %v19187_v11 }
0x2af5   :  { %15104 = vmatpush1.bf16.msra.mxu0 %v19212_v55  ;;  %15136 = vmatpush1.bf16.msra.mxu1 %v19214_v47 }
0x2af6   :  { %15106 = vmatprep.subr.bf16.mxu0 %v19225_v39  ;;  %15138 = vmatprep.subr.bf16.mxu1 %v19227_v30 }
0x2af9   :  { %15108 = vmatpush1.bf16.msra.mxu0 %v19249_v8  ;;  %15140 = vmatpush1.bf16.msra.mxu1 %v19251_v13 }
0x2afa   :  { %15110 = vmatprep.subr.bf16.mxu0 %v19261_v49  ;;  %15142 = vmatprep.subr.bf16.mxu1 %v19263_v53 }
0x2afd   :  { %15112 = vmatpush1.bf16.msra.mxu0 %v19285_v35  ;;  %15144 = vmatpush1.bf16.msra.mxu1 %v19287_v61 }
0x2afe   :  { %15114 = vmatprep.subr.bf16.mxu0 %v19300_v57  ;;  %15146 = vmatprep.subr.bf16.mxu1 %v19302_v50 }
0x2b01   :  { %15116 = vmatpush1.bf16.msra.mxu0 %v19321_v46  ;;  %15148 = vmatpush1.bf16.msra.mxu1 %v19323_v22 }
0x2b02   :  { %15118 = vmatprep.subr.bf16.mxu0 %v19333_v10  ;;  %15150 = vmatprep.subr.bf16.mxu1 %v19335_v26 }
0x2b05   :  { %15120 = vmatpush1.bf16.msra.mxu0 %v19359_v41  ;;  %15152 = vmatpush1.bf16.msra.mxu1 %v19361_v28 }
0x2b06   :  { %15122 = vmatprep.subr.bf16.mxu0 %v19368_v18  ;;  %15154 = vmatprep.subr.bf16.mxu1 %v19370_v16 }
0x2b09   :  { %15124 = vmatpush1.bf16.msra.mxu0 %v19383_v58  ;;  %15156 = vmatpush1.bf16.msra.mxu1 %v19385_v17 }
0x2b0a   :  { %15158 = vmatprep.subr.bf16.mxu0 %v19070_v62  ;;  %15190 = vmatprep.subr.bf16.mxu1 %v19072_v20  ;;  %v20417_v62 = vld [vmem:[#allocation13_spill] sm:$0xff] }
0x2bbf   :  { %v10773_v4 = vpop.f32.mrb[54].mxu0  ;;  %v10844_v32 = vpop.f32.mrb[62].mxu1 }
0x2bc0   :  { %v10775_v33 = vpop.f32.mrb[55].mxu0  ;;  %v10846_v3 = vpop.f32.mrb[63].mxu1  ;;  %v10865_v29 = vrot.slane %v10844_v32, 6  ;;  %v10867_v43 = vrot.slane %v10844_v32, 7  ;;  %v10853_v31 = vrot.slane %v10773_v4, 4 }
0x2bc1   :  { %v10866_v23 = vrot.slane %v10846_v3, 6  ;;  %v10868_v48 = vrot.slane %v10846_v3, 7  ;;  %v10854_v60 = vrot.slane %v10775_v33, 4  ;;  %v10852_v37 = vrot.slane %v10775_v33, 3 }
0x2bc2   :  { %v10873_v33 = vadd.f32 %v10865_v29, %v20418_v2  ;;  %v10851_v3 = vrot.slane %v10773_v4, 3 }
0x2bc3   :  { %v19936_v7 = vadd.f32 %v10866_v23, %v19434_v15  ;;  %v19939_v21 = vadd.f32 %v10868_v48, %v19438_v14  ;;  %v19942_v24 = vadd.f32 %v10854_v60, %v20416_v40  ;;  %v19946_v20 = vadd.f32 %v10852_v37, %v20417_v62 }
0x2bc4   :  { %v10875_v23 = vadd.f32 %v10867_v43, %v19470_v34  ;;  %v10861_v48 = vadd.f32 %v10853_v31, %v19474_v63  ;;  %v12616_v60 = vmul.f32 -1.442695, %v10873_v33  ;;  %v10859_v37 = vadd.f32 %v10851_v3, %v19476_v0 }
0x2bc5   :  { %16138 = vtanh.f32 %v19936_v7 }
0x2bc6   :  { %16140 = vtanh.f32 %v19939_v21  ;;  %v12612_v59 = vmul.f32 -1.442695, %v10859_v37 }
0x2bc7   :  { %16142 = vtanh.f32 %v19942_v24 }
0x2bc8   :  { %16144 = vtanh.f32 %v19946_v20 }
0x2bc9   :  { %16146 = vpow2.f32 %v12616_v60 }
0x2bcf   :  { %v16139_v38 = vpop.eup %16138 }
0x2bd0   :  { %v16141_v19 = vpop.eup %16140  ;;  %10979 = vrot.lane.b32.xlu1 %v16139_v38, %s16307_s12  ;;  %v12618_v38 = vmul.f32 -1.442695, %v10875_v23 }
0x2bd1   :  { %10981 = vrot.lane.b32.xlu0 %v16141_v19, %s16307_s12  ;;  %v16143_v12 = vpop.eup %16142  ;;  %v12614_v19 = vmul.f32 -1.442695, %v10861_v48 }
0x2bd2   :  { %v16145_v52 = vpop.eup %16144  ;;  %16148 = vpow2.f32 %v12618_v38 }
0x2bd3   :  { %16150 = vpow2.f32 %v12614_v19 }
0x2bd4   :  { %10941 = vrot.lane.b32.xlu1 %v16143_v12, %s16307_s12  ;;  %16152 = vpow2.f32 %v12612_v59  ;;  %v16147_v12 = vpop.eup %16146 }
0x2bd5   :  { %10939 = vrot.lane.b32.xlu0 %v16145_v52, %s16307_s12  ;;  %v10913_v52 = vadd.f32 1.0, %v16147_v12 }
0x2bd7   :  { %16154 = vrcp.f32 %v10913_v52 }
0x2bdc   :  { %v16149_v32 = vpop.eup %16148 }
0x2bdd   :  { %v16151_v51 = vpop.eup %16150  ;;  %v10915_v29 = vadd.f32 1.0, %v16149_v32  ;;  %v10972_v32 = vrot.slane %v19873_v5, 1 }
0x2bde   :  { %v16153_v4 = vpop.eup %16152  ;;  %v10891_v2 = vadd.f32 1.0, %v16151_v51 }
0x2bdf   :  { %v10889_v43 = vadd.f32 1.0, %v16153_v4  ;;  %16156 = vrcp.f32 %v10915_v29 }
0x2be0   :  { %16158 = vrcp.f32 %v10891_v2  ;;  %v10971_v2 = vrot.slane %v19870_v9, 1 }
0x2be1   :  { %16160 = vrcp.f32 %v10889_v43  ;;  %v16155_v31 = vpop.eup %16154  ;;  %v10932_v43 = vrot.slane %v19877_v6, 7 }
0x2be2   :  { %v10975_v52 = vmul.f32 %v16155_v31, %v10971_v2  ;;  %v12615_v2 = vmul.f32 -1.442695, %v19942_v24 }
0x2be9   :  { %v16157_v3 = vpop.eup %16156 }
0x2bea   :  { %v16159_v59 = vpop.eup %16158  ;;  %v10976_v4 = vmul.f32 %v16157_v3, %v10972_v32  ;;  %v12613_v32 = vmul.f32 -1.442695, %v19946_v20 }
0x2beb   :  { %v16161_v38 = vpop.eup %16160 }
0x2c42   :  { %v10980_v33 = vpop.permute.xlu1 %10979 }
0x2c43   :  { %v10982_v23 = vpop.permute.xlu0 %10981  ;;  %v10985_v48 = vmul.f32 %v16155_v31, %v10980_v33 }
0x2c44   :  { %v10986_v60 = vmul.f32 %v16157_v3, %v10982_v23 }
0x2c45   :  { %10989 = vrot.lane.b32.xlu1 %v10985_v48, %s16307_s12  ;;  %v10931_v48 = vrot.slane %v19879_v42, 7 }
0x2c46   :  { %10991 = vrot.lane.b32.xlu0 %v10986_v60, %s16307_s12  ;;  %v10942_v37 = vpop.permute.xlu1 %10941 }
0x2c47   :  { %v10946_v19 = vmul.f32 %v16159_v59, %v10942_v37  ;;  %v10940_v51 = vpop.permute.xlu0 %10939  ;;  %v10936_v37 = vmul.f32 %v16159_v59, %v10932_v43 }
0x2c48   :  { %v10945_v12 = vmul.f32 %v16161_v38, %v10940_v51 }
0x2c49   :  { %10951 = vrot.lane.b32.xlu1 %v10946_v19, %s16307_s12  ;;  %v10935_v19 = vmul.f32 %v16161_v38, %v10931_v48  ;;  %v12617_v38 = vmul.f32 -1.442695, %v19936_v7 }
0x2c4a   :  { %10949 = vrot.lane.b32.xlu0 %v10945_v12, %s16307_s12  ;;  %v12619_v12 = vmul.f32 -1.442695, %v19939_v21 }
0x2cb7   :  { %v10990_v29 = vpop.permute.xlu1 %10989 }
0x2cb8   :  { %v19966_v33 = vadd.f32 %v10990_v29, %v10975_v52  ;;  %v10992_v23 = vpop.permute.xlu0 %10991 }
0x2cb9   :  { %v19969_v60 = vadd.f32 %v10992_v23, %v10976_v4 }
0x2cba   :  { %16162 = vtanh.f32 %v19966_v33 }
0x2cbb   :  { %16164 = vtanh.f32 %v19969_v60  ;;  %v10952_v9 = vpop.permute.xlu1 %10951 }
0x2cbc   :  { %v19973_v5 = vadd.f32 %v10952_v9, %v10936_v37  ;;  %v10950_v31 = vpop.permute.xlu0 %10949 }
0x2cbd   :  { %v19975_v3 = vadd.f32 %v10950_v31, %v10935_v19 }
0x2cbe   :  { %16166 = vtanh.f32 %v19973_v5 }
0x2cbf   :  { %16168 = vtanh.f32 %v19975_v3 }
0x2cc0   :  { %16170 = vpow2.f32 %v12617_v38 }
0x2cc1   :  { %16172 = vpow2.f32 %v12619_v12 }
0x2cc2   :  { %16174 = vpow2.f32 %v12615_v2 }
0x2cc3   :  { %16176 = vpow2.f32 %v12613_v32 }
0x2cc4   :  { %v16163_v6 = vpop.eup %16162 }
0x2cc5   :  { %v16165_v42 = vpop.eup %16164  ;;  %11001 = vrot.lane.b32.xlu1 %v16163_v6, %s16307_s12 }
0x2cc6   :  { %11003 = vrot.lane.b32.xlu0 %v16165_v42, %s16307_s12 }
0x2cc8   :  { %v16167_v59 = vpop.eup %16166 }
0x2cc9   :  { %v16169_v51 = vpop.eup %16168  ;;  %10963 = vrot.lane.b32.xlu1 %v16167_v59, %s16307_s12 }
0x2cca   :  { %10961 = vrot.lane.b32.xlu0 %v16169_v51, %s16307_s12  ;;  %v16171_v52 = vpop.eup %16170 }
0x2ccb   :  { %v16173_v29 = vpop.eup %16172  ;;  %v10914_v4 = vadd.f32 1.0, %v16171_v52 }
0x2ccc   :  { %v16175_v43 = vpop.eup %16174  ;;  %v10916_v23 = vadd.f32 1.0, %v16173_v29 }
0x2ccd   :  { %v16177_v48 = vpop.eup %16176  ;;  %v10892_v37 = vadd.f32 1.0, %v16175_v43  ;;  %16178 = vrcp.f32 %v10914_v4 }
0x2cce   :  { %16180 = vrcp.f32 %v10916_v23  ;;  %v10890_v7 = vadd.f32 1.0, %v16177_v48 }
0x2ccf   :  { %16182 = vrcp.f32 %v10892_v37 }
0x2cd0   :  { %16184 = vrcp.f32 %v10890_v7 }
0x2cd7   :  { %v16179_v21 = vpop.eup %16178 }
0x2cd8   :  { %v16181_v9 = vpop.eup %16180 }
0x2cd9   :  { %v16183_v42 = vpop.eup %16182 }
0x2cda   :  { %v16185_v32 = vpop.eup %16184 }
0x2d37   :  { %v11002_v24 = vpop.permute.xlu1 %11001 }
0x2d38   :  { %v11007_v19 = vmul.f32 %v16179_v21, %v11002_v24  ;;  %v11004_v31 = vpop.permute.xlu0 %11003 }
0x2d39   :  { %v11008_v20 = vmul.f32 %v16181_v9, %v11004_v31 }
0x2d3a   :  { %v11016_v6 = vrot.slane %v11007_v19, 5 }
0x2d3b   :  { %v11017_v59 = vrot.slane %v11008_v20, 4  ;;  %v11712_v51 = vrot.slane %v11008_v20, 7  ;;  %v10964_v38 = vpop.permute.xlu1 %10963 }
0x2d3c   :  { %v10968_v12 = vmul.f32 %v16183_v42, %v10964_v38  ;;  %v10962_v2 = vpop.permute.xlu0 %10961 }
0x2d3d   :  { %v11018_v52 = vsel %vm7891_vm8, %v11017_v59, %v11016_v6  ;;  %v19989_v29 = vsel %vm6932_vm7, %v11712_v51, %v11007_v19  ;;  %v10967_v43 = vmul.f32 %v16185_v32, %v10962_v2 }
0x2d3e   :  { %v11011_v4 = vrot.slane %v10968_v12, 7  ;;  %11019 = vrot.lane.b32.xlu1 %v11018_v52, %s16307_s12 }
0x2d40   :  { %v19993_v23 = vsel %vm7891_vm8, %v11011_v4, %v10967_v43  ;;  %v11288_v43 = vrot.slane %v19966_v33, 1 }
0x2db0   :  { %v11020_v48 = vpop.permute.xlu1 %11019 }
0x2db1   :  { %v11022_v37 = vsel %vm6307_vm4, %v19993_v23, %v11020_v48  ;;  %v11289_v48 = vrot.slane %v19969_v60, 1 }
0x2db2   :  { %v11024_v7 = vrot.slane %v11022_v37, 5 }
0x2db4   :  { %11091 = vmatmul.mubr.f32.vlgmr.msra.gmra.mrb[56].mxu0 %v11024_v7  ;;  %11162 = vmatmul.mubr.f32.vlgmr.msra.gmra.mrb[64].mxu1 %v11024_v7 }
0x2db5   :  { %15160 = vmatpush1.bf16.msra.mxu0 %v19139_v45  ;;  %15192 = vmatpush1.bf16.msra.mxu1 %v19141_v1 }
0x2db6   :  { %15162 = vmatprep.subr.bf16.mxu0 %v19152_v27  ;;  %15194 = vmatprep.subr.bf16.mxu1 %v19154_v54 }
0x2db7   :  { %11407 = vmatprep.mubr.f32.mxu0 %v20354_v44  ;;  %11478 = vmatprep.mubr.f32.mxu1 %v20354_v44 }
0x2db9   :  { %15164 = vmatpush1.bf16.msra.mxu0 %v19173_v56  ;;  %15196 = vmatpush1.bf16.msra.mxu1 %v19175_v25 }
0x2dba   :  { %15166 = vmatprep.subr.bf16.mxu0 %v19185_v36  ;;  %15198 = vmatprep.subr.bf16.mxu1 %v19187_v11 }
0x2dbd   :  { %15168 = vmatpush1.bf16.msra.mxu0 %v19212_v55  ;;  %15200 = vmatpush1.bf16.msra.mxu1 %v19214_v47 }
0x2dbe   :  { %15170 = vmatprep.subr.bf16.mxu0 %v19225_v39  ;;  %15202 = vmatprep.subr.bf16.mxu1 %v19227_v30 }
0x2dc1   :  { %15172 = vmatpush1.bf16.msra.mxu0 %v19249_v8  ;;  %15204 = vmatpush1.bf16.msra.mxu1 %v19251_v13 }
0x2dc2   :  { %15174 = vmatprep.subr.bf16.mxu0 %v19261_v49  ;;  %15206 = vmatprep.subr.bf16.mxu1 %v19263_v53 }
0x2dc5   :  { %15176 = vmatpush1.bf16.msra.mxu0 %v19285_v35  ;;  %15208 = vmatpush1.bf16.msra.mxu1 %v19287_v61  ;;  %v20419_v35 = vld [vmem:[#allocation23_spill] sm:$0xff] }
0x2dc6   :  { %15178 = vmatprep.subr.bf16.mxu0 %v19300_v57  ;;  %15210 = vmatprep.subr.bf16.mxu1 %v19302_v50 }
0x2dc9   :  { %15180 = vmatpush1.bf16.msra.mxu0 %v19321_v46  ;;  %15212 = vmatpush1.bf16.msra.mxu1 %v19323_v22 }
0x2dca   :  { %15182 = vmatprep.subr.bf16.mxu0 %v19333_v10  ;;  %15214 = vmatprep.subr.bf16.mxu1 %v19335_v26 }
0x2dcd   :  { %15184 = vmatpush1.bf16.msra.mxu0 %v19359_v41  ;;  %15216 = vmatpush1.bf16.msra.mxu1 %v19361_v28 }
0x2dce   :  { %15186 = vmatprep.subr.bf16.mxu0 %v19368_v18  ;;  %15218 = vmatprep.subr.bf16.mxu1 %v19370_v16 }
0x2dd1   :  { %15188 = vmatpush1.bf16.msra.mxu0 %v19383_v58  ;;  %15220 = vmatpush1.bf16.msra.mxu1 %v19385_v17 }
0x2e87   :  { %v11092_v44 = vpop.f32.mrb[56].mxu0  ;;  %v11163_v45 = vpop.f32.mrb[64].mxu1 }
0x2e88   :  { %v11094_v1 = vpop.f32.mrb[57].mxu0  ;;  %v11165_v27 = vpop.f32.mrb[65].mxu1  ;;  %v11184_v49 = vrot.slane %v11163_v45, 7  ;;  %v11172_v53 = vrot.slane %v11092_v44, 3  ;;  %v11170_v57 = vrot.slane %v11092_v44, 2  ;;  %v11192_v50 = vadd.f32 %v11163_v45, %v19470_v34 }
0x2e89   :  { %v11185_v54 = vrot.slane %v11165_v27, 7  ;;  %v11173_v56 = vrot.slane %v11094_v1, 3  ;;  %v11171_v36 = vrot.slane %v11094_v1, 2  ;;  %v20033_v11 = vadd.f32 %v11165_v27, %v19438_v14 }
0x2e8a   :  { %v11190_v61 = vadd.f32 %v11184_v49, %v20419_v35  ;;  %v11180_v46 = vadd.f32 %v11172_v53, %v19474_v63  ;;  %v11178_v10 = vadd.f32 %v11170_v57, %v19476_v0  ;;  %v12626_v26 = vmul.f32 -1.442695, %v11192_v50 }
0x2e8b   :  { %v20030_v25 = vadd.f32 %v11185_v54, %v19434_v15  ;;  %v20036_v55 = vadd.f32 %v11173_v56, %v20416_v40  ;;  %v20040_v47 = vadd.f32 %v11171_v36, %v20417_v62  ;;  %v11249_v45 = vrot.slane %v19973_v5, 7 }
0x2e8c   :  { %v12624_v22 = vmul.f32 -1.442695, %v11190_v61  ;;  %v12622_v41 = vmul.f32 -1.442695, %v11180_v46  ;;  %v12620_v28 = vmul.f32 -1.442695, %v11178_v10 }
0x2e8d   :  { %16186 = vtanh.f32 %v20030_v25  ;;  %v11248_v54 = vrot.slane %v19975_v3, 7  ;;  %v12625_v53 = vmul.f32 -1.442695, %v20030_v25  ;;  %v12627_v61 = vmul.f32 -1.442695, %v20033_v11 }
0x2e8e   :  { %16188 = vtanh.f32 %v20033_v11  ;;  %v12623_v57 = vmul.f32 -1.442695, %v20036_v55  ;;  %v12621_v50 = vmul.f32 -1.442695, %v20040_v47 }
0x2e8f   :  { %16190 = vtanh.f32 %v20036_v55 }
0x2e90   :  { %16192 = vtanh.f32 %v20040_v47 }
0x2e91   :  { %16194 = vpow2.f32 %v12624_v22 }
0x2e92   :  { %16196 = vpow2.f32 %v12626_v26 }
0x2e93   :  { %16198 = vpow2.f32 %v12622_v41 }
0x2e94   :  { %16200 = vpow2.f32 %v12620_v28 }
0x2e97   :  { %v16187_v39 = vpop.eup %16186 }
0x2e98   :  { %v16189_v30 = vpop.eup %16188  ;;  %11296 = vrot.lane.b32.xlu0 %v16187_v39, %s16307_s12 }
0x2e99   :  { %11298 = vrot.lane.b32.xlu1 %v16189_v30, %s16307_s12  ;;  %v16191_v8 = vpop.eup %16190 }
0x2e9a   :  { %v16193_v13 = vpop.eup %16192 }
0x2e9b   :  { %v16195_v18 = vpop.eup %16194 }
0x2e9c   :  { %11258 = vrot.lane.b32.xlu0 %v16191_v8, %s16307_s12  ;;  %v16197_v16 = vpop.eup %16196  ;;  %v11230_v58 = vadd.f32 1.0, %v16195_v18 }
0x2e9d   :  { %11256 = vrot.lane.b32.xlu1 %v16193_v13, %s16307_s12  ;;  %v16199_v17 = vpop.eup %16198  ;;  %v11232_v21 = vadd.f32 1.0, %v16197_v16 }
0x2e9e   :  { %v16201_v24 = vpop.eup %16200  ;;  %v11208_v9 = vadd.f32 1.0, %v16199_v17  ;;  %16202 = vrcp.f32 %v11230_v58 }
0x2e9f   :  { %v11206_v19 = vadd.f32 1.0, %v16201_v24  ;;  %16204 = vrcp.f32 %v11232_v21 }
0x2ea0   :  { %16206 = vrcp.f32 %v11208_v9 }
0x2ea1   :  { %16208 = vrcp.f32 %v11206_v19 }
0x2ea8   :  { %v16203_v31 = vpop.eup %16202 }
0x2ea9   :  { %v16205_v6 = vpop.eup %16204  ;;  %v11292_v37 = vmul.f32 %v16203_v31, %v11288_v43  ;;  %v20420_v43 = vld [vmem:[#allocation8_spill] sm:$0xff] }
0x2eaa   :  { %v16207_v38 = vpop.eup %16206  ;;  %v11293_v7 = vmul.f32 %v16205_v6, %v11289_v48 }
0x2eab   :  { %v16209_v2 = vpop.eup %16208  ;;  %v11253_v36 = vmul.f32 %v16207_v38, %v11249_v45 }
0x2eac   :  { %v11252_v33 = vmul.f32 %v16209_v2, %v11248_v54 }
0x2f0a   :  { %v11297_v20 = vpop.permute.xlu0 %11296 }
0x2f0b   :  { %v11299_v42 = vpop.permute.xlu1 %11298  ;;  %v11302_v59 = vmul.f32 %v16203_v31, %v11297_v20 }
0x2f0c   :  { %v11303_v51 = vmul.f32 %v16205_v6, %v11299_v42 }
0x2f0d   :  { %11306 = vrot.lane.b32.xlu0 %v11302_v59, %s16307_s12 }
0x2f0e   :  { %11308 = vrot.lane.b32.xlu1 %v11303_v51, %s16307_s12  ;;  %v11259_v12 = vpop.permute.xlu0 %11258 }
0x2f0f   :  { %v11257_v32 = vpop.permute.xlu1 %11256  ;;  %v11263_v52 = vmul.f32 %v16207_v38, %v11259_v12 }
0x2f10   :  { %v11262_v4 = vmul.f32 %v16209_v2, %v11257_v32 }
0x2f11   :  { %11268 = vrot.lane.b32.xlu0 %v11263_v52, %s16307_s12 }
0x2f12   :  { %11266 = vrot.lane.b32.xlu1 %v11262_v4, %s16307_s12 }
0x2f7f   :  { %v11307_v44 = vpop.permute.xlu0 %11306 }
0x2f80   :  { %v11309_v1 = vpop.permute.xlu1 %11308  ;;  %v20060_v27 = vadd.f32 %v11307_v44, %v11292_v37 }
0x2f81   :  { %v20063_v56 = vadd.f32 %v11309_v1, %v11293_v7 }
0x2f82   :  { %16210 = vtanh.f32 %v20060_v27 }
0x2f83   :  { %16212 = vtanh.f32 %v20063_v56  ;;  %v11269_v39 = vpop.permute.xlu0 %11268 }
0x2f84   :  { %v11267_v60 = vpop.permute.xlu1 %11266  ;;  %v20067_v30 = vadd.f32 %v11269_v39, %v11253_v36 }
0x2f85   :  { %v20069_v8 = vadd.f32 %v11267_v60, %v11252_v33 }
0x2f86   :  { %16214 = vtanh.f32 %v20067_v30 }
0x2f87   :  { %16216 = vtanh.f32 %v20069_v8 }
0x2f88   :  { %16218 = vpow2.f32 %v12625_v53 }
0x2f89   :  { %16220 = vpow2.f32 %v12627_v61 }
0x2f8a   :  { %16222 = vpow2.f32 %v12623_v57 }
0x2f8b   :  { %16224 = vpow2.f32 %v12621_v50 }
0x2f8c   :  { %v16211_v5 = vpop.eup %16210 }
0x2f8d   :  { %v16213_v3 = vpop.eup %16212  ;;  %11318 = vrot.lane.b32.xlu0 %v16211_v5, %s16307_s12 }
0x2f8e   :  { %11320 = vrot.lane.b32.xlu1 %v16213_v3, %s16307_s12 }
0x2f90   :  { %v16215_v13 = vpop.eup %16214 }
0x2f91   :  { %v16217_v49 = vpop.eup %16216  ;;  %11280 = vrot.lane.b32.xlu0 %v16215_v13, %s16307_s12 }
0x2f92   :  { %11278 = vrot.lane.b32.xlu1 %v16217_v49, %s16307_s12  ;;  %v16219_v46 = vpop.eup %16218 }
0x2f93   :  { %v16221_v22 = vpop.eup %16220  ;;  %v11231_v10 = vadd.f32 1.0, %v16219_v46 }
0x2f94   :  { %v16223_v26 = vpop.eup %16222  ;;  %v11233_v41 = vadd.f32 1.0, %v16221_v22 }
0x2f95   :  { %v16225_v28 = vpop.eup %16224  ;;  %v11209_v18 = vadd.f32 1.0, %v16223_v26  ;;  %16226 = vrcp.f32 %v11231_v10 }
0x2f96   :  { %16228 = vrcp.f32 %v11233_v41  ;;  %v11207_v25 = vadd.f32 1.0, %v16225_v28 }
0x2f97   :  { %16230 = vrcp.f32 %v11209_v18 }
0x2f98   :  { %16232 = vrcp.f32 %v11207_v25 }
0x2f9f   :  { %v16227_v11 = vpop.eup %16226 }
0x2fa0   :  { %v16229_v16 = vpop.eup %16228 }
0x2fa1   :  { %v16231_v24 = vpop.eup %16230 }
0x2fa2   :  { %v16233_v42 = vpop.eup %16232 }
0x2fff   :  { %v11319_v55 = vpop.permute.xlu0 %11318 }
0x3000   :  { %v11321_v58 = vpop.permute.xlu1 %11320  ;;  %v11324_v17 = vmul.f32 %v16227_v11, %v11319_v55 }
0x3001   :  { %v11325_v47 = vmul.f32 %v16229_v16, %v11321_v58 }
0x3002   :  { %v11333_v21 = vrot.slane %v11324_v17, 3 }
0x3003   :  { %v11334_v9 = vrot.slane %v11325_v47, 2  ;;  %v11678_v19 = vrot.slane %v11325_v47, 7  ;;  %v11281_v31 = vpop.permute.xlu0 %11280 }
0x3004   :  { %v11279_v20 = vpop.permute.xlu1 %11278  ;;  %v11285_v6 = vmul.f32 %v16231_v24, %v11281_v31  ;;  %v11606_v31 = vrot.slane %v20063_v56, 1 }
0x3005   :  { %v11335_v59 = vsel %vm8209_vm6, %v11334_v9, %v11333_v21  ;;  %v20083_v51 = vsel %vm6612_vm5, %v11678_v19, %v11324_v17  ;;  %v11284_v38 = vmul.f32 %v16233_v42, %v11279_v20  ;;  %v11605_v19 = vrot.slane %v20060_v27, 1 }
0x3006   :  { %v11328_v12 = vrot.slane %v11285_v6, 7  ;;  %11336 = vrot.lane.b32.xlu0 %v11335_v59, %s16307_s12 }
0x3008   :  { %v20087_v2 = vsel %vm8209_vm6, %v11328_v12, %v11284_v38 }
0x3078   :  { %v11337_v32 = vpop.permute.xlu0 %11336 }
0x3079   :  { %v11339_v52 = vsel %vm6307_vm4, %v20087_v2, %v11337_v32  ;;  %v11565_v32 = vrot.slane %v20069_v8, 7  ;;  %v20421_v8 = vld [vmem:[#allocation14_spill] sm:$0xff] }
0x307a   :  { %v11341_v4 = vrot.slane %v11339_v52, 6 }
0x307c   :  { %11408 = vmatmul.mubr.f32.vlgmr.msra.gmra.mrb[58].mxu0 %v11341_v4  ;;  %11479 = vmatmul.mubr.f32.vlgmr.msra.gmra.mrb[66].mxu1 %v11341_v4 }
0x307d   :  { %12645 = vmatprep.mubr.msk.f32.mxu0 %vm218_vm1, %v20420_v43 }
0x314f   :  { %v11409_v48 = vpop.f32.mrb[58].mxu0  ;;  %v11480_v37 = vpop.f32.mrb[66].mxu1 }
0x3150   :  { %v11411_v7 = vpop.f32.mrb[59].mxu0  ;;  %v11482_v44 = vpop.f32.mrb[67].mxu1  ;;  %v11507_v5 = vadd.f32 %v11480_v37, %v20419_v35  ;;  %v11487_v3 = vrot.slane %v11409_v48, 1 }
0x3151   :  { %v11502_v45 = vrot.slane %v11482_v44, 1  ;;  %v20094_v1 = vadd.f32 %v11482_v44, %v19434_v15  ;;  %v11488_v54 = vrot.slane %v11411_v7, 1  ;;  %v11490_v26 = vrot.slane %v11411_v7, 2  ;;  %v20422_v7 = vld [vmem:[#allocation24_spill] sm:$0xff] }
0x3152   :  { %v12632_v13 = vmul.f32 -1.442695, %v11507_v5  ;;  %v11495_v49 = vadd.f32 %v11487_v3, %v19476_v0  ;;  %v11950_v3 = vld [vmem:[%s20293_s17 + $0x18] sm:$0xff] }
0x3153   :  { %v20097_v36 = vadd.f32 %v11502_v45, %v19438_v14  ;;  %16234 = vtanh.f32 %v20094_v1  ;;  %v20101_v33 = vadd.f32 %v11488_v54, %v20417_v62  ;;  %v11501_v14 = vrot.slane %v11480_v37, 1  ;;  %v20423_v45 = vld [vmem:[#allocation21_spill] sm:$0xff]  ;;  %v20424_v54 = vld [vmem:[#allocation22_spill] sm:$0xff] }
0x3154   :  { %v12628_v61 = vmul.f32 -1.442695, %v11495_v49  ;;  %v20112_v35 = vadd.f32 %v11490_v26, %v20416_v40  ;;  %v11489_v40 = vrot.slane %v11409_v48, 2  ;;  %v11951_v49 = vld [vmem:[%s20293_s17 + $0x20] sm:$0xff]  ;;  %v11958_v26 = vld [vmem:[%s20293_s17 + $0x58] sm:$0xff] }
0x3155   :  { %16236 = vtanh.f32 %v20097_v36  ;;  %v11509_v62 = vadd.f32 %v11501_v14, %v19470_v34  ;;  %v16309_v14 = vmov 0.0|0.0  }
0x3156   :  { %16238 = vtanh.f32 %v20101_v33  ;;  %v11497_v47 = vadd.f32 %v11489_v40, %v19474_v63  ;;  %15221 = vmatprep.subr.bf16.mxu0 %v16309_v14  ;;  %v11566_v40 = vrot.slane %v20067_v30, 7  ;;  %v11963_v30 = vld [vmem:[%s20293_s17 + $0x80] sm:$0xff] }
0x3157   :  { %v12634_v53 = vmul.f32 -1.442695, %v11509_v62  ;;  %16240 = vpow2.f32 %v12632_v13  ;;  %v20425_v13 = vld [vmem:[#allocation20_spill] sm:$0xff] }
0x3158   :  { %v12630_v21 = vmul.f32 -1.442695, %v11497_v47 }
0x3159   :  { %16242 = vpow2.f32 %v12634_v53 }
0x315a   :  { %16244 = vpow2.f32 %v12628_v61  ;;  %v11953_v61 = vld [vmem:[%s20293_s17 + $0x30] sm:$0xff] }
0x315d   :  { %v16235_v39 = vpop.eup %16234 }
0x315e   :  { %11613 = vrot.lane.b32.xlu0 %v16235_v39, %s16307_s12  ;;  %v11947_v39 = vld [vmem:[%s20293_s17] sm:$0xff] }
0x315f   :  { %v16237_v60 = vpop.eup %16236 }
0x3160   :  { %11615 = vrot.lane.b32.xlu1 %v16237_v60, %s16307_s12  ;;  %v16239_v15 = vpop.eup %16238  ;;  %v11948_v60 = vld [vmem:[%s20293_s17 + $0x8] sm:$0xff] }
0x3161   :  { %v16241_v57 = vpop.eup %16240  ;;  %v15222_v5 = vpack.c.bf16 %v11948_v60, %v11947_v39 }
0x3162   :  { %v11547_v46 = vadd.f32 1.0, %v16241_v57  ;;  %v11954_v57 = vld [vmem:[%s20293_s17 + $0x38] sm:$0xff] }
0x3163   :  { %v16243_v50 = vpop.eup %16242  ;;  %15223 = vmatpush1.bf16.msra.mxu0 %v15222_v5 }
0x3164   :  { %11573 = vrot.lane.b32.xlu1 %v16239_v15, %s16307_s12  ;;  %v11549_v22 = vadd.f32 1.0, %v16243_v50  ;;  %v16245_v10 = vpop.eup %16244  ;;  %16246 = vrcp.f32 %v11547_v46  ;;  %v11949_v15 = vld [vmem:[%s20293_s17 + $0x10] sm:$0xff]  ;;  %15224 = vmatprep.subr.bf16.mxu0 %v16309_v14  ;;  %v15231_v50 = vpack.c.bf16 %v11954_v57, %v11953_v61  ;;  %v11956_v46 = vld [vmem:[%s20293_s17 + $0x48] sm:$0xff] }
0x3165   :  { %v11523_v41 = vadd.f32 1.0, %v16245_v10  ;;  %v15225_v62 = vpack.c.bf16 %v11950_v3, %v11949_v15  ;;  %v11957_v10 = vld [vmem:[%s20293_s17 + $0x50] sm:$0xff] }
0x3166   :  { %16248 = vrcp.f32 %v11549_v22 }
0x3167   :  { %16250 = vrcp.f32 %v11523_v41  ;;  %15226 = vmatpush1.bf16.msra.mxu0 %v15225_v62  ;;  %v15237_v41 = vpack.c.bf16 %v11958_v26, %v11957_v10  ;;  %v20428_v62 = vld [vmem:[#allocation17_spill] sm:$0xff] }
0x3168   :  { %16252 = vtanh.f32 %v20112_v35  ;;  %15227 = vmatprep.subr.bf16.mxu0 %v16309_v14 }
0x3169   :  { %16254 = vpow2.f32 %v12630_v21  ;;  %v11961_v21 = vld [vmem:[%s20293_s17 + $0x70] sm:$0xff] }
0x316e   :  { %v16247_v34 = vpop.eup %16246 }
0x316f   :  { %v11609_v20 = vmul.f32 %v16247_v34, %v11605_v19 }
0x3170   :  { %v16249_v28 = vpop.eup %16248 }
0x3171   :  { %v16251_v55 = vpop.eup %16250  ;;  %v11610_v42 = vmul.f32 %v16249_v28, %v11606_v31  ;;  %v11964_v31 = vld [vmem:[%s20293_s17 + $0x88] sm:$0xff] }
0x3172   :  { %v16253_v17 = vpop.eup %16252  ;;  %v11569_v48 = vmul.f32 %v16251_v55, %v11565_v32 }
0x3173   :  { %v16255_v24 = vpop.eup %16254 }
0x3174   :  { %v11525_v9 = vadd.f32 1.0, %v16255_v24 }
0x3176   :  { %16256 = vrcp.f32 %v11525_v9 }
0x3180   :  { %v20123_v63 = vpop.eup %16256 }
0x31d0   :  { %v11614_v0 = vpop.permute.xlu0 %11613 }
0x31d1   :  { %v11619_v18 = vmul.f32 %v16247_v34, %v11614_v0  ;;  %v11959_v34 = vld [vmem:[%s20293_s17 + $0x60] sm:$0xff]  ;;  %v11960_v0 = vld [vmem:[%s20293_s17 + $0x68] sm:$0xff] }
0x31d2   :  { %v11616_v25 = vpop.permute.xlu1 %11615 }
0x31d3   :  { %v11620_v11 = vmul.f32 %v16249_v28, %v11616_v25  ;;  %11623 = vrot.lane.b32.xlu1 %v11619_v18, %s16307_s12  ;;  %v15240_v28 = vpack.c.bf16 %v11960_v0, %v11959_v34  ;;  %v12635_v18 = vmul.f32 -1.442695, %v20097_v36  ;;  %v12633_v25 = vmul.f32 -1.442695, %v20094_v1  ;;  %v11962_v1 = vld [vmem:[%s20293_s17 + $0x78] sm:$0xff]  ;;  %v20429_v34 = vld [vmem:[#allocation15_spill] sm:$0xff] }
0x31d4   :  { %v11570_v36 = vmul.f32 %v20123_v63, %v11566_v40  ;;  %v20430_v40 = vld [vmem:[#allocation16_spill] sm:$0xff] }
0x31d5   :  { %11625 = vrot.lane.b32.xlu0 %v11620_v11, %s16307_s12  ;;  %v12629_v11 = vmul.f32 -1.442695, %v20101_v33  ;;  %v15243_v33 = vpack.c.bf16 %v11962_v1, %v11961_v21 }
0x31d6   :  { %v11574_v16 = vpop.permute.xlu1 %11573 }
0x31d7   :  { %v11579_v58 = vmul.f32 %v16251_v55, %v11574_v16 }
0x31d9   :  { %11575 = vrot.lane.b32.xlu0 %v16253_v17, %s16307_s12  ;;  %11583 = vrot.lane.b32.xlu1 %v11579_v58, %s16307_s12 }
0x3245   :  { %v11624_v6 = vpop.permute.xlu1 %11623 }
0x3246   :  { %v11629_v59 = vadd.f32 %v11624_v6, %v11609_v20  ;;  %v15246_v20 = vpack.c.bf16 %v11964_v31, %v11963_v30  ;;  %v20431_v31 = vld [vmem:[#allocation10_spill] sm:$0xff] }
0x3247   :  { %v11626_v38 = vpop.permute.xlu0 %11625 }
0x3248   :  { %v11630_v12 = vadd.f32 %v11626_v38, %v11610_v42  ;;  %16258 = vtanh.f32 %v11629_v59  ;;  %v11965_v42 = vld [vmem:[%s20293_s17 + $0x90] sm:$0xff]  ;;  %v11966_v59 = vld [vmem:[%s20293_s17 + $0x98] sm:$0xff] }
0x3249   :  { %v15249_v32 = vpack.c.bf16 %v11966_v59, %v11965_v42 }
0x324a   :  { %16260 = vtanh.f32 %v11630_v12 }
0x324b   :  { %v11576_v52 = vpop.permute.xlu0 %11575  ;;  %v11584_v4 = vpop.permute.xlu1 %11583 }
0x324c   :  { %v11580_v43 = vmul.f32 %v20123_v63, %v11576_v52  ;;  %v11589_v27 = vadd.f32 %v11584_v4, %v11569_v48 }
0x324e   :  { %11585 = vrot.lane.b32.xlu0 %v11580_v43, %s16307_s12  ;;  %16262 = vtanh.f32 %v11589_v27 }
0x324f   :  { %16264 = vpow2.f32 %v12635_v18 }
0x3250   :  { %16266 = vpow2.f32 %v12633_v25 }
0x3251   :  { %16268 = vpow2.f32 %v12629_v11 }
0x3252   :  { %v16259_v56 = vpop.eup %16258 }
0x3253   :  { %11635 = vrot.lane.b32.xlu0 %v16259_v56, %s16307_s12  ;;  %v20426_v56 = vld [vmem:[#allocation18_spill] sm:$0xff] }
0x3254   :  { %v16261_v37 = vpop.eup %16260 }
0x3255   :  { %11637 = vrot.lane.b32.xlu1 %v16261_v37, %s16307_s12 }
0x3257   :  { %11900 = vrot.lane.b32.xlu0 %v20421_v8, %s16307_s12 }
0x3258   :  { %v16263_v44 = vpop.eup %16262 }
0x3259   :  { %11749 = vrot.lane.b32.xlu1 %v20422_v7, %s16307_s12  ;;  %v16265_v55 = vpop.eup %16264 }
0x325a   :  { %v16267_v16 = vpop.eup %16266  ;;  %v11550_v58 = vadd.f32 1.0, %v16265_v55 }
0x325b   :  { %11860 = vrot.lane.b32.xlu0 %v20423_v45, %s16307_s12  ;;  %v11548_v17 = vadd.f32 1.0, %v16267_v16  ;;  %v16269_v47 = vpop.eup %16268  ;;  %v20427_v45 = vld [vmem:[#allocation12_spill] sm:$0xff] }
0x325c   :  { %16270 = vrcp.f32 %v11550_v58  ;;  %v11524_v9 = vadd.f32 1.0, %v16269_v47 }
0x325d   :  { %11595 = vrot.lane.b32.xlu1 %v16263_v44, %s16307_s12  ;;  %16272 = vrcp.f32 %v11548_v17 }
0x325f   :  { %11825 = vrot.lane.b32.xlu0 %v20424_v54, %s16307_s12 }
0x3261   :  { %11714 = vrot.lane.b32.xlu1 %v19989_v29, %s16307_s12  ;;  %v11952_v29 = vld [vmem:[%s20293_s17 + $0x28] sm:$0xff] }
0x3262   :  { %v15228_v53 = vpack.c.bf16 %v11952_v29, %v11951_v49 }
0x3263   :  { %11791 = vrot.lane.b32.xlu0 %v20425_v13, %s16307_s12  ;;  %v11899_v13 = vrot.slane %v20428_v62, 7  ;;  %v20433_v62 = vld [vmem:[#allocation9_spill] sm:$0xff] }
0x3264   :  { %15229 = vmatpush1.bf16.msra.mxu0 %v15228_v53 }
0x3265   :  { %11680 = vrot.lane.b32.xlu1 %v20083_v51, %s16307_s12  ;;  %15230 = vmatprep.subr.bf16.mxu0 %v16309_v14  ;;  %v11955_v51 = vld [vmem:[%s20293_s17 + $0x40] sm:$0xff] }
0x3266   :  { %v15234_v22 = vpack.c.bf16 %v11956_v46, %v11955_v51  ;;  %v16271_v38 = vpop.eup %16270 }
0x3267   :  { %v16273_v52 = vpop.eup %16272 }
0x3268   :  { %15232 = vmatpush1.bf16.msra.mxu0 %v15231_v50 }
0x3269   :  { %15233 = vmatprep.subr.bf16.mxu0 %v16309_v14 }
0x326c   :  { %15235 = vmatpush1.bf16.msra.mxu0 %v15234_v22 }
0x326d   :  { %15236 = vmatprep.subr.bf16.mxu0 %v16309_v14 }
0x3270   :  { %15238 = vmatpush1.bf16.msra.mxu0 %v15237_v41 }
0x3271   :  { %15239 = vmatprep.subr.bf16.mxu0 %v16309_v14 }
0x3274   :  { %15241 = vmatpush1.bf16.msra.mxu0 %v15240_v28 }
0x3275   :  { %15242 = vmatprep.subr.bf16.mxu0 %v16309_v14 }
0x3278   :  { %15244 = vmatpush1.bf16.msra.mxu0 %v15243_v33 }
0x3279   :  { %15245 = vmatprep.subr.bf16.mxu0 %v16309_v14 }
0x327c   :  { %15247 = vmatpush1.bf16.msra.mxu0 %v15246_v20 }
0x327d   :  { %15248 = vmatprep.subr.bf16.mxu0 %v16309_v14 }
0x3280   :  { %15250 = vmatpush1.bf16.msra.mxu0 %v15249_v32 }
0x32c0   :  { %v11586_v24 = vpop.permute.xlu0 %11585 }
0x32c1   :  { %v11590_v19 = vadd.f32 %v11586_v24, %v11570_v36 }
0x32c3   :  { %16274 = vtanh.f32 %v11590_v19 }
0x32c4   :  { %16276 = vrcp.f32 %v11524_v9 }
0x32c5   :  { %v11636_v6 = vpop.permute.xlu0 %11635 }
0x32c6   :  { %v11641_v4 = vmul.f32 %v16273_v52, %v11636_v6 }
0x32c7   :  { %v11638_v12 = vpop.permute.xlu1 %11637 }
0x32c8   :  { %v11642_v63 = vmul.f32 %v16271_v38, %v11638_v12 }
0x32c9   :  { %v11901_v48 = vpop.permute.xlu0 %11900 }
0x32ca   :  { %v11645_v43 = vrot.slane %v11642_v63, 7 }
0x32cb   :  { %v11750_v27 = vpop.permute.xlu1 %11749 }
0x32cc   :  { %v11752_v37 = vsel %vm6307_vm4, %v20426_v56, %v11750_v27  ;;  %v11646_v8 = vsel %vm6296_vm3, %v11645_v43, %v11641_v4  ;;  %v12631_v43 = vmul.f32 -1.442695, %v20112_v35 }
0x32cd   :  { %v16275_v7 = vpop.eup %16274  ;;  %v11754_v44 = vcombine.high %v11752_v37, %v11752_v37  ;;  %v11761_v54 = vrot.slane %v11752_v37, %v20427_v45  ;;  %11647 = vrot.lane.b32.xlu0 %v11646_v8, %s16307_s12  ;;  %v11861_v39 = vpop.permute.xlu0 %11860  ;;  %v20432_v8 = vld [vmem:[#allocation19_spill] sm:$0xff] }
0x32ce   :  { %11597 = vrot.lane.b32.xlu1 %v16275_v7, %s16307_s12  ;;  %v16277_v60 = vpop.eup %16276  ;;  %v11863_v5 = vsel %vm6307_vm4, %v20087_v2, %v11861_v39  ;;  %16278 = vpow2.f32 %v12631_v43 }
0x32cf   :  { %v11768_v15 = vrot.slane %v11754_v44, %v20427_v45  ;;  %v11769_v14 = vcombine.high %v11761_v54, %v11761_v54  ;;  %v11596_v3 = vpop.permute.xlu1 %11595  ;;  %v11865_v49 = vcombine.high %v11863_v5, %v11863_v5 }
0x32d0   :  { %v11601_v29 = vmul.f32 %v16277_v60, %v11596_v3 }
0x32d1   :  { %v11783_v53 = vrot.slane %v11769_v14, %v20427_v45  ;;  %12639 = vst.sshfl [vmem:[#allocation4 + $0xb] sm:$0x1 pattern:$0x73625140] %v11768_v15  ;;  %v11872_v61 = vrot.slane %v11865_v49, %v20427_v45  ;;  %v11826_v50 = vpop.permute.xlu0 %11825  ;;  %v12644_v49 = vld [vmem:[%s20294_s18] ss:$0 sm:$0xff] }
0x32d2   :  { %v11906_v57 = vsel %vm6307_vm4, %v11601_v29, %v11901_v48  ;;  %11902 = vrot.lane.b32.xlu1 %v11899_v13, %s16307_s12  ;;  %v11828_v2 = vsel %vm6307_vm4, %v19993_v23, %v11826_v50 }
0x32d3   :  { %v11784_v51 = vcombine.high %v11783_v53, %v11783_v53  ;;  %v11910_v46 = vcombine.high %v11906_v57, %v11906_v57  ;;  %v11715_v22 = vpop.permute.xlu1 %11714  ;;  %v11873_v10 = vcombine.high %v11872_v61, %v11872_v61  ;;  %v11880_v26 = vrot.slane %v11872_v61, %v20427_v45 }
0x32d4   :  { %v11830_v41 = vcombine.high %v11828_v2, %v11828_v2  ;;  %v11717_v0 = vsel %vm6307_vm4, %v20429_v34, %v11715_v22 }
0x32d5   :  { %11787 = vst [vmem:[#allocation4 + $0x3] sm:$0x1] %v11784_v51  ;;  %v11917_v28 = vrot.slane %v11910_v46, %v20427_v45  ;;  %v11725_v18 = vrot.slane %v11717_v0, %v20427_v45  ;;  %v11887_v25 = vrot.slane %v11873_v10, %v20427_v45  ;;  %v11888_v11 = vcombine.high %v11880_v26, %v11880_v26  ;;  %v11792_v16 = vpop.permute.xlu0 %11791 }
0x32d6   :  { %v11837_v55 = vrot.slane %v11830_v41, %v20427_v45  ;;  %v11794_v47 = vsel %vm6307_vm4, %v20430_v40, %v11792_v16 }
0x32d7   :  { %v11918_v23 = vcombine.high %v11917_v28, %v11917_v28  ;;  %v11726_v58 = vcombine.high %v11725_v18, %v11725_v18  ;;  %v11733_v17 = vrot.slane %v11725_v18, %v20427_v45  ;;  %v11681_v21 = vpop.permute.xlu1 %11680  ;;  %v11889_v1 = vcombine.high %v11887_v25, %v11887_v25  ;;  %11892 = vst [vmem:[#allocation4 + $0x6] sm:$0x1] %v11888_v11 }
0x32d8   :  { %v11838_v36 = vcombine.high %v11837_v55, %v11837_v55  ;;  %v11845_v33 = vrot.slane %v11837_v55, %v20427_v45  ;;  %v11796_v24 = vcombine.high %v11794_v47, %v11794_v47  ;;  %v11683_v20 = vsel %vm6307_vm4, %v20431_v31, %v11681_v21  ;;  %v16279_v48 = vpop.eup %16278 }
0x32d9   :  { %v11925_v9 = vrot.slane %v11918_v23, %v20427_v45  ;;  %v11740_v19 = vrot.slane %v11726_v58, %v20427_v45  ;;  %v11741_v30 = vcombine.high %v11733_v17, %v11733_v17  ;;  %11893 = vst [vmem:[#allocation4 + $0xe] sm:$0x1] %v11889_v1  ;;  %v11691_v59 = vrot.slane %v11683_v20, %v20427_v45 }
0x32da   :  { %v11853_v6 = vcombine.high %v11845_v33, %v11845_v33  ;;  %12642 = vst.sshfl [vmem:[#allocation4 + $0x5] sm:$0x1 pattern:$0x73625140] %v11838_v36  ;;  %v11803_v42 = vrot.slane %v11796_v24, %v20427_v45  ;;  %v11526_v27 = vadd.f32 1.0, %v16279_v48 }
0x32db   :  { %v11926_v38 = vcombine.high %v11925_v9, %v11925_v9  ;;  %v11742_v12 = vcombine.high %v11740_v19, %v11740_v19  ;;  %11745 = vst [vmem:[#allocation4 + $0x2] sm:$0x1] %v11741_v30  ;;  %v11692_v63 = vcombine.high %v11691_v59, %v11691_v59  ;;  %v11699_v52 = vrot.slane %v11691_v59, %v20427_v45 }
0x32dc   :  { %11857 = vst [vmem:[#allocation4 + $0xd] sm:$0x1] %v11853_v6  ;;  %v11804_v32 = vcombine.high %v11803_v42, %v11803_v42  ;;  %12640 = vst.sshfl [vmem:[#allocation4 + $0x4] sm:$0x1 pattern:$0x73625140] %v11803_v42  ;;  %16280 = vrcp.f32 %v11526_v27 }
0x32dd   :  { %11943 = vst [vmem:[#allocation4 + $0x7] sm:$0x1] %v11926_v38  ;;  %11746 = vst [vmem:[#allocation4 + $0xa] sm:$0x1] %v11742_v12  ;;  %v11707_v4 = vcombine.high %v11699_v52, %v11699_v52 }
0x32de   :  { %12641 = vst.sshfl [vmem:[#allocation4 + $0xc] sm:$0x1 pattern:$0x73625140] %v11804_v32 }
0x32df   :  { %12638 = vst.sshfl [vmem:[#allocation4 + $0x1] sm:$0x1 pattern:$0x73625140] %v11692_v63  ;;  %11711 = vst [vmem:[#allocation4 + $0x9] sm:$0x1] %v11707_v4 }
0x32e6   :  { %v16281_v37 = vpop.eup %16280 }
0x333f   :  { %v11648_v56 = vpop.permute.xlu0 %11647 }
0x3340   :  { %v11650_v7 = vsel %vm6307_vm4, %v20432_v8, %v11648_v56  ;;  %v11598_v44 = vpop.permute.xlu1 %11597 }
0x3341   :  { %v11658_v54 = vrot.slane %v11650_v7, %v20427_v45  ;;  %v11602_v39 = vmul.f32 %v16281_v37, %v11598_v44 }
0x3343   :  { %v11659_v60 = vcombine.high %v11658_v54, %v11658_v54  ;;  %12636 = vst.sshfl [vmem:[#allocation4] sm:$0x1 pattern:$0x73625140] %v11658_v54  ;;  %v11896_v15 = vrot.slane %v11602_v39, 7 }
0x3344   :  { %v11903_v14 = vpop.permute.xlu1 %11902 }
0x3345   :  { %12637 = vst.sshfl [vmem:[#allocation4 + $0x8] sm:$0x1 pattern:$0x73625140] %v11659_v60  ;;  %v11907_v35 = vsel %vm6307_vm4, %v11896_v15, %v11903_v14 }
0x3346   :  { %v11933_v5 = vrot.slane %v11907_v35, %v20427_v45 }
0x3348   :  { %12643 = vst.sshfl [vmem:[#allocation4 + $0xf] sm:$0x1 pattern:$0x73625140] %v11933_v5 }
0x334a   :  { %v11945_v3 = vld [vmem:[#allocation4] sm:$0xff] }
0x334b   :  { %12039 = vmatmul.mubr.f32.vlgmr.msra.gmra.mrb[60].mxu0 %v11945_v3 }
0x334c   :  { %12646 = vmatprep.mubr.msk.f32.mxu0 %vm218_vm1, %v20433_v62 }
0x334f   :  { %v11946_v13 = vld [vmem:[#allocation4 + $0x8] sm:$0xff] }
0x3350   :  { %12044 = vmatmul.mubr.f32.gmra.mrb[62].mxu0 %v11946_v13 }
0x341e   :  { %v12040_v29 = vpop.f32.mrb[60].mxu0 }
0x341f   :  { %v12041_v53 = vadd.f32 %v12644_v49, %v12040_v29  ;;  %v12042_v61 = vpop.f32.mrb[61].mxu0 }
0x3421   :  { %12049 = vst [vmem:[#allocation5] sm:$0xff] %v12041_v53 }
0x3423   :  { %v12045_v57 = vpop.f32.mrb[62].mxu0 }
0x3424   :  { %v12046_v45 = vadd.f32 %v12644_v49, %v12045_v57  ;;  %v12047_v50 = vpop.f32.mrb[63].mxu0 }
0x3426   :  { %12050 = vst [vmem:[#allocation5 + $0x8] sm:$0xff] %v12046_v45 }
0x3427   :  { %16293 = shalt.err (!%p16290_p4)
}
0x3428   :  { %s16294_s28 = scalar_lea.hbm %s20295_s19, 256 }
0x3429   :  { %p16295_p5 = scmp.ne.s32.totalorder %s20295_s19, %s16294_s28  ;;  %p16298_p6 = scmp.lt.u32.totalorder %s16294_s28, %s20295_s19 }
0x342b   :  { %p16300_p7 = pnand %p16298_p6, %p16295_p5 }
0x342d   :  { %16303 = shalt.err (!%p16300_p7)
}
0x342e   :  { %s16311_s11 = smov 128   ;;  %s16312_s20 = smov 8  }
0x342f   :  { %12062 = dma.vmem_to_hbm [thread:$0]  %s12057_s27, 256, %s20295_s19, [#allocation6], %s16311_s11, %s16311_s11, %s16312_s20  }
0x3430   :  { %16304 = dma.done.wait [#allocation6], 256  }
0x3431   :  { %16305 = vsyncadd [#allocation6], 4294967040 }
0x3432   :  { %12066 = vsyncpa [#allocation6], 1 }

</bundles_post_ra>
